<compile_context>
chip_gen: v6e
topology: v6e:2x2x1
jax: 0.10.0
libtpu: 0.0.40
codegen_flags: <defaults>
</compile_context>

<pallas_src>
import functools

import jax
import jax.numpy as jnp
from jax.experimental import pallas as pl
from jax.experimental.pallas import tpu as pltpu

FEAT = 1024  # fixed by the module definition (Linear(1024, 1024))


def _default_n_split():
    """Final-N split factor: 2 on v7x (two TensorCores, per-TC HBM bandwidth),
    1 on single-TC chips (v5e/v6e) where a 2-step grid is just a sequential loop."""
    try:
        kind = jax.devices()[0].device_kind.lower()
    except Exception:
        return 1
    return 2 if "7" in kind else 1


# ----------------------------------------------------------------------------
# Fused kernel (one grid step computes one N-slab of the final output):
#   x1 = x @ W1 + b1
#   x2 = x1 @ W2 + b2
#   out[:, slab] = x1 @ W3[:, slab] + x2 @ W4[:, slab] + (b3 + b4)[slab]
# Weights bf16, all matmuls accumulate in f32 on the MXU.
# ----------------------------------------------------------------------------
def _fused_linear_net_kernel(x_ref, w1_ref, w2_ref, w3_ref, w4_ref,
                             b1_ref, b2_ref, b34_ref, o_ref):
    x_bf = x_ref[...].astype(jnp.bfloat16)

    x1 = jnp.dot(x_bf, w1_ref[...], preferred_element_type=jnp.float32) + b1_ref[...]
    x1_bf = x1.astype(jnp.bfloat16)

    x2 = jnp.dot(x1_bf, w2_ref[...], preferred_element_type=jnp.float32) + b2_ref[...]
    x2_bf = x2.astype(jnp.bfloat16)

    y = (jnp.dot(x1_bf, w3_ref[...], preferred_element_type=jnp.float32)
         + jnp.dot(x2_bf, w4_ref[...], preferred_element_type=jnp.float32)
         + b34_ref[...])

    o_ref[...] = y.astype(o_ref.dtype)


# ----------------------------------------------------------------------------
# One-time weight preparation (run OUTSIDE jit, at weight-load time):
#   * cast weights to bf16 (halves HBM bytes on a bandwidth-bound kernel)
#   * fold b34 = b3 + b4
#   * re-layout W3/W4/b34 half-major as (n_split, K, tn) so each grid step's
#     block is one contiguous DMA (no strided 1 KiB descriptors on v7x).
# ----------------------------------------------------------------------------
def prepare_params(params_f32, n_split):
    (w1, b1), (w2, b2), (w3, b3), (w4, b4), _fc5_unused = params_f32
    K, N = w1.shape
    assert N % n_split == 0
    tn = N // n_split
    assert tn % 128 == 0

    def half_major(w):  # (K, N) -> (n_split, K, tn), contiguous per split
        return jnp.transpose(w.astype(jnp.bfloat16).reshape(K, n_split, tn), (1, 0, 2))

    return {
        "w1": w1.astype(jnp.bfloat16),
        "w2": w2.astype(jnp.bfloat16),
        "w3": half_major(w3),
        "w4": half_major(w4),
        "b1": b1.reshape(1, N),
        "b2": b2.reshape(1, N),
        "b34": (b3 + b4).reshape(1, n_split, tn).transpose(1, 0, 2),  # (n_split,1,tn)
        "n_split": n_split,
        "tn": tn,
    }


def linear_net_forward(prepped, x):
    """Fused forward: x -> fc1 -> fc2 -> (fc3 + fc4) in one pallas_call."""
    n_split, tn = prepped["n_split"], prepped["tn"]
    w1, w2, w3, w4 = prepped["w1"], prepped["w2"], prepped["w3"], prepped["w4"]
    b1, b2, b34 = prepped["b1"], prepped["b2"], prepped["b34"]

    M, K = x.shape
    N = w1.shape[1]
    assert K == FEAT and N == FEAT
    assert M % 8 == 0, "block-shape constraint (8,128)"

    def full(j):      # resident across the N-split (index never changes)
        return (0, 0)

    def nsplit3(j):   # per-slab blocks of the half-major W3/W4/b34
        return (j, 0, 0)

    def out_map(j):
        return (0, j)

    # Advisory cost hint: ~0.067 GFLOP, ~8.5 MB streamed, no transcendentals.
    flops = 4 * 2 * M * K * N
    bytes_accessed = (4 * K * N * 2          # W1..W4 bf16
                      + M * K * 4 + M * N * 4  # x in, out
                      + 3 * N * 4)             # biases
    cost = pl.CostEstimate(flops=flops, transcendentals=0,
                           bytes_accessed=bytes_accessed)

    return pl.pallas_call(
        _fused_linear_net_kernel,
        out_shape=jax.ShapeDtypeStruct((M, N), jnp.float32),
        grid_spec=pltpu.PrefetchScalarGridSpec(
            num_scalar_prefetch=0,
            grid=(n_split,),
            in_specs=[
                pl.BlockSpec((M, K), full),          # x   (f32, tiny)
                pl.BlockSpec((K, N), full),          # W1  (bf16, resident)
                pl.BlockSpec((K, N), full),          # W2  (bf16, resident)
                pl.BlockSpec((None, K, tn), nsplit3),  # W3 slab (contiguous)
                pl.BlockSpec((None, K, tn), nsplit3),  # W4 slab (contiguous)
                pl.BlockSpec((1, N), full),          # b1
                pl.BlockSpec((1, N), full),          # b2
                pl.BlockSpec((None, 1, tn), nsplit3),  # b3+b4 slab
            ],
            out_specs=pl.BlockSpec((M, tn), out_map),
        ),
        compiler_params=pltpu.CompilerParams(
            dimension_semantics=("parallel",),
            vmem_limit_bytes=32 << 20,  # <=16 MiB used; fits v5e/v6e/v7x budgets
        ),
        cost_estimate=cost,
    )(x, w1, w2, w3, w4, b1, b2, b34)


# ----------------------------------------------------------------------------
# Parameter init (deterministic, mimics torch.nn.Linear default U(-1/sqrt(in), 1/sqrt(in)))
# ----------------------------------------------------------------------------
def init_linear_params_f32(key, in_f, out_f):
    kw, kb = jax.random.split(key)
    bound = 1.0 / jnp.sqrt(jnp.float32(in_f))
    # Stored as W_t with shape (in_f, out_f) so forward does x @ W_t.
    w_t = jax.random.uniform(kw, (in_f, out_f), jnp.float32, -bound, bound)
    b = jax.random.uniform(kb, (out_f,), jnp.float32, -bound, bound)
    return w_t, b


# ----------------------------------------------------------------------------
# References
# ----------------------------------------------------------------------------
def linear_net_forward_ref_f32(params_f32, x):
    (w1, b1), (w2, b2), (w3, b3), (w4, b4), _ = params_f32
    x1 = x @ w1 + b1
    x2 = x1 @ w2 + b2
    return (x1 @ w3 + b3) + (x2 @ w4 + b4)


def linear_net_forward_ref_bf16(params_f32, x):
    # Same mixed-precision math as the kernel (bf16 operands, f32 accumulation).
    (w1, b1), (w2, b2), (w3, b3), (w4, b4), _ = params_f32

    def dot(a, w):
        return jnp.dot(a.astype(jnp.bfloat16), w.astype(jnp.bfloat16),
                       preferred_element_type=jnp.float32)

    x1 = dot(x, w1) + b1
    x2 = dot(x1, w2) + b2
    return dot(x1, w3) + dot(x2, w4) + (b3 + b4)


if __name__ == "__main__":
    key = jax.random.PRNGKey(0)
    keys = jax.random.split(key, 6)

    # fc1..fc5 parameters (fc5 is unused by forward, kept for parity with __init__)
    params_f32 = tuple(init_linear_params_f32(keys[i], FEAT, FEAT) for i in range(5))

    # One-time weight prep (bf16 cast, bias fusion, half-major layout) — outside jit.
    n_split = _default_n_split()
    prepped = prepare_params(params_f32, n_split)

    # Small batch; feature dim is fixed at 1024 by the module.
    x = jax.random.normal(keys[5], (8, FEAT), jnp.float32)

    fwd = jax.jit(functools.partial(linear_net_forward, prepped))
    out = jax.block_until_ready(fwd(x))
    assert out.shape == (8, FEAT)

    # Tight check against an identical-precision reference ...
    ref_bf16 = linear_net_forward_ref_bf16(params_f32, x)
    assert jnp.allclose(out, ref_bf16, atol=1e-2, rtol=1e-2), "mismatch vs bf16 reference"
    # ... and a loose check against the full-f32 spec (bf16 operands lose ~2^-9/element).
    ref_f32 = linear_net_forward_ref_f32(params_f32, x)
    assert jnp.allclose(out, ref_f32, atol=5e-2, rtol=5e-2), "mismatch vs f32 reference"

    print("KERNEL_OK")
</pallas_src>

<mosaic_0001>
module attributes {stable_mosaic.version = 11 : i64} {
  func.func @_fused_linear_net_kernel(%arg0: i32, %arg1: memref<8x1024xf32, #tpu.memory_space<vmem>>, %arg2: memref<1024x1024xbf16, #tpu.memory_space<vmem>>, %arg3: memref<1024x1024xbf16, #tpu.memory_space<vmem>>, %arg4: memref<1x1024x1024xbf16, #tpu.memory_space<vmem>>, %arg5: memref<1x1024x1024xbf16, #tpu.memory_space<vmem>>, %arg6: memref<1x1024xf32, #tpu.memory_space<vmem>>, %arg7: memref<1x1024xf32, #tpu.memory_space<vmem>>, %arg8: memref<1x1x1024xf32, #tpu.memory_space<vmem>>, %arg9: memref<8x1024xf32, #tpu.memory_space<vmem>>) attributes {dimension_semantics = [#tpu.dimension_semantics<parallel>], iteration_bounds = array<i64: 1>, scalar_prefetch = 0 : i64, scratch_operands = 0 : i64, tpu.core_type = #tpu.core_type<tc>, window_params = [{pipeline_mode = #tpu.pipeline_mode<synchronous>, transform_indices = @transform_0, window_bounds = array<i64: 8, 1024>}, {pipeline_mode = #tpu.pipeline_mode<synchronous>, transform_indices = @transform_1, window_bounds = array<i64: 1024, 1024>}, {pipeline_mode = #tpu.pipeline_mode<synchronous>, transform_indices = @transform_2, window_bounds = array<i64: 1024, 1024>}, {transform_indices = @transform_3, window_bounds = array<i64: 1, 1024, 1024>}, {transform_indices = @transform_4, window_bounds = array<i64: 1, 1024, 1024>}, {pipeline_mode = #tpu.pipeline_mode<synchronous>, transform_indices = @transform_5, window_bounds = array<i64: 1, 1024>}, {pipeline_mode = #tpu.pipeline_mode<synchronous>, transform_indices = @transform_6, window_bounds = array<i64: 1, 1024>}, {transform_indices = @transform_7, window_bounds = array<i64: 1, 1, 1024>}, {transform_indices = @transform_8, window_bounds = array<i64: 8, 1024>}]} {
    %c0 = arith.constant 0 : index
    %c0_0 = arith.constant 0 : index
    %0 = vector.load %arg1[%c0, %c0_0] : memref<8x1024xf32, #tpu.memory_space<vmem>>, vector<8x1024xf32>
    %1 = arith.truncf %0 : vector<8x1024xf32> to vector<8x1024xbf16>
    %c0_1 = arith.constant 0 : index
    %c0_2 = arith.constant 0 : index
    %2 = vector.load %arg2[%c0_1, %c0_2] : memref<1024x1024xbf16, #tpu.memory_space<vmem>>, vector<1024x1024xbf16>
    %cst = arith.constant dense<0.000000e+00> : vector<8x1024xf32>
    %3 = tpu.matmul %1, %2, %cst {dimension_numbers = #tpu.dot_dimension_numbers<[1], [0], [0], [1], [0, 0, 1, 1], [], []>} : vector<8x1024xbf16>, vector<1024x1024xbf16>, vector<8x1024xf32> -> vector<8x1024xf32>
    %c0_3 = arith.constant 0 : index
    %c0_4 = arith.constant 0 : index
    %4 = vector.load %arg6[%c0_3, %c0_4] : memref<1x1024xf32, #tpu.memory_space<vmem>>, vector<1x1024xf32>
    %5 = vector.broadcast %4 : vector<1x1024xf32> to vector<8x1024xf32>
    %6 = arith.addf %3, %5 : vector<8x1024xf32>
    %7 = arith.truncf %6 : vector<8x1024xf32> to vector<8x1024xbf16>
    %c0_5 = arith.constant 0 : index
    %c0_6 = arith.constant 0 : index
    %8 = vector.load %arg3[%c0_5, %c0_6] : memref<1024x1024xbf16, #tpu.memory_space<vmem>>, vector<1024x1024xbf16>
    %cst_7 = arith.constant dense<0.000000e+00> : vector<8x1024xf32>
    %9 = tpu.matmul %7, %8, %cst_7 {dimension_numbers = #tpu.dot_dimension_numbers<[1], [0], [0], [1], [0, 0, 1, 1], [], []>} : vector<8x1024xbf16>, vector<1024x1024xbf16>, vector<8x1024xf32> -> vector<8x1024xf32>
    %c0_8 = arith.constant 0 : index
    %c0_9 = arith.constant 0 : index
    %10 = vector.load %arg7[%c0_8, %c0_9] : memref<1x1024xf32, #tpu.memory_space<vmem>>, vector<1x1024xf32>
    %11 = vector.broadcast %10 : vector<1x1024xf32> to vector<8x1024xf32>
    %12 = arith.addf %9, %11 : vector<8x1024xf32>
    %13 = arith.truncf %12 : vector<8x1024xf32> to vector<8x1024xbf16>
    %c0_10 = arith.constant 0 : index
    %c0_11 = arith.constant 0 : index
    %c0_12 = arith.constant 0 : index
    %14 = vector.load %arg4[%c0_10, %c0_11, %c0_12] : memref<1x1024x1024xbf16, #tpu.memory_space<vmem>>, vector<1x1024x1024xbf16>
    %15 = vector.shape_cast %14 : vector<1x1024x1024xbf16> to vector<1024x1024xbf16>
    %cst_13 = arith.constant dense<0.000000e+00> : vector<8x1024xf32>
    %16 = tpu.matmul %7, %15, %cst_13 {dimension_numbers = #tpu.dot_dimension_numbers<[1], [0], [0], [1], [0, 0, 1, 1], [], []>} : vector<8x1024xbf16>, vector<1024x1024xbf16>, vector<8x1024xf32> -> vector<8x1024xf32>
    %c0_14 = arith.constant 0 : index
    %c0_15 = arith.constant 0 : index
    %c0_16 = arith.constant 0 : index
    %17 = vector.load %arg5[%c0_14, %c0_15, %c0_16] : memref<1x1024x1024xbf16, #tpu.memory_space<vmem>>, vector<1x1024x1024xbf16>
    %18 = vector.shape_cast %17 : vector<1x1024x1024xbf16> to vector<1024x1024xbf16>
    %cst_17 = arith.constant dense<0.000000e+00> : vector<8x1024xf32>
    %19 = tpu.matmul %13, %18, %cst_17 {dimension_numbers = #tpu.dot_dimension_numbers<[1], [0], [0], [1], [0, 0, 1, 1], [], []>} : vector<8x1024xbf16>, vector<1024x1024xbf16>, vector<8x1024xf32> -> vector<8x1024xf32>
    %20 = arith.addf %16, %19 : vector<8x1024xf32>
    %c0_18 = arith.constant 0 : index
    %c0_19 = arith.constant 0 : index
    %c0_20 = arith.constant 0 : index
    %21 = vector.load %arg8[%c0_18, %c0_19, %c0_20] : memref<1x1x1024xf32, #tpu.memory_space<vmem>>, vector<1x1x1024xf32>
    %22 = vector.shape_cast %21 : vector<1x1x1024xf32> to vector<1x1024xf32>
    %23 = vector.broadcast %22 : vector<1x1024xf32> to vector<8x1024xf32>
    %24 = arith.addf %20, %23 : vector<8x1024xf32>
    %c0_21 = arith.constant 0 : index
    %c0_22 = arith.constant 0 : index
    %25 = vector.load %arg9[%c0_21, %c0_22] : memref<8x1024xf32, #tpu.memory_space<vmem>>, vector<8x1024xf32>
    tpu.vector_store %arg9[%c0_21, %c0_22], %24 {strides = array<i32>} : memref<8x1024xf32, #tpu.memory_space<vmem>>, vector<8x1024xf32>,
    return
  }
  func.func @transform_0(%arg0: i32) -> (i32, i32) {
    %c0_i32 = arith.constant 0 : i32
    %c0_i32_0 = arith.constant 0 : i32
    %c0_i32_1 = arith.constant 0 : i32
    return %c0_i32, %c0_i32_0 : i32, i32
  }
  func.func @transform_1(%arg0: i32) -> (i32, i32) {
    %c0_i32 = arith.constant 0 : i32
    %c0_i32_0 = arith.constant 0 : i32
    %c0_i32_1 = arith.constant 0 : i32
    return %c0_i32, %c0_i32_0 : i32, i32
  }
  func.func @transform_2(%arg0: i32) -> (i32, i32) {
    %c0_i32 = arith.constant 0 : i32
    %c0_i32_0 = arith.constant 0 : i32
    %c0_i32_1 = arith.constant 0 : i32
    return %c0_i32, %c0_i32_0 : i32, i32
  }
  func.func @transform_3(%arg0: i32) -> (i32, i32, i32) {
    %c0_i32 = arith.constant 0 : i32
    %c0_i32_0 = arith.constant 0 : i32
    %c0_i32_1 = arith.constant 0 : i32
    return %arg0, %c0_i32, %c0_i32_0 : i32, i32, i32
  }
  func.func @transform_4(%arg0: i32) -> (i32, i32, i32) {
    %c0_i32 = arith.constant 0 : i32
    %c0_i32_0 = arith.constant 0 : i32
    %c0_i32_1 = arith.constant 0 : i32
    return %arg0, %c0_i32, %c0_i32_0 : i32, i32, i32
  }
  func.func @transform_5(%arg0: i32) -> (i32, i32) {
    %c0_i32 = arith.constant 0 : i32
    %c0_i32_0 = arith.constant 0 : i32
    %c0_i32_1 = arith.constant 0 : i32
    return %c0_i32, %c0_i32_0 : i32, i32
  }
  func.func @transform_6(%arg0: i32) -> (i32, i32) {
    %c0_i32 = arith.constant 0 : i32
    %c0_i32_0 = arith.constant 0 : i32
    %c0_i32_1 = arith.constant 0 : i32
    return %c0_i32, %c0_i32_0 : i32, i32
  }
  func.func @transform_7(%arg0: i32) -> (i32, i32, i32) {
    %c0_i32 = arith.constant 0 : i32
    %c0_i32_0 = arith.constant 0 : i32
    %c0_i32_1 = arith.constant 0 : i32
    return %arg0, %c0_i32, %c0_i32_0 : i32, i32, i32
  }
  func.func @transform_8(%arg0: i32) -> (i32, i32) {
    %c0_i32 = arith.constant 0 : i32
    %c0_i32_0 = arith.constant 0 : i32
    return %c0_i32, %arg0 : i32, i32
  }
}

</mosaic_0001>

<bundles_post_ra>
// kernel: linear_net_forward.1
= control target key start
LH: loop header
LB: loop body
LE: loop exit
PB: predicated region body
PF: predicated region fallthrough
CT: control target
= control target key end

     0   :  { %13 = vsyncpa [#allocation3], 0  ;;  %s18126_s0 = inlined_call_operand.hbm [shape: f32[8,1024], index: 0, kind: input, shape index: {}]   ;;  %s18127_s1 = inlined_call_operand.hbm [shape: bf16[1024,1024], index: 1, kind: input, shape index: {}]   ;;  %s18128_s2 = inlined_call_operand.hbm [shape: bf16[1024,1024], index: 2, kind: input, shape index: {}]   ;;  %s18129_s3 = inlined_call_operand.hbm [shape: bf16[1,1024,1024], index: 3, kind: input, shape index: {}]   ;;  %s18130_s4 = inlined_call_operand.hbm [shape: bf16[1,1024,1024], index: 4, kind: input, shape index: {}]   ;;  %s18131_s5 = inlined_call_operand.hbm [shape: f32[1,1024], index: 5, kind: input, shape index: {}]   ;;  %s18132_s6 = inlined_call_operand.hbm [shape: f32[1,1024], index: 6, kind: input, shape index: {}]   ;;  %s18133_s7 = inlined_call_operand.hbm [shape: f32[1,1,1024], index: 7, kind: input, shape index: {}]   ;;  %s18134_s8 = inlined_call_operand.hbm [shape: f32[8,1024], index: 8, kind: output, shape index: {}]  }
   0x1   :  { %14 = vsyncpa [#allocation6], 0 }
   0x2   :  { %15 = vsyncpa [#allocation9], 0 }
   0x3   :  { %16 = vsyncpa [#allocation12], 0 }
   0x4   :  { %17 = vsyncpa [#allocation15], 0 }
   0x5   :  { %18 = vsyncpa [#allocation4], 0  ;;  %s17491_s27 = smov [#allocation5]  }
   0x6   :  { %s34_s28 = sshll.u32 %s17491_s27, 4  ;;  %s35_s28 = int_to_ptr.vmem [resolvable:$true] %s34_s28 }
   0x7   :  { %s17307_s29 = scalar_lea.vmem %s35_s28, 65536  ;;  %p17312_p1 = scmp.lt.s32.totalorder %s35_s28, %s35_s28 }
   0x8   :  { %p17308_p0 = scmp.ne.s32.totalorder %s35_s28, %s17307_s29  ;;  %p17313_p2 = scmp.lt.s32.totalorder %s17307_s29, %s17307_s29 }
   0xa   :  { %p17314_p3 = por %p17313_p2, %p17312_p1 }
   0xc   :  { %p17315_p4 = pnand %p17314_p3, %p17308_p0 }
   0xe   :  { %17318 = shalt.err (!%p17315_p4)
}
   0xf   :  { %s17492_s30 = smov 512   ;;  %s17493_s9 = smov 32  }
  0x10   :  { %40 = dma.hbm_to_vmem [thread:$0]  %s18127_s1, 65536, %s35_s28, [#allocation6], %s17492_s30, %s17492_s30, %s17493_s9  }
  0x11   :  { %s17494_s12 = smov [#allocation8]   ;;  %s17495_s14 = smov [#allocation11]  }
  0x12   :  { %s58_s13 = sshll.u32 %s17494_s12, 4  ;;  %s83_s15 = sshll.u32 %s17495_s14, 4  ;;  %s59_s13 = int_to_ptr.vmem [resolvable:$true] %s58_s13  ;;  %s84_s15 = int_to_ptr.vmem [resolvable:$true] %s83_s15 }
  0x13   :  { %s17327_s16 = scalar_lea.vmem %s59_s13, 65536  ;;  %p17332_p6 = scmp.lt.s32.totalorder %s59_s13, %s59_s13 }
  0x14   :  { %p17328_p5 = scmp.ne.s32.totalorder %s59_s13, %s17327_s16  ;;  %p17333_p7 = scmp.lt.s32.totalorder %s17327_s16, %s17327_s16 }
  0x16   :  { %p17334_p8 = por %p17333_p7, %p17332_p6 }
  0x18   :  { %p17335_p9 = pnand %p17334_p8, %p17328_p5 }
  0x1a   :  { %17338 = shalt.err (!%p17335_p9)
}
  0x1b   :  { %64 = dma.hbm_to_vmem [thread:$0]  %s18129_s3, 65536, %s59_s13, [#allocation9], %s17492_s30, %s17492_s30, %s17493_s9  }
  0x1c   :  { %s17347_s1 = scalar_lea.vmem %s84_s15, 128  ;;  %p17352_p11 = scmp.lt.s32.totalorder %s84_s15, %s84_s15 }
  0x1d   :  { %p17348_p10 = scmp.ne.s32.totalorder %s84_s15, %s17347_s1  ;;  %p17353_p12 = scmp.lt.s32.totalorder %s17347_s1, %s17347_s1 }
  0x1f   :  { %p17354_p13 = por %p17353_p12, %p17352_p11 }
  0x21   :  { %p17355_p0 = pnand %p17354_p13, %p17348_p10 }
  0x23   :  { %17358 = shalt.err (!%p17355_p0)
}
  0x24   :  { %86 = dma.hbm_to_vmem [thread:$0]  %s18131_s5, 128, %s84_s15, [#allocation12]  }
  0x25   :  { %s17496_s21 = smov [#allocation2]   ;;  %s17497_s23 = smov [#allocation7]  }
  0x26   :  { %s25_s22 = sshll.u32 %s17496_s21, 4  ;;  %s46_s24 = sshll.u32 %s17497_s23, 4  ;;  %s26_s22 = int_to_ptr.vmem [resolvable:$true] %s25_s22  ;;  %s47_s24 = int_to_ptr.vmem [resolvable:$true] %s46_s24 }
  0x27   :  { %s17367_s25 = scalar_lea.vmem %s26_s22, 1024  ;;  %p17372_p2 = scmp.lt.s32.totalorder %s26_s22, %s26_s22 }
  0x28   :  { %p17368_p1 = scmp.ne.s32.totalorder %s26_s22, %s17367_s25  ;;  %p17373_p3 = scmp.lt.s32.totalorder %s17367_s25, %s17367_s25 }
  0x2a   :  { %p17374_p4 = por %p17373_p3, %p17372_p2 }
  0x2c   :  { %p17375_p5 = pnand %p17374_p4, %p17368_p1 }
  0x2e   :  { %17378 = shalt.err (!%p17375_p5)
}
  0x2f   :  { %28 = dma.hbm_to_vmem [thread:$0]  %s18126_s0, 1024, %s26_s22, [#allocation3]  }
  0x30   :  { %s17387_s27 = scalar_lea.vmem %s47_s24, 65536  ;;  %p17392_p7 = scmp.lt.s32.totalorder %s47_s24, %s47_s24 }
  0x31   :  { %p17388_p6 = scmp.ne.s32.totalorder %s47_s24, %s17387_s27  ;;  %p17393_p8 = scmp.lt.s32.totalorder %s17387_s27, %s17387_s27 }
  0x33   :  { %p17394_p9 = por %p17393_p8, %p17392_p7 }
  0x35   :  { %p17395_p10 = pnand %p17394_p9, %p17388_p6 }
  0x37   :  { %17398 = shalt.err (!%p17395_p10)
}
  0x38   :  { %52 = dma.hbm_to_vmem [thread:$0]  %s18128_s2, 65536, %s47_s24, [#allocation6], %s17492_s30, %s17492_s30, %s17493_s9  }
  0x39   :  { %s17498_s29 = smov [#allocation10]   ;;  %s17499_s11 = smov [#allocation13]  }
  0x3a   :  { %s70_s10 = sshll.u32 %s17498_s29, 4  ;;  %s93_s0 = sshll.u32 %s17499_s11, 4  ;;  %s71_s10 = int_to_ptr.vmem [resolvable:$true] %s70_s10  ;;  %s94_s0 = int_to_ptr.vmem [resolvable:$true] %s93_s0 }
  0x3b   :  { %s17407_s12 = scalar_lea.vmem %s71_s10, 65536  ;;  %p17412_p12 = scmp.lt.s32.totalorder %s71_s10, %s71_s10 }
  0x3c   :  { %p17408_p11 = scmp.ne.s32.totalorder %s71_s10, %s17407_s12  ;;  %p17413_p13 = scmp.lt.s32.totalorder %s17407_s12, %s17407_s12 }
  0x3e   :  { %p17414_p0 = por %p17413_p13, %p17412_p12 }
  0x40   :  { %p17415_p1 = pnand %p17414_p0, %p17408_p11 }
  0x42   :  { %17418 = shalt.err (!%p17415_p1)
}
  0x43   :  { %76 = dma.hbm_to_vmem [thread:$0]  %s18130_s4, 65536, %s71_s10, [#allocation9], %s17492_s30, %s17492_s30, %s17493_s9  }
  0x44   :  { %s17427_s2 = scalar_lea.vmem %s94_s0, 128  ;;  %p17432_p3 = scmp.lt.s32.totalorder %s94_s0, %s94_s0 }
  0x45   :  { %p17428_p2 = scmp.ne.s32.totalorder %s94_s0, %s17427_s2  ;;  %p17433_p4 = scmp.lt.s32.totalorder %s17427_s2, %s17427_s2 }
  0x47   :  { %p17434_p5 = por %p17433_p4, %p17432_p3 }
  0x49   :  { %p17435_p6 = pnand %p17434_p5, %p17428_p2 }
  0x4b   :  { %17438 = shalt.err (!%p17435_p6)
}
  0x4c   :  { %96 = dma.hbm_to_vmem [thread:$0]  %s18132_s6, 128, %s94_s0, [#allocation12]  }
  0x4d   :  { %s17500_s17 = smov [#allocation14]  }
  0x4e   :  { %s103_s18 = sshll.u32 %s17500_s17, 4  ;;  %s104_s18 = int_to_ptr.vmem [resolvable:$true] %s103_s18 }
  0x4f   :  { %s17447_s1 = scalar_lea.vmem %s104_s18, 128  ;;  %p17452_p8 = scmp.lt.s32.totalorder %s104_s18, %s104_s18 }
  0x50   :  { %p17448_p7 = scmp.ne.s32.totalorder %s104_s18, %s17447_s1  ;;  %p17453_p9 = scmp.lt.s32.totalorder %s17447_s1, %s17447_s1 }
  0x52   :  { %p17454_p10 = por %p17453_p9, %p17452_p8 }
  0x54   :  { %p17455_p11 = pnand %p17454_p10, %p17448_p7 }
  0x56   :  { %17458 = shalt.err (!%p17455_p11)
}
  0x57   :  { %106 = dma.hbm_to_vmem [thread:$0]  %s18133_s7, 128, %s104_s18, [#allocation15]  }
  0x58   :  { %17479 = dma.done.wait [#allocation3], 1024  }
  0x59   :  { %17480 = vsyncadd [#allocation3], 4294966272 }
  0x5a   :  { %17481 = dma.done.wait [#allocation6], 131072  }
  0x5b   :  { %17482 = vsyncadd [#allocation6], 4294836224 }
  0x5c   :  { %17483 = dma.done.wait [#allocation9], 131072  }
  0x5d   :  { %17484 = vsyncadd [#allocation9], 4294836224 }
  0x5e   :  { %17485 = dma.done.wait [#allocation12], 256  }
  0x5f   :  { %17486 = vsyncadd [#allocation12], 4294967040 }
  0x60   :  { %17487 = dma.done.wait [#allocation15], 128  }
  0x61   :  { %17488 = vsyncadd [#allocation15], 4294967168  ;;  %v203_v0 = vld [vmem:[#allocation5 + $0x1c0] sm:$0xff]  ;;  %v132_v53 = vld [vmem:[#allocation2 + $0x8] sm:$0xff]  ;;  %s17501_s6 = smov [#allocation16]  }
  0x62   :  { %v207_v1 = vld [vmem:[#allocation5 + $0x1e0] sm:$0xff]  ;;  %v134_v54 = vld [vmem:[#allocation2 + $0x18] sm:$0xff]  ;;  %v17583_v58 = vpack.c.bf16 %v132_v53, %v132_v53  ;;  %s15223_s7 = sshll.u32 %s17501_s6, 4  ;;  %s15224_s7 = int_to_ptr.vmem [resolvable:$true] %s15223_s7 }
  0x63   :  { %v331_v2 = vld [vmem:[#allocation5 + $0x5c0] sm:$0xff]  ;;  %v15293_v3 = vcombine.high %v203_v0, %v207_v1  ;;  %v15292_v5 = vcombine.low %v203_v0, %v207_v1  ;;  %v17585_v59 = vpack.c.bf16 %v134_v54, %v134_v54  ;;  %s17459_s9 = scalar_lea.vmem %s15224_s7, 1024  ;;  %p17464_p13 = scmp.lt.s32.totalorder %s15224_s7, %s15224_s7 }
  0x64   :  { %v335_v4 = vld [vmem:[#allocation5 + $0x5e0] sm:$0xff]  ;;  %3293 = vmatprep.mubr.bf16.mxu0 %v17583_v58  ;;  %p17460_p12 = scmp.ne.s32.totalorder %s15224_s7, %s17459_s9  ;;  %p17465_p0 = scmp.lt.s32.totalorder %s17459_s9, %s17459_s9 }
  0x65   :  { %v195_v6 = vld [vmem:[#allocation5 + $0x180] sm:$0xff]  ;;  %v15421_v8 = vcombine.high %v331_v2, %v335_v4  ;;  %v15420_v9 = vcombine.low %v331_v2, %v335_v4  ;;  %3261 = vmatprep.subr.bf16.mxu0 %v15293_v3  ;;  %3334 = vmatprep.mubr.bf16.mxu1 %v17585_v59 }
  0x66   :  { %v199_v7 = vld [vmem:[#allocation5 + $0x1a0] sm:$0xff]  ;;  %3262 = vmatpush1.bf16.msra.mxu0 %v15292_v5  ;;  %p17466_p1 = por %p17465_p0, %p17464_p13 }
  0x67   :  { %v15285_v10 = vcombine.high %v195_v6, %v199_v7  ;;  %v323_v11 = vld [vmem:[#allocation5 + $0x580] sm:$0xff]  ;;  %3302 = vmatprep.subr.bf16.mxu1 %v15421_v8  ;;  %v15284_v18 = vcombine.low %v195_v6, %v199_v7 }
  0x68   :  { %v327_v12 = vld [vmem:[#allocation5 + $0x5a0] sm:$0xff]  ;;  %3303 = vmatpush1.bf16.msra.mxu1 %v15420_v9  ;;  %p17467_p2 = pnand %p17466_p1, %p17460_p12 }
  0x69   :  { %v187_v13 = vld [vmem:[#allocation5 + $0x140] sm:$0xff]  ;;  %v15413_v14 = vcombine.high %v323_v11, %v327_v12  ;;  %3263 = vmatprep.subr.bf16.mxu0 %v15285_v10  ;;  %v15412_v19 = vcombine.low %v323_v11, %v327_v12 }
  0x6a   :  { %v191_v15 = vld [vmem:[#allocation5 + $0x160] sm:$0xff]  ;;  %3264 = vmatpush1.bf16.msra.mxu0 %v15284_v18 }
  0x6b   :  { %v315_v16 = vld [vmem:[#allocation5 + $0x540] sm:$0xff]  ;;  %v15277_v20 = vcombine.high %v187_v13, %v191_v15  ;;  %3304 = vmatprep.subr.bf16.mxu1 %v15413_v14  ;;  %v15276_v26 = vcombine.low %v187_v13, %v191_v15 }
  0x6c   :  { %v319_v17 = vld [vmem:[#allocation5 + $0x560] sm:$0xff]  ;;  %3305 = vmatpush1.bf16.msra.mxu1 %v15412_v19 }
  0x6d   :  { %v15405_v21 = vcombine.high %v315_v16, %v319_v17  ;;  %v179_v22 = vld [vmem:[#allocation5 + $0x100] sm:$0xff]  ;;  %3265 = vmatprep.subr.bf16.mxu0 %v15277_v20  ;;  %v15404_v27 = vcombine.low %v315_v16, %v319_v17 }
  0x6e   :  { %v183_v23 = vld [vmem:[#allocation5 + $0x120] sm:$0xff]  ;;  %3266 = vmatpush1.bf16.msra.mxu0 %v15276_v26 }
  0x6f   :  { %v307_v24 = vld [vmem:[#allocation5 + $0x500] sm:$0xff]  ;;  %v15269_v28 = vcombine.high %v179_v22, %v183_v23  ;;  %3306 = vmatprep.subr.bf16.mxu1 %v15405_v21  ;;  %v15268_v34 = vcombine.low %v179_v22, %v183_v23 }
  0x70   :  { %v311_v25 = vld [vmem:[#allocation5 + $0x520] sm:$0xff]  ;;  %3307 = vmatpush1.bf16.msra.mxu1 %v15404_v27 }
  0x71   :  { %v15397_v29 = vcombine.high %v307_v24, %v311_v25  ;;  %v171_v30 = vld [vmem:[#allocation5 + $0xc0] sm:$0xff]  ;;  %3267 = vmatprep.subr.bf16.mxu0 %v15269_v28  ;;  %v15396_v35 = vcombine.low %v307_v24, %v311_v25 }
  0x72   :  { %v175_v31 = vld [vmem:[#allocation5 + $0xe0] sm:$0xff]  ;;  %3268 = vmatpush1.bf16.msra.mxu0 %v15268_v34 }
  0x73   :  { %v299_v32 = vld [vmem:[#allocation5 + $0x4c0] sm:$0xff]  ;;  %v15261_v36 = vcombine.high %v171_v30, %v175_v31  ;;  %3308 = vmatprep.subr.bf16.mxu1 %v15397_v29  ;;  %v15260_v42 = vcombine.low %v171_v30, %v175_v31 }
  0x74   :  { %v303_v33 = vld [vmem:[#allocation5 + $0x4e0] sm:$0xff]  ;;  %3309 = vmatpush1.bf16.msra.mxu1 %v15396_v35 }
  0x75   :  { %v15389_v37 = vcombine.high %v299_v32, %v303_v33  ;;  %v163_v38 = vld [vmem:[#allocation5 + $0x80] sm:$0xff]  ;;  %3269 = vmatprep.subr.bf16.mxu0 %v15261_v36  ;;  %v15388_v43 = vcombine.low %v299_v32, %v303_v33 }
  0x76   :  { %v167_v39 = vld [vmem:[#allocation5 + $0xa0] sm:$0xff]  ;;  %3270 = vmatpush1.bf16.msra.mxu0 %v15260_v42 }
  0x77   :  { %v291_v40 = vld [vmem:[#allocation5 + $0x480] sm:$0xff]  ;;  %v15253_v44 = vcombine.high %v163_v38, %v167_v39  ;;  %3310 = vmatprep.subr.bf16.mxu1 %v15389_v37  ;;  %v15252_v50 = vcombine.low %v163_v38, %v167_v39 }
  0x78   :  { %v295_v41 = vld [vmem:[#allocation5 + $0x4a0] sm:$0xff]  ;;  %3311 = vmatpush1.bf16.msra.mxu1 %v15388_v43 }
  0x79   :  { %v15381_v45 = vcombine.high %v291_v40, %v295_v41  ;;  %v155_v46 = vld [vmem:[#allocation5 + $0x40] sm:$0xff]  ;;  %3271 = vmatprep.subr.bf16.mxu0 %v15253_v44  ;;  %v15380_v51 = vcombine.low %v291_v40, %v295_v41 }
  0x7a   :  { %v159_v47 = vld [vmem:[#allocation5 + $0x60] sm:$0xff]  ;;  %3272 = vmatpush1.bf16.msra.mxu0 %v15252_v50 }
  0x7b   :  { %v283_v48 = vld [vmem:[#allocation5 + $0x440] sm:$0xff]  ;;  %v15245_v52 = vcombine.high %v155_v46, %v159_v47  ;;  %3312 = vmatprep.subr.bf16.mxu1 %v15381_v45  ;;  %v15244_v62 = vcombine.low %v155_v46, %v159_v47 }
  0x7c   :  { %v287_v49 = vld [vmem:[#allocation5 + $0x460] sm:$0xff]  ;;  %3313 = vmatpush1.bf16.msra.mxu1 %v15380_v51 }
  0x7d   :  { %v15373_v55 = vcombine.high %v283_v48, %v287_v49  ;;  %v147_v56 = vld [vmem:[#allocation5] sm:$0xff]  ;;  %3273 = vmatprep.subr.bf16.mxu0 %v15245_v52  ;;  %v15372_v63 = vcombine.low %v283_v48, %v287_v49 }
  0x7e   :  { %v151_v57 = vld [vmem:[#allocation5 + $0x20] sm:$0xff]  ;;  %3274 = vmatpush1.bf16.msra.mxu0 %v15244_v62 }
  0x7f   :  { %v275_v60 = vld [vmem:[#allocation5 + $0x400] sm:$0xff]  ;;  %v15237_v0 = vcombine.high %v147_v56, %v151_v57  ;;  %3314 = vmatprep.subr.bf16.mxu1 %v15373_v55  ;;  %v15236_v6 = vcombine.low %v147_v56, %v151_v57 }
  0x80   :  { %v279_v61 = vld [vmem:[#allocation5 + $0x420] sm:$0xff]  ;;  %3315 = vmatpush1.bf16.msra.mxu1 %v15372_v63 }
  0x81   :  { %v15365_v1 = vcombine.high %v275_v60, %v279_v61  ;;  %v267_v2 = vld [vmem:[#allocation5 + $0x3c0] sm:$0xff]  ;;  %3275 = vmatprep.subr.bf16.mxu0 %v15237_v0  ;;  %v15364_v7 = vcombine.low %v275_v60, %v279_v61 }
  0x82   :  { %v271_v3 = vld [vmem:[#allocation5 + $0x3e0] sm:$0xff]  ;;  %3276 = vmatpush1.bf16.msra.mxu0 %v15236_v6 }
  0x83   :  { %v395_v4 = vld [vmem:[#allocation5 + $0x7c0] sm:$0xff]  ;;  %v15357_v8 = vcombine.high %v267_v2, %v271_v3  ;;  %3316 = vmatprep.subr.bf16.mxu1 %v15365_v1  ;;  %v15356_v14 = vcombine.low %v267_v2, %v271_v3 }
  0x84   :  { %v399_v5 = vld [vmem:[#allocation5 + $0x7e0] sm:$0xff]  ;;  %3317 = vmatpush1.bf16.msra.mxu1 %v15364_v7 }
  0x85   :  { %v15485_v9 = vcombine.high %v395_v4, %v399_v5  ;;  %v259_v10 = vld [vmem:[#allocation5 + $0x380] sm:$0xff]  ;;  %3277 = vmatprep.subr.bf16.mxu0 %v15357_v8  ;;  %v15484_v15 = vcombine.low %v395_v4, %v399_v5 }
  0x86   :  { %v263_v11 = vld [vmem:[#allocation5 + $0x3a0] sm:$0xff]  ;;  %3278 = vmatpush2.bf16.msra.mxu0 %v15356_v14 }
  0x87   :  { %v387_v12 = vld [vmem:[#allocation5 + $0x780] sm:$0xff]  ;;  %v15349_v16 = vcombine.high %v259_v10, %v263_v11  ;;  %3318 = vmatprep.subr.bf16.mxu1 %v15485_v9  ;;  %v15348_v22 = vcombine.low %v259_v10, %v263_v11  ;;  %v133_v11 = vld [vmem:[#allocation2 + $0x10] sm:$0xff] }
  0x88   :  { %v391_v13 = vld [vmem:[#allocation5 + $0x7a0] sm:$0xff]  ;;  %3319 = vmatpush2.bf16.msra.mxu1 %v15484_v15 }
  0x89   :  { %v15477_v17 = vcombine.high %v387_v12, %v391_v13  ;;  %v251_v18 = vld [vmem:[#allocation5 + $0x340] sm:$0xff]  ;;  %3279 = vmatprep.subr.bf16.mxu0 %v15349_v16  ;;  %v15476_v23 = vcombine.low %v387_v12, %v391_v13 }
  0x8a   :  { %v255_v19 = vld [vmem:[#allocation5 + $0x360] sm:$0xff]  ;;  %3280 = vmatpush2.bf16.msra.mxu0 %v15348_v22  ;;  %v138_v22 = vld [vmem:[#allocation2 + $0x38] sm:$0xff] }
  0x8b   :  { %v379_v20 = vld [vmem:[#allocation5 + $0x740] sm:$0xff]  ;;  %v15341_v24 = vcombine.high %v251_v18, %v255_v19  ;;  %3320 = vmatprep.subr.bf16.mxu1 %v15477_v17  ;;  %v15340_v30 = vcombine.low %v251_v18, %v255_v19  ;;  %v136_v19 = vld [vmem:[#allocation2 + $0x28] sm:$0xff] }
  0x8c   :  { %v383_v21 = vld [vmem:[#allocation5 + $0x760] sm:$0xff]  ;;  %3321 = vmatpush2.bf16.msra.mxu1 %v15476_v23 }
  0x8d   :  { %v15469_v25 = vcombine.high %v379_v20, %v383_v21  ;;  %v243_v26 = vld [vmem:[#allocation5 + $0x300] sm:$0xff]  ;;  %3281 = vmatprep.subr.bf16.mxu0 %v15341_v24  ;;  %v15468_v31 = vcombine.low %v379_v20, %v383_v21  ;;  %v17591_v20 = vpack.c.bf16 %v133_v11, %v133_v11 }
  0x8e   :  { %v247_v27 = vld [vmem:[#allocation5 + $0x320] sm:$0xff]  ;;  %3282 = vmatpush2.bf16.msra.mxu0 %v15340_v30 }
  0x8f   :  { %v371_v28 = vld [vmem:[#allocation5 + $0x700] sm:$0xff]  ;;  %v15333_v32 = vcombine.high %v243_v26, %v247_v27  ;;  %3322 = vmatprep.subr.bf16.mxu1 %v15469_v25  ;;  %v15332_v38 = vcombine.low %v243_v26, %v247_v27 }
  0x90   :  { %v375_v29 = vld [vmem:[#allocation5 + $0x720] sm:$0xff]  ;;  %3323 = vmatpush2.bf16.msra.mxu1 %v15468_v31  ;;  %v17596_v31 = vpack.c.bf16 %v138_v22, %v138_v22 }
  0x91   :  { %v15461_v33 = vcombine.high %v371_v28, %v375_v29  ;;  %v235_v34 = vld [vmem:[#allocation5 + $0x2c0] sm:$0xff]  ;;  %3283 = vmatprep.subr.bf16.mxu0 %v15333_v32  ;;  %v15460_v39 = vcombine.low %v371_v28, %v375_v29  ;;  %v17593_v28 = vpack.c.bf16 %v136_v19, %v136_v19 }
  0x92   :  { %v239_v35 = vld [vmem:[#allocation5 + $0x2e0] sm:$0xff]  ;;  %3284 = vmatpush2.bf16.msra.mxu0 %v15332_v38 }
  0x93   :  { %v363_v36 = vld [vmem:[#allocation5 + $0x6c0] sm:$0xff]  ;;  %v15325_v40 = vcombine.high %v235_v34, %v239_v35  ;;  %3324 = vmatprep.subr.bf16.mxu1 %v15461_v33  ;;  %v15324_v46 = vcombine.low %v235_v34, %v239_v35 }
  0x94   :  { %v367_v37 = vld [vmem:[#allocation5 + $0x6e0] sm:$0xff]  ;;  %3325 = vmatpush2.bf16.msra.mxu1 %v15460_v39 }
  0x95   :  { %v15453_v41 = vcombine.high %v363_v36, %v367_v37  ;;  %v227_v42 = vld [vmem:[#allocation5 + $0x280] sm:$0xff]  ;;  %3285 = vmatprep.subr.bf16.mxu0 %v15325_v40  ;;  %v15452_v47 = vcombine.low %v363_v36, %v367_v37 }
  0x96   :  { %v231_v43 = vld [vmem:[#allocation5 + $0x2a0] sm:$0xff]  ;;  %3286 = vmatpush2.bf16.msra.mxu0 %v15324_v46 }
  0x97   :  { %v355_v44 = vld [vmem:[#allocation5 + $0x680] sm:$0xff]  ;;  %v15317_v48 = vcombine.high %v227_v42, %v231_v43  ;;  %3326 = vmatprep.subr.bf16.mxu1 %v15453_v41  ;;  %v15316_v54 = vcombine.low %v227_v42, %v231_v43 }
  0x98   :  { %v359_v45 = vld [vmem:[#allocation5 + $0x6a0] sm:$0xff]  ;;  %3327 = vmatpush2.bf16.msra.mxu1 %v15452_v47 }
  0x99   :  { %v15445_v49 = vcombine.high %v355_v44, %v359_v45  ;;  %v219_v50 = vld [vmem:[#allocation5 + $0x240] sm:$0xff]  ;;  %3287 = vmatprep.subr.bf16.mxu0 %v15317_v48  ;;  %v15444_v55 = vcombine.low %v355_v44, %v359_v45 }
  0x9a   :  { %v223_v51 = vld [vmem:[#allocation5 + $0x260] sm:$0xff]  ;;  %3288 = vmatpush2.bf16.msra.mxu0 %v15316_v54 }
  0x9b   :  { %v347_v52 = vld [vmem:[#allocation5 + $0x640] sm:$0xff]  ;;  %v15309_v56 = vcombine.high %v219_v50, %v223_v51  ;;  %3328 = vmatprep.subr.bf16.mxu1 %v15445_v49  ;;  %v15308_v0 = vcombine.low %v219_v50, %v223_v51 }
  0x9c   :  { %v351_v53 = vld [vmem:[#allocation5 + $0x660] sm:$0xff]  ;;  %3329 = vmatpush2.bf16.msra.mxu1 %v15444_v55 }
  0x9d   :  { %v15437_v57 = vcombine.high %v347_v52, %v351_v53  ;;  %v211_v60 = vld [vmem:[#allocation5 + $0x200] sm:$0xff]  ;;  %3289 = vmatprep.subr.bf16.mxu0 %v15309_v56  ;;  %v15436_v1 = vcombine.low %v347_v52, %v351_v53 }
  0x9e   :  { %v215_v61 = vld [vmem:[#allocation5 + $0x220] sm:$0xff]  ;;  %3290 = vmatpush2.bf16.msra.mxu0 %v15308_v0 }
  0x9f   :  { %v339_v62 = vld [vmem:[#allocation5 + $0x600] sm:$0xff]  ;;  %v15301_v2 = vcombine.high %v211_v60, %v215_v61  ;;  %3330 = vmatprep.subr.bf16.mxu1 %v15437_v57  ;;  %v15300_v8 = vcombine.low %v211_v60, %v215_v61 }
  0xa0   :  { %v343_v63 = vld [vmem:[#allocation5 + $0x620] sm:$0xff]  ;;  %3331 = vmatpush2.bf16.msra.mxu1 %v15436_v1 }
  0xa1   :  { %v15429_v3 = vcombine.high %v339_v62, %v343_v63  ;;  %v459_v4 = vld [vmem:[#allocation5 + $0x9c0] sm:$0xff]  ;;  %3291 = vmatprep.subr.bf16.mxu0 %v15301_v2  ;;  %v15428_v10 = vcombine.low %v339_v62, %v343_v63 }
  0xa2   :  { %v463_v5 = vld [vmem:[#allocation5 + $0x9e0] sm:$0xff]  ;;  %3292 = vmatpush2.bf16.msra.mxu0 %v15300_v8 }
  0xa3   :  { %v587_v6 = vld [vmem:[#allocation5 + $0xdc0] sm:$0xff]  ;;  %v15549_v12 = vcombine.high %v459_v4, %v463_v5  ;;  %3332 = vmatprep.subr.bf16.mxu1 %v15429_v3  ;;  %v15548_v21 = vcombine.low %v459_v4, %v463_v5 }
  0xa4   :  { %v591_v7 = vld [vmem:[#allocation5 + $0xde0] sm:$0xff]  ;;  %3333 = vmatpush2.bf16.msra.mxu1 %v15428_v10 }
  0xa5   :  { %v131_v9 = vld [vmem:[#allocation2] sm:$0xff]  ;;  %v15677_v13 = vcombine.high %v587_v6, %v591_v7  ;;  %3343 = vmatprep.subr.bf16.mxu0 %v15549_v12  ;;  %v15676_v23 = vcombine.low %v587_v6, %v591_v7 }
  0xa6   :  { %v451_v14 = vld [vmem:[#allocation5 + $0x980] sm:$0xff]  ;;  %v17589_v16 = vpack.c.bf16 %v131_v9, %v131_v9 }
  0xa7   :  { %v455_v15 = vld [vmem:[#allocation5 + $0x9a0] sm:$0xff]  ;;  %3384 = vmatprep.subr.bf16.mxu1 %v15677_v13  ;;  %3335 = vmatmul.mubr.bf16.vlgmr.msra.gmra.mxu1 %v17591_v20 }
  0xa8   :  { %v579_v17 = vld [vmem:[#allocation5 + $0xd80] sm:$0xff]  ;;  %v15541_v24 = vcombine.high %v451_v14, %v455_v15  ;;  %3294 = vmatmul.mubr.bf16.vlgmr.msra.gmra.mxu0 %v17589_v16  ;;  %v15540_v32 = vcombine.low %v451_v14, %v455_v15  ;;  %3385 = vmatpush1.bf16.msra.mxu1 %v15676_v23 }
  0xa9   :  { %v583_v18 = vld [vmem:[#allocation5 + $0xda0] sm:$0xff]  ;;  %3344 = vmatpush1.bf16.msra.mxu0 %v15548_v21  ;;  %3375 = vmatprep.mubr.bf16.mxu0 %v17593_v28 }
  0xaa   :  { %v15669_v25 = vcombine.high %v579_v17, %v583_v18  ;;  %v443_v26 = vld [vmem:[#allocation5 + $0x940] sm:$0xff]  ;;  %3345 = vmatprep.subr.bf16.mxu0 %v15541_v24  ;;  %v15668_v33 = vcombine.low %v579_v17, %v583_v18  ;;  %3416 = vmatprep.mubr.bf16.mxu1 %v17596_v31 }
  0xab   :  { %v447_v27 = vld [vmem:[#allocation5 + $0x960] sm:$0xff] }
  0xac   :  { %v571_v29 = vld [vmem:[#allocation5 + $0xd40] sm:$0xff]  ;;  %v15533_v34 = vcombine.high %v443_v26, %v447_v27  ;;  %3386 = vmatprep.subr.bf16.mxu1 %v15669_v25  ;;  %v15532_v40 = vcombine.low %v443_v26, %v447_v27 }
  0xad   :  { %v575_v30 = vld [vmem:[#allocation5 + $0xd60] sm:$0xff]  ;;  %3346 = vmatpush1.bf16.msra.mxu0 %v15540_v32  ;;  %3387 = vmatpush1.bf16.msra.mxu1 %v15668_v33 }
  0xae   :  { %v15661_v35 = vcombine.high %v571_v29, %v575_v30  ;;  %v435_v36 = vld [vmem:[#allocation5 + $0x900] sm:$0xff]  ;;  %3347 = vmatprep.subr.bf16.mxu0 %v15533_v34  ;;  %v15660_v41 = vcombine.low %v571_v29, %v575_v30 }
  0xaf   :  { %v439_v37 = vld [vmem:[#allocation5 + $0x920] sm:$0xff] }
  0xb0   :  { %v563_v38 = vld [vmem:[#allocation5 + $0xd00] sm:$0xff]  ;;  %v15525_v42 = vcombine.high %v435_v36, %v439_v37  ;;  %3388 = vmatprep.subr.bf16.mxu1 %v15661_v35  ;;  %v15524_v48 = vcombine.low %v435_v36, %v439_v37 }
  0xb1   :  { %v567_v39 = vld [vmem:[#allocation5 + $0xd20] sm:$0xff]  ;;  %3348 = vmatpush1.bf16.msra.mxu0 %v15532_v40  ;;  %3389 = vmatpush1.bf16.msra.mxu1 %v15660_v41 }
  0xb2   :  { %v15653_v43 = vcombine.high %v563_v38, %v567_v39  ;;  %v427_v44 = vld [vmem:[#allocation5 + $0x8c0] sm:$0xff]  ;;  %3349 = vmatprep.subr.bf16.mxu0 %v15525_v42  ;;  %v15652_v49 = vcombine.low %v563_v38, %v567_v39 }
  0xb3   :  { %v431_v45 = vld [vmem:[#allocation5 + $0x8e0] sm:$0xff] }
  0xb4   :  { %v555_v46 = vld [vmem:[#allocation5 + $0xcc0] sm:$0xff]  ;;  %v15517_v50 = vcombine.high %v427_v44, %v431_v45  ;;  %3390 = vmatprep.subr.bf16.mxu1 %v15653_v43  ;;  %v15516_v56 = vcombine.low %v427_v44, %v431_v45 }
  0xb5   :  { %v559_v47 = vld [vmem:[#allocation5 + $0xce0] sm:$0xff]  ;;  %3350 = vmatpush1.bf16.msra.mxu0 %v15524_v48  ;;  %3391 = vmatpush1.bf16.msra.mxu1 %v15652_v49 }
  0xb6   :  { %v15645_v51 = vcombine.high %v555_v46, %v559_v47  ;;  %v419_v52 = vld [vmem:[#allocation5 + $0x880] sm:$0xff]  ;;  %3351 = vmatprep.subr.bf16.mxu0 %v15517_v50  ;;  %v15644_v57 = vcombine.low %v555_v46, %v559_v47 }
  0xb7   :  { %v423_v53 = vld [vmem:[#allocation5 + $0x8a0] sm:$0xff] }
  0xb8   :  { %v547_v54 = vld [vmem:[#allocation5 + $0xc80] sm:$0xff]  ;;  %v15509_v60 = vcombine.high %v419_v52, %v423_v53  ;;  %3392 = vmatprep.subr.bf16.mxu1 %v15645_v51  ;;  %v15508_v2 = vcombine.low %v419_v52, %v423_v53 }
  0xb9   :  { %v551_v55 = vld [vmem:[#allocation5 + $0xca0] sm:$0xff]  ;;  %3352 = vmatpush1.bf16.msra.mxu0 %v15516_v56  ;;  %3393 = vmatpush1.bf16.msra.mxu1 %v15644_v57 }
  0xba   :  { %v15637_v61 = vcombine.high %v547_v54, %v551_v55  ;;  %v411_v62 = vld [vmem:[#allocation5 + $0x840] sm:$0xff]  ;;  %3353 = vmatprep.subr.bf16.mxu0 %v15509_v60  ;;  %v15636_v3 = vcombine.low %v547_v54, %v551_v55 }
  0xbb   :  { %v415_v63 = vld [vmem:[#allocation5 + $0x860] sm:$0xff] }
  0xbc   :  { %v539_v0 = vld [vmem:[#allocation5 + $0xc40] sm:$0xff]  ;;  %v15501_v4 = vcombine.high %v411_v62, %v415_v63  ;;  %3394 = vmatprep.subr.bf16.mxu1 %v15637_v61  ;;  %v15500_v10 = vcombine.low %v411_v62, %v415_v63 }
  0xbd   :  { %v543_v1 = vld [vmem:[#allocation5 + $0xc60] sm:$0xff]  ;;  %3354 = vmatpush1.bf16.msra.mxu0 %v15508_v2  ;;  %3395 = vmatpush1.bf16.msra.mxu1 %v15636_v3 }
  0xbe   :  { %v15629_v5 = vcombine.high %v539_v0, %v543_v1  ;;  %v403_v6 = vld [vmem:[#allocation5 + $0x800] sm:$0xff]  ;;  %3355 = vmatprep.subr.bf16.mxu0 %v15501_v4  ;;  %v15628_v11 = vcombine.low %v539_v0, %v543_v1 }
  0xbf   :  { %v407_v7 = vld [vmem:[#allocation5 + $0x820] sm:$0xff] }
  0xc0   :  { %v531_v8 = vld [vmem:[#allocation5 + $0xc00] sm:$0xff]  ;;  %v15493_v12 = vcombine.high %v403_v6, %v407_v7  ;;  %3396 = vmatprep.subr.bf16.mxu1 %v15629_v5  ;;  %v15492_v19 = vcombine.low %v403_v6, %v407_v7 }
  0xc1   :  { %v535_v9 = vld [vmem:[#allocation5 + $0xc20] sm:$0xff]  ;;  %3356 = vmatpush1.bf16.msra.mxu0 %v15500_v10  ;;  %3397 = vmatpush1.bf16.msra.mxu1 %v15628_v11 }
  0xc2   :  { %v15621_v13 = vcombine.high %v531_v8, %v535_v9  ;;  %v523_v14 = vld [vmem:[#allocation5 + $0xbc0] sm:$0xff]  ;;  %3357 = vmatprep.subr.bf16.mxu0 %v15493_v12  ;;  %v15620_v21 = vcombine.low %v531_v8, %v535_v9 }
  0xc3   :  { %v527_v15 = vld [vmem:[#allocation5 + $0xbe0] sm:$0xff] }
  0xc4   :  { %v651_v17 = vld [vmem:[#allocation5 + $0xfc0] sm:$0xff]  ;;  %v15613_v22 = vcombine.high %v523_v14, %v527_v15  ;;  %3398 = vmatprep.subr.bf16.mxu1 %v15621_v13  ;;  %v15612_v29 = vcombine.low %v523_v14, %v527_v15 }
  0xc5   :  { %v655_v18 = vld [vmem:[#allocation5 + $0xfe0] sm:$0xff]  ;;  %3358 = vmatpush1.bf16.msra.mxu0 %v15492_v19  ;;  %3399 = vmatpush1.bf16.msra.mxu1 %v15620_v21 }
  0xc6   :  { %v15741_v23 = vcombine.high %v651_v17, %v655_v18  ;;  %v515_v24 = vld [vmem:[#allocation5 + $0xb80] sm:$0xff]  ;;  %3359 = vmatprep.subr.bf16.mxu0 %v15613_v22  ;;  %v15740_v30 = vcombine.low %v651_v17, %v655_v18  ;;  %v204_v22 = vld [vmem:[#allocation5 + $0x1c8] sm:$0xff] }
  0xc7   :  { %v519_v25 = vld [vmem:[#allocation5 + $0xba0] sm:$0xff] }
  0xc8   :  { %v643_v26 = vld [vmem:[#allocation5 + $0xf80] sm:$0xff]  ;;  %v15605_v32 = vcombine.high %v515_v24, %v519_v25  ;;  %3400 = vmatprep.subr.bf16.mxu1 %v15741_v23  ;;  %v15604_v38 = vcombine.low %v515_v24, %v519_v25  ;;  %v208_v23 = vld [vmem:[#allocation5 + $0x1e8] sm:$0xff] }
  0xc9   :  { %v647_v27 = vld [vmem:[#allocation5 + $0xfa0] sm:$0xff]  ;;  %3360 = vmatpush2.bf16.msra.mxu0 %v15612_v29  ;;  %3401 = vmatpush2.bf16.msra.mxu1 %v15740_v30  ;;  %v332_v24 = vld [vmem:[#allocation5 + $0x5c8] sm:$0xff]  ;;  %v137_v30 = vld [vmem:[#allocation2 + $0x30] sm:$0xff] }
  0xca   :  { %v15733_v33 = vcombine.high %v643_v26, %v647_v27  ;;  %v507_v34 = vld [vmem:[#allocation5 + $0xb40] sm:$0xff]  ;;  %3361 = vmatprep.subr.bf16.mxu0 %v15605_v32  ;;  %v15732_v39 = vcombine.low %v643_v26, %v647_v27  ;;  %v336_v25 = vld [vmem:[#allocation5 + $0x5e8] sm:$0xff]  ;;  %v15295_v32 = vcombine.high %v204_v22, %v208_v23 }
  0xcb   :  { %v511_v35 = vld [vmem:[#allocation5 + $0xb60] sm:$0xff] }
  0xcc   :  { %v635_v36 = vld [vmem:[#allocation5 + $0xf40] sm:$0xff]  ;;  %v15597_v40 = vcombine.high %v507_v34, %v511_v35  ;;  %3402 = vmatprep.subr.bf16.mxu1 %v15733_v33  ;;  %v15596_v46 = vcombine.low %v507_v34, %v511_v35  ;;  %v15423_v33 = vcombine.high %v332_v24, %v336_v25  ;;  %v196_v34 = vld [vmem:[#allocation5 + $0x188] sm:$0xff] }
  0xcd   :  { %v639_v37 = vld [vmem:[#allocation5 + $0xf60] sm:$0xff]  ;;  %3362 = vmatpush2.bf16.msra.mxu0 %v15604_v38  ;;  %3403 = vmatpush2.bf16.msra.mxu1 %v15732_v39  ;;  %v200_v35 = vld [vmem:[#allocation5 + $0x1a8] sm:$0xff]  ;;  %v17603_v39 = vpack.c.bf16 %v137_v30, %v137_v30 }
  0xce   :  { %v15725_v41 = vcombine.high %v635_v36, %v639_v37  ;;  %v499_v42 = vld [vmem:[#allocation5 + $0xb00] sm:$0xff]  ;;  %3363 = vmatprep.subr.bf16.mxu0 %v15597_v40  ;;  %v15724_v47 = vcombine.low %v635_v36, %v639_v37  ;;  %v324_v37 = vld [vmem:[#allocation5 + $0x588] sm:$0xff]  ;;  %v15294_v40 = vcombine.low %v204_v22, %v208_v23 }
  0xcf   :  { %v503_v43 = vld [vmem:[#allocation5 + $0xb20] sm:$0xff]  ;;  %v328_v38 = vld [vmem:[#allocation5 + $0x5a8] sm:$0xff] }
  0xd0   :  { %v627_v44 = vld [vmem:[#allocation5 + $0xf00] sm:$0xff]  ;;  %v15589_v48 = vcombine.high %v499_v42, %v503_v43  ;;  %3404 = vmatprep.subr.bf16.mxu1 %v15725_v41  ;;  %v15588_v54 = vcombine.low %v499_v42, %v503_v43  ;;  %v15422_v41 = vcombine.low %v332_v24, %v336_v25  ;;  %v15287_v42 = vcombine.high %v196_v34, %v200_v35  ;;  %v148_v24 = vld [vmem:[#allocation5 + $0x8] sm:$0xff] }
  0xd1   :  { %v631_v45 = vld [vmem:[#allocation5 + $0xf20] sm:$0xff]  ;;  %3364 = vmatpush2.bf16.msra.mxu0 %v15596_v46  ;;  %3405 = vmatpush2.bf16.msra.mxu1 %v15724_v47  ;;  %v15415_v43 = vcombine.high %v324_v37, %v328_v38  ;;  %v316_v46 = vld [vmem:[#allocation5 + $0x548] sm:$0xff] }
  0xd2   :  { %v15717_v49 = vcombine.high %v627_v44, %v631_v45  ;;  %v491_v50 = vld [vmem:[#allocation5 + $0xac0] sm:$0xff]  ;;  %3365 = vmatprep.subr.bf16.mxu0 %v15589_v48  ;;  %v15716_v55 = vcombine.low %v627_v44, %v631_v45  ;;  %v188_v44 = vld [vmem:[#allocation5 + $0x148] sm:$0xff]  ;;  %v15286_v48 = vcombine.low %v196_v34, %v200_v35 }
  0xd3   :  { %v495_v51 = vld [vmem:[#allocation5 + $0xae0] sm:$0xff]  ;;  %v192_v45 = vld [vmem:[#allocation5 + $0x168] sm:$0xff] }
  0xd4   :  { %v619_v52 = vld [vmem:[#allocation5 + $0xec0] sm:$0xff]  ;;  %v15581_v56 = vcombine.high %v491_v50, %v495_v51  ;;  %3406 = vmatprep.subr.bf16.mxu1 %v15717_v49  ;;  %v15580_v0 = vcombine.low %v491_v50, %v495_v51  ;;  %v320_v47 = vld [vmem:[#allocation5 + $0x568] sm:$0xff]  ;;  %v15414_v49 = vcombine.low %v324_v37, %v328_v38  ;;  %v15279_v50 = vcombine.high %v188_v44, %v192_v45 }
  0xd5   :  { %v623_v53 = vld [vmem:[#allocation5 + $0xee0] sm:$0xff]  ;;  %3366 = vmatpush2.bf16.msra.mxu0 %v15588_v54  ;;  %3407 = vmatpush2.bf16.msra.mxu1 %v15716_v55  ;;  %v15407_v51 = vcombine.high %v316_v46, %v320_v47  ;;  %v308_v54 = vld [vmem:[#allocation5 + $0x508] sm:$0xff] }
  0xd6   :  { %v15709_v57 = vcombine.high %v619_v52, %v623_v53  ;;  %v483_v60 = vld [vmem:[#allocation5 + $0xa80] sm:$0xff]  ;;  %3367 = vmatprep.subr.bf16.mxu0 %v15581_v56  ;;  %v15708_v1 = vcombine.low %v619_v52, %v623_v53  ;;  %v180_v52 = vld [vmem:[#allocation5 + $0x108] sm:$0xff]  ;;  %v15278_v56 = vcombine.low %v188_v44, %v192_v45 }
  0xd7   :  { %v487_v61 = vld [vmem:[#allocation5 + $0xaa0] sm:$0xff]  ;;  %v184_v53 = vld [vmem:[#allocation5 + $0x128] sm:$0xff] }
  0xd8   :  { %v611_v62 = vld [vmem:[#allocation5 + $0xe80] sm:$0xff]  ;;  %v15573_v2 = vcombine.high %v483_v60, %v487_v61  ;;  %3408 = vmatprep.subr.bf16.mxu1 %v15709_v57  ;;  %v15572_v8 = vcombine.low %v483_v60, %v487_v61  ;;  %v312_v55 = vld [vmem:[#allocation5 + $0x528] sm:$0xff]  ;;  %v15406_v57 = vcombine.low %v316_v46, %v320_v47  ;;  %v15271_v60 = vcombine.high %v180_v52, %v184_v53 }
  0xd9   :  { %v615_v63 = vld [vmem:[#allocation5 + $0xea0] sm:$0xff]  ;;  %3368 = vmatpush2.bf16.msra.mxu0 %v15580_v0  ;;  %3409 = vmatpush2.bf16.msra.mxu1 %v15708_v1  ;;  %v15399_v61 = vcombine.high %v308_v54, %v312_v55  ;;  %v300_v0 = vld [vmem:[#allocation5 + $0x4c8] sm:$0xff] }
  0xda   :  { %v15701_v3 = vcombine.high %v611_v62, %v615_v63  ;;  %v475_v4 = vld [vmem:[#allocation5 + $0xa40] sm:$0xff]  ;;  %3369 = vmatprep.subr.bf16.mxu0 %v15573_v2  ;;  %v15700_v9 = vcombine.low %v611_v62, %v615_v63  ;;  %v172_v62 = vld [vmem:[#allocation5 + $0xc8] sm:$0xff]  ;;  %v15270_v2 = vcombine.low %v180_v52, %v184_v53 }
  0xdb   :  { %v479_v5 = vld [vmem:[#allocation5 + $0xa60] sm:$0xff]  ;;  %v176_v63 = vld [vmem:[#allocation5 + $0xe8] sm:$0xff] }
  0xdc   :  { %v603_v6 = vld [vmem:[#allocation5 + $0xe40] sm:$0xff]  ;;  %v15565_v10 = vcombine.high %v475_v4, %v479_v5  ;;  %3410 = vmatprep.subr.bf16.mxu1 %v15701_v3  ;;  %v15564_v17 = vcombine.low %v475_v4, %v479_v5  ;;  %v304_v1 = vld [vmem:[#allocation5 + $0x4e8] sm:$0xff]  ;;  %v15398_v3 = vcombine.low %v308_v54, %v312_v55  ;;  %v15263_v4 = vcombine.high %v172_v62, %v176_v63 }
  0xdd   :  { %v607_v7 = vld [vmem:[#allocation5 + $0xe60] sm:$0xff]  ;;  %3370 = vmatpush2.bf16.msra.mxu0 %v15572_v8  ;;  %3411 = vmatpush2.bf16.msra.mxu1 %v15700_v9  ;;  %v15391_v5 = vcombine.high %v300_v0, %v304_v1  ;;  %v292_v8 = vld [vmem:[#allocation5 + $0x488] sm:$0xff] }
  0xde   :  { %v15693_v11 = vcombine.high %v603_v6, %v607_v7  ;;  %v467_v12 = vld [vmem:[#allocation5 + $0xa00] sm:$0xff]  ;;  %3371 = vmatprep.subr.bf16.mxu0 %v15565_v10  ;;  %v15692_v18 = vcombine.low %v603_v6, %v607_v7  ;;  %v164_v6 = vld [vmem:[#allocation5 + $0x88] sm:$0xff]  ;;  %v15262_v10 = vcombine.low %v172_v62, %v176_v63 }
  0xdf   :  { %v471_v13 = vld [vmem:[#allocation5 + $0xa20] sm:$0xff]  ;;  %v168_v7 = vld [vmem:[#allocation5 + $0xa8] sm:$0xff] }
  0xe0   :  { %v595_v14 = vld [vmem:[#allocation5 + $0xe00] sm:$0xff]  ;;  %v15557_v19 = vcombine.high %v467_v12, %v471_v13  ;;  %3412 = vmatprep.subr.bf16.mxu1 %v15693_v11  ;;  %v15556_v26 = vcombine.low %v467_v12, %v471_v13  ;;  %v296_v9 = vld [vmem:[#allocation5 + $0x4a8] sm:$0xff]  ;;  %v15390_v11 = vcombine.low %v300_v0, %v304_v1  ;;  %v15255_v12 = vcombine.high %v164_v6, %v168_v7 }
  0xe1   :  { %v599_v15 = vld [vmem:[#allocation5 + $0xe20] sm:$0xff]  ;;  %3372 = vmatpush2.bf16.msra.mxu0 %v15564_v17  ;;  %3413 = vmatpush2.bf16.msra.mxu1 %v15692_v18  ;;  %v15383_v13 = vcombine.high %v292_v8, %v296_v9  ;;  %v284_v17 = vld [vmem:[#allocation5 + $0x448] sm:$0xff] }
  0xe2   :  { %v15685_v21 = vcombine.high %v595_v14, %v599_v15  ;;  %v135_v27 = vld [vmem:[#allocation2 + $0x20] sm:$0xff]  ;;  %3373 = vmatprep.subr.bf16.mxu0 %v15557_v19  ;;  %v15684_v29 = vcombine.low %v595_v14, %v599_v15  ;;  %v156_v14 = vld [vmem:[#allocation5 + $0x48] sm:$0xff]  ;;  %v15254_v19 = vcombine.low %v164_v6, %v168_v7 }
  0xe3   :  { %v17601_v36 = vpack.c.bf16 %v135_v27, %v135_v27  ;;  %v160_v15 = vld [vmem:[#allocation5 + $0x68] sm:$0xff] }
  0xe4   :  { %3414 = vmatprep.subr.bf16.mxu1 %v15685_v21  ;;  %v288_v18 = vld [vmem:[#allocation5 + $0x468] sm:$0xff]  ;;  %v15382_v21 = vcombine.low %v292_v8, %v296_v9  ;;  %v15247_v22 = vcombine.high %v156_v14, %v160_v15 }
  0xe5   :  { %3374 = vmatpush2.bf16.msra.mxu0 %v15556_v26  ;;  %3415 = vmatpush2.bf16.msra.mxu1 %v15684_v29  ;;  %v15375_v23 = vcombine.high %v284_v17, %v288_v18  ;;  %v152_v25 = vld [vmem:[#allocation5 + $0x28] sm:$0xff]  ;;  %v15246_v29 = vcombine.low %v156_v14, %v160_v15  ;;  %v15374_v30 = vcombine.low %v284_v17, %v288_v18 }
  0xe6   :  { %3425 = vmatprep.subr.bf16.mxu0 %v15295_v32  ;;  %3466 = vmatprep.subr.bf16.mxu1 %v15423_v33  ;;  %v276_v26 = vld [vmem:[#allocation5 + $0x408] sm:$0xff]  ;;  %v15239_v32 = vcombine.high %v148_v24, %v152_v25 }
  0xe7   :  { %v280_v27 = vld [vmem:[#allocation5 + $0x428] sm:$0xff] }
  0xe8   :  { %3376 = vmatmul.mubr.bf16.vlgmr.msra.gmra.mxu0 %v17601_v36  ;;  %3417 = vmatmul.mubr.bf16.vlgmr.msra.gmra.mxu1 %v17603_v39  ;;  %v15367_v33 = vcombine.high %v276_v26, %v280_v27  ;;  %v268_v34 = vld [vmem:[#allocation5 + $0x3c8] sm:$0xff] }
  0xe9   :  { %3426 = vmatpush1.bf16.msra.mxu0 %v15294_v40  ;;  %3467 = vmatpush1.bf16.msra.mxu1 %v15422_v41  ;;  %v272_v35 = vld [vmem:[#allocation5 + $0x3e8] sm:$0xff]  ;;  %v15238_v40 = vcombine.low %v148_v24, %v152_v25  ;;  %v15366_v41 = vcombine.low %v276_v26, %v280_v27 }
  0xea   :  { %3427 = vmatprep.subr.bf16.mxu0 %v15287_v42  ;;  %3468 = vmatprep.subr.bf16.mxu1 %v15415_v43  ;;  %v396_v37 = vld [vmem:[#allocation5 + $0x7c8] sm:$0xff]  ;;  %v15359_v42 = vcombine.high %v268_v34, %v272_v35 }
  0xeb   :  { %3457 = vmatprep.mubr.bf16.mxu0 %v17583_v58  ;;  %3498 = vmatprep.mubr.bf16.mxu1 %v17585_v59  ;;  %v400_v38 = vld [vmem:[#allocation5 + $0x7e8] sm:$0xff] }
  0xec   :  { %v15487_v43 = vcombine.high %v396_v37, %v400_v38  ;;  %v260_v44 = vld [vmem:[#allocation5 + $0x388] sm:$0xff] }
  0xed   :  { %3428 = vmatpush1.bf16.msra.mxu0 %v15286_v48  ;;  %3469 = vmatpush1.bf16.msra.mxu1 %v15414_v49  ;;  %v264_v45 = vld [vmem:[#allocation5 + $0x3a8] sm:$0xff]  ;;  %v15358_v48 = vcombine.low %v268_v34, %v272_v35  ;;  %v15486_v49 = vcombine.low %v396_v37, %v400_v38 }
  0xee   :  { %3429 = vmatprep.subr.bf16.mxu0 %v15279_v50  ;;  %3470 = vmatprep.subr.bf16.mxu1 %v15407_v51  ;;  %v388_v46 = vld [vmem:[#allocation5 + $0x788] sm:$0xff]  ;;  %v15351_v50 = vcombine.high %v260_v44, %v264_v45 }
  0xef   :  { %v392_v47 = vld [vmem:[#allocation5 + $0x7a8] sm:$0xff] }
  0xf0   :  { %v15479_v51 = vcombine.high %v388_v46, %v392_v47  ;;  %v252_v52 = vld [vmem:[#allocation5 + $0x348] sm:$0xff] }
  0xf1   :  { %3430 = vmatpush1.bf16.msra.mxu0 %v15278_v56  ;;  %3471 = vmatpush1.bf16.msra.mxu1 %v15406_v57  ;;  %v256_v53 = vld [vmem:[#allocation5 + $0x368] sm:$0xff]  ;;  %v15350_v56 = vcombine.low %v260_v44, %v264_v45  ;;  %v15478_v57 = vcombine.low %v388_v46, %v392_v47 }
  0xf2   :  { %3431 = vmatprep.subr.bf16.mxu0 %v15271_v60  ;;  %3472 = vmatprep.subr.bf16.mxu1 %v15399_v61  ;;  %v380_v54 = vld [vmem:[#allocation5 + $0x748] sm:$0xff]  ;;  %v15343_v60 = vcombine.high %v252_v52, %v256_v53 }
  0xf3   :  { %v384_v55 = vld [vmem:[#allocation5 + $0x768] sm:$0xff] }
  0xf4   :  { %v15471_v61 = vcombine.high %v380_v54, %v384_v55  ;;  %v244_v62 = vld [vmem:[#allocation5 + $0x308] sm:$0xff] }
  0xf5   :  { %3432 = vmatpush1.bf16.msra.mxu0 %v15270_v2  ;;  %3473 = vmatpush1.bf16.msra.mxu1 %v15398_v3  ;;  %v248_v63 = vld [vmem:[#allocation5 + $0x328] sm:$0xff]  ;;  %v15342_v2 = vcombine.low %v252_v52, %v256_v53  ;;  %v15470_v3 = vcombine.low %v380_v54, %v384_v55 }
  0xf6   :  { %3433 = vmatprep.subr.bf16.mxu0 %v15263_v4  ;;  %3474 = vmatprep.subr.bf16.mxu1 %v15391_v5  ;;  %v372_v0 = vld [vmem:[#allocation5 + $0x708] sm:$0xff]  ;;  %v15335_v4 = vcombine.high %v244_v62, %v248_v63 }
  0xf7   :  { %v376_v1 = vld [vmem:[#allocation5 + $0x728] sm:$0xff] }
  0xf8   :  { %v15463_v5 = vcombine.high %v372_v0, %v376_v1  ;;  %v236_v6 = vld [vmem:[#allocation5 + $0x2c8] sm:$0xff] }
  0xf9   :  { %3434 = vmatpush1.bf16.msra.mxu0 %v15262_v10  ;;  %3475 = vmatpush1.bf16.msra.mxu1 %v15390_v11  ;;  %v240_v7 = vld [vmem:[#allocation5 + $0x2e8] sm:$0xff]  ;;  %v15334_v10 = vcombine.low %v244_v62, %v248_v63  ;;  %v15462_v11 = vcombine.low %v372_v0, %v376_v1 }
  0xfa   :  { %3435 = vmatprep.subr.bf16.mxu0 %v15255_v12  ;;  %3476 = vmatprep.subr.bf16.mxu1 %v15383_v13  ;;  %v364_v8 = vld [vmem:[#allocation5 + $0x6c8] sm:$0xff]  ;;  %v15327_v12 = vcombine.high %v236_v6, %v240_v7 }
  0xfb   :  { %v368_v9 = vld [vmem:[#allocation5 + $0x6e8] sm:$0xff] }
  0xfc   :  { %v15455_v13 = vcombine.high %v364_v8, %v368_v9  ;;  %v228_v14 = vld [vmem:[#allocation5 + $0x288] sm:$0xff] }
  0xfd   :  { %3436 = vmatpush1.bf16.msra.mxu0 %v15254_v19  ;;  %3477 = vmatpush1.bf16.msra.mxu1 %v15382_v21  ;;  %v232_v15 = vld [vmem:[#allocation5 + $0x2a8] sm:$0xff]  ;;  %v15326_v19 = vcombine.low %v236_v6, %v240_v7  ;;  %v15454_v21 = vcombine.low %v364_v8, %v368_v9 }
  0xfe   :  { %3437 = vmatprep.subr.bf16.mxu0 %v15247_v22  ;;  %3478 = vmatprep.subr.bf16.mxu1 %v15375_v23  ;;  %v356_v17 = vld [vmem:[#allocation5 + $0x688] sm:$0xff]  ;;  %v15319_v22 = vcombine.high %v228_v14, %v232_v15 }
  0xff   :  { %v360_v18 = vld [vmem:[#allocation5 + $0x6a8] sm:$0xff] }
 0x100   :  { %v15447_v23 = vcombine.high %v356_v17, %v360_v18  ;;  %v220_v24 = vld [vmem:[#allocation5 + $0x248] sm:$0xff] }
 0x101   :  { %3438 = vmatpush1.bf16.msra.mxu0 %v15246_v29  ;;  %3479 = vmatpush1.bf16.msra.mxu1 %v15374_v30  ;;  %v224_v25 = vld [vmem:[#allocation5 + $0x268] sm:$0xff]  ;;  %v15318_v29 = vcombine.low %v228_v14, %v232_v15  ;;  %v15446_v30 = vcombine.low %v356_v17, %v360_v18 }
 0x102   :  { %3439 = vmatprep.subr.bf16.mxu0 %v15239_v32  ;;  %3480 = vmatprep.subr.bf16.mxu1 %v15367_v33  ;;  %v348_v26 = vld [vmem:[#allocation5 + $0x648] sm:$0xff]  ;;  %v15311_v32 = vcombine.high %v220_v24, %v224_v25 }
 0x103   :  { %v352_v27 = vld [vmem:[#allocation5 + $0x668] sm:$0xff] }
 0x104   :  { %v15439_v33 = vcombine.high %v348_v26, %v352_v27  ;;  %v212_v34 = vld [vmem:[#allocation5 + $0x208] sm:$0xff] }
 0x105   :  { %3440 = vmatpush1.bf16.msra.mxu0 %v15238_v40  ;;  %3481 = vmatpush1.bf16.msra.mxu1 %v15366_v41  ;;  %v216_v35 = vld [vmem:[#allocation5 + $0x228] sm:$0xff]  ;;  %v15310_v40 = vcombine.low %v220_v24, %v224_v25  ;;  %v15438_v41 = vcombine.low %v348_v26, %v352_v27 }
 0x106   :  { %3441 = vmatprep.subr.bf16.mxu0 %v15359_v42  ;;  %3482 = vmatprep.subr.bf16.mxu1 %v15487_v43  ;;  %v340_v37 = vld [vmem:[#allocation5 + $0x608] sm:$0xff]  ;;  %v15303_v42 = vcombine.high %v212_v34, %v216_v35 }
 0x107   :  { %v344_v38 = vld [vmem:[#allocation5 + $0x628] sm:$0xff] }
 0x108   :  { %v15431_v43 = vcombine.high %v340_v37, %v344_v38  ;;  %v460_v44 = vld [vmem:[#allocation5 + $0x9c8] sm:$0xff] }
 0x109   :  { %3442 = vmatpush2.bf16.msra.mxu0 %v15358_v48  ;;  %3483 = vmatpush2.bf16.msra.mxu1 %v15486_v49  ;;  %v464_v45 = vld [vmem:[#allocation5 + $0x9e8] sm:$0xff]  ;;  %v15302_v48 = vcombine.low %v212_v34, %v216_v35  ;;  %v15430_v49 = vcombine.low %v340_v37, %v344_v38 }
 0x10a   :  { %3443 = vmatprep.subr.bf16.mxu0 %v15351_v50  ;;  %3484 = vmatprep.subr.bf16.mxu1 %v15479_v51  ;;  %v588_v46 = vld [vmem:[#allocation5 + $0xdc8] sm:$0xff]  ;;  %v15551_v50 = vcombine.high %v460_v44, %v464_v45 }
 0x10b   :  { %v592_v47 = vld [vmem:[#allocation5 + $0xde8] sm:$0xff] }
 0x10c   :  { %v15679_v51 = vcombine.high %v588_v46, %v592_v47  ;;  %v452_v52 = vld [vmem:[#allocation5 + $0x988] sm:$0xff] }
 0x10d   :  { %3444 = vmatpush2.bf16.msra.mxu0 %v15350_v56  ;;  %3485 = vmatpush2.bf16.msra.mxu1 %v15478_v57  ;;  %v456_v53 = vld [vmem:[#allocation5 + $0x9a8] sm:$0xff]  ;;  %v15550_v56 = vcombine.low %v460_v44, %v464_v45  ;;  %v15678_v57 = vcombine.low %v588_v46, %v592_v47 }
 0x10e   :  { %3445 = vmatprep.subr.bf16.mxu0 %v15343_v60  ;;  %3486 = vmatprep.subr.bf16.mxu1 %v15471_v61  ;;  %v580_v54 = vld [vmem:[#allocation5 + $0xd88] sm:$0xff]  ;;  %v15543_v60 = vcombine.high %v452_v52, %v456_v53 }
 0x10f   :  { %v584_v55 = vld [vmem:[#allocation5 + $0xda8] sm:$0xff] }
 0x110   :  { %v15671_v61 = vcombine.high %v580_v54, %v584_v55  ;;  %v444_v62 = vld [vmem:[#allocation5 + $0x948] sm:$0xff] }
 0x111   :  { %3446 = vmatpush2.bf16.msra.mxu0 %v15342_v2  ;;  %3487 = vmatpush2.bf16.msra.mxu1 %v15470_v3  ;;  %v448_v63 = vld [vmem:[#allocation5 + $0x968] sm:$0xff]  ;;  %v15542_v2 = vcombine.low %v452_v52, %v456_v53  ;;  %v15670_v3 = vcombine.low %v580_v54, %v584_v55 }
 0x112   :  { %3447 = vmatprep.subr.bf16.mxu0 %v15335_v4  ;;  %3488 = vmatprep.subr.bf16.mxu1 %v15463_v5  ;;  %v572_v0 = vld [vmem:[#allocation5 + $0xd48] sm:$0xff]  ;;  %v15535_v4 = vcombine.high %v444_v62, %v448_v63 }
 0x113   :  { %v576_v1 = vld [vmem:[#allocation5 + $0xd68] sm:$0xff] }
 0x114   :  { %v15663_v5 = vcombine.high %v572_v0, %v576_v1  ;;  %v436_v6 = vld [vmem:[#allocation5 + $0x908] sm:$0xff] }
 0x115   :  { %3448 = vmatpush2.bf16.msra.mxu0 %v15334_v10  ;;  %3489 = vmatpush2.bf16.msra.mxu1 %v15462_v11  ;;  %v440_v7 = vld [vmem:[#allocation5 + $0x928] sm:$0xff]  ;;  %v15534_v10 = vcombine.low %v444_v62, %v448_v63  ;;  %v15662_v11 = vcombine.low %v572_v0, %v576_v1 }
 0x116   :  { %3449 = vmatprep.subr.bf16.mxu0 %v15327_v12  ;;  %3490 = vmatprep.subr.bf16.mxu1 %v15455_v13  ;;  %v564_v8 = vld [vmem:[#allocation5 + $0xd08] sm:$0xff]  ;;  %v15527_v12 = vcombine.high %v436_v6, %v440_v7 }
 0x117   :  { %v568_v9 = vld [vmem:[#allocation5 + $0xd28] sm:$0xff] }
 0x118   :  { %v15655_v13 = vcombine.high %v564_v8, %v568_v9  ;;  %v428_v14 = vld [vmem:[#allocation5 + $0x8c8] sm:$0xff] }
 0x119   :  { %3450 = vmatpush2.bf16.msra.mxu0 %v15326_v19  ;;  %3491 = vmatpush2.bf16.msra.mxu1 %v15454_v21  ;;  %v432_v15 = vld [vmem:[#allocation5 + $0x8e8] sm:$0xff]  ;;  %v15526_v19 = vcombine.low %v436_v6, %v440_v7  ;;  %v15654_v21 = vcombine.low %v564_v8, %v568_v9 }
 0x11a   :  { %3451 = vmatprep.subr.bf16.mxu0 %v15319_v22  ;;  %3492 = vmatprep.subr.bf16.mxu1 %v15447_v23  ;;  %v556_v17 = vld [vmem:[#allocation5 + $0xcc8] sm:$0xff]  ;;  %v15519_v22 = vcombine.high %v428_v14, %v432_v15 }
 0x11b   :  { %v560_v18 = vld [vmem:[#allocation5 + $0xce8] sm:$0xff] }
 0x11c   :  { %v15647_v23 = vcombine.high %v556_v17, %v560_v18  ;;  %v420_v24 = vld [vmem:[#allocation5 + $0x888] sm:$0xff] }
 0x11d   :  { %3452 = vmatpush2.bf16.msra.mxu0 %v15318_v29  ;;  %3493 = vmatpush2.bf16.msra.mxu1 %v15446_v30  ;;  %v424_v25 = vld [vmem:[#allocation5 + $0x8a8] sm:$0xff]  ;;  %v15518_v29 = vcombine.low %v428_v14, %v432_v15  ;;  %v15646_v30 = vcombine.low %v556_v17, %v560_v18 }
 0x11e   :  { %3453 = vmatprep.subr.bf16.mxu0 %v15311_v32  ;;  %3494 = vmatprep.subr.bf16.mxu1 %v15439_v33  ;;  %v548_v26 = vld [vmem:[#allocation5 + $0xc88] sm:$0xff]  ;;  %v15511_v32 = vcombine.high %v420_v24, %v424_v25 }
 0x11f   :  { %v552_v27 = vld [vmem:[#allocation5 + $0xca8] sm:$0xff] }
 0x120   :  { %v15639_v33 = vcombine.high %v548_v26, %v552_v27  ;;  %v412_v34 = vld [vmem:[#allocation5 + $0x848] sm:$0xff] }
 0x121   :  { %3454 = vmatpush2.bf16.msra.mxu0 %v15310_v40  ;;  %3495 = vmatpush2.bf16.msra.mxu1 %v15438_v41  ;;  %v416_v35 = vld [vmem:[#allocation5 + $0x868] sm:$0xff]  ;;  %v15510_v40 = vcombine.low %v420_v24, %v424_v25  ;;  %v15638_v41 = vcombine.low %v548_v26, %v552_v27 }
 0x122   :  { %3455 = vmatprep.subr.bf16.mxu0 %v15303_v42  ;;  %3496 = vmatprep.subr.bf16.mxu1 %v15431_v43  ;;  %v540_v37 = vld [vmem:[#allocation5 + $0xc48] sm:$0xff]  ;;  %v15503_v42 = vcombine.high %v412_v34, %v416_v35 }
 0x123   :  { %v544_v38 = vld [vmem:[#allocation5 + $0xc68] sm:$0xff] }
 0x124   :  { %v15631_v43 = vcombine.high %v540_v37, %v544_v38  ;;  %v404_v44 = vld [vmem:[#allocation5 + $0x808] sm:$0xff] }
 0x125   :  { %3456 = vmatpush2.bf16.msra.mxu0 %v15302_v48  ;;  %3497 = vmatpush2.bf16.msra.mxu1 %v15430_v49  ;;  %v408_v45 = vld [vmem:[#allocation5 + $0x828] sm:$0xff]  ;;  %v15502_v48 = vcombine.low %v412_v34, %v416_v35  ;;  %v15630_v49 = vcombine.low %v540_v37, %v544_v38 }
 0x126   :  { %3507 = vmatprep.subr.bf16.mxu0 %v15551_v50  ;;  %3548 = vmatprep.subr.bf16.mxu1 %v15679_v51  ;;  %v532_v46 = vld [vmem:[#allocation5 + $0xc08] sm:$0xff]  ;;  %v15495_v50 = vcombine.high %v404_v44, %v408_v45 }
 0x127   :  { %v536_v47 = vld [vmem:[#allocation5 + $0xc28] sm:$0xff] }
 0x128   :  { %3458 = vmatmul.mubr.bf16.vlgmr.msra.gmra.mxu0 %v17589_v16  ;;  %3499 = vmatmul.mubr.bf16.vlgmr.msra.gmra.mxu1 %v17591_v20  ;;  %v15623_v51 = vcombine.high %v532_v46, %v536_v47  ;;  %v524_v52 = vld [vmem:[#allocation5 + $0xbc8] sm:$0xff] }
 0x129   :  { %3508 = vmatpush1.bf16.msra.mxu0 %v15550_v56  ;;  %3549 = vmatpush1.bf16.msra.mxu1 %v15678_v57  ;;  %v528_v53 = vld [vmem:[#allocation5 + $0xbe8] sm:$0xff]  ;;  %v15494_v56 = vcombine.low %v404_v44, %v408_v45  ;;  %v15622_v57 = vcombine.low %v532_v46, %v536_v47 }
 0x12a   :  { %3509 = vmatprep.subr.bf16.mxu0 %v15543_v60  ;;  %3550 = vmatprep.subr.bf16.mxu1 %v15671_v61  ;;  %v652_v54 = vld [vmem:[#allocation5 + $0xfc8] sm:$0xff]  ;;  %v15615_v60 = vcombine.high %v524_v52, %v528_v53 }
 0x12b   :  { %3539 = vmatprep.mubr.bf16.mxu0 %v17593_v28  ;;  %3580 = vmatprep.mubr.bf16.mxu1 %v17596_v31  ;;  %v656_v55 = vld [vmem:[#allocation5 + $0xfe8] sm:$0xff] }
 0x12c   :  { %v15743_v61 = vcombine.high %v652_v54, %v656_v55  ;;  %v516_v62 = vld [vmem:[#allocation5 + $0xb88] sm:$0xff] }
 0x12d   :  { %3510 = vmatpush1.bf16.msra.mxu0 %v15542_v2  ;;  %3551 = vmatpush1.bf16.msra.mxu1 %v15670_v3  ;;  %v520_v63 = vld [vmem:[#allocation5 + $0xba8] sm:$0xff]  ;;  %v15614_v2 = vcombine.low %v524_v52, %v528_v53  ;;  %v15742_v3 = vcombine.low %v652_v54, %v656_v55 }
 0x12e   :  { %3511 = vmatprep.subr.bf16.mxu0 %v15535_v4  ;;  %3552 = vmatprep.subr.bf16.mxu1 %v15663_v5  ;;  %v644_v0 = vld [vmem:[#allocation5 + $0xf88] sm:$0xff]  ;;  %v15607_v4 = vcombine.high %v516_v62, %v520_v63 }
 0x12f   :  { %v648_v1 = vld [vmem:[#allocation5 + $0xfa8] sm:$0xff] }
 0x130   :  { %v15735_v5 = vcombine.high %v644_v0, %v648_v1  ;;  %v508_v6 = vld [vmem:[#allocation5 + $0xb48] sm:$0xff] }
 0x131   :  { %3512 = vmatpush1.bf16.msra.mxu0 %v15534_v10  ;;  %3553 = vmatpush1.bf16.msra.mxu1 %v15662_v11  ;;  %v512_v7 = vld [vmem:[#allocation5 + $0xb68] sm:$0xff]  ;;  %v15606_v10 = vcombine.low %v516_v62, %v520_v63  ;;  %v15734_v11 = vcombine.low %v644_v0, %v648_v1  ;;  %v205_v0 = vld [vmem:[#allocation5 + $0x1d0] sm:$0xff] }
 0x132   :  { %3513 = vmatprep.subr.bf16.mxu0 %v15527_v12  ;;  %3554 = vmatprep.subr.bf16.mxu1 %v15655_v13  ;;  %v636_v8 = vld [vmem:[#allocation5 + $0xf48] sm:$0xff]  ;;  %v15599_v12 = vcombine.high %v508_v6, %v512_v7  ;;  %v209_v1 = vld [vmem:[#allocation5 + $0x1f0] sm:$0xff] }
 0x133   :  { %v640_v9 = vld [vmem:[#allocation5 + $0xf68] sm:$0xff] }
 0x134   :  { %v15727_v13 = vcombine.high %v636_v8, %v640_v9  ;;  %v500_v14 = vld [vmem:[#allocation5 + $0xb08] sm:$0xff] }
 0x135   :  { %3514 = vmatpush1.bf16.msra.mxu0 %v15526_v19  ;;  %3555 = vmatpush1.bf16.msra.mxu1 %v15654_v21  ;;  %v504_v15 = vld [vmem:[#allocation5 + $0xb28] sm:$0xff]  ;;  %v15598_v19 = vcombine.low %v508_v6, %v512_v7  ;;  %v15726_v21 = vcombine.low %v636_v8, %v640_v9  ;;  %v17618_v7 = vld [vmem:[#allocation11] sm:$0xff]  ;;  %v15297_v8 = vcombine.high %v205_v0, %v209_v1 }
 0x136   :  { %3515 = vmatprep.subr.bf16.mxu0 %v15519_v22  ;;  %3556 = vmatprep.subr.bf16.mxu1 %v15647_v23  ;;  %v628_v17 = vld [vmem:[#allocation5 + $0xf08] sm:$0xff]  ;;  %v15591_v22 = vcombine.high %v500_v14, %v504_v15 }
 0x137   :  { %v632_v18 = vld [vmem:[#allocation5 + $0xf28] sm:$0xff] }
 0x138   :  { %v15719_v23 = vcombine.high %v628_v17, %v632_v18  ;;  %v492_v24 = vld [vmem:[#allocation5 + $0xac8] sm:$0xff] }
 0x139   :  { %3516 = vmatpush1.bf16.msra.mxu0 %v15518_v29  ;;  %3557 = vmatpush1.bf16.msra.mxu1 %v15646_v30  ;;  %v496_v25 = vld [vmem:[#allocation5 + $0xae8] sm:$0xff]  ;;  %v15590_v29 = vcombine.low %v500_v14, %v504_v15  ;;  %v15718_v30 = vcombine.low %v628_v17, %v632_v18  ;;  %v329_v14 = vld [vmem:[#allocation5 + $0x5b0] sm:$0xff]  ;;  %v15296_v17 = vcombine.low %v205_v0, %v209_v1 }
 0x13a   :  { %3517 = vmatprep.subr.bf16.mxu0 %v15511_v32  ;;  %3558 = vmatprep.subr.bf16.mxu1 %v15639_v33  ;;  %v620_v26 = vld [vmem:[#allocation5 + $0xec8] sm:$0xff]  ;;  %v15583_v32 = vcombine.high %v492_v24, %v496_v25 }
 0x13b   :  { %v624_v27 = vld [vmem:[#allocation5 + $0xee8] sm:$0xff] }
 0x13c   :  { %v15711_v33 = vcombine.high %v620_v26, %v624_v27  ;;  %v484_v34 = vld [vmem:[#allocation5 + $0xa88] sm:$0xff] }
 0x13d   :  { %3518 = vmatpush1.bf16.msra.mxu0 %v15510_v40  ;;  %3559 = vmatpush1.bf16.msra.mxu1 %v15638_v41  ;;  %v488_v35 = vld [vmem:[#allocation5 + $0xaa8] sm:$0xff]  ;;  %v15582_v40 = vcombine.low %v492_v24, %v496_v25  ;;  %v15710_v41 = vcombine.low %v620_v26, %v624_v27  ;;  %v193_v24 = vld [vmem:[#allocation5 + $0x170] sm:$0xff] }
 0x13e   :  { %3519 = vmatprep.subr.bf16.mxu0 %v15503_v42  ;;  %3560 = vmatprep.subr.bf16.mxu1 %v15631_v43  ;;  %v612_v37 = vld [vmem:[#allocation5 + $0xe88] sm:$0xff]  ;;  %v15575_v42 = vcombine.high %v484_v34, %v488_v35  ;;  %v317_v26 = vld [vmem:[#allocation5 + $0x550] sm:$0xff] }
 0x13f   :  { %v616_v38 = vld [vmem:[#allocation5 + $0xea8] sm:$0xff]  ;;  %v321_v27 = vld [vmem:[#allocation5 + $0x570] sm:$0xff] }
 0x140   :  { %v15703_v43 = vcombine.high %v612_v37, %v616_v38  ;;  %v476_v44 = vld [vmem:[#allocation5 + $0xa48] sm:$0xff] }
 0x141   :  { %3520 = vmatpush1.bf16.msra.mxu0 %v15502_v48  ;;  %3561 = vmatpush1.bf16.msra.mxu1 %v15630_v49  ;;  %v480_v45 = vld [vmem:[#allocation5 + $0xa68] sm:$0xff]  ;;  %v15574_v48 = vcombine.low %v484_v34, %v488_v35  ;;  %v661_v49 = vlaneseq }
 0x142   :  { %3521 = vmatprep.subr.bf16.mxu0 %v15495_v50  ;;  %3562 = vmatprep.subr.bf16.mxu1 %v15623_v51  ;;  %v604_v46 = vld [vmem:[#allocation5 + $0xe48] sm:$0xff]  ;;  %v15702_v50 = vcombine.low %v612_v37, %v616_v38  ;;  %v15567_v51 = vcombine.high %v476_v44, %v480_v45 }
 0x143   :  { %v608_v47 = vld [vmem:[#allocation5 + $0xe68] sm:$0xff] }
 0x144   :  { %v15695_v52 = vcombine.high %v604_v46, %v608_v47  ;;  %v468_v53 = vld [vmem:[#allocation5 + $0xa08] sm:$0xff] }
 0x145   :  { %3522 = vmatpush1.bf16.msra.mxu0 %v15494_v56  ;;  %3563 = vmatpush1.bf16.msra.mxu1 %v15622_v57  ;;  %v472_v54 = vld [vmem:[#allocation5 + $0xa28] sm:$0xff]  ;;  %v15566_v57 = vcombine.low %v476_v44, %v480_v45  ;;  %v309_v45 = vld [vmem:[#allocation5 + $0x510] sm:$0xff] }
 0x146   :  { %3523 = vmatprep.subr.bf16.mxu0 %v15615_v60  ;;  %3564 = vmatprep.subr.bf16.mxu1 %v15743_v61  ;;  %v596_v55 = vld [vmem:[#allocation5 + $0xe08] sm:$0xff]  ;;  %v17613_v60 = vshrl.u32 %v661_v49, 7  ;;  %v15694_v61 = vcombine.low %v604_v46, %v608_v47  ;;  %v15559_v62 = vcombine.high %v468_v53, %v472_v54  ;;  %v313_v46 = vld [vmem:[#allocation5 + $0x530] sm:$0xff] }
 0x147   :  { %v600_v56 = vld [vmem:[#allocation5 + $0xe28] sm:$0xff] }
 0x148   :  { %v15687_v63 = vcombine.high %v596_v55, %v600_v56  ;;  %v15686_v6 = vcombine.low %v596_v55, %v600_v56  ;;  %v173_v55 = vld [vmem:[#allocation5 + $0xd0] sm:$0xff] }
 0x149   :  { %3524 = vmatpush2.bf16.msra.mxu0 %v15614_v2  ;;  %3565 = vmatpush2.bf16.msra.mxu1 %v15742_v3  ;;  %v333_v2 = vld [vmem:[#allocation5 + $0x5d0] sm:$0xff] }
 0x14a   :  { %3525 = vmatprep.subr.bf16.mxu0 %v15607_v4  ;;  %3566 = vmatprep.subr.bf16.mxu1 %v15735_v5  ;;  %v337_v3 = vld [vmem:[#allocation5 + $0x5f0] sm:$0xff]  ;;  %v15558_v4 = vcombine.low %v468_v53, %v472_v54  ;;  %v17616_v5 = vsub.s32 0, %v17613_v60  ;;  %v15401_v54 = vcombine.high %v309_v45, %v313_v46 }
 0x14b   :  { %v15425_v9 = vcombine.high %v333_v2, %v337_v3  ;;  %v15424_v18 = vcombine.low %v333_v2, %v337_v3  ;;  %v177_v56 = vld [vmem:[#allocation5 + $0xf0] sm:$0xff] }
 0x14c   :  { %v664_v15 = vrot.slane %v17618_v7, %v17616_v5  ;;  %v15265_v0 = vcombine.high %v173_v55, %v177_v56  ;;  %v165_v2 = vld [vmem:[#allocation5 + $0x90] sm:$0xff] }
 0x14d   :  { %3526 = vmatpush2.bf16.msra.mxu0 %v15606_v10  ;;  %3567 = vmatpush2.bf16.msra.mxu1 %v15734_v11  ;;  %v17621_v10 = vsub.s32 1, %v17613_v60  ;;  %v197_v11 = vld [vmem:[#allocation5 + $0x190] sm:$0xff] }
 0x14e   :  { %3527 = vmatprep.subr.bf16.mxu0 %v15599_v12  ;;  %3568 = vmatprep.subr.bf16.mxu1 %v15727_v13  ;;  %v201_v12 = vld [vmem:[#allocation5 + $0x1b0] sm:$0xff] }
 0x14f   :  { %v325_v13 = vld [vmem:[#allocation5 + $0x590] sm:$0xff] }
 0x150   :  { %v15416_v34 = vcombine.low %v325_v13, %v329_v14  ;;  %v169_v3 = vld [vmem:[#allocation5 + $0xb0] sm:$0xff] }
 0x151   :  { %3528 = vmatpush2.bf16.msra.mxu0 %v15598_v19  ;;  %3569 = vmatpush2.bf16.msra.mxu1 %v15726_v21  ;;  %v15289_v19 = vcombine.high %v197_v11, %v201_v12  ;;  %v668_v21 = vrot.slane %v17618_v7, %v17621_v10 }
 0x152   :  { %3529 = vmatprep.subr.bf16.mxu0 %v15591_v22  ;;  %3570 = vmatprep.subr.bf16.mxu1 %v15719_v23  ;;  %v15417_v22 = vcombine.high %v325_v13, %v329_v14  ;;  %v189_v23 = vld [vmem:[#allocation5 + $0x150] sm:$0xff] }
 0x153   :  { %v15281_v35 = vcombine.high %v189_v23, %v193_v24  ;;  %v15280_v49 = vcombine.low %v189_v23, %v193_v24  ;;  %v157_v13 = vld [vmem:[#allocation5 + $0x50] sm:$0xff] }
 0x154   :  { %v161_v14 = vld [vmem:[#allocation5 + $0x70] sm:$0xff] }
 0x155   :  { %3530 = vmatpush2.bf16.msra.mxu0 %v15590_v29  ;;  %3571 = vmatpush2.bf16.msra.mxu1 %v15718_v30  ;;  %v149_v23 = vld [vmem:[#allocation5 + $0x10] sm:$0xff] }
 0x156   :  { %3531 = vmatprep.subr.bf16.mxu0 %v15583_v32  ;;  %3572 = vmatprep.subr.bf16.mxu1 %v15711_v33  ;;  %v15288_v32 = vcombine.low %v197_v11, %v201_v12  ;;  %v15257_v11 = vcombine.high %v165_v2, %v169_v3  ;;  %v153_v24 = vld [vmem:[#allocation5 + $0x30] sm:$0xff] }
 0x159   :  { %3532 = vmatpush2.bf16.msra.mxu0 %v15582_v40  ;;  %3573 = vmatpush2.bf16.msra.mxu1 %v15710_v41  ;;  %v15409_v41 = vcombine.high %v317_v26, %v321_v27 }
 0x15a   :  { %3533 = vmatprep.subr.bf16.mxu0 %v15575_v42  ;;  %3574 = vmatprep.subr.bf16.mxu1 %v15703_v43  ;;  %v181_v42 = vld [vmem:[#allocation5 + $0x110] sm:$0xff] }
 0x15b   :  { %v185_v43 = vld [vmem:[#allocation5 + $0x130] sm:$0xff] }
 0x15d   :  { %3534 = vmatpush2.bf16.msra.mxu0 %v15574_v48  ;;  %3575 = vmatpush2.bf16.msra.mxu1 %v15702_v50 }
 0x15e   :  { %3535 = vmatprep.subr.bf16.mxu0 %v15567_v51  ;;  %3576 = vmatprep.subr.bf16.mxu1 %v15695_v52  ;;  %v15408_v51 = vcombine.low %v317_v26, %v321_v27  ;;  %v15273_v52 = vcombine.high %v181_v42, %v185_v43  ;;  %v281_v26 = vld [vmem:[#allocation5 + $0x430] sm:$0xff]  ;;  %v15248_v27 = vcombine.low %v157_v13, %v161_v14 }
 0x161   :  { %3536 = vmatpush2.bf16.msra.mxu0 %v15566_v57  ;;  %3577 = vmatpush2.bf16.msra.mxu1 %v15694_v61  ;;  %v301_v57 = vld [vmem:[#allocation5 + $0x4d0] sm:$0xff] }
 0x162   :  { %3537 = vmatprep.subr.bf16.mxu0 %v15559_v62  ;;  %3578 = vmatprep.subr.bf16.mxu1 %v15687_v63  ;;  %v305_v61 = vld [vmem:[#allocation5 + $0x4f0] sm:$0xff]  ;;  %v15272_v62 = vcombine.low %v181_v42, %v185_v43  ;;  %v15400_v63 = vcombine.low %v309_v45, %v313_v46 }
 0x163   :  { %v15393_v1 = vcombine.high %v301_v57, %v305_v61  ;;  %v265_v45 = vld [vmem:[#allocation5 + $0x3b0] sm:$0xff] }
 0x164   :  { %v389_v46 = vld [vmem:[#allocation5 + $0x790] sm:$0xff] }
 0x165   :  { %3538 = vmatpush2.bf16.msra.mxu0 %v15558_v4  ;;  %3579 = vmatpush2.bf16.msra.mxu1 %v15686_v6  ;;  %v293_v4 = vld [vmem:[#allocation5 + $0x490] sm:$0xff] }
 0x166   :  { %3589 = vmatprep.subr.bf16.mxu0 %v15297_v8  ;;  %3630 = vmatprep.subr.bf16.mxu1 %v15425_v9  ;;  %v297_v6 = vld [vmem:[#allocation5 + $0x4b0] sm:$0xff]  ;;  %v15264_v8 = vcombine.low %v173_v55, %v177_v56  ;;  %v15392_v9 = vcombine.low %v301_v57, %v305_v61 }
 0x167   :  { %v3336_v30 = vpop.f32.mrf.mxu1  ;;  %v15385_v12 = vcombine.high %v293_v4, %v297_v6  ;;  %v381_v55 = vld [vmem:[#allocation5 + $0x750] sm:$0xff] }
 0x168   :  { %v3295_v25 = vpop.f32.mrf.mxu0  ;;  %3540 = vmatmul.mubr.bf16.vlgmr.msra.gmra.mxu0 %v17601_v36  ;;  %3581 = vmatmul.mubr.bf16.vlgmr.msra.gmra.mxu1 %v17603_v39  ;;  %v385_v56 = vld [vmem:[#allocation5 + $0x770] sm:$0xff] }
 0x169   :  { %v3296_v29 = vadd.f32 %v3295_v25, %v664_v15  ;;  %3590 = vmatpush1.bf16.msra.mxu0 %v15296_v17  ;;  %3631 = vmatpush1.bf16.msra.mxu1 %v15424_v18  ;;  %v3338_v40 = vpop.f32.mrf.mxu1  ;;  %v285_v15 = vld [vmem:[#allocation5 + $0x450] sm:$0xff]  ;;  %v15256_v18 = vcombine.low %v165_v2, %v169_v3 }
 0x16a   :  { %v3297_v33 = vpop.f32.mrf.mxu0  ;;  %3591 = vmatprep.subr.bf16.mxu0 %v15289_v19  ;;  %3632 = vmatprep.subr.bf16.mxu1 %v15417_v22  ;;  %v289_v17 = vld [vmem:[#allocation5 + $0x470] sm:$0xff]  ;;  %v15384_v19 = vcombine.low %v293_v4, %v297_v6  ;;  %v15472_v6 = vcombine.low %v381_v55, %v385_v56 }
 0x16b   :  { %v17629_v37 = vadd.f32 %v3336_v30, %v3296_v29  ;;  %v3298_v38 = vadd.f32 %v3297_v33, %v668_v21  ;;  %3621 = vmatprep.mubr.bf16.mxu0 %v17583_v58  ;;  %3662 = vmatprep.mubr.bf16.mxu1 %v17585_v59  ;;  %v3340_v48 = vpop.f32.mrf.mxu1  ;;  %v15249_v21 = vcombine.high %v157_v13, %v161_v14  ;;  %v277_v25 = vld [vmem:[#allocation5 + $0x410] sm:$0xff] }
 0x16c   :  { %v3299_v44 = vpop.f32.mrf.mxu0  ;;  %v15377_v22 = vcombine.high %v285_v15, %v289_v17  ;;  %v15376_v29 = vcombine.low %v285_v15, %v289_v17  ;;  %v15241_v30 = vcombine.high %v149_v23, %v153_v24  ;;  %v269_v33 = vld [vmem:[#allocation5 + $0x3d0] sm:$0xff] }
 0x16d   :  { %v17633_v47 = vadd.f32 %v3338_v40, %v3298_v38  ;;  %3592 = vmatpush1.bf16.msra.mxu0 %v15288_v32  ;;  %3633 = vmatpush1.bf16.msra.mxu1 %v15416_v34  ;;  %v3341_v53 = vpop.f32.mrf.mxu1  ;;  %v15369_v32 = vcombine.high %v277_v25, %v281_v26  ;;  %v273_v34 = vld [vmem:[#allocation5 + $0x3f0] sm:$0xff]  ;;  %v15240_v40 = vcombine.low %v149_v23, %v153_v24 }
 0x16e   :  { %v3300_v50 = vpop.f32.mrf.mxu0  ;;  %3593 = vmatprep.subr.bf16.mxu0 %v15281_v35  ;;  %3634 = vmatprep.subr.bf16.mxu1 %v15409_v41  ;;  %v397_v35 = vld [vmem:[#allocation5 + $0x7d0] sm:$0xff]  ;;  %v15368_v41 = vcombine.low %v277_v25, %v281_v26  ;;  %v15361_v42 = vcombine.high %v269_v33, %v273_v34 }
 0x16f   :  { %v401_v38 = vld [vmem:[#allocation5 + $0x7f0] sm:$0xff] }
 0x170   :  { %v15489_v43 = vcombine.high %v397_v35, %v401_v38  ;;  %v261_v44 = vld [vmem:[#allocation5 + $0x390] sm:$0xff]  ;;  %v15488_v50 = vcombine.low %v397_v35, %v401_v38 }
 0x171   :  { %3594 = vmatpush1.bf16.msra.mxu0 %v15280_v49  ;;  %3635 = vmatpush1.bf16.msra.mxu1 %v15408_v51  ;;  %v393_v48 = vld [vmem:[#allocation5 + $0x7b0] sm:$0xff]  ;;  %v15360_v49 = vcombine.low %v269_v33, %v273_v34  ;;  %v15353_v51 = vcombine.high %v261_v44, %v265_v45  ;;  %v15352_v57 = vcombine.low %v261_v44, %v265_v45 }
 0x172   :  { %3595 = vmatprep.subr.bf16.mxu0 %v15273_v52  ;;  %3636 = vmatprep.subr.bf16.mxu1 %v15401_v54  ;;  %v15481_v52 = vcombine.high %v389_v46, %v393_v48  ;;  %v253_v53 = vld [vmem:[#allocation5 + $0x350] sm:$0xff]  ;;  %v15480_v61 = vcombine.low %v389_v46, %v393_v48 }
 0x173   :  { %v257_v54 = vld [vmem:[#allocation5 + $0x370] sm:$0xff] }
 0x174   :  { %v373_v2 = vld [vmem:[#allocation5 + $0x710] sm:$0xff]  ;;  %v15344_v4 = vcombine.low %v253_v53, %v257_v54 }
 0x175   :  { %3596 = vmatpush1.bf16.msra.mxu0 %v15272_v62  ;;  %3637 = vmatpush1.bf16.msra.mxu1 %v15400_v63  ;;  %v15345_v62 = vcombine.high %v253_v53, %v257_v54  ;;  %v15473_v63 = vcombine.high %v381_v55, %v385_v56  ;;  %v377_v3 = vld [vmem:[#allocation5 + $0x730] sm:$0xff] }
 0x176   :  { %3597 = vmatprep.subr.bf16.mxu0 %v15265_v0  ;;  %3638 = vmatprep.subr.bf16.mxu1 %v15393_v1  ;;  %v245_v0 = vld [vmem:[#allocation5 + $0x310] sm:$0xff]  ;;  %v15464_v17 = vcombine.low %v373_v2, %v377_v3 }
 0x177   :  { %v249_v1 = vld [vmem:[#allocation5 + $0x330] sm:$0xff] }
 0x178   :  { %v365_v13 = vld [vmem:[#allocation5 + $0x6d0] sm:$0xff]  ;;  %v15336_v15 = vcombine.low %v245_v0, %v249_v1 }
 0x179   :  { %3598 = vmatpush1.bf16.msra.mxu0 %v15264_v8  ;;  %3639 = vmatpush1.bf16.msra.mxu1 %v15392_v9  ;;  %v15337_v8 = vcombine.high %v245_v0, %v249_v1  ;;  %v15465_v9 = vcombine.high %v373_v2, %v377_v3  ;;  %v369_v14 = vld [vmem:[#allocation5 + $0x6f0] sm:$0xff] }
 0x17a   :  { %3599 = vmatprep.subr.bf16.mxu0 %v15257_v11  ;;  %3640 = vmatprep.subr.bf16.mxu1 %v15385_v12  ;;  %v237_v11 = vld [vmem:[#allocation5 + $0x2d0] sm:$0xff]  ;;  %v15456_v26 = vcombine.low %v365_v13, %v369_v14 }
 0x17b   :  { %v241_v12 = vld [vmem:[#allocation5 + $0x2f0] sm:$0xff] }
 0x17c   :  { %v357_v23 = vld [vmem:[#allocation5 + $0x690] sm:$0xff]  ;;  %v15328_v25 = vcombine.low %v237_v11, %v241_v12 }
 0x17d   :  { %3600 = vmatpush1.bf16.msra.mxu0 %v15256_v18  ;;  %3641 = vmatpush1.bf16.msra.mxu1 %v15384_v19  ;;  %v15329_v18 = vcombine.high %v237_v11, %v241_v12  ;;  %v15457_v19 = vcombine.high %v365_v13, %v369_v14  ;;  %v361_v24 = vld [vmem:[#allocation5 + $0x6b0] sm:$0xff] }
 0x17e   :  { %3601 = vmatprep.subr.bf16.mxu0 %v15249_v21  ;;  %3642 = vmatprep.subr.bf16.mxu1 %v15377_v22  ;;  %v229_v21 = vld [vmem:[#allocation5 + $0x290] sm:$0xff]  ;;  %v15448_v38 = vcombine.low %v357_v23, %v361_v24 }
 0x17f   :  { %v233_v22 = vld [vmem:[#allocation5 + $0x2b0] sm:$0xff] }
 0x180   :  { %v349_v33 = vld [vmem:[#allocation5 + $0x650] sm:$0xff]  ;;  %v15320_v35 = vcombine.low %v229_v21, %v233_v22 }
 0x181   :  { %3602 = vmatpush1.bf16.msra.mxu0 %v15248_v27  ;;  %3643 = vmatpush1.bf16.msra.mxu1 %v15376_v29  ;;  %v15321_v27 = vcombine.high %v229_v21, %v233_v22  ;;  %v15449_v29 = vcombine.high %v357_v23, %v361_v24  ;;  %v353_v34 = vld [vmem:[#allocation5 + $0x670] sm:$0xff] }
 0x182   :  { %3603 = vmatprep.subr.bf16.mxu0 %v15241_v30  ;;  %3644 = vmatprep.subr.bf16.mxu1 %v15369_v32  ;;  %v221_v30 = vld [vmem:[#allocation5 + $0x250] sm:$0xff]  ;;  %v15440_v48 = vcombine.low %v349_v33, %v353_v34 }
 0x183   :  { %v225_v32 = vld [vmem:[#allocation5 + $0x270] sm:$0xff] }
 0x184   :  { %v341_v44 = vld [vmem:[#allocation5 + $0x610] sm:$0xff]  ;;  %v15312_v46 = vcombine.low %v221_v30, %v225_v32 }
 0x185   :  { %3604 = vmatpush1.bf16.msra.mxu0 %v15240_v40  ;;  %3645 = vmatpush1.bf16.msra.mxu1 %v15368_v41  ;;  %v15313_v40 = vcombine.high %v221_v30, %v225_v32  ;;  %v15441_v41 = vcombine.high %v349_v33, %v353_v34  ;;  %v345_v45 = vld [vmem:[#allocation5 + $0x630] sm:$0xff] }
 0x186   :  { %3605 = vmatprep.subr.bf16.mxu0 %v15361_v42  ;;  %3646 = vmatprep.subr.bf16.mxu1 %v15489_v43  ;;  %v213_v42 = vld [vmem:[#allocation5 + $0x210] sm:$0xff]  ;;  %v15432_v56 = vcombine.low %v341_v44, %v345_v45 }
 0x187   :  { %v217_v43 = vld [vmem:[#allocation5 + $0x230] sm:$0xff] }
 0x188   :  { %v589_v53 = vld [vmem:[#allocation5 + $0xdd0] sm:$0xff]  ;;  %v15304_v55 = vcombine.low %v213_v42, %v217_v43 }
 0x189   :  { %3606 = vmatpush2.bf16.msra.mxu0 %v15360_v49  ;;  %3647 = vmatpush2.bf16.msra.mxu1 %v15488_v50  ;;  %v15305_v49 = vcombine.high %v213_v42, %v217_v43  ;;  %v15433_v50 = vcombine.high %v341_v44, %v345_v45  ;;  %v593_v54 = vld [vmem:[#allocation5 + $0xdf0] sm:$0xff] }
 0x18a   :  { %3607 = vmatprep.subr.bf16.mxu0 %v15353_v51  ;;  %3648 = vmatprep.subr.bf16.mxu1 %v15481_v52  ;;  %v461_v51 = vld [vmem:[#allocation5 + $0x9d0] sm:$0xff]  ;;  %v15680_v3 = vcombine.low %v589_v53, %v593_v54 }
 0x18b   :  { %v465_v52 = vld [vmem:[#allocation5 + $0x9f0] sm:$0xff] }
 0x18c   :  { %v581_v0 = vld [vmem:[#allocation5 + $0xd90] sm:$0xff]  ;;  %v15552_v2 = vcombine.low %v461_v51, %v465_v52 }
 0x18d   :  { %3608 = vmatpush2.bf16.msra.mxu0 %v15352_v57  ;;  %3649 = vmatpush2.bf16.msra.mxu1 %v15480_v61  ;;  %v15553_v57 = vcombine.high %v461_v51, %v465_v52  ;;  %v15681_v61 = vcombine.high %v589_v53, %v593_v54  ;;  %v585_v1 = vld [vmem:[#allocation5 + $0xdb0] sm:$0xff] }
 0x18e   :  { %3609 = vmatprep.subr.bf16.mxu0 %v15345_v62  ;;  %3650 = vmatprep.subr.bf16.mxu1 %v15473_v63  ;;  %v453_v62 = vld [vmem:[#allocation5 + $0x990] sm:$0xff] }
 0x18f   :  { %v457_v63 = vld [vmem:[#allocation5 + $0x9b0] sm:$0xff] }
 0x190   :  { %v573_v12 = vld [vmem:[#allocation5 + $0xd50] sm:$0xff] }
 0x191   :  { %3610 = vmatpush2.bf16.msra.mxu0 %v15344_v4  ;;  %3651 = vmatpush2.bf16.msra.mxu1 %v15472_v6  ;;  %v15545_v4 = vcombine.high %v453_v62, %v457_v63  ;;  %v15673_v6 = vcombine.high %v581_v0, %v585_v1  ;;  %v577_v13 = vld [vmem:[#allocation5 + $0xd70] sm:$0xff] }
 0x192   :  { %3611 = vmatprep.subr.bf16.mxu0 %v15337_v8  ;;  %3652 = vmatprep.subr.bf16.mxu1 %v15465_v9  ;;  %v445_v8 = vld [vmem:[#allocation5 + $0x950] sm:$0xff] }
 0x193   :  { %v449_v9 = vld [vmem:[#allocation5 + $0x970] sm:$0xff] }
 0x194   :  { %v15537_v21 = vcombine.high %v445_v8, %v449_v9  ;;  %v569_v30 = vld [vmem:[#allocation5 + $0xd30] sm:$0xff]  ;;  %v15536_v34 = vcombine.low %v445_v8, %v449_v9 }
 0x195   :  { %3612 = vmatpush2.bf16.msra.mxu0 %v15336_v15  ;;  %3653 = vmatpush2.bf16.msra.mxu1 %v15464_v17  ;;  %v15544_v17 = vcombine.low %v453_v62, %v457_v63  ;;  %v429_v42 = vld [vmem:[#allocation5 + $0x8d0] sm:$0xff] }
 0x196   :  { %3613 = vmatprep.subr.bf16.mxu0 %v15329_v18  ;;  %3654 = vmatprep.subr.bf16.mxu1 %v15457_v19  ;;  %v15672_v19 = vcombine.low %v581_v0, %v585_v1  ;;  %v433_v43 = vld [vmem:[#allocation5 + $0x8f0] sm:$0xff] }
 0x197   :  { %v557_v44 = vld [vmem:[#allocation5 + $0xcd0] sm:$0xff] }
 0x198   :  { %v561_v45 = vld [vmem:[#allocation5 + $0xcf0] sm:$0xff] }
 0x199   :  { %3614 = vmatpush2.bf16.msra.mxu0 %v15328_v25  ;;  %3655 = vmatpush2.bf16.msra.mxu1 %v15456_v26  ;;  %v15665_v25 = vcombine.high %v573_v12, %v577_v13  ;;  %v437_v26 = vld [vmem:[#allocation5 + $0x910] sm:$0xff] }
 0x19a   :  { %3615 = vmatprep.subr.bf16.mxu0 %v15321_v27  ;;  %3656 = vmatprep.subr.bf16.mxu1 %v15449_v29  ;;  %v441_v27 = vld [vmem:[#allocation5 + $0x930] sm:$0xff] }
 0x19b   :  { %v565_v29 = vld [vmem:[#allocation5 + $0xd10] sm:$0xff] }
 0x19c   :  { %v421_v51 = vld [vmem:[#allocation5 + $0x890] sm:$0xff] }
 0x19d   :  { %3616 = vmatpush2.bf16.msra.mxu0 %v15320_v35  ;;  %3657 = vmatpush2.bf16.msra.mxu1 %v15448_v38  ;;  %v15529_v38 = vcombine.high %v437_v26, %v441_v27  ;;  %v425_v52 = vld [vmem:[#allocation5 + $0x8b0] sm:$0xff] }
 0x19e   :  { %3617 = vmatprep.subr.bf16.mxu0 %v15313_v40  ;;  %3658 = vmatprep.subr.bf16.mxu1 %v15441_v41  ;;  %v15657_v41 = vcombine.high %v565_v29, %v569_v30  ;;  %v549_v53 = vld [vmem:[#allocation5 + $0xc90] sm:$0xff] }
 0x19f   :  { %v553_v54 = vld [vmem:[#allocation5 + $0xcb0] sm:$0xff] }
 0x1a0   :  { %v413_v62 = vld [vmem:[#allocation5 + $0x850] sm:$0xff] }
 0x1a1   :  { %3618 = vmatpush2.bf16.msra.mxu0 %v15312_v46  ;;  %3659 = vmatpush2.bf16.msra.mxu1 %v15440_v48  ;;  %v15528_v46 = vcombine.low %v437_v26, %v441_v27  ;;  %v15656_v48 = vcombine.low %v565_v29, %v569_v30  ;;  %v417_v63 = vld [vmem:[#allocation5 + $0x870] sm:$0xff] }
 0x1a2   :  { %3619 = vmatprep.subr.bf16.mxu0 %v15305_v49  ;;  %3660 = vmatprep.subr.bf16.mxu1 %v15433_v50  ;;  %v15521_v49 = vcombine.high %v429_v42, %v433_v43  ;;  %v15649_v50 = vcombine.high %v557_v44, %v561_v45  ;;  %v541_v0 = vld [vmem:[#allocation5 + $0xc50] sm:$0xff] }
 0x1a3   :  { %v545_v1 = vld [vmem:[#allocation5 + $0xc70] sm:$0xff] }
 0x1a4   :  { %v405_v8 = vld [vmem:[#allocation5 + $0x810] sm:$0xff] }
 0x1a5   :  { %3620 = vmatpush2.bf16.msra.mxu0 %v15304_v55  ;;  %3661 = vmatpush2.bf16.msra.mxu1 %v15432_v56  ;;  %v15520_v55 = vcombine.low %v429_v42, %v433_v43  ;;  %v15648_v56 = vcombine.low %v557_v44, %v561_v45  ;;  %v409_v9 = vld [vmem:[#allocation5 + $0x830] sm:$0xff] }
 0x1a6   :  { %3671 = vmatprep.subr.bf16.mxu0 %v15553_v57  ;;  %3712 = vmatprep.subr.bf16.mxu1 %v15681_v61  ;;  %v15513_v57 = vcombine.high %v421_v51, %v425_v52  ;;  %v15641_v61 = vcombine.high %v549_v53, %v553_v54  ;;  %v521_v29 = vld [vmem:[#allocation5 + $0xbb0] sm:$0xff] }
 0x1a7   :  { %v645_v30 = vld [vmem:[#allocation5 + $0xf90] sm:$0xff] }
 0x1a8   :  { %v3377_v11 = vpop.f32.mrf.mxu0  ;;  %3622 = vmatmul.mubr.bf16.vlgmr.msra.gmra.mxu0 %v17589_v16  ;;  %v3418_v15 = vpop.f32.mrf.mxu1  ;;  %3663 = vmatmul.mubr.bf16.vlgmr.msra.gmra.mxu1 %v17591_v20  ;;  %v637_v42 = vld [vmem:[#allocation5 + $0xf50] sm:$0xff] }
 0x1a9   :  { %v3378_v14 = vadd.f32 %v3377_v11, %v17629_v37  ;;  %3672 = vmatpush1.bf16.msra.mxu0 %v15552_v2  ;;  %3713 = vmatpush1.bf16.msra.mxu1 %v15680_v3  ;;  %v15512_v2 = vcombine.low %v421_v51, %v425_v52  ;;  %v15640_v3 = vcombine.low %v549_v53, %v553_v54  ;;  %v533_v11 = vld [vmem:[#allocation5 + $0xc10] sm:$0xff] }
 0x1aa   :  { %v3379_v18 = vpop.f32.mrf.mxu0  ;;  %3673 = vmatprep.subr.bf16.mxu0 %v15545_v4  ;;  %v3420_v24 = vpop.f32.mrf.mxu1  ;;  %3714 = vmatprep.subr.bf16.mxu1 %v15673_v6  ;;  %v15505_v4 = vcombine.high %v413_v62, %v417_v63  ;;  %v15633_v6 = vcombine.high %v541_v0, %v545_v1  ;;  %v641_v43 = vld [vmem:[#allocation5 + $0xf70] sm:$0xff] }
 0x1ab   :  { %v17638_v22 = vadd.f32 %v3418_v15, %v3378_v14  ;;  %v3380_v23 = vadd.f32 %v3379_v18, %v17633_v47  ;;  %3703 = vmatprep.mubr.bf16.mxu0 %v17593_v28  ;;  %3744 = vmatprep.mubr.bf16.mxu1 %v17596_v31  ;;  %v15664_v47 = vcombine.low %v573_v12, %v577_v13  ;;  %v537_v12 = vld [vmem:[#allocation5 + $0xc30] sm:$0xff] }
 0x1ac   :  { %v3381_v37 = vpop.f32.mrf.mxu0  ;;  %v3422_v33 = vpop.f32.mrf.mxu1  ;;  %v15504_v13 = vcombine.low %v413_v62, %v417_v63  ;;  %v15632_v14 = vcombine.low %v541_v0, %v545_v1  ;;  %v15497_v15 = vcombine.high %v405_v8, %v409_v9  ;;  %v525_v18 = vld [vmem:[#allocation5 + $0xbd0] sm:$0xff]  ;;  %v15728_v54 = vcombine.low %v637_v42, %v641_v43 }
 0x1ad   :  { %v17643_v32 = vadd.f32 %v3420_v24, %v3380_v23  ;;  %3674 = vmatpush1.bf16.msra.mxu0 %v15544_v17  ;;  %3715 = vmatpush1.bf16.msra.mxu1 %v15672_v19  ;;  %v15625_v17 = vcombine.high %v533_v11, %v537_v12  ;;  %v529_v19 = vld [vmem:[#allocation5 + $0xbf0] sm:$0xff]  ;;  %v15496_v24 = vcombine.low %v405_v8, %v409_v9 }
 0x1ae   :  { %v3382_v35 = vpop.f32.mrf.mxu0  ;;  %3675 = vmatprep.subr.bf16.mxu0 %v15537_v21  ;;  %v3423_v40 = vpop.f32.mrf.mxu1  ;;  %3716 = vmatprep.subr.bf16.mxu1 %v15665_v25  ;;  %v653_v21 = vld [vmem:[#allocation5 + $0xfd0] sm:$0xff]  ;;  %v15624_v25 = vcombine.low %v533_v11, %v537_v12  ;;  %v15617_v26 = vcombine.high %v525_v18, %v529_v19 }
 0x1af   :  { %v657_v23 = vld [vmem:[#allocation5 + $0xff0] sm:$0xff] }
 0x1b0   :  { %v15745_v27 = vcombine.high %v653_v21, %v657_v23  ;;  %v517_v37 = vld [vmem:[#allocation5 + $0xb90] sm:$0xff]  ;;  %v15744_v35 = vcombine.low %v653_v21, %v657_v23 }
 0x1b1   :  { %3676 = vmatpush1.bf16.msra.mxu0 %v15536_v34  ;;  %3717 = vmatpush1.bf16.msra.mxu1 %v15664_v47  ;;  %v649_v33 = vld [vmem:[#allocation5 + $0xfb0] sm:$0xff]  ;;  %v15616_v34 = vcombine.low %v525_v18, %v529_v19  ;;  %v15609_v47 = vcombine.high %v517_v37, %v521_v29  ;;  %v15608_v44 = vcombine.low %v517_v37, %v521_v29 }
 0x1b2   :  { %3677 = vmatprep.subr.bf16.mxu0 %v15529_v38  ;;  %3718 = vmatprep.subr.bf16.mxu1 %v15657_v41  ;;  %v15737_v38 = vcombine.high %v645_v30, %v649_v33  ;;  %v509_v40 = vld [vmem:[#allocation5 + $0xb50] sm:$0xff]  ;;  %v15736_v45 = vcombine.low %v645_v30, %v649_v33 }
 0x1b3   :  { %v513_v41 = vld [vmem:[#allocation5 + $0xb70] sm:$0xff] }
 0x1b4   :  { %v629_v51 = vld [vmem:[#allocation5 + $0xf10] sm:$0xff]  ;;  %v15600_v53 = vcombine.low %v509_v40, %v513_v41 }
 0x1b5   :  { %3678 = vmatpush1.bf16.msra.mxu0 %v15528_v46  ;;  %3719 = vmatpush1.bf16.msra.mxu1 %v15656_v48  ;;  %v15601_v46 = vcombine.high %v509_v40, %v513_v41  ;;  %v15729_v48 = vcombine.high %v637_v42, %v641_v43  ;;  %v633_v52 = vld [vmem:[#allocation5 + $0xf30] sm:$0xff]  ;;  %v334_v40 = vld [vmem:[#allocation5 + $0x5d8] sm:$0xff]  ;;  %v17646_v43 = vsub.s32 2, %v17613_v60 }
 0x1b6   :  { %3679 = vmatprep.subr.bf16.mxu0 %v15521_v49  ;;  %3720 = vmatprep.subr.bf16.mxu1 %v15649_v50  ;;  %v501_v49 = vld [vmem:[#allocation5 + $0xb10] sm:$0xff]  ;;  %v15720_v1 = vcombine.low %v629_v51, %v633_v52  ;;  %v338_v41 = vld [vmem:[#allocation5 + $0x5f8] sm:$0xff] }
 0x1b7   :  { %v505_v50 = vld [vmem:[#allocation5 + $0xb30] sm:$0xff] }
 0x1b8   :  { %v621_v62 = vld [vmem:[#allocation5 + $0xed0] sm:$0xff]  ;;  %v15592_v0 = vcombine.low %v501_v49, %v505_v50 }
 0x1b9   :  { %3680 = vmatpush1.bf16.msra.mxu0 %v15520_v55  ;;  %3721 = vmatpush1.bf16.msra.mxu1 %v15648_v56  ;;  %v15593_v55 = vcombine.high %v501_v49, %v505_v50  ;;  %v15721_v56 = vcombine.high %v629_v51, %v633_v52  ;;  %v625_v63 = vld [vmem:[#allocation5 + $0xef0] sm:$0xff]  ;;  %v198_v49 = vld [vmem:[#allocation5 + $0x198] sm:$0xff] }
 0x1ba   :  { %3681 = vmatprep.subr.bf16.mxu0 %v15513_v57  ;;  %3722 = vmatprep.subr.bf16.mxu1 %v15641_v61  ;;  %v493_v57 = vld [vmem:[#allocation5 + $0xad0] sm:$0xff]  ;;  %v15712_v12 = vcombine.low %v621_v62, %v625_v63  ;;  %v202_v50 = vld [vmem:[#allocation5 + $0x1b8] sm:$0xff] }
 0x1bb   :  { %v497_v61 = vld [vmem:[#allocation5 + $0xaf0] sm:$0xff]  ;;  %v326_v51 = vld [vmem:[#allocation5 + $0x598] sm:$0xff] }
 0x1bc   :  { %v613_v8 = vld [vmem:[#allocation5 + $0xe90] sm:$0xff]  ;;  %v15584_v11 = vcombine.low %v493_v57, %v497_v61  ;;  %v330_v52 = vld [vmem:[#allocation5 + $0x5b8] sm:$0xff] }
 0x1bd   :  { %3682 = vmatpush1.bf16.msra.mxu0 %v15512_v2  ;;  %3723 = vmatpush1.bf16.msra.mxu1 %v15640_v3  ;;  %v15585_v2 = vcombine.high %v493_v57, %v497_v61  ;;  %v15713_v3 = vcombine.high %v621_v62, %v625_v63  ;;  %v617_v9 = vld [vmem:[#allocation5 + $0xeb0] sm:$0xff]  ;;  %v15419_v61 = vcombine.high %v326_v51, %v330_v52  ;;  %v190_v62 = vld [vmem:[#allocation5 + $0x158] sm:$0xff] }
 0x1be   :  { %3683 = vmatprep.subr.bf16.mxu0 %v15505_v4  ;;  %3724 = vmatprep.subr.bf16.mxu1 %v15633_v6  ;;  %v485_v4 = vld [vmem:[#allocation5 + $0xa90] sm:$0xff]  ;;  %v15704_v23 = vcombine.low %v613_v8, %v617_v9  ;;  %v194_v63 = vld [vmem:[#allocation5 + $0x178] sm:$0xff] }
 0x1bf   :  { %v489_v6 = vld [vmem:[#allocation5 + $0xab0] sm:$0xff] }
 0x1c0   :  { %v605_v18 = vld [vmem:[#allocation5 + $0xe50] sm:$0xff]  ;;  %v15576_v21 = vcombine.low %v485_v4, %v489_v6 }
 0x1c1   :  { %3684 = vmatpush1.bf16.msra.mxu0 %v15504_v13  ;;  %3725 = vmatpush1.bf16.msra.mxu1 %v15632_v14  ;;  %v15577_v13 = vcombine.high %v485_v4, %v489_v6  ;;  %v15705_v14 = vcombine.high %v613_v8, %v617_v9  ;;  %v609_v19 = vld [vmem:[#allocation5 + $0xe70] sm:$0xff]  ;;  %v15290_v6 = vcombine.low %v198_v49, %v202_v50 }
 0x1c2   :  { %3685 = vmatprep.subr.bf16.mxu0 %v15497_v15  ;;  %3726 = vmatprep.subr.bf16.mxu1 %v15625_v17  ;;  %v477_v15 = vld [vmem:[#allocation5 + $0xa50] sm:$0xff]  ;;  %v15696_v33 = vcombine.low %v605_v18, %v609_v19  ;;  %v15418_v9 = vcombine.low %v326_v51, %v330_v52  ;;  %v158_v52 = vld [vmem:[#allocation5 + $0x58] sm:$0xff] }
 0x1c3   :  { %v481_v17 = vld [vmem:[#allocation5 + $0xa70] sm:$0xff] }
 0x1c4   :  { %v597_v37 = vld [vmem:[#allocation5 + $0xe10] sm:$0xff]  ;;  %v15568_v30 = vcombine.low %v477_v15, %v481_v17 }
 0x1c5   :  { %3686 = vmatpush1.bf16.msra.mxu0 %v15496_v24  ;;  %3727 = vmatpush1.bf16.msra.mxu1 %v15624_v25  ;;  %v15569_v24 = vcombine.high %v477_v15, %v481_v17  ;;  %v15697_v25 = vcombine.high %v605_v18, %v609_v19  ;;  %v601_v29 = vld [vmem:[#allocation5 + $0xe30] sm:$0xff]  ;;  %v182_v15 = vld [vmem:[#allocation5 + $0x118] sm:$0xff] }
 0x1c6   :  { %3687 = vmatprep.subr.bf16.mxu0 %v15617_v26  ;;  %3728 = vmatprep.subr.bf16.mxu1 %v15745_v27  ;;  %v469_v26 = vld [vmem:[#allocation5 + $0xa10] sm:$0xff]  ;;  %v186_v17 = vld [vmem:[#allocation5 + $0x138] sm:$0xff] }
 0x1c7   :  { %v473_v27 = vld [vmem:[#allocation5 + $0xa30] sm:$0xff]  ;;  %v310_v19 = vld [vmem:[#allocation5 + $0x518] sm:$0xff] }
 0x1c8   :  { %v15560_v42 = vcombine.low %v469_v26, %v473_v27 }
 0x1c9   :  { %3688 = vmatpush2.bf16.msra.mxu0 %v15616_v34  ;;  %3729 = vmatpush2.bf16.msra.mxu1 %v15744_v35  ;;  %v15561_v34 = vcombine.high %v469_v26, %v473_v27  ;;  %v15689_v35 = vcombine.high %v597_v37, %v601_v29 }
 0x1ca   :  { %3689 = vmatprep.subr.bf16.mxu0 %v15609_v47  ;;  %3730 = vmatprep.subr.bf16.mxu1 %v15737_v38  ;;  %v206_v47 = vld [vmem:[#allocation5 + $0x1d8] sm:$0xff] }
 0x1cb   :  { %v210_v38 = vld [vmem:[#allocation5 + $0x1f8] sm:$0xff] }
 0x1cd   :  { %3690 = vmatpush2.bf16.msra.mxu0 %v15608_v44  ;;  %3731 = vmatpush2.bf16.msra.mxu1 %v15736_v45  ;;  %v15688_v44 = vcombine.low %v597_v37, %v601_v29  ;;  %v15299_v45 = vcombine.high %v206_v47, %v210_v38  ;;  %v15275_v37 = vcombine.high %v182_v15, %v186_v17 }
 0x1ce   :  { %3691 = vmatprep.subr.bf16.mxu0 %v15601_v46  ;;  %3732 = vmatprep.subr.bf16.mxu1 %v15729_v48  ;;  %v15427_v46 = vcombine.high %v334_v40, %v338_v41  ;;  %v17649_v48 = vsub.s32 3, %v17613_v60 }
 0x1d0   :  { %v676_v57 = vrot.slane %v17618_v7, %v17649_v48 }
 0x1d1   :  { %3692 = vmatpush2.bf16.msra.mxu0 %v15600_v53  ;;  %3733 = vmatpush2.bf16.msra.mxu1 %v15728_v54  ;;  %v672_v53 = vrot.slane %v17618_v7, %v17646_v43  ;;  %v15298_v54 = vcombine.low %v206_v47, %v210_v38  ;;  %v15274_v47 = vcombine.low %v182_v15, %v186_v17 }
 0x1d2   :  { %3693 = vmatprep.subr.bf16.mxu0 %v15593_v55  ;;  %3734 = vmatprep.subr.bf16.mxu1 %v15721_v56  ;;  %v15426_v55 = vcombine.low %v334_v40, %v338_v41  ;;  %v15291_v56 = vcombine.high %v198_v49, %v202_v50  ;;  %v166_v41 = vld [vmem:[#allocation5 + $0x98] sm:$0xff] }
 0x1d5   :  { %3694 = vmatpush2.bf16.msra.mxu0 %v15592_v0  ;;  %3735 = vmatpush2.bf16.msra.mxu1 %v15720_v1  ;;  %v318_v1 = vld [vmem:[#allocation5 + $0x558] sm:$0xff] }
 0x1d6   :  { %3695 = vmatprep.subr.bf16.mxu0 %v15585_v2  ;;  %3736 = vmatprep.subr.bf16.mxu1 %v15713_v3  ;;  %v322_v2 = vld [vmem:[#allocation5 + $0x578] sm:$0xff] }
 0x1d7   :  { %v15410_v27 = vcombine.low %v318_v1, %v322_v2 }
 0x1d9   :  { %3696 = vmatpush2.bf16.msra.mxu0 %v15584_v11  ;;  %3737 = vmatpush2.bf16.msra.mxu1 %v15712_v12  ;;  %v15283_v11 = vcombine.high %v190_v62, %v194_v63 }
 0x1da   :  { %3697 = vmatprep.subr.bf16.mxu0 %v15577_v13  ;;  %3738 = vmatprep.subr.bf16.mxu1 %v15705_v14  ;;  %v15411_v14 = vcombine.high %v318_v1, %v322_v2  ;;  %v278_v1 = vld [vmem:[#allocation5 + $0x418] sm:$0xff] }
 0x1db   :  { %v282_v2 = vld [vmem:[#allocation5 + $0x438] sm:$0xff] }
 0x1dc   :  { %v15370_v15 = vcombine.low %v278_v1, %v282_v2 }
 0x1dd   :  { %3698 = vmatpush2.bf16.msra.mxu0 %v15576_v21  ;;  %3739 = vmatpush2.bf16.msra.mxu1 %v15704_v23  ;;  %v314_v21 = vld [vmem:[#allocation5 + $0x538] sm:$0xff] }
 0x1de   :  { %3699 = vmatprep.subr.bf16.mxu0 %v15569_v24  ;;  %3740 = vmatprep.subr.bf16.mxu1 %v15697_v25  ;;  %v15282_v25 = vcombine.low %v190_v62, %v194_v63  ;;  %v150_v63 = vld [vmem:[#allocation5 + $0x18] sm:$0xff] }
 0x1e1   :  { %3700 = vmatpush2.bf16.msra.mxu0 %v15568_v30  ;;  %3741 = vmatpush2.bf16.msra.mxu1 %v15696_v33  ;;  %v15403_v30 = vcombine.high %v310_v19, %v314_v21  ;;  %v174_v33 = vld [vmem:[#allocation5 + $0xd8] sm:$0xff] }
 0x1e2   :  { %3701 = vmatprep.subr.bf16.mxu0 %v15561_v34  ;;  %3742 = vmatprep.subr.bf16.mxu1 %v15689_v35  ;;  %v302_v34 = vld [vmem:[#allocation5 + $0x4d8] sm:$0xff] }
 0x1e3   :  { %v306_v35 = vld [vmem:[#allocation5 + $0x4f8] sm:$0xff] }
 0x1e4   :  { %v15395_v40 = vcombine.high %v302_v34, %v306_v35  ;;  %v15394_v49 = vcombine.low %v302_v34, %v306_v35  ;;  %v386_v34 = vld [vmem:[#allocation5 + $0x778] sm:$0xff] }
 0x1e5   :  { %3702 = vmatpush2.bf16.msra.mxu0 %v15560_v42  ;;  %3743 = vmatpush2.bf16.msra.mxu1 %v15688_v44  ;;  %v170_v42 = vld [vmem:[#allocation5 + $0xb8] sm:$0xff] }
 0x1e6   :  { %3753 = vmatprep.subr.bf16.mxu0 %v15299_v45  ;;  %3794 = vmatprep.subr.bf16.mxu1 %v15427_v46  ;;  %v294_v44 = vld [vmem:[#allocation5 + $0x498] sm:$0xff]  ;;  %v15259_v50 = vcombine.high %v166_v41, %v170_v42 }
 0x1e7   :  { %v298_v45 = vld [vmem:[#allocation5 + $0x4b8] sm:$0xff] }
 0x1e8   :  { %v3459_v0 = vpop.f32.mrf.mxu0  ;;  %3704 = vmatmul.mubr.bf16.vlgmr.msra.gmra.mxu0 %v17601_v36  ;;  %v3500_v4 = vpop.f32.mrf.mxu1  ;;  %3745 = vmatmul.mubr.bf16.vlgmr.msra.gmra.mxu1 %v17603_v39  ;;  %v15387_v51 = vcombine.high %v294_v44, %v298_v45 }
 0x1e9   :  { %v3460_v3 = vadd.f32 %v3459_v0, %v672_v53  ;;  %3754 = vmatpush1.bf16.msra.mxu0 %v15298_v54  ;;  %3795 = vmatpush1.bf16.msra.mxu1 %v15426_v55  ;;  %v162_v53 = vld [vmem:[#allocation5 + $0x78] sm:$0xff] }
 0x1ea   :  { %v3461_v8 = vpop.f32.mrf.mxu0  ;;  %3755 = vmatprep.subr.bf16.mxu0 %v15291_v56  ;;  %v3502_v13 = vpop.f32.mrf.mxu1  ;;  %3796 = vmatprep.subr.bf16.mxu1 %v15419_v61  ;;  %v286_v54 = vld [vmem:[#allocation5 + $0x458] sm:$0xff]  ;;  %v15258_v56 = vcombine.low %v166_v41, %v170_v42  ;;  %v15251_v61 = vcombine.high %v158_v52, %v162_v53 }
 0x1eb   :  { %v17657_v7 = vadd.f32 %v3500_v4, %v3460_v3  ;;  %v3462_v12 = vadd.f32 %v3461_v8, %v676_v57  ;;  %3785 = vmatprep.mubr.bf16.mxu0 %v17583_v58  ;;  %3826 = vmatprep.mubr.bf16.mxu1 %v17585_v59  ;;  %v178_v58 = vld [vmem:[#allocation5 + $0xf8] sm:$0xff]  ;;  %v15402_v59 = vcombine.low %v310_v19, %v314_v21 }
 0x1ec   :  { %v3463_v18 = vpop.f32.mrf.mxu0  ;;  %v3504_v24 = vpop.f32.mrf.mxu1  ;;  %v15267_v38 = vcombine.high %v174_v33, %v178_v58  ;;  %v15266_v46 = vcombine.low %v174_v33, %v178_v58  ;;  %v290_v55 = vld [vmem:[#allocation5 + $0x478] sm:$0xff]  ;;  %v15386_v57 = vcombine.low %v294_v44, %v298_v45  ;;  %v15250_v3 = vcombine.low %v158_v52, %v162_v53 }
 0x1ed   :  { %v17661_v23 = vadd.f32 %v3502_v13, %v3462_v12  ;;  %3756 = vmatpush1.bf16.msra.mxu0 %v15290_v6  ;;  %3797 = vmatpush1.bf16.msra.mxu1 %v15418_v9  ;;  %v15379_v62 = vcombine.high %v286_v54, %v290_v55  ;;  %v154_v0 = vld [vmem:[#allocation5 + $0x38] sm:$0xff]  ;;  %v15378_v4 = vcombine.low %v286_v54, %v290_v55 }
 0x1ee   :  { %v3464_v26 = vpop.f32.mrf.mxu0  ;;  %3757 = vmatprep.subr.bf16.mxu0 %v15283_v11  ;;  %v3505_v29 = vpop.f32.mrf.mxu1  ;;  %3798 = vmatprep.subr.bf16.mxu1 %v15411_v14  ;;  %v15243_v6 = vcombine.high %v150_v63, %v154_v0  ;;  %v15371_v8 = vcombine.high %v278_v1, %v282_v2  ;;  %v270_v9 = vld [vmem:[#allocation5 + $0x3d8] sm:$0xff]  ;;  %v15242_v14 = vcombine.low %v150_v63, %v154_v0 }
 0x1ef   :  { %v274_v11 = vld [vmem:[#allocation5 + $0x3f8] sm:$0xff] }
 0x1f0   :  { %v398_v12 = vld [vmem:[#allocation5 + $0x7d8] sm:$0xff]  ;;  %v15363_v17 = vcombine.high %v270_v9, %v274_v11  ;;  %v15362_v26 = vcombine.low %v270_v9, %v274_v11 }
 0x1f1   :  { %3758 = vmatpush1.bf16.msra.mxu0 %v15282_v25  ;;  %3799 = vmatpush1.bf16.msra.mxu1 %v15410_v27  ;;  %v402_v13 = vld [vmem:[#allocation5 + $0x7f8] sm:$0xff] }
 0x1f2   :  { %3759 = vmatprep.subr.bf16.mxu0 %v15275_v37  ;;  %3800 = vmatprep.subr.bf16.mxu1 %v15403_v30  ;;  %v15491_v18 = vcombine.high %v398_v12, %v402_v13  ;;  %v262_v19 = vld [vmem:[#allocation5 + $0x398] sm:$0xff]  ;;  %v15490_v27 = vcombine.low %v398_v12, %v402_v13 }
 0x1f3   :  { %v266_v21 = vld [vmem:[#allocation5 + $0x3b8] sm:$0xff] }
 0x1f4   :  { %v390_v24 = vld [vmem:[#allocation5 + $0x798] sm:$0xff]  ;;  %v15355_v37 = vcombine.high %v262_v19, %v266_v21  ;;  %v15354_v35 = vcombine.low %v262_v19, %v266_v21 }
 0x1f5   :  { %3760 = vmatpush1.bf16.msra.mxu0 %v15274_v47  ;;  %3801 = vmatpush1.bf16.msra.mxu1 %v15402_v59  ;;  %v394_v25 = vld [vmem:[#allocation5 + $0x7b8] sm:$0xff] }
 0x1f6   :  { %3761 = vmatprep.subr.bf16.mxu0 %v15267_v38  ;;  %3802 = vmatprep.subr.bf16.mxu1 %v15395_v40  ;;  %v15483_v29 = vcombine.high %v390_v24, %v394_v25  ;;  %v254_v30 = vld [vmem:[#allocation5 + $0x358] sm:$0xff]  ;;  %v15482_v47 = vcombine.low %v390_v24, %v394_v25 }
 0x1f7   :  { %v258_v33 = vld [vmem:[#allocation5 + $0x378] sm:$0xff] }
 0x1f8   :  { %v382_v58 = vld [vmem:[#allocation5 + $0x758] sm:$0xff]  ;;  %v15347_v59 = vcombine.high %v254_v30, %v258_v33  ;;  %v15346_v45 = vcombine.low %v254_v30, %v258_v33 }
 0x1f9   :  { %3762 = vmatpush1.bf16.msra.mxu0 %v15266_v46  ;;  %3803 = vmatpush1.bf16.msra.mxu1 %v15394_v49  ;;  %v15475_v38 = vcombine.high %v382_v58, %v386_v34  ;;  %v246_v40 = vld [vmem:[#allocation5 + $0x318] sm:$0xff]  ;;  %v15474_v46 = vcombine.low %v382_v58, %v386_v34 }
 0x1fa   :  { %3763 = vmatprep.subr.bf16.mxu0 %v15259_v50  ;;  %3804 = vmatprep.subr.bf16.mxu1 %v15387_v51  ;;  %v250_v41 = vld [vmem:[#allocation5 + $0x338] sm:$0xff] }
 0x1fb   :  { %v374_v42 = vld [vmem:[#allocation5 + $0x718] sm:$0xff]  ;;  %v15339_v49 = vcombine.high %v246_v40, %v250_v41  ;;  %v15338_v55 = vcombine.low %v246_v40, %v250_v41 }
 0x1fc   :  { %v378_v44 = vld [vmem:[#allocation5 + $0x738] sm:$0xff] }
 0x1fd   :  { %3764 = vmatpush1.bf16.msra.mxu0 %v15258_v56  ;;  %3805 = vmatpush1.bf16.msra.mxu1 %v15386_v57  ;;  %v15467_v50 = vcombine.high %v374_v42, %v378_v44  ;;  %v238_v51 = vld [vmem:[#allocation5 + $0x2d8] sm:$0xff]  ;;  %v15466_v56 = vcombine.low %v374_v42, %v378_v44 }
 0x1fe   :  { %3765 = vmatprep.subr.bf16.mxu0 %v15251_v61  ;;  %3806 = vmatprep.subr.bf16.mxu1 %v15379_v62  ;;  %v242_v52 = vld [vmem:[#allocation5 + $0x2f8] sm:$0xff] }
 0x1ff   :  { %v366_v53 = vld [vmem:[#allocation5 + $0x6d8] sm:$0xff]  ;;  %v15331_v57 = vcombine.high %v238_v51, %v242_v52  ;;  %v15330_v2 = vcombine.low %v238_v51, %v242_v52 }
 0x200   :  { %v370_v54 = vld [vmem:[#allocation5 + $0x6f8] sm:$0xff] }
 0x201   :  { %3766 = vmatpush1.bf16.msra.mxu0 %v15250_v3  ;;  %3807 = vmatpush1.bf16.msra.mxu1 %v15378_v4  ;;  %v15459_v61 = vcombine.high %v366_v53, %v370_v54  ;;  %v230_v62 = vld [vmem:[#allocation5 + $0x298] sm:$0xff]  ;;  %v15458_v3 = vcombine.low %v366_v53, %v370_v54 }
 0x202   :  { %3767 = vmatprep.subr.bf16.mxu0 %v15243_v6  ;;  %3808 = vmatprep.subr.bf16.mxu1 %v15371_v8  ;;  %v234_v63 = vld [vmem:[#allocation5 + $0x2b8] sm:$0xff] }
 0x203   :  { %v358_v0 = vld [vmem:[#allocation5 + $0x698] sm:$0xff]  ;;  %v15323_v4 = vcombine.high %v230_v62, %v234_v63  ;;  %v15322_v13 = vcombine.low %v230_v62, %v234_v63 }
 0x204   :  { %v362_v1 = vld [vmem:[#allocation5 + $0x6b8] sm:$0xff] }
 0x205   :  { %3768 = vmatpush1.bf16.msra.mxu0 %v15242_v14  ;;  %3809 = vmatpush1.bf16.msra.mxu1 %v15370_v15  ;;  %v15451_v6 = vcombine.high %v358_v0, %v362_v1  ;;  %v222_v8 = vld [vmem:[#allocation5 + $0x258] sm:$0xff]  ;;  %v15450_v14 = vcombine.low %v358_v0, %v362_v1 }
 0x206   :  { %3769 = vmatprep.subr.bf16.mxu0 %v15363_v17  ;;  %3810 = vmatprep.subr.bf16.mxu1 %v15491_v18  ;;  %v226_v9 = vld [vmem:[#allocation5 + $0x278] sm:$0xff] }
 0x207   :  { %v350_v11 = vld [vmem:[#allocation5 + $0x658] sm:$0xff]  ;;  %v15315_v15 = vcombine.high %v222_v8, %v226_v9  ;;  %v15314_v25 = vcombine.low %v222_v8, %v226_v9 }
 0x208   :  { %v354_v12 = vld [vmem:[#allocation5 + $0x678] sm:$0xff] }
 0x209   :  { %3770 = vmatpush2.bf16.msra.mxu0 %v15362_v26  ;;  %3811 = vmatpush2.bf16.msra.mxu1 %v15490_v27  ;;  %v15443_v17 = vcombine.high %v350_v11, %v354_v12  ;;  %v214_v18 = vld [vmem:[#allocation5 + $0x218] sm:$0xff]  ;;  %v15442_v26 = vcombine.low %v350_v11, %v354_v12 }
 0x20a   :  { %3771 = vmatprep.subr.bf16.mxu0 %v15355_v37  ;;  %3812 = vmatprep.subr.bf16.mxu1 %v15483_v29  ;;  %v218_v19 = vld [vmem:[#allocation5 + $0x238] sm:$0xff] }
 0x20b   :  { %v342_v21 = vld [vmem:[#allocation5 + $0x618] sm:$0xff]  ;;  %v15307_v27 = vcombine.high %v214_v18, %v218_v19  ;;  %v15306_v34 = vcombine.low %v214_v18, %v218_v19 }
 0x20c   :  { %v346_v24 = vld [vmem:[#allocation5 + $0x638] sm:$0xff] }
 0x20d   :  { %3772 = vmatpush2.bf16.msra.mxu0 %v15354_v35  ;;  %3813 = vmatpush2.bf16.msra.mxu1 %v15482_v47  ;;  %v15435_v37 = vcombine.high %v342_v21, %v346_v24  ;;  %v462_v29 = vld [vmem:[#allocation5 + $0x9d8] sm:$0xff]  ;;  %v15434_v35 = vcombine.low %v342_v21, %v346_v24 }
 0x20e   :  { %3773 = vmatprep.subr.bf16.mxu0 %v15347_v59  ;;  %3814 = vmatprep.subr.bf16.mxu1 %v15475_v38  ;;  %v466_v30 = vld [vmem:[#allocation5 + $0x9f8] sm:$0xff] }
 0x20f   :  { %v590_v33 = vld [vmem:[#allocation5 + $0xdd8] sm:$0xff]  ;;  %v15555_v47 = vcombine.high %v462_v29, %v466_v30  ;;  %v15554_v44 = vcombine.low %v462_v29, %v466_v30 }
 0x210   :  { %v594_v58 = vld [vmem:[#allocation5 + $0xdf8] sm:$0xff] }
 0x211   :  { %3774 = vmatpush2.bf16.msra.mxu0 %v15346_v45  ;;  %3815 = vmatpush2.bf16.msra.mxu1 %v15474_v46  ;;  %v15683_v59 = vcombine.high %v590_v33, %v594_v58  ;;  %v454_v38 = vld [vmem:[#allocation5 + $0x998] sm:$0xff]  ;;  %v15682_v45 = vcombine.low %v590_v33, %v594_v58 }
 0x212   :  { %3775 = vmatprep.subr.bf16.mxu0 %v15339_v49  ;;  %3816 = vmatprep.subr.bf16.mxu1 %v15467_v50  ;;  %v458_v40 = vld [vmem:[#allocation5 + $0x9b8] sm:$0xff] }
 0x213   :  { %v582_v41 = vld [vmem:[#allocation5 + $0xd98] sm:$0xff]  ;;  %v15547_v46 = vcombine.high %v454_v38, %v458_v40 }
 0x214   :  { %v586_v42 = vld [vmem:[#allocation5 + $0xdb8] sm:$0xff] }
 0x215   :  { %3776 = vmatpush2.bf16.msra.mxu0 %v15338_v55  ;;  %3817 = vmatpush2.bf16.msra.mxu1 %v15466_v56  ;;  %v15675_v49 = vcombine.high %v582_v41, %v586_v42  ;;  %v446_v50 = vld [vmem:[#allocation5 + $0x958] sm:$0xff]  ;;  %v15674_v62 = vcombine.low %v582_v41, %v586_v42 }
 0x216   :  { %3777 = vmatprep.subr.bf16.mxu0 %v15331_v57  ;;  %3818 = vmatprep.subr.bf16.mxu1 %v15459_v61  ;;  %v450_v51 = vld [vmem:[#allocation5 + $0x978] sm:$0xff]  ;;  %v15546_v57 = vcombine.low %v454_v38, %v458_v40 }
 0x217   :  { %v574_v53 = vld [vmem:[#allocation5 + $0xd58] sm:$0xff]  ;;  %v15539_v63 = vcombine.high %v446_v50, %v450_v51  ;;  %v15538_v8 = vcombine.low %v446_v50, %v450_v51 }
 0x218   :  { %v578_v54 = vld [vmem:[#allocation5 + $0xd78] sm:$0xff] }
 0x219   :  { %3778 = vmatpush2.bf16.msra.mxu0 %v15330_v2  ;;  %3819 = vmatpush2.bf16.msra.mxu1 %v15458_v3  ;;  %v438_v2 = vld [vmem:[#allocation5 + $0x918] sm:$0xff]  ;;  %v15666_v11 = vcombine.low %v574_v53, %v578_v54 }
 0x21a   :  { %3779 = vmatprep.subr.bf16.mxu0 %v15323_v4  ;;  %3820 = vmatprep.subr.bf16.mxu1 %v15451_v6  ;;  %v442_v3 = vld [vmem:[#allocation5 + $0x938] sm:$0xff] }
 0x21b   :  { %v570_v4 = vld [vmem:[#allocation5 + $0xd38] sm:$0xff]  ;;  %v15531_v12 = vcombine.high %v438_v2, %v442_v3  ;;  %v15530_v19 = vcombine.low %v438_v2, %v442_v3 }
 0x21c   :  { %v558_v18 = vld [vmem:[#allocation5 + $0xcd8] sm:$0xff] }
 0x21d   :  { %3780 = vmatpush2.bf16.msra.mxu0 %v15322_v13  ;;  %3821 = vmatpush2.bf16.msra.mxu1 %v15450_v14  ;;  %v518_v3 = vld [vmem:[#allocation5 + $0xb98] sm:$0xff] }
 0x21e   :  { %3781 = vmatprep.subr.bf16.mxu0 %v15315_v15  ;;  %3822 = vmatprep.subr.bf16.mxu1 %v15443_v17  ;;  %v430_v15 = vld [vmem:[#allocation5 + $0x8d8] sm:$0xff] }
 0x21f   :  { %v434_v17 = vld [vmem:[#allocation5 + $0x8f8] sm:$0xff] }
 0x220   :  { %v15523_v21 = vcombine.high %v430_v15, %v434_v17  ;;  %v15522_v29 = vcombine.low %v430_v15, %v434_v17  ;;  %v642_v15 = vld [vmem:[#allocation5 + $0xf78] sm:$0xff] }
 0x221   :  { %3782 = vmatpush2.bf16.msra.mxu0 %v15314_v25  ;;  %3823 = vmatpush2.bf16.msra.mxu1 %v15442_v26  ;;  %v422_v25 = vld [vmem:[#allocation5 + $0x898] sm:$0xff] }
 0x222   :  { %3783 = vmatprep.subr.bf16.mxu0 %v15307_v27  ;;  %3824 = vmatprep.subr.bf16.mxu1 %v15435_v37  ;;  %v426_v26 = vld [vmem:[#allocation5 + $0x8b8] sm:$0xff] }
 0x223   :  { %v550_v27 = vld [vmem:[#allocation5 + $0xc98] sm:$0xff]  ;;  %v15515_v33 = vcombine.high %v422_v25, %v426_v26  ;;  %v15514_v38 = vcombine.low %v422_v25, %v426_v26 }
 0x224   :  { %v554_v37 = vld [vmem:[#allocation5 + $0xcb8] sm:$0xff] }
 0x225   :  { %3784 = vmatpush2.bf16.msra.mxu0 %v15306_v34  ;;  %3825 = vmatpush2.bf16.msra.mxu1 %v15434_v35  ;;  %v15643_v58 = vcombine.high %v550_v27, %v554_v37  ;;  %v414_v34 = vld [vmem:[#allocation5 + $0x858] sm:$0xff]  ;;  %v15642_v40 = vcombine.low %v550_v27, %v554_v37 }
 0x226   :  { %3835 = vmatprep.subr.bf16.mxu0 %v15555_v47  ;;  %3876 = vmatprep.subr.bf16.mxu1 %v15683_v59  ;;  %v418_v35 = vld [vmem:[#allocation5 + $0x878] sm:$0xff] }
 0x227   :  { %v542_v47 = vld [vmem:[#allocation5 + $0xc58] sm:$0xff]  ;;  %v15507_v41 = vcombine.high %v414_v34, %v418_v35  ;;  %v15506_v50 = vcombine.low %v414_v34, %v418_v35 }
 0x228   :  { %v3541_v52 = vpop.f32.mrf.mxu0  ;;  %3786 = vmatmul.mubr.bf16.vlgmr.msra.gmra.mxu0 %v17589_v16  ;;  %v3582_v56 = vpop.f32.mrf.mxu1  ;;  %3827 = vmatmul.mubr.bf16.vlgmr.msra.gmra.mxu1 %v17591_v20  ;;  %v15667_v16 = vcombine.high %v574_v53, %v578_v54  ;;  %v566_v20 = vld [vmem:[#allocation5 + $0xd18] sm:$0xff] }
 0x229   :  { %v3542_v55 = vadd.f32 %v3541_v52, %v17657_v7  ;;  %3836 = vmatpush1.bf16.msra.mxu0 %v15554_v44  ;;  %3877 = vmatpush1.bf16.msra.mxu1 %v15682_v45  ;;  %v15659_v14 = vcombine.high %v566_v20, %v570_v4  ;;  %v546_v59 = vld [vmem:[#allocation5 + $0xc78] sm:$0xff] }
 0x22a   :  { %v17666_v61 = vpop.f32.mrf.mxu0  ;;  %3837 = vmatprep.subr.bf16.mxu0 %v15547_v46  ;;  %v17670_v1 = vpop.f32.mrf.mxu1  ;;  %3878 = vmatprep.subr.bf16.mxu1 %v15675_v49  ;;  %v15635_v42 = vcombine.high %v542_v47, %v546_v59  ;;  %v406_v44 = vld [vmem:[#allocation5 + $0x818] sm:$0xff]  ;;  %v15634_v51 = vcombine.low %v542_v47, %v546_v59 }
 0x22b   :  { %v17668_v0 = vadd.f32 %v3582_v56, %v3542_v55  ;;  %3867 = vmatprep.mubr.bf16.mxu0 %v17593_v28  ;;  %3908 = vmatprep.mubr.bf16.mxu1 %v17596_v31  ;;  %v562_v28 = vld [vmem:[#allocation5 + $0xcf8] sm:$0xff]  ;;  %v15658_v31 = vcombine.low %v566_v20, %v570_v4 }
 0x22c   :  { %v3545_v7 = vpop.f32.mrf.mxu0  ;;  %v3586_v6 = vpop.f32.mrf.mxu1  ;;  %v15651_v24 = vcombine.high %v558_v18, %v562_v28  ;;  %v15650_v30 = vcombine.low %v558_v18, %v562_v28  ;;  %v410_v45 = vld [vmem:[#allocation5 + $0x838] sm:$0xff] }
 0x22d   :  { %3838 = vmatpush1.bf16.msra.mxu0 %v15546_v57  ;;  %3879 = vmatpush1.bf16.msra.mxu1 %v15674_v62  ;;  %v534_v46 = vld [vmem:[#allocation5 + $0xc18] sm:$0xff]  ;;  %v15499_v52 = vcombine.high %v406_v44, %v410_v45  ;;  %v15498_v62 = vcombine.low %v406_v44, %v410_v45 }
 0x22e   :  { %v3546_v9 = vpop.f32.mrf.mxu0  ;;  %3839 = vmatprep.subr.bf16.mxu0 %v15539_v63  ;;  %v3587_v13 = vpop.f32.mrf.mxu1  ;;  %3880 = vmatprep.subr.bf16.mxu1 %v15667_v16  ;;  %v538_v49 = vld [vmem:[#allocation5 + $0xc38] sm:$0xff] }
 0x22f   :  { %v15627_v53 = vcombine.high %v534_v46, %v538_v49  ;;  %v526_v54 = vld [vmem:[#allocation5 + $0xbd8] sm:$0xff]  ;;  %v15626_v63 = vcombine.low %v534_v46, %v538_v49 }
 0x230   :  { %v530_v55 = vld [vmem:[#allocation5 + $0xbf8] sm:$0xff] }
 0x231   :  { %3840 = vmatpush1.bf16.msra.mxu0 %v15538_v8  ;;  %3881 = vmatpush1.bf16.msra.mxu1 %v15666_v11  ;;  %v654_v56 = vld [vmem:[#allocation5 + $0xfd8] sm:$0xff]  ;;  %v15619_v16 = vcombine.high %v526_v54, %v530_v55  ;;  %v15618_v6 = vcombine.low %v526_v54, %v530_v55 }
 0x232   :  { %3841 = vmatprep.subr.bf16.mxu0 %v15531_v12  ;;  %3882 = vmatprep.subr.bf16.mxu1 %v15659_v14  ;;  %v658_v57 = vld [vmem:[#allocation5 + $0xff8] sm:$0xff] }
 0x233   :  { %v15747_v2 = vcombine.high %v654_v56, %v658_v57  ;;  %v522_v7 = vld [vmem:[#allocation5 + $0xbb8] sm:$0xff]  ;;  %v15746_v8 = vcombine.low %v654_v56, %v658_v57 }
 0x234   :  { %v646_v20 = vld [vmem:[#allocation5 + $0xf98] sm:$0xff]  ;;  %v15611_v9 = vcombine.high %v518_v3, %v522_v7  ;;  %v15610_v17 = vcombine.low %v518_v3, %v522_v7 }
 0x235   :  { %3842 = vmatpush1.bf16.msra.mxu0 %v15530_v19  ;;  %3883 = vmatpush1.bf16.msra.mxu1 %v15658_v31  ;;  %v650_v4 = vld [vmem:[#allocation5 + $0xfb8] sm:$0xff] }
 0x236   :  { %3843 = vmatprep.subr.bf16.mxu0 %v15523_v21  ;;  %3884 = vmatprep.subr.bf16.mxu1 %v15651_v24  ;;  %v15739_v11 = vcombine.high %v646_v20, %v650_v4  ;;  %v510_v12 = vld [vmem:[#allocation5 + $0xb58] sm:$0xff]  ;;  %v15738_v18 = vcombine.low %v646_v20, %v650_v4 }
 0x237   :  { %v514_v13 = vld [vmem:[#allocation5 + $0xb78] sm:$0xff] }
 0x238   :  { %v638_v14 = vld [vmem:[#allocation5 + $0xf58] sm:$0xff]  ;;  %v15603_v28 = vcombine.high %v510_v12, %v514_v13  ;;  %v15602_v26 = vcombine.low %v510_v12, %v514_v13  ;;  %v4113_v12 = vld [vmem:[#allocation7 + $0x5e0] sm:$0xff]  ;;  %v3544_v13 = vadd.f32 %v17666_v61, %v17661_v23 }
 0x239   :  { %3844 = vmatpush1.bf16.msra.mxu0 %v15522_v29  ;;  %3885 = vmatpush1.bf16.msra.mxu1 %v15650_v30  ;;  %v15731_v19 = vcombine.high %v638_v14, %v642_v15  ;;  %v502_v31 = vld [vmem:[#allocation5 + $0xb18] sm:$0xff]  ;;  %v15730_v27 = vcombine.low %v638_v14, %v642_v15  ;;  %v17677_v15 = vsub.s32 4, %v17613_v60 }
 0x23a   :  { %3845 = vmatprep.subr.bf16.mxu0 %v15515_v33  ;;  %3886 = vmatprep.subr.bf16.mxu1 %v15643_v58  ;;  %v506_v21 = vld [vmem:[#allocation5 + $0xb38] sm:$0xff] }
 0x23b   :  { %v630_v24 = vld [vmem:[#allocation5 + $0xf18] sm:$0xff]  ;;  %v15595_v37 = vcombine.high %v502_v31, %v506_v21  ;;  %v15594_v35 = vcombine.low %v502_v31, %v506_v21  ;;  %v3977_v31 = vld [vmem:[#allocation7 + $0x1a0] sm:$0xff]  ;;  %v3585_v21 = vadd.f32 %v17670_v1, %v3544_v13 }
 0x23c   :  { %v634_v25 = vld [vmem:[#allocation5 + $0xf38] sm:$0xff] }
 0x23d   :  { %3846 = vmatpush1.bf16.msra.mxu0 %v15514_v38  ;;  %3887 = vmatpush1.bf16.msra.mxu1 %v15642_v40  ;;  %v15723_v29 = vcombine.high %v630_v24, %v634_v25  ;;  %v494_v30 = vld [vmem:[#allocation5 + $0xad8] sm:$0xff]  ;;  %v15722_v47 = vcombine.low %v630_v24, %v634_v25  ;;  %v17680_v24 = vld [vmem:[#allocation11] sm:$0xff] }
 0x23e   :  { %3847 = vmatprep.subr.bf16.mxu0 %v15507_v41  ;;  %3888 = vmatprep.subr.bf16.mxu1 %v15635_v42  ;;  %v498_v33 = vld [vmem:[#allocation5 + $0xaf8] sm:$0xff]  ;;  %v680_v23 = vrot.slane %v17680_v24, %v17677_v15  ;;  %v4101_v25 = vld [vmem:[#allocation7 + $0x580] sm:$0xff] }
 0x23f   :  { %v622_v58 = vld [vmem:[#allocation5 + $0xed8] sm:$0xff]  ;;  %v15587_v59 = vcombine.high %v494_v30, %v498_v33  ;;  %v15586_v45 = vcombine.low %v494_v30, %v498_v33  ;;  %v3969_v30 = vld [vmem:[#allocation7 + $0x160] sm:$0xff]  ;;  %v17686_v33 = vpack.c.bf16 %v17643_v32, %v17643_v32 }
 0x240   :  { %v626_v34 = vld [vmem:[#allocation5 + $0xef8] sm:$0xff] }
 0x241   :  { %3848 = vmatpush1.bf16.msra.mxu0 %v15506_v50  ;;  %3889 = vmatpush1.bf16.msra.mxu1 %v15634_v51  ;;  %v15715_v38 = vcombine.high %v622_v58, %v626_v34  ;;  %v486_v40 = vld [vmem:[#allocation5 + $0xa98] sm:$0xff]  ;;  %v15714_v46 = vcombine.low %v622_v58, %v626_v34  ;;  %v4093_v34 = vld [vmem:[#allocation7 + $0x540] sm:$0xff] }
 0x242   :  { %3849 = vmatprep.subr.bf16.mxu0 %v15499_v52  ;;  %3890 = vmatprep.subr.bf16.mxu1 %v15627_v53  ;;  %v490_v41 = vld [vmem:[#allocation5 + $0xab8] sm:$0xff] }
 0x243   :  { %v614_v42 = vld [vmem:[#allocation5 + $0xe98] sm:$0xff]  ;;  %v15579_v49 = vcombine.high %v486_v40, %v490_v41  ;;  %v15578_v55 = vcombine.low %v486_v40, %v490_v41 }
 0x244   :  { %v618_v44 = vld [vmem:[#allocation5 + $0xeb8] sm:$0xff] }
 0x245   :  { %3850 = vmatpush1.bf16.msra.mxu0 %v15498_v62  ;;  %3891 = vmatpush1.bf16.msra.mxu1 %v15626_v63  ;;  %v15707_v50 = vcombine.high %v614_v42, %v618_v44  ;;  %v478_v51 = vld [vmem:[#allocation5 + $0xa58] sm:$0xff]  ;;  %v15706_v56 = vcombine.low %v614_v42, %v618_v44 }
 0x246   :  { %3851 = vmatprep.subr.bf16.mxu0 %v15619_v16  ;;  %3892 = vmatprep.subr.bf16.mxu1 %v15747_v2  ;;  %v482_v52 = vld [vmem:[#allocation5 + $0xa78] sm:$0xff] }
 0x247   :  { %v606_v53 = vld [vmem:[#allocation5 + $0xe58] sm:$0xff]  ;;  %v15571_v57 = vcombine.high %v478_v51, %v482_v52  ;;  %v15570_v7 = vcombine.low %v478_v51, %v482_v52  ;;  %v4089_v51 = vld [vmem:[#allocation7 + $0x520] sm:$0xff] }
 0x248   :  { %v610_v54 = vld [vmem:[#allocation5 + $0xe78] sm:$0xff] }
 0x249   :  { %3852 = vmatpush2.bf16.msra.mxu0 %v15618_v6  ;;  %3893 = vmatpush2.bf16.msra.mxu1 %v15746_v8  ;;  %v15699_v62 = vcombine.high %v606_v53, %v610_v54  ;;  %v470_v63 = vld [vmem:[#allocation5 + $0xa18] sm:$0xff]  ;;  %v15698_v20 = vcombine.low %v606_v53, %v610_v54  ;;  %v3981_v8 = vld [vmem:[#allocation7 + $0x1c0] sm:$0xff] }
 0x24a   :  { %3853 = vmatprep.subr.bf16.mxu0 %v15611_v9  ;;  %3894 = vmatprep.subr.bf16.mxu1 %v15739_v11  ;;  %v474_v16 = vld [vmem:[#allocation5 + $0xa38] sm:$0xff]  ;;  %v3985_v9 = vld [vmem:[#allocation7 + $0x1e0] sm:$0xff] }
 0x24b   :  { %v598_v2 = vld [vmem:[#allocation5 + $0xe18] sm:$0xff]  ;;  %v15563_v4 = vcombine.high %v470_v63, %v474_v16  ;;  %v4109_v11 = vld [vmem:[#allocation7 + $0x5c0] sm:$0xff]  ;;  %v15562_v14 = vcombine.low %v470_v63, %v474_v16  ;;  %v15804_v61 = vcombine.low %v3981_v8, %v3985_v9 }
 0x24c   :  { %v602_v3 = vld [vmem:[#allocation5 + $0xe38] sm:$0xff]  ;;  %v3949_v63 = vld [vmem:[#allocation7 + $0xc0] sm:$0xff] }
 0x24d   :  { %3854 = vmatpush2.bf16.msra.mxu0 %v15610_v17  ;;  %3895 = vmatpush2.bf16.msra.mxu1 %v15738_v18  ;;  %v15691_v6 = vcombine.high %v598_v2, %v602_v3  ;;  %v15690_v17 = vcombine.low %v598_v2, %v602_v3  ;;  %v15805_v18 = vcombine.high %v3981_v8, %v3985_v9  ;;  %v3953_v16 = vld [vmem:[#allocation7 + $0xe0] sm:$0xff] }
 0x24e   :  { %3855 = vmatprep.subr.bf16.mxu0 %v15603_v28  ;;  %3896 = vmatprep.subr.bf16.mxu1 %v15731_v19  ;;  %v15933_v28 = vcombine.high %v4109_v11, %v4113_v12  ;;  %v3973_v19 = vld [vmem:[#allocation7 + $0x180] sm:$0xff]  ;;  %v15772_v13 = vcombine.low %v3949_v63, %v3953_v16 }
 0x24f   :  { %v15796_v40 = vcombine.low %v3973_v19, %v3977_v31  ;;  %v4077_v2 = vld [vmem:[#allocation7 + $0x4c0] sm:$0xff] }
 0x250   :  { %v4081_v3 = vld [vmem:[#allocation7 + $0x4e0] sm:$0xff] }
 0x251   :  { %3856 = vmatpush2.bf16.msra.mxu0 %v15602_v26  ;;  %3897 = vmatpush2.bf16.msra.mxu1 %v15730_v27  ;;  %v4105_v26 = vld [vmem:[#allocation7 + $0x5a0] sm:$0xff]  ;;  %v15932_v27 = vcombine.low %v4109_v11, %v4113_v12 }
 0x252   :  { %3857 = vmatprep.subr.bf16.mxu0 %v15595_v37  ;;  %3898 = vmatprep.subr.bf16.mxu1 %v15723_v29  ;;  %v15797_v37 = vcombine.high %v3973_v19, %v3977_v31  ;;  %v3965_v29 = vld [vmem:[#allocation7 + $0x140] sm:$0xff]  ;;  %v15925_v58 = vcombine.high %v4101_v25, %v4105_v26  ;;  %v15924_v32 = vcombine.low %v4101_v25, %v4105_v26 }
 0x253   :  { %v15789_v42 = vcombine.high %v3965_v29, %v3969_v30  ;;  %v15788_v53 = vcombine.low %v3965_v29, %v3969_v30  ;;  %v3941_v8 = vld [vmem:[#allocation7 + $0x80] sm:$0xff] }
 0x254   :  { %v3945_v9 = vld [vmem:[#allocation7 + $0xa0] sm:$0xff] }
 0x255   :  { %3858 = vmatpush2.bf16.msra.mxu0 %v15594_v35  ;;  %3899 = vmatpush2.bf16.msra.mxu1 %v15722_v47  ;;  %v4097_v35 = vld [vmem:[#allocation7 + $0x560] sm:$0xff]  ;;  %v17689_v47 = vpack.c.bf16 %v3585_v21, %v3585_v21 }
 0x256   :  { %3859 = vmatprep.subr.bf16.mxu0 %v15587_v59  ;;  %3900 = vmatprep.subr.bf16.mxu1 %v15715_v38  ;;  %v4069_v11 = vld [vmem:[#allocation7 + $0x480] sm:$0xff] }
 0x257   :  { %v4073_v12 = vld [vmem:[#allocation7 + $0x4a0] sm:$0xff] }
 0x258   :  { %v3937_v19 = vld [vmem:[#allocation7 + $0x60] sm:$0xff] }
 0x259   :  { %3860 = vmatpush2.bf16.msra.mxu0 %v15586_v45  ;;  %3901 = vmatpush2.bf16.msra.mxu1 %v15714_v46  ;;  %v15917_v45 = vcombine.high %v4093_v34, %v4097_v35  ;;  %v3957_v46 = vld [vmem:[#allocation7 + $0x100] sm:$0xff] }
 0x25a   :  { %3861 = vmatprep.subr.bf16.mxu0 %v15579_v49  ;;  %3902 = vmatprep.subr.bf16.mxu1 %v15707_v50  ;;  %v3961_v49 = vld [vmem:[#allocation7 + $0x120] sm:$0xff] }
 0x25b   :  { %v4085_v50 = vld [vmem:[#allocation7 + $0x500] sm:$0xff] }
 0x25c   :  { %v4061_v31 = vld [vmem:[#allocation7 + $0x440] sm:$0xff] }
 0x25d   :  { %3862 = vmatpush2.bf16.msra.mxu0 %v15578_v55  ;;  %3903 = vmatpush2.bf16.msra.mxu1 %v15706_v56  ;;  %v15916_v55 = vcombine.low %v4093_v34, %v4097_v35  ;;  %v15781_v56 = vcombine.high %v3957_v46, %v3961_v49  ;;  %v4065_v21 = vld [vmem:[#allocation7 + $0x460] sm:$0xff] }
 0x25e   :  { %3863 = vmatprep.subr.bf16.mxu0 %v15571_v57  ;;  %3904 = vmatprep.subr.bf16.mxu1 %v15699_v62  ;;  %v15909_v62 = vcombine.high %v4085_v50, %v4089_v51  ;;  %v15885_v26 = vcombine.high %v4061_v31, %v4065_v21  ;;  %v4053_v29 = vld [vmem:[#allocation7 + $0x400] sm:$0xff] }
 0x25f   :  { %v4057_v30 = vld [vmem:[#allocation7 + $0x420] sm:$0xff] }
 0x260   :  { %v15877_v35 = vcombine.high %v4053_v29, %v4057_v30 }
 0x261   :  { %3864 = vmatpush2.bf16.msra.mxu0 %v15570_v7  ;;  %3905 = vmatpush2.bf16.msra.mxu1 %v15698_v20  ;;  %v15780_v7 = vcombine.low %v3957_v46, %v3961_v49  ;;  %v15908_v20 = vcombine.low %v4085_v50, %v4089_v51  ;;  %v4041_v50 = vld [vmem:[#allocation7 + $0x3a0] sm:$0xff] }
 0x262   :  { %3865 = vmatprep.subr.bf16.mxu0 %v15563_v4  ;;  %3906 = vmatprep.subr.bf16.mxu1 %v15691_v6  ;;  %v15773_v4 = vcombine.high %v3949_v63, %v3953_v16  ;;  %v15901_v6 = vcombine.high %v4077_v2, %v4081_v3  ;;  %v4165_v51 = vld [vmem:[#allocation7 + $0x780] sm:$0xff] }
 0x263   :  { %v4157_v63 = vld [vmem:[#allocation7 + $0x740] sm:$0xff] }
 0x264   :  { %v4161_v16 = vld [vmem:[#allocation7 + $0x760] sm:$0xff] }
 0x265   :  { %3866 = vmatpush2.bf16.msra.mxu0 %v15562_v14  ;;  %3907 = vmatpush2.bf16.msra.mxu1 %v15690_v17  ;;  %v15900_v14 = vcombine.low %v4077_v2, %v4081_v3  ;;  %v15765_v17 = vcombine.high %v3941_v8, %v3945_v9 }
 0x266   :  { %7039 = vmatprep.subr.bf16.mxu0 %v15805_v18  ;;  %7080 = vmatprep.subr.bf16.mxu1 %v15933_v28  ;;  %v15893_v18 = vcombine.high %v4069_v11, %v4073_v12  ;;  %v3933_v28 = vld [vmem:[#allocation7 + $0x40] sm:$0xff] }
 0x267   :  { %v15757_v25 = vcombine.high %v3933_v28, %v3937_v19 }
 0x268   :  { %v3623_v1 = vpop.f32.mrf.mxu0  ;;  %3868 = vmatmul.mubr.bf16.vlgmr.msra.gmra.mxu0 %v17601_v36  ;;  %v3664_v38 = vpop.f32.mrf.mxu1  ;;  %3909 = vmatmul.mubr.bf16.vlgmr.msra.gmra.mxu1 %v17603_v39 }
 0x269   :  { %v3624_v59 = vadd.f32 %v3623_v1, %v680_v23  ;;  %7040 = vmatpush1.bf16.msra.mxu0 %v15804_v61  ;;  %7071 = vmatprep.mubr.bf16.mxu0 %v17686_v33  ;;  %v15764_v23 = vcombine.low %v3941_v8, %v3945_v9  ;;  %v15892_v61 = vcombine.low %v4069_v11, %v4073_v12  ;;  %v4149_v8 = vld [vmem:[#allocation7 + $0x700] sm:$0xff] }
 0x26a   :  { %7081 = vmatpush1.bf16.msra.mxu1 %v15932_v27  ;;  %v17693_v41 = vpop.f32.mrf.mxu0  ;;  %7112 = vmatprep.mubr.bf16.mxu1 %v17689_v47  ;;  %v17698_v36 = vpop.f32.mrf.mxu1  ;;  %v3925_v27 = vld [vmem:[#allocation7] sm:$0xff]  ;;  %v15756_v1 = vcombine.low %v3933_v28, %v3937_v19  ;;  %v15980_v12 = vcombine.low %v4157_v63, %v4161_v16 }
 0x26b   :  { %v17695_v44 = vadd.f32 %v3664_v38, %v3624_v59  ;;  %7041 = vmatprep.subr.bf16.mxu0 %v15797_v37  ;;  %7082 = vmatprep.subr.bf16.mxu1 %v15925_v58  ;;  %v3929_v37 = vld [vmem:[#allocation7 + $0x20] sm:$0xff]  ;;  %v15884_v58 = vcombine.low %v4061_v31, %v4065_v21 }
 0x26c   :  { %v3627_v39 = vpop.f32.mrf.mxu0  ;;  %v3668_v52 = vpop.f32.mrf.mxu1  ;;  %v15749_v34 = vcombine.high %v3925_v27, %v3929_v37  ;;  %v4045_v59 = vld [vmem:[#allocation7 + $0x3c0] sm:$0xff] }
 0x26d   :  { %7042 = vmatpush1.bf16.msra.mxu0 %v15796_v40  ;;  %v4049_v38 = vld [vmem:[#allocation7 + $0x3e0] sm:$0xff] }
 0x26e   :  { %7083 = vmatpush1.bf16.msra.mxu1 %v15924_v32  ;;  %v3628_v54 = vpop.f32.mrf.mxu0  ;;  %7043 = vmatprep.subr.bf16.mxu0 %v15789_v42  ;;  %v3669_v57 = vpop.f32.mrf.mxu1  ;;  %v4173_v40 = vld [vmem:[#allocation7 + $0x7c0] sm:$0xff]  ;;  %v15748_v42 = vcombine.low %v3925_v27, %v3929_v37  ;;  %v15869_v46 = vcombine.high %v4045_v59, %v4049_v38 }
 0x26f   :  { %7084 = vmatprep.subr.bf16.mxu1 %v15917_v45  ;;  %v4177_v32 = vld [vmem:[#allocation7 + $0x7e0] sm:$0xff]  ;;  %v15876_v45 = vcombine.low %v4053_v29, %v4057_v30 }
 0x270   :  { %v15997_v49 = vcombine.high %v4173_v40, %v4177_v32  ;;  %v4037_v39 = vld [vmem:[#allocation7 + $0x380] sm:$0xff]  ;;  %v15996_v54 = vcombine.low %v4173_v40, %v4177_v32 }
 0x271   :  { %7044 = vmatpush1.bf16.msra.mxu0 %v15788_v53  ;;  %v4169_v52 = vld [vmem:[#allocation7 + $0x7a0] sm:$0xff]  ;;  %v15868_v53 = vcombine.low %v4045_v59, %v4049_v38  ;;  %v15860_v2 = vcombine.low %v4037_v39, %v4041_v50 }
 0x272   :  { %7085 = vmatpush1.bf16.msra.mxu1 %v15916_v55  ;;  %7045 = vmatprep.subr.bf16.mxu0 %v15781_v56  ;;  %v15861_v55 = vcombine.high %v4037_v39, %v4041_v50  ;;  %v15989_v56 = vcombine.high %v4165_v51, %v4169_v52  ;;  %v4029_v57 = vld [vmem:[#allocation7 + $0x340] sm:$0xff]  ;;  %v15988_v3 = vcombine.low %v4165_v51, %v4169_v52  ;;  %v17701_v51 = vsub.s32 5, %v17613_v60 }
 0x273   :  { %7086 = vmatprep.subr.bf16.mxu1 %v15909_v62  ;;  %v4033_v62 = vld [vmem:[#allocation7 + $0x360] sm:$0xff] }
 0x274   :  { %v4153_v9 = vld [vmem:[#allocation7 + $0x720] sm:$0xff]  ;;  %v15852_v11 = vcombine.low %v4029_v57, %v4033_v62 }
 0x275   :  { %7046 = vmatpush1.bf16.msra.mxu0 %v15780_v7  ;;  %v15853_v7 = vcombine.high %v4029_v57, %v4033_v62  ;;  %v4141_v28 = vld [vmem:[#allocation7 + $0x6c0] sm:$0xff]  ;;  %v15972_v21 = vcombine.low %v4149_v8, %v4153_v9 }
 0x276   :  { %7087 = vmatpush1.bf16.msra.mxu1 %v15908_v20  ;;  %7047 = vmatprep.subr.bf16.mxu0 %v15773_v4  ;;  %v15981_v20 = vcombine.high %v4157_v63, %v4161_v16  ;;  %v4021_v4 = vld [vmem:[#allocation7 + $0x300] sm:$0xff]  ;;  %v684_v16 = vrot.slane %v17680_v24, %v17701_v51 }
 0x277   :  { %7088 = vmatprep.subr.bf16.mxu1 %v15901_v6  ;;  %v4025_v6 = vld [vmem:[#allocation7 + $0x320] sm:$0xff] }
 0x278   :  { %v4145_v19 = vld [vmem:[#allocation7 + $0x6e0] sm:$0xff]  ;;  %v15844_v31 = vcombine.low %v4021_v4, %v4025_v6 }
 0x279   :  { %7048 = vmatpush1.bf16.msra.mxu0 %v15772_v13  ;;  %v15845_v13 = vcombine.high %v4021_v4, %v4025_v6  ;;  %v4133_v27 = vld [vmem:[#allocation7 + $0x680] sm:$0xff]  ;;  %v15964_v30 = vcombine.low %v4141_v28, %v4145_v19 }
 0x27a   :  { %7089 = vmatpush1.bf16.msra.mxu1 %v15900_v14  ;;  %7049 = vmatprep.subr.bf16.mxu0 %v15765_v17  ;;  %v15973_v14 = vcombine.high %v4149_v8, %v4153_v9  ;;  %v4013_v17 = vld [vmem:[#allocation7 + $0x2c0] sm:$0xff] }
 0x27b   :  { %7090 = vmatprep.subr.bf16.mxu1 %v15893_v18  ;;  %v4017_v18 = vld [vmem:[#allocation7 + $0x2e0] sm:$0xff] }
 0x27c   :  { %v4137_v37 = vld [vmem:[#allocation7 + $0x6a0] sm:$0xff]  ;;  %v15836_v29 = vcombine.low %v4013_v17, %v4017_v18 }
 0x27d   :  { %7050 = vmatpush1.bf16.msra.mxu0 %v15764_v23  ;;  %v15837_v23 = vcombine.high %v4013_v17, %v4017_v18  ;;  %v4125_v59 = vld [vmem:[#allocation7 + $0x640] sm:$0xff]  ;;  %v15956_v32 = vcombine.low %v4133_v27, %v4137_v37  ;;  %v17712_v17 = vpack.c.bf16 %v17668_v0, %v17668_v0 }
 0x27e   :  { %7091 = vmatpush1.bf16.msra.mxu1 %v15892_v61  ;;  %7051 = vmatprep.subr.bf16.mxu0 %v15757_v25  ;;  %v15965_v61 = vcombine.high %v4141_v28, %v4145_v19  ;;  %v4005_v25 = vld [vmem:[#allocation7 + $0x280] sm:$0xff] }
 0x27f   :  { %7092 = vmatprep.subr.bf16.mxu1 %v15885_v26  ;;  %v4009_v26 = vld [vmem:[#allocation7 + $0x2a0] sm:$0xff] }
 0x280   :  { %v4129_v38 = vld [vmem:[#allocation7 + $0x660] sm:$0xff]  ;;  %v15828_v40 = vcombine.low %v4005_v25, %v4009_v26 }
 0x281   :  { %7052 = vmatpush1.bf16.msra.mxu0 %v15756_v1  ;;  %v15829_v1 = vcombine.high %v4005_v25, %v4009_v26  ;;  %v4117_v39 = vld [vmem:[#allocation7 + $0x600] sm:$0xff] }
 0x282   :  { %7093 = vmatpush1.bf16.msra.mxu1 %v15884_v58  ;;  %7053 = vmatprep.subr.bf16.mxu0 %v15749_v34  ;;  %v15957_v58 = vcombine.high %v4133_v27, %v4137_v37  ;;  %v3997_v34 = vld [vmem:[#allocation7 + $0x240] sm:$0xff] }
 0x283   :  { %7094 = vmatprep.subr.bf16.mxu1 %v15877_v35  ;;  %v4001_v35 = vld [vmem:[#allocation7 + $0x260] sm:$0xff] }
 0x284   :  { %v4121_v50 = vld [vmem:[#allocation7 + $0x620] sm:$0xff]  ;;  %v15820_v52 = vcombine.low %v3997_v34, %v4001_v35 }
 0x285   :  { %7054 = vmatpush1.bf16.msra.mxu0 %v15748_v42  ;;  %v15821_v42 = vcombine.high %v3997_v34, %v4001_v35  ;;  %v4241_v57 = vld [vmem:[#allocation7 + $0x9e0] sm:$0xff] }
 0x286   :  { %7095 = vmatpush1.bf16.msra.mxu1 %v15876_v45  ;;  %7055 = vmatprep.subr.bf16.mxu0 %v15869_v46  ;;  %v15949_v45 = vcombine.high %v4125_v59, %v4129_v38  ;;  %v3989_v46 = vld [vmem:[#allocation7 + $0x200] sm:$0xff] }
 0x287   :  { %7096 = vmatprep.subr.bf16.mxu1 %v15997_v49  ;;  %v3993_v49 = vld [vmem:[#allocation7 + $0x220] sm:$0xff] }
 0x288   :  { %v4365_v62 = vld [vmem:[#allocation7 + $0xdc0] sm:$0xff] }
 0x289   :  { %7056 = vmatpush2.bf16.msra.mxu0 %v15868_v53  ;;  %v15948_v53 = vcombine.low %v4125_v59, %v4129_v38  ;;  %v4369_v63 = vld [vmem:[#allocation7 + $0xde0] sm:$0xff] }
 0x28a   :  { %7097 = vmatpush2.bf16.msra.mxu1 %v15996_v54  ;;  %7057 = vmatprep.subr.bf16.mxu0 %v15861_v55  ;;  %v15813_v54 = vcombine.high %v3989_v46, %v3993_v49  ;;  %v15941_v55 = vcombine.high %v4117_v39, %v4121_v50  ;;  %v4233_v4 = vld [vmem:[#allocation7 + $0x9a0] sm:$0xff]  ;;  %v16189_v6 = vcombine.high %v4365_v62, %v4369_v63 }
 0x28b   :  { %7098 = vmatprep.subr.bf16.mxu1 %v15989_v56  ;;  %v4237_v56 = vld [vmem:[#allocation7 + $0x9c0] sm:$0xff] }
 0x28c   :  { %v4357_v8 = vld [vmem:[#allocation7 + $0xd80] sm:$0xff] }
 0x28d   :  { %7058 = vmatpush2.bf16.msra.mxu0 %v15860_v2  ;;  %v15812_v2 = vcombine.low %v3989_v46, %v3993_v49  ;;  %v4361_v9 = vld [vmem:[#allocation7 + $0xda0] sm:$0xff] }
 0x28e   :  { %7099 = vmatpush2.bf16.msra.mxu1 %v15988_v3  ;;  %7059 = vmatprep.subr.bf16.mxu0 %v15853_v7  ;;  %v15940_v3 = vcombine.low %v4117_v39, %v4121_v50  ;;  %v16061_v7 = vcombine.high %v4237_v56, %v4241_v57  ;;  %v4221_v18 = vld [vmem:[#allocation7 + $0x940] sm:$0xff]  ;;  %v16181_v19 = vcombine.high %v4357_v8, %v4361_v9 }
 0x28f   :  { %7100 = vmatprep.subr.bf16.mxu1 %v15981_v20  ;;  %v4229_v20 = vld [vmem:[#allocation7 + $0x980] sm:$0xff]  ;;  %v16180_v26 = vcombine.low %v4357_v8, %v4361_v9 }
 0x290   :  { %v16053_v24 = vcombine.high %v4229_v20, %v4233_v4  ;;  %v4225_v28 = vld [vmem:[#allocation7 + $0x960] sm:$0xff] }
 0x291   :  { %7060 = vmatpush2.bf16.msra.mxu0 %v15852_v11  ;;  %v3626_v11 = vadd.f32 %v17693_v41, %v684_v16  ;;  %v4349_v41 = vld [vmem:[#allocation7 + $0xd40] sm:$0xff]  ;;  %v16045_v25 = vcombine.high %v4221_v18, %v4225_v28  ;;  %v16044_v38 = vcombine.low %v4221_v18, %v4225_v28 }
 0x292   :  { %7101 = vmatpush2.bf16.msra.mxu1 %v15980_v12  ;;  %7061 = vmatprep.subr.bf16.mxu0 %v15845_v13  ;;  %v16060_v12 = vcombine.low %v4237_v56, %v4241_v57  ;;  %v17708_v13 = vpack.c.bf16 %v17638_v22, %v17638_v22  ;;  %v4341_v34 = vld [vmem:[#allocation7 + $0xd00] sm:$0xff] }
 0x293   :  { %7102 = vmatprep.subr.bf16.mxu1 %v15973_v14  ;;  %v16188_v14 = vcombine.low %v4365_v62, %v4369_v63  ;;  %v3667_v22 = vadd.f32 %v17698_v36, %v3626_v11  ;;  %v4345_v36 = vld [vmem:[#allocation7 + $0xd20] sm:$0xff] }
 0x294   :  { %v4205_v49 = vld [vmem:[#allocation7 + $0x8c0] sm:$0xff]  ;;  %v16165_v50 = vcombine.high %v4341_v34, %v4345_v36  ;;  %v16164_v63 = vcombine.low %v4341_v34, %v4345_v36 }
 0x295   :  { %7062 = vmatpush2.bf16.msra.mxu0 %v15844_v31  ;;  %v4209_v39 = vld [vmem:[#allocation7 + $0x8e0] sm:$0xff] }
 0x296   :  { %7103 = vmatpush2.bf16.msra.mxu1 %v15972_v21  ;;  %7063 = vmatprep.subr.bf16.mxu0 %v15837_v23  ;;  %v4353_v21 = vld [vmem:[#allocation7 + $0xd60] sm:$0xff]  ;;  %v16029_v62 = vcombine.high %v4205_v49, %v4209_v39 }
 0x297   :  { %7104 = vmatprep.subr.bf16.mxu1 %v15965_v61  ;;  %v16052_v61 = vcombine.low %v4229_v20, %v4233_v4  ;;  %v4197_v16 = vld [vmem:[#allocation7 + $0x880] sm:$0xff]  ;;  %v16028_v4 = vcombine.low %v4205_v49, %v4209_v39 }
 0x298   :  { %v4329_v20 = vld [vmem:[#allocation7 + $0xca0] sm:$0xff] }
 0x299   :  { %7064 = vmatpush2.bf16.msra.mxu0 %v15836_v29  ;;  %v4213_v29 = vld [vmem:[#allocation7 + $0x900] sm:$0xff] }
 0x29a   :  { %7105 = vmatpush2.bf16.msra.mxu1 %v15964_v30  ;;  %7065 = vmatprep.subr.bf16.mxu0 %v15829_v1  ;;  %v4217_v30 = vld [vmem:[#allocation7 + $0x920] sm:$0xff]  ;;  %v16173_v1 = vcombine.high %v4349_v41, %v4353_v21 }
 0x29b   :  { %7106 = vmatprep.subr.bf16.mxu1 %v15957_v58  ;;  %v16036_v56 = vcombine.low %v4213_v29, %v4217_v30  ;;  %v4189_v9 = vld [vmem:[#allocation7 + $0x840] sm:$0xff] }
 0x29c   :  { %v4193_v11 = vld [vmem:[#allocation7 + $0x860] sm:$0xff] }
 0x29d   :  { %7066 = vmatpush2.bf16.msra.mxu0 %v15828_v40  ;;  %v16013_v28 = vcombine.high %v4189_v9, %v4193_v11 }
 0x29e   :  { %7107 = vmatpush2.bf16.msra.mxu1 %v15956_v32  ;;  %7067 = vmatprep.subr.bf16.mxu0 %v15821_v42  ;;  %v16037_v32 = vcombine.high %v4213_v29, %v4217_v30  ;;  %v16172_v42 = vcombine.low %v4349_v41, %v4353_v21  ;;  %v4181_v41 = vld [vmem:[#allocation7 + $0x800] sm:$0xff] }
 0x29f   :  { %7108 = vmatprep.subr.bf16.mxu1 %v15949_v45  ;;  %v4185_v21 = vld [vmem:[#allocation7 + $0x820] sm:$0xff] }
 0x2a0   :  { %v4305_v29 = vld [vmem:[#allocation7 + $0xbe0] sm:$0xff]  ;;  %v16004_v34 = vcombine.low %v4181_v41, %v4185_v21 }
 0x2a1   :  { %7068 = vmatpush2.bf16.msra.mxu0 %v15820_v52  ;;  %v4333_v52 = vld [vmem:[#allocation7 + $0xcc0] sm:$0xff] }
 0x2a2   :  { %7109 = vmatpush2.bf16.msra.mxu1 %v15948_v53  ;;  %7069 = vmatprep.subr.bf16.mxu0 %v15813_v54  ;;  %v4337_v53 = vld [vmem:[#allocation7 + $0xce0] sm:$0xff]  ;;  %v17723_v54 = vld [vmem:[#allocation7 + $0x5c8] sm:$0xff] }
 0x2a3   :  { %7110 = vmatprep.subr.bf16.mxu1 %v15941_v55  ;;  %v17725_v55 = vld [vmem:[#allocation7 + $0x5e8] sm:$0xff]  ;;  %v16156_v8 = vcombine.low %v4333_v52, %v4337_v53 }
 0x2a4   :  { %v15934_v57 = vcombine.low %v17723_v54, %v17725_v55 }
 0x2a5   :  { %7070 = vmatpush2.bf16.msra.mxu0 %v15812_v2  ;;  %v4201_v2 = vld [vmem:[#allocation7 + $0x8a0] sm:$0xff] }
 0x2a6   :  { %7111 = vmatpush2.bf16.msra.mxu1 %v15940_v3  ;;  %7121 = vmatprep.subr.bf16.mxu0 %v16061_v7  ;;  %v16157_v3 = vcombine.high %v4333_v52, %v4337_v53  ;;  %v4325_v7 = vld [vmem:[#allocation7 + $0xc80] sm:$0xff]  ;;  %v16020_v18 = vcombine.low %v4197_v16, %v4201_v2 }
 0x2a7   :  { %7162 = vmatprep.subr.bf16.mxu1 %v16189_v6  ;;  %v16021_v6 = vcombine.high %v4197_v16, %v4201_v2  ;;  %v4289_v52 = vld [vmem:[#allocation7 + $0xb60] sm:$0xff] }
 0x2a8   :  { %v17714_v31 = vpop.f32.mrf.mxu0  ;;  %7072 = vmatmul.mubr.bf16.vlgmr.msra.gmra.mxu0 %v17708_v13  ;;  %v17718_v23 = vpop.f32.mrf.mxu1 }
 0x2a9   :  { %7113 = vmatmul.mubr.bf16.vlgmr.msra.gmra.mxu1 %v17712_v17  ;;  %7122 = vmatpush1.bf16.msra.mxu0 %v16060_v12  ;;  %v16149_v12 = vcombine.high %v4325_v7, %v4329_v20 }
 0x2aa   :  { %v3707_v0 = vpop.f32.mrf.mxu0  ;;  %7123 = vmatprep.subr.bf16.mxu0 %v16053_v24  ;;  %7163 = vmatpush1.bf16.msra.mxu1 %v16188_v14  ;;  %v3748_v37 = vpop.f32.mrf.mxu1  ;;  %v4317_v24 = vld [vmem:[#allocation7 + $0xc40] sm:$0xff] }
 0x2ab   :  { %v3708_v27 = vadd.f32 %v3707_v0, %v3667_v22  ;;  %7164 = vmatprep.subr.bf16.mxu1 %v16181_v19  ;;  %v4321_v14 = vld [vmem:[#allocation7 + $0xc60] sm:$0xff]  ;;  %v16148_v19 = vcombine.low %v4325_v7, %v4329_v20 }
 0x2ac   :  { %v3709_v58 = vpop.f32.mrf.mxu0  ;;  %v3750_v59 = vpop.f32.mrf.mxu1  ;;  %v16141_v22 = vcombine.high %v4317_v24, %v4321_v14  ;;  %v4313_v0 = vld [vmem:[#allocation7 + $0xc20] sm:$0xff] }
 0x2ad   :  { %v3749_v35 = vadd.f32 %v3748_v37, %v3708_v27  ;;  %7124 = vmatpush1.bf16.msra.mxu0 %v16052_v61  ;;  %v4309_v61 = vld [vmem:[#allocation7 + $0xc00] sm:$0xff]  ;;  %v16140_v27 = vcombine.low %v4317_v24, %v4321_v14 }
 0x2ae   :  { %v3710_v40 = vpop.f32.mrf.mxu0  ;;  %7125 = vmatprep.subr.bf16.mxu0 %v16045_v25  ;;  %7165 = vmatpush1.bf16.msra.mxu1 %v16180_v26  ;;  %v3751_v46 = vpop.f32.mrf.mxu1  ;;  %v16012_v25 = vcombine.low %v4189_v9, %v4193_v11  ;;  %v16005_v26 = vcombine.high %v4181_v41, %v4185_v21  ;;  %v4301_v37 = vld [vmem:[#allocation7 + $0xbc0] sm:$0xff]  ;;  %v16133_v30 = vcombine.high %v4309_v61, %v4313_v0 }
 0x2af   :  { %v17721_v45 = vpack.c.bf16 %v3749_v35, %v3749_v35  ;;  %7166 = vmatprep.subr.bf16.mxu1 %v16173_v1  ;;  %v4429_v1 = vld [vmem:[#allocation7 + $0xfc0] sm:$0xff]  ;;  %v16125_v36 = vcombine.high %v4301_v37, %v4305_v29  ;;  %v16132_v35 = vcombine.low %v4309_v61, %v4313_v0  ;;  %v16124_v46 = vcombine.low %v4301_v37, %v4305_v29 }
 0x2b0   :  { %v4433_v58 = vld [vmem:[#allocation7 + $0xfe0] sm:$0xff] }
 0x2b1   :  { %7126 = vmatpush1.bf16.msra.mxu0 %v16044_v38  ;;  %7153 = vmatprep.mubr.bf16.mxu0 %v17721_v45  ;;  %v4293_v59 = vld [vmem:[#allocation7 + $0xb80] sm:$0xff]  ;;  %v16253_v40 = vcombine.high %v4429_v1, %v4433_v58  ;;  %v16252_v39 = vcombine.low %v4429_v1, %v4433_v58 }
 0x2b2   :  { %7127 = vmatprep.subr.bf16.mxu0 %v16037_v32  ;;  %7167 = vmatpush1.bf16.msra.mxu1 %v16172_v42  ;;  %v4297_v38 = vld [vmem:[#allocation7 + $0xba0] sm:$0xff] }
 0x2b3   :  { %7168 = vmatprep.subr.bf16.mxu1 %v16165_v50  ;;  %v4421_v32 = vld [vmem:[#allocation7 + $0xf80] sm:$0xff]  ;;  %v16117_v49 = vcombine.high %v4293_v59, %v4297_v38 }
 0x2b4   :  { %v4425_v42 = vld [vmem:[#allocation7 + $0xfa0] sm:$0xff] }
 0x2b5   :  { %7128 = vmatpush1.bf16.msra.mxu0 %v16036_v56  ;;  %v4285_v50 = vld [vmem:[#allocation7 + $0xb40] sm:$0xff]  ;;  %v16245_v53 = vcombine.high %v4421_v32, %v4425_v42  ;;  %v16244_v2 = vcombine.low %v4421_v32, %v4425_v42 }
 0x2b6   :  { %7129 = vmatprep.subr.bf16.mxu0 %v16029_v62  ;;  %7169 = vmatpush1.bf16.msra.mxu1 %v16164_v63  ;;  %v4413_v56 = vld [vmem:[#allocation7 + $0xf40] sm:$0xff]  ;;  %v16116_v63 = vcombine.low %v4293_v59, %v4297_v38  ;;  %v16109_v16 = vcombine.high %v4285_v50, %v4289_v52 }
 0x2b7   :  { %7170 = vmatprep.subr.bf16.mxu1 %v16157_v3  ;;  %v4417_v62 = vld [vmem:[#allocation7 + $0xf60] sm:$0xff] }
 0x2b8   :  { %v4277_v3 = vld [vmem:[#allocation7 + $0xb00] sm:$0xff]  ;;  %v16237_v20 = vcombine.high %v4413_v56, %v4417_v62  ;;  %v16236_v11 = vcombine.low %v4413_v56, %v4417_v62  ;;  %v3982_v56 = vld [vmem:[#allocation7 + $0x1c8] sm:$0xff] }
 0x2b9   :  { %7130 = vmatpush1.bf16.msra.mxu0 %v16028_v4  ;;  %v4281_v7 = vld [vmem:[#allocation7 + $0xb20] sm:$0xff]  ;;  %v3986_v62 = vld [vmem:[#allocation7 + $0x1e8] sm:$0xff] }
 0x2ba   :  { %7131 = vmatprep.subr.bf16.mxu0 %v16021_v6  ;;  %7171 = vmatpush1.bf16.msra.mxu1 %v16156_v8  ;;  %v4405_v4 = vld [vmem:[#allocation7 + $0xf00] sm:$0xff]  ;;  %v16108_v8 = vcombine.low %v4285_v50, %v4289_v52  ;;  %v16101_v9 = vcombine.high %v4277_v3, %v4281_v7  ;;  %v3706_v50 = vadd.f32 %v17714_v31, %v17695_v44 }
 0x2bb   :  { %7172 = vmatprep.subr.bf16.mxu1 %v16149_v12  ;;  %v4409_v6 = vld [vmem:[#allocation7 + $0xf20] sm:$0xff]  ;;  %v15935_v44 = vcombine.high %v17723_v54, %v17725_v55  ;;  %v15806_v31 = vcombine.low %v3982_v56, %v3986_v62 }
 0x2bc   :  { %v4269_v12 = vld [vmem:[#allocation7 + $0xac0] sm:$0xff]  ;;  %v16229_v14 = vcombine.high %v4405_v4, %v4409_v6  ;;  %v16228_v21 = vcombine.low %v4405_v4, %v4409_v6  ;;  %v3978_v4 = vld [vmem:[#allocation7 + $0x1a8] sm:$0xff] }
 0x2bd   :  { %7132 = vmatpush1.bf16.msra.mxu0 %v16020_v18  ;;  %v4273_v24 = vld [vmem:[#allocation7 + $0xae0] sm:$0xff] }
 0x2be   :  { %7133 = vmatprep.subr.bf16.mxu0 %v16013_v28  ;;  %7173 = vmatpush1.bf16.msra.mxu1 %v16148_v19  ;;  %v4397_v18 = vld [vmem:[#allocation7 + $0xec0] sm:$0xff]  ;;  %v16100_v19 = vcombine.low %v4277_v3, %v4281_v7  ;;  %v16093_v41 = vcombine.high %v4269_v12, %v4273_v24  ;;  %v15807_v3 = vcombine.high %v3982_v56, %v3986_v62  ;;  %v4038_v56 = vld [vmem:[#allocation7 + $0x388] sm:$0xff] }
 0x2bf   :  { %7174 = vmatprep.subr.bf16.mxu1 %v16141_v22  ;;  %v4401_v28 = vld [vmem:[#allocation7 + $0xee0] sm:$0xff]  ;;  %v4042_v62 = vld [vmem:[#allocation7 + $0x3a8] sm:$0xff] }
 0x2c0   :  { %v4261_v22 = vld [vmem:[#allocation7 + $0xa80] sm:$0xff]  ;;  %v16221_v0 = vcombine.high %v4397_v18, %v4401_v28  ;;  %v16220_v29 = vcombine.low %v4397_v18, %v4401_v28 }
 0x2c1   :  { %7134 = vmatpush1.bf16.msra.mxu0 %v16012_v25  ;;  %v4265_v61 = vld [vmem:[#allocation7 + $0xaa0] sm:$0xff] }
 0x2c2   :  { %7135 = vmatprep.subr.bf16.mxu0 %v16005_v26  ;;  %7175 = vmatpush1.bf16.msra.mxu1 %v16140_v27  ;;  %v4389_v25 = vld [vmem:[#allocation7 + $0xe80] sm:$0xff]  ;;  %v16092_v27 = vcombine.low %v4269_v12, %v4273_v24  ;;  %v16085_v37 = vcombine.high %v4261_v22, %v4265_v61 }
 0x2c3   :  { %7176 = vmatprep.subr.bf16.mxu1 %v16133_v30  ;;  %v4393_v26 = vld [vmem:[#allocation7 + $0xea0] sm:$0xff] }
 0x2c4   :  { %v4253_v30 = vld [vmem:[#allocation7 + $0xa40] sm:$0xff]  ;;  %v16213_v58 = vcombine.high %v4389_v25, %v4393_v26  ;;  %v16212_v38 = vcombine.low %v4389_v25, %v4393_v26 }
 0x2c5   :  { %7136 = vmatpush1.bf16.msra.mxu0 %v16004_v34  ;;  %v4257_v1 = vld [vmem:[#allocation7 + $0xa60] sm:$0xff] }
 0x2c6   :  { %7137 = vmatprep.subr.bf16.mxu0 %v16125_v36  ;;  %7177 = vmatpush1.bf16.msra.mxu1 %v16132_v35  ;;  %v4381_v34 = vld [vmem:[#allocation7 + $0xe40] sm:$0xff]  ;;  %v16084_v35 = vcombine.low %v4261_v22, %v4265_v61  ;;  %v16077_v59 = vcombine.high %v4253_v30, %v4257_v1 }
 0x2c7   :  { %7178 = vmatprep.subr.bf16.mxu1 %v16253_v40  ;;  %v4385_v36 = vld [vmem:[#allocation7 + $0xe60] sm:$0xff] }
 0x2c8   :  { %v4245_v40 = vld [vmem:[#allocation7 + $0xa00] sm:$0xff]  ;;  %v16205_v42 = vcombine.high %v4381_v34, %v4385_v36 }
 0x2c9   :  { %7138 = vmatpush2.bf16.msra.mxu0 %v16124_v46  ;;  %v4249_v32 = vld [vmem:[#allocation7 + $0xa20] sm:$0xff] }
 0x2ca   :  { %7139 = vmatprep.subr.bf16.mxu0 %v16117_v49  ;;  %7179 = vmatpush2.bf16.msra.mxu1 %v16252_v39  ;;  %v4373_v46 = vld [vmem:[#allocation7 + $0xe00] sm:$0xff]  ;;  %v16076_v39 = vcombine.low %v4253_v30, %v4257_v1  ;;  %v16069_v52 = vcombine.high %v4245_v40, %v4249_v32  ;;  %v3942_v1 = vld [vmem:[#allocation7 + $0x88] sm:$0xff] }
 0x2cb   :  { %7180 = vmatprep.subr.bf16.mxu1 %v16245_v53  ;;  %v4377_v49 = vld [vmem:[#allocation7 + $0xe20] sm:$0xff]  ;;  %v16204_v53 = vcombine.low %v4381_v34, %v4385_v36 }
 0x2cc   :  { %v16196_v7 = vcombine.low %v4373_v46, %v4377_v49 }
 0x2cd   :  { %7140 = vmatpush2.bf16.msra.mxu0 %v16116_v63  ;;  %v16197_v63 = vcombine.high %v4373_v46, %v4377_v49 }
 0x2ce   :  { %7141 = vmatprep.subr.bf16.mxu0 %v16109_v16  ;;  %7181 = vmatpush2.bf16.msra.mxu1 %v16244_v2  ;;  %v16068_v16 = vcombine.low %v4245_v40, %v4249_v32  ;;  %v3747_v2 = vadd.f32 %v17718_v23, %v3706_v50  ;;  %v3926_v32 = vld [vmem:[#allocation7 + $0x8] sm:$0xff] }
 0x2cf   :  { %7182 = vmatprep.subr.bf16.mxu1 %v16237_v20  ;;  %v3974_v20 = vld [vmem:[#allocation7 + $0x188] sm:$0xff] }
 0x2d0   :  { %v17735_v6 = vpack.c.bf16 %v3747_v2, %v3747_v2  ;;  %v15798_v24 = vcombine.low %v3974_v20, %v3978_v4  ;;  %v4050_v50 = vld [vmem:[#allocation7 + $0x3e8] sm:$0xff] }
 0x2d1   :  { %7142 = vmatpush2.bf16.msra.mxu0 %v16108_v8  ;;  %v15799_v8 = vcombine.high %v3974_v20, %v3978_v4  ;;  %v4030_v2 = vld [vmem:[#allocation7 + $0x348] sm:$0xff] }
 0x2d2   :  { %7143 = vmatprep.subr.bf16.mxu0 %v16101_v9  ;;  %7183 = vmatpush2.bf16.msra.mxu1 %v16236_v11  ;;  %v3966_v9 = vld [vmem:[#allocation7 + $0x148] sm:$0xff] }
 0x2d3   :  { %7184 = vmatprep.subr.bf16.mxu1 %v16229_v14  ;;  %v3970_v11 = vld [vmem:[#allocation7 + $0x168] sm:$0xff] }
 0x2d4   :  { %v15791_v18 = vcombine.high %v3966_v9, %v3970_v11  ;;  %v15790_v61 = vcombine.low %v3966_v9, %v3970_v11  ;;  %v4022_v4 = vld [vmem:[#allocation7 + $0x308] sm:$0xff] }
 0x2d5   :  { %7144 = vmatpush2.bf16.msra.mxu0 %v16100_v19  ;;  %v3958_v19 = vld [vmem:[#allocation7 + $0x108] sm:$0xff] }
 0x2d6   :  { %7145 = vmatprep.subr.bf16.mxu0 %v16093_v41  ;;  %7185 = vmatpush2.bf16.msra.mxu1 %v16228_v21  ;;  %v3962_v41 = vld [vmem:[#allocation7 + $0x128] sm:$0xff] }
 0x2d7   :  { %7186 = vmatprep.subr.bf16.mxu1 %v16221_v0  ;;  %v15783_v25 = vcombine.high %v3958_v19, %v3962_v41  ;;  %v4014_v9 = vld [vmem:[#allocation7 + $0x2c8] sm:$0xff] }
 0x2d8   :  { %v4018_v11 = vld [vmem:[#allocation7 + $0x2e8] sm:$0xff] }
 0x2d9   :  { %7146 = vmatpush2.bf16.msra.mxu0 %v16092_v27  ;;  %v3950_v27 = vld [vmem:[#allocation7 + $0xc8] sm:$0xff] }
 0x2da   :  { %7147 = vmatprep.subr.bf16.mxu0 %v16085_v37  ;;  %7187 = vmatpush2.bf16.msra.mxu1 %v16220_v29  ;;  %v3954_v37 = vld [vmem:[#allocation7 + $0xe8] sm:$0xff]  ;;  %v15782_v29 = vcombine.low %v3958_v19, %v3962_v41 }
 0x2db   :  { %7188 = vmatprep.subr.bf16.mxu1 %v16213_v58  ;;  %v15775_v30 = vcombine.high %v3950_v27, %v3954_v37  ;;  %v3946_v58 = vld [vmem:[#allocation7 + $0xa8] sm:$0xff]  ;;  %v15774_v34 = vcombine.low %v3950_v27, %v3954_v37  ;;  %v17748_v27 = vsub.s32 6, %v17613_v60 }
 0x2dc   :  { %v15767_v36 = vcombine.high %v3942_v1, %v3946_v58  ;;  %v4006_v19 = vld [vmem:[#allocation7 + $0x288] sm:$0xff] }
 0x2dd   :  { %7148 = vmatpush2.bf16.msra.mxu0 %v16084_v35  ;;  %v3934_v35 = vld [vmem:[#allocation7 + $0x48] sm:$0xff] }
 0x2de   :  { %7149 = vmatprep.subr.bf16.mxu0 %v16077_v59  ;;  %7189 = vmatpush2.bf16.msra.mxu1 %v16212_v38  ;;  %v3938_v59 = vld [vmem:[#allocation7 + $0x68] sm:$0xff]  ;;  %v15766_v38 = vcombine.low %v3942_v1, %v3946_v58 }
 0x2df   :  { %7190 = vmatprep.subr.bf16.mxu1 %v16205_v42  ;;  %v15759_v40 = vcombine.high %v3934_v35, %v3938_v59  ;;  %v3930_v42 = vld [vmem:[#allocation7 + $0x28] sm:$0xff]  ;;  %v15758_v46 = vcombine.low %v3934_v35, %v3938_v59 }
 0x2e0   :  { %v15751_v49 = vcombine.high %v3926_v32, %v3930_v42  ;;  %v4010_v41 = vld [vmem:[#allocation7 + $0x2a8] sm:$0xff] }
 0x2e1   :  { %7150 = vmatpush2.bf16.msra.mxu0 %v16076_v39  ;;  %v4046_v39 = vld [vmem:[#allocation7 + $0x3c8] sm:$0xff] }
 0x2e2   :  { %7151 = vmatprep.subr.bf16.mxu0 %v16069_v52  ;;  %7191 = vmatpush2.bf16.msra.mxu1 %v16204_v53  ;;  %v15750_v52 = vcombine.low %v3926_v32, %v3930_v42  ;;  %v15871_v53 = vcombine.high %v4046_v39, %v4050_v50  ;;  %v3990_v37 = vld [vmem:[#allocation7 + $0x208] sm:$0xff] }
 0x2e3   :  { %7192 = vmatprep.subr.bf16.mxu1 %v16197_v63  ;;  %v15870_v63 = vcombine.low %v4046_v39, %v4050_v50  ;;  %v4238_v35 = vld [vmem:[#allocation7 + $0x9c8] sm:$0xff] }
 0x2e4   :  { %v4242_v59 = vld [vmem:[#allocation7 + $0x9e8] sm:$0xff] }
 0x2e5   :  { %7152 = vmatpush2.bf16.msra.mxu0 %v16068_v16  ;;  %v15863_v16 = vcombine.high %v4038_v56, %v4042_v62  ;;  %v16063_v32 = vcombine.high %v4238_v35, %v4242_v59  ;;  %v16062_v39 = vcombine.low %v4238_v35, %v4242_v59 }
 0x2e6   :  { %7203 = vmatprep.subr.bf16.mxu0 %v15807_v3  ;;  %7193 = vmatpush2.bf16.msra.mxu1 %v16196_v7  ;;  %v4034_v3 = vld [vmem:[#allocation7 + $0x368] sm:$0xff]  ;;  %v15862_v7 = vcombine.low %v4038_v56, %v4042_v62 }
 0x2e7   :  { %7244 = vmatprep.subr.bf16.mxu1 %v15935_v44  ;;  %v15855_v20 = vcombine.high %v4030_v2, %v4034_v3  ;;  %v4026_v44 = vld [vmem:[#allocation7 + $0x328] sm:$0xff] }
 0x2e8   :  { %v17737_v23 = vpop.f32.mrf.mxu0  ;;  %7154 = vmatmul.mubr.bf16.vlgmr.msra.gmra.mxu0 %v17735_v6  ;;  %v17740_v12 = vpop.f32.mrf.mxu1  ;;  %v4226_v56 = vld [vmem:[#allocation7 + $0x968] sm:$0xff] }
 0x2e9   :  { %7204 = vmatpush1.bf16.msra.mxu0 %v15806_v31  ;;  %7235 = vmatprep.mubr.bf16.mxu0 %v17686_v33  ;;  %v15854_v31 = vcombine.low %v4030_v2, %v4034_v3 }
 0x2ea   :  { %v17743_v14 = vpop.f32.mrf.mxu0  ;;  %7205 = vmatprep.subr.bf16.mxu0 %v15799_v8  ;;  %v17745_v28 = vpop.f32.mrf.mxu1  ;;  %v15847_v8 = vcombine.high %v4022_v4, %v4026_v44 }
 0x2ec   :  { %v3791_v21 = vpop.f32.mrf.mxu0  ;;  %v3832_v22 = vpop.f32.mrf.mxu1 }
 0x2ed   :  { %7206 = vmatpush1.bf16.msra.mxu0 %v15798_v24  ;;  %v15846_v24 = vcombine.low %v4022_v4, %v4026_v44  ;;  %v15838_v21 = vcombine.low %v4014_v9, %v4018_v11  ;;  %v15831_v22 = vcombine.high %v4006_v19, %v4010_v41  ;;  %v4214_v4 = vld [vmem:[#allocation7 + $0x908] sm:$0xff] }
 0x2ee   :  { %v3792_v0 = vpop.f32.mrf.mxu0  ;;  %7207 = vmatprep.subr.bf16.mxu0 %v15791_v18  ;;  %v3833_v26 = vpop.f32.mrf.mxu1  ;;  %v15839_v18 = vcombine.high %v4014_v9, %v4018_v11 }
 0x2ef   :  { %v4002_v0 = vld [vmem:[#allocation7 + $0x268] sm:$0xff] }
 0x2f1   :  { %7208 = vmatpush1.bf16.msra.mxu0 %v15790_v61  ;;  %v3998_v61 = vld [vmem:[#allocation7 + $0x248] sm:$0xff] }
 0x2f2   :  { %7209 = vmatprep.subr.bf16.mxu0 %v15783_v25  ;;  %v15830_v25 = vcombine.low %v4006_v19, %v4010_v41  ;;  %v15823_v26 = vcombine.high %v3998_v61, %v4002_v0  ;;  %v15822_v1 = vcombine.low %v3998_v61, %v4002_v0  ;;  %v4210_v61 = vld [vmem:[#allocation7 + $0x8e8] sm:$0xff] }
 0x2f5   :  { %7210 = vmatpush1.bf16.msra.mxu0 %v15782_v29  ;;  %v3994_v29 = vld [vmem:[#allocation7 + $0x228] sm:$0xff] }
 0x2f6   :  { %7211 = vmatprep.subr.bf16.mxu0 %v15775_v30  ;;  %v17751_v30 = vsub.s32 7, %v17613_v60  ;;  %v15815_v58 = vcombine.high %v3990_v37, %v3994_v29  ;;  %v4234_v60 = vld [vmem:[#allocation7 + $0x9a8] sm:$0xff] }
 0x2f9   :  { %7212 = vmatpush1.bf16.msra.mxu0 %v15774_v34  ;;  %v17296_v34 = vld [vmem:[#allocation11] sm:$0xff] }
 0x2fa   :  { %7213 = vmatprep.subr.bf16.mxu0 %v15767_v36  ;;  %v688_v36 = vrot.slane %v17296_v34, %v17748_v27 }
 0x2fc   :  { %v3788_v42 = vadd.f32 %v17737_v23, %v688_v36  ;;  %v4202_v36 = vld [vmem:[#allocation7 + $0x8a8] sm:$0xff] }
 0x2fd   :  { %7214 = vmatpush1.bf16.msra.mxu0 %v15766_v38  ;;  %v692_v38 = vrot.slane %v17296_v34, %v17751_v30  ;;  %v4198_v34 = vld [vmem:[#allocation7 + $0x888] sm:$0xff] }
 0x2fe   :  { %7215 = vmatprep.subr.bf16.mxu0 %v15759_v40  ;;  %v15814_v40 = vcombine.low %v3990_v37, %v3994_v29  ;;  %v4094_v37 = vld [vmem:[#allocation7 + $0x548] sm:$0xff]  ;;  %v16022_v55 = vcombine.low %v4198_v34, %v4202_v36 }
 0x2ff   :  { %v4098_v29 = vld [vmem:[#allocation7 + $0x568] sm:$0xff] }
 0x300   :  { %v15919_v35 = vcombine.high %v4094_v37, %v4098_v29 }
 0x301   :  { %7216 = vmatpush1.bf16.msra.mxu0 %v15758_v46  ;;  %v4230_v46 = vld [vmem:[#allocation7 + $0x988] sm:$0xff] }
 0x302   :  { %7217 = vmatprep.subr.bf16.mxu0 %v15751_v49  ;;  %v3790_v49 = vadd.f32 %v17743_v14, %v692_v38  ;;  %v16055_v50 = vcombine.high %v4230_v46, %v4234_v60  ;;  %v16054_v23 = vcombine.low %v4230_v46, %v4234_v60  ;;  %v4086_v38 = vld [vmem:[#allocation7 + $0x508] sm:$0xff] }
 0x303   :  { %v4190_v46 = vld [vmem:[#allocation7 + $0x848] sm:$0xff] }
 0x304   :  { %v4194_v60 = vld [vmem:[#allocation7 + $0x868] sm:$0xff] }
 0x305   :  { %7218 = vmatpush1.bf16.msra.mxu0 %v15750_v52  ;;  %v3829_v52 = vadd.f32 %v17740_v12, %v3788_v42  ;;  %v4218_v12 = vld [vmem:[#allocation7 + $0x928] sm:$0xff]  ;;  %v15918_v42 = vcombine.low %v4094_v37, %v4098_v29 }
 0x306   :  { %7219 = vmatprep.subr.bf16.mxu0 %v15871_v53  ;;  %v4222_v53 = vld [vmem:[#allocation7 + $0x948] sm:$0xff]  ;;  %v16039_v19 = vcombine.high %v4214_v4, %v4218_v12 }
 0x307   :  { %v16047_v3 = vcombine.high %v4222_v53, %v4226_v56  ;;  %v16046_v11 = vcombine.low %v4222_v53, %v4226_v56  ;;  %v4186_v53 = vld [vmem:[#allocation7 + $0x828] sm:$0xff] }
 0x308   :  { %v4174_v37 = vld [vmem:[#allocation7 + $0x7c8] sm:$0xff] }
 0x309   :  { %7220 = vmatpush2.bf16.msra.mxu0 %v15870_v63  ;;  %v3831_v63 = vadd.f32 %v17745_v28, %v3790_v49  ;;  %v4102_v28 = vld [vmem:[#allocation7 + $0x588] sm:$0xff] }
 0x30a   :  { %7221 = vmatprep.subr.bf16.mxu0 %v15863_v16  ;;  %v4082_v49 = vld [vmem:[#allocation7 + $0x4e8] sm:$0xff] }
 0x30b   :  { %v4178_v29 = vld [vmem:[#allocation7 + $0x7e8] sm:$0xff] }
 0x30d   :  { %7222 = vmatpush2.bf16.msra.mxu0 %v15862_v7 }
 0x30e   :  { %7223 = vmatprep.subr.bf16.mxu0 %v15855_v20 }
 0x311   :  { %7224 = vmatpush2.bf16.msra.mxu0 %v15854_v31 }
 0x312   :  { %7225 = vmatprep.subr.bf16.mxu0 %v15847_v8 }
 0x315   :  { %7226 = vmatpush2.bf16.msra.mxu0 %v15846_v24  ;;  %v4106_v24 = vld [vmem:[#allocation7 + $0x5a8] sm:$0xff] }
 0x316   :  { %7227 = vmatprep.subr.bf16.mxu0 %v15839_v18 }
 0x319   :  { %7228 = vmatpush2.bf16.msra.mxu0 %v15838_v21 }
 0x31a   :  { %7229 = vmatprep.subr.bf16.mxu0 %v15831_v22  ;;  %v4206_v22 = vld [vmem:[#allocation7 + $0x8c8] sm:$0xff] }
 0x31b   :  { %v16030_v59 = vcombine.low %v4206_v22, %v4210_v61 }
 0x31d   :  { %7230 = vmatpush2.bf16.msra.mxu0 %v15830_v25  ;;  %v15927_v25 = vcombine.high %v4102_v28, %v4106_v24 }
 0x31e   :  { %7231 = vmatprep.subr.bf16.mxu0 %v15823_v26  ;;  %v16038_v26 = vcombine.low %v4214_v4, %v4218_v12  ;;  %v4062_v4 = vld [vmem:[#allocation7 + $0x448] sm:$0xff] }
 0x31f   :  { %v4066_v12 = vld [vmem:[#allocation7 + $0x468] sm:$0xff] }
 0x321   :  { %7232 = vmatpush2.bf16.msra.mxu0 %v15822_v1  ;;  %v16031_v1 = vcombine.high %v4206_v22, %v4210_v61  ;;  %v4286_v22 = vld [vmem:[#allocation7 + $0xb48] sm:$0xff] }
 0x322   :  { %7233 = vmatprep.subr.bf16.mxu0 %v15815_v58  ;;  %v15926_v58 = vcombine.low %v4102_v28, %v4106_v24  ;;  %v4054_v24 = vld [vmem:[#allocation7 + $0x408] sm:$0xff] }
 0x323   :  { %v4290_v61 = vld [vmem:[#allocation7 + $0xb68] sm:$0xff] }
 0x325   :  { %7234 = vmatpush2.bf16.msra.mxu0 %v15814_v40  ;;  %v4090_v40 = vld [vmem:[#allocation7 + $0x528] sm:$0xff] }
 0x326   :  { %7285 = vmatprep.subr.bf16.mxu0 %v16063_v32  ;;  %v16023_v32 = vcombine.high %v4198_v34, %v4202_v36  ;;  %v15911_v54 = vcombine.high %v4086_v38, %v4090_v40  ;;  %v4278_v34 = vld [vmem:[#allocation7 + $0xb08] sm:$0xff] }
 0x327   :  { %v4282_v36 = vld [vmem:[#allocation7 + $0xb28] sm:$0xff] }
 0x328   :  { %v3869_v62 = vpop.f32.mrf.mxu0  ;;  %7236 = vmatmul.mubr.bf16.vlgmr.msra.gmra.mxu0 %v17708_v13  ;;  %v3910_v2 = vpop.f32.mrf.mxu1 }
 0x329   :  { %v3870_v16 = vadd.f32 %v3869_v62, %v3829_v52  ;;  %7286 = vmatpush1.bf16.msra.mxu0 %v16062_v39  ;;  %7317 = vmatprep.mubr.bf16.mxu0 %v17721_v45  ;;  %v16015_v39 = vcombine.high %v4190_v46, %v4194_v60  ;;  %v4182_v52 = vld [vmem:[#allocation7 + $0x808] sm:$0xff]  ;;  %v16014_v62 = vcombine.low %v4190_v46, %v4194_v60 }
 0x32a   :  { %v3871_v14 = vpop.f32.mrf.mxu0  ;;  %7287 = vmatprep.subr.bf16.mxu0 %v16055_v50  ;;  %v3912_v20 = vpop.f32.mrf.mxu1  ;;  %v15910_v50 = vcombine.low %v4086_v38, %v4090_v40  ;;  %v4166_v38 = vld [vmem:[#allocation7 + $0x788] sm:$0xff] }
 0x32b   :  { %v3872_v7 = vadd.f32 %v3871_v14, %v3831_v63  ;;  %v3911_v44 = vadd.f32 %v3910_v2, %v3870_v16  ;;  %v4070_v63 = vld [vmem:[#allocation7 + $0x488] sm:$0xff]  ;;  %v16007_v2 = vcombine.high %v4182_v52, %v4186_v53 }
 0x32c   :  { %v3873_v31 = vpop.f32.mrf.mxu0  ;;  %v3914_v9 = vpop.f32.mrf.mxu1  ;;  %v4074_v16 = vld [vmem:[#allocation7 + $0x4a8] sm:$0xff] }
 0x32d   :  { %v3913_v8 = vadd.f32 %v3912_v20, %v3872_v7  ;;  %7288 = vmatpush1.bf16.msra.mxu0 %v16054_v23  ;;  %v17763_v0 = vpack.c.bf16 %v3911_v44, %v3911_v44  ;;  %v4302_v14 = vld [vmem:[#allocation7 + $0xbc8] sm:$0xff]  ;;  %v15895_v7 = vcombine.high %v4070_v63, %v4074_v16  ;;  %v16006_v20 = vcombine.low %v4182_v52, %v4186_v53 }
 0x32e   :  { %v3874_v18 = vpop.f32.mrf.mxu0  ;;  %7289 = vmatprep.subr.bf16.mxu0 %v16047_v3  ;;  %v3915_v21 = vpop.f32.mrf.mxu1  ;;  %v4306_v3 = vld [vmem:[#allocation7 + $0xbe8] sm:$0xff]  ;;  %v15894_v31 = vcombine.low %v4070_v63, %v4074_v16 }
 0x32f   :  { %v17761_v41 = vpack.c.bf16 %v3913_v8, %v3913_v8  ;;  %v16127_v44 = vcombine.high %v4302_v14, %v4306_v3  ;;  %v4294_v8 = vld [vmem:[#allocation7 + $0xb88] sm:$0xff]  ;;  %v16126_v28 = vcombine.low %v4302_v14, %v4306_v3  ;;  %v15886_v21 = vcombine.low %v4062_v4, %v4066_v12 }
 0x330   :  { %v4298_v9 = vld [vmem:[#allocation7 + $0xba8] sm:$0xff] }
 0x331   :  { %7194 = vmatprep.mubr.bf16.mxu1 %v17761_v41  ;;  %7290 = vmatpush1.bf16.msra.mxu0 %v16046_v11  ;;  %v15887_v11 = vcombine.high %v4062_v4, %v4066_v12  ;;  %v4058_v18 = vld [vmem:[#allocation7 + $0x428] sm:$0xff] }
 0x332   :  { %7195 = vmatmul.mubr.bf16.vlgmr.msra.gmra.mxu1 %v17763_v0  ;;  %7291 = vmatprep.subr.bf16.mxu0 %v16039_v19  ;;  %v16119_v19 = vcombine.high %v4294_v8, %v4298_v9  ;;  %v4170_v40 = vld [vmem:[#allocation7 + $0x7a8] sm:$0xff] }
 0x333   :  { %7245 = vmatpush1.bf16.msra.mxu1 %v15934_v57  ;;  %7276 = vmatprep.mubr.bf16.mxu1 %v17689_v47  ;;  %v4078_v57 = vld [vmem:[#allocation7 + $0x4c8] sm:$0xff] }
 0x334   :  { %7246 = vmatprep.subr.bf16.mxu1 %v15927_v25  ;;  %v15903_v56 = vcombine.high %v4078_v57, %v4082_v49  ;;  %v15902_v23 = vcombine.low %v4078_v57, %v4082_v49  ;;  %v15879_v25 = vcombine.high %v4054_v24, %v4058_v18  ;;  %v4270_v46 = vld [vmem:[#allocation7 + $0xac8] sm:$0xff] }
 0x335   :  { %7292 = vmatpush1.bf16.msra.mxu0 %v16038_v26  ;;  %v16118_v26 = vcombine.low %v4294_v8, %v4298_v9  ;;  %v4274_v60 = vld [vmem:[#allocation7 + $0xae8] sm:$0xff] }
 0x336   :  { %7293 = vmatprep.subr.bf16.mxu0 %v16031_v1  ;;  %v16111_v1 = vcombine.high %v4286_v22, %v4290_v61  ;;  %v4158_v57 = vld [vmem:[#allocation7 + $0x748] sm:$0xff] }
 0x337   :  { %7247 = vmatpush1.bf16.msra.mxu1 %v15926_v58  ;;  %v15878_v58 = vcombine.low %v4054_v24, %v4058_v18  ;;  %v4162_v49 = vld [vmem:[#allocation7 + $0x768] sm:$0xff] }
 0x338   :  { %7248 = vmatprep.subr.bf16.mxu1 %v15919_v35  ;;  %v15999_v35 = vcombine.high %v4174_v37, %v4178_v29  ;;  %v4262_v52 = vld [vmem:[#allocation7 + $0xa88] sm:$0xff] }
 0x339   :  { %7294 = vmatpush1.bf16.msra.mxu0 %v16030_v59  ;;  %v16110_v59 = vcombine.low %v4286_v22, %v4290_v61  ;;  %v4266_v53 = vld [vmem:[#allocation7 + $0xaa8] sm:$0xff]  ;;  %v3983_v22 = vld [vmem:[#allocation7 + $0x1d0] sm:$0xff] }
 0x33a   :  { %7295 = vmatprep.subr.bf16.mxu0 %v16023_v32  ;;  %v16103_v32 = vcombine.high %v4278_v34, %v4282_v36  ;;  %v4150_v63 = vld [vmem:[#allocation7 + $0x708] sm:$0xff]  ;;  %v3987_v61 = vld [vmem:[#allocation7 + $0x1f0] sm:$0xff] }
 0x33b   :  { %7249 = vmatpush1.bf16.msra.mxu1 %v15918_v42  ;;  %v15998_v42 = vcombine.low %v4174_v37, %v4178_v29  ;;  %v4154_v16 = vld [vmem:[#allocation7 + $0x728] sm:$0xff] }
 0x33c   :  { %7250 = vmatprep.subr.bf16.mxu1 %v15911_v54  ;;  %v15991_v54 = vcombine.high %v4166_v38, %v4170_v40  ;;  %v4254_v14 = vld [vmem:[#allocation7 + $0xa48] sm:$0xff] }
 0x33d   :  { %7296 = vmatpush1.bf16.msra.mxu0 %v16022_v55  ;;  %v16102_v55 = vcombine.low %v4278_v34, %v4282_v36  ;;  %v4258_v3 = vld [vmem:[#allocation7 + $0xa68] sm:$0xff]  ;;  %v3975_v36 = vld [vmem:[#allocation7 + $0x190] sm:$0xff] }
 0x33e   :  { %7297 = vmatprep.subr.bf16.mxu0 %v16015_v39  ;;  %v16095_v39 = vcombine.high %v4270_v46, %v4274_v60  ;;  %v4142_v4 = vld [vmem:[#allocation7 + $0x6c8] sm:$0xff] }
 0x33f   :  { %7251 = vmatpush1.bf16.msra.mxu1 %v15910_v50  ;;  %v15990_v50 = vcombine.low %v4166_v38, %v4170_v40  ;;  %v4146_v12 = vld [vmem:[#allocation7 + $0x6e8] sm:$0xff]  ;;  %v15808_v40 = vcombine.low %v3983_v22, %v3987_v61 }
 0x340   :  { %7252 = vmatprep.subr.bf16.mxu1 %v15903_v56  ;;  %v15983_v56 = vcombine.high %v4158_v57, %v4162_v49  ;;  %v4246_v8 = vld [vmem:[#allocation7 + $0xa08] sm:$0xff] }
 0x341   :  { %7298 = vmatpush1.bf16.msra.mxu0 %v16014_v62  ;;  %v16094_v62 = vcombine.low %v4270_v46, %v4274_v60  ;;  %v4250_v9 = vld [vmem:[#allocation7 + $0xa28] sm:$0xff] }
 0x342   :  { %7299 = vmatprep.subr.bf16.mxu0 %v16007_v2  ;;  %v16087_v2 = vcombine.high %v4262_v52, %v4266_v53  ;;  %v4134_v24 = vld [vmem:[#allocation7 + $0x688] sm:$0xff] }
 0x343   :  { %7253 = vmatpush1.bf16.msra.mxu1 %v15902_v23  ;;  %v15982_v23 = vcombine.low %v4158_v57, %v4162_v49  ;;  %v4138_v18 = vld [vmem:[#allocation7 + $0x6a8] sm:$0xff]  ;;  %v3971_v57 = vld [vmem:[#allocation7 + $0x170] sm:$0xff] }
 0x344   :  { %7254 = vmatprep.subr.bf16.mxu1 %v15895_v7  ;;  %v15975_v7 = vcombine.high %v4150_v63, %v4154_v16  ;;  %v4126_v37 = vld [vmem:[#allocation7 + $0x648] sm:$0xff]  ;;  %v15958_v34 = vcombine.low %v4134_v24, %v4138_v18 }
 0x345   :  { %7300 = vmatpush1.bf16.msra.mxu0 %v16006_v20  ;;  %v16086_v20 = vcombine.low %v4262_v52, %v4266_v53  ;;  %v4130_v29 = vld [vmem:[#allocation7 + $0x668] sm:$0xff] }
 0x346   :  { %7301 = vmatprep.subr.bf16.mxu0 %v16127_v44  ;;  %v16079_v44 = vcombine.high %v4254_v14, %v4258_v3  ;;  %v15950_v60 = vcombine.low %v4126_v37, %v4130_v29 }
 0x347   :  { %7255 = vmatpush1.bf16.msra.mxu1 %v15894_v31  ;;  %v15974_v31 = vcombine.low %v4150_v63, %v4154_v16 }
 0x348   :  { %7256 = vmatprep.subr.bf16.mxu1 %v15887_v11  ;;  %v15967_v11 = vcombine.high %v4142_v4, %v4146_v12 }
 0x349   :  { %7302 = vmatpush2.bf16.msra.mxu0 %v16126_v28  ;;  %v16078_v28 = vcombine.low %v4254_v14, %v4258_v3 }
 0x34a   :  { %7303 = vmatprep.subr.bf16.mxu0 %v16119_v19  ;;  %v16071_v19 = vcombine.high %v4246_v8, %v4250_v9 }
 0x34b   :  { %7257 = vmatpush1.bf16.msra.mxu1 %v15886_v21  ;;  %v15966_v21 = vcombine.low %v4142_v4, %v4146_v12 }
 0x34c   :  { %7258 = vmatprep.subr.bf16.mxu1 %v15879_v25  ;;  %v15959_v25 = vcombine.high %v4134_v24, %v4138_v18 }
 0x34d   :  { %7304 = vmatpush2.bf16.msra.mxu0 %v16118_v26  ;;  %v16070_v26 = vcombine.low %v4246_v8, %v4250_v9  ;;  %v4358_v9 = vld [vmem:[#allocation7 + $0xd88] sm:$0xff] }
 0x34e   :  { %7305 = vmatprep.subr.bf16.mxu0 %v16111_v1  ;;  %v4437_v1 = vld [vmem:[#allocation13] sm:$0xff] }
 0x34f   :  { %7259 = vmatpush1.bf16.msra.mxu1 %v15878_v58  ;;  %v15809_v58 = vcombine.high %v3983_v22, %v3987_v61  ;;  %v4442_v38 = vrot.slane %v4437_v1, %v17616_v5  ;;  %v3955_v22 = vld [vmem:[#allocation7 + $0xf0] sm:$0xff] }
 0x350   :  { %7260 = vmatprep.subr.bf16.mxu1 %v15999_v35  ;;  %v3979_v35 = vld [vmem:[#allocation7 + $0x1b0] sm:$0xff] }
 0x351   :  { %7306 = vmatpush2.bf16.msra.mxu0 %v16110_v59  ;;  %v15951_v59 = vcombine.high %v4126_v37, %v4130_v29  ;;  %v15801_v46 = vcombine.high %v3975_v36, %v3979_v35  ;;  %v15800_v53 = vcombine.low %v3975_v36, %v3979_v35  ;;  %v4354_v37 = vld [vmem:[#allocation7 + $0xd68] sm:$0xff] }
 0x352   :  { %7307 = vmatprep.subr.bf16.mxu0 %v16103_v32  ;;  %v4118_v32 = vld [vmem:[#allocation7 + $0x608] sm:$0xff] }
 0x353   :  { %7261 = vmatpush2.bf16.msra.mxu1 %v15998_v42  ;;  %v4122_v42 = vld [vmem:[#allocation7 + $0x628] sm:$0xff] }
 0x354   :  { %7262 = vmatprep.subr.bf16.mxu1 %v15991_v54  ;;  %v4446_v54 = vrot.slane %v4437_v1, %v17621_v10  ;;  %v15942_v3 = vcombine.low %v4118_v32, %v4122_v42 }
 0x355   :  { %7308 = vmatpush2.bf16.msra.mxu0 %v16102_v55  ;;  %v3967_v55 = vld [vmem:[#allocation7 + $0x150] sm:$0xff] }
 0x356   :  { %7309 = vmatprep.subr.bf16.mxu0 %v16095_v39  ;;  %v15943_v39 = vcombine.high %v4118_v32, %v4122_v42  ;;  %v15793_v16 = vcombine.high %v3967_v55, %v3971_v57  ;;  %v15792_v8 = vcombine.low %v3967_v55, %v3971_v57  ;;  %v3935_v42 = vld [vmem:[#allocation7 + $0x50] sm:$0xff]  ;;  %v4334_v55 = vld [vmem:[#allocation7 + $0xcc8] sm:$0xff] }
 0x357   :  { %7263 = vmatpush2.bf16.msra.mxu1 %v15990_v50  ;;  %v4338_v57 = vld [vmem:[#allocation7 + $0xce8] sm:$0xff] }
 0x358   :  { %7264 = vmatprep.subr.bf16.mxu1 %v15983_v56  ;;  %v4366_v56 = vld [vmem:[#allocation7 + $0xdc8] sm:$0xff] }
 0x359   :  { %7310 = vmatpush2.bf16.msra.mxu0 %v16094_v62  ;;  %v4370_v62 = vld [vmem:[#allocation7 + $0xde8] sm:$0xff] }
 0x35a   :  { %7311 = vmatprep.subr.bf16.mxu0 %v16087_v2  ;;  %v16191_v12 = vcombine.high %v4366_v56, %v4370_v62 }
 0x35b   :  { %7265 = vmatpush2.bf16.msra.mxu1 %v15982_v23 }
 0x35c   :  { %7266 = vmatprep.subr.bf16.mxu1 %v15975_v7  ;;  %v3959_v7 = vld [vmem:[#allocation7 + $0x110] sm:$0xff] }
 0x35d   :  { %7312 = vmatpush2.bf16.msra.mxu0 %v16086_v20  ;;  %v3963_v20 = vld [vmem:[#allocation7 + $0x130] sm:$0xff] }
 0x35e   :  { %7313 = vmatprep.subr.bf16.mxu0 %v16079_v44  ;;  %v15785_v24 = vcombine.high %v3959_v7, %v3963_v20 }
 0x35f   :  { %7267 = vmatpush2.bf16.msra.mxu1 %v15974_v31 }
 0x360   :  { %7268 = vmatprep.subr.bf16.mxu1 %v15967_v11  ;;  %v4362_v11 = vld [vmem:[#allocation7 + $0xda8] sm:$0xff] }
 0x361   :  { %7314 = vmatpush2.bf16.msra.mxu0 %v16078_v28  ;;  %v16183_v61 = vcombine.high %v4358_v9, %v4362_v11  ;;  %v16182_v1 = vcombine.low %v4358_v9, %v4362_v11  ;;  %v4039_v9 = vld [vmem:[#allocation7 + $0x390] sm:$0xff] }
 0x362   :  { %7315 = vmatprep.subr.bf16.mxu0 %v16071_v19  ;;  %v16190_v19 = vcombine.low %v4366_v56, %v4370_v62  ;;  %v4326_v62 = vld [vmem:[#allocation7 + $0xc88] sm:$0xff]  ;;  %v4043_v11 = vld [vmem:[#allocation7 + $0x3b0] sm:$0xff] }
 0x363   :  { %7269 = vmatpush2.bf16.msra.mxu1 %v15966_v21  ;;  %v3951_v21 = vld [vmem:[#allocation7 + $0xd0] sm:$0xff] }
 0x364   :  { %7270 = vmatprep.subr.bf16.mxu1 %v15959_v25  ;;  %v15784_v25 = vcombine.low %v3959_v7, %v3963_v20  ;;  %v15777_v29 = vcombine.high %v3951_v21, %v3955_v22  ;;  %v15776_v35 = vcombine.low %v3951_v21, %v3955_v22  ;;  %v15865_v21 = vcombine.high %v4039_v9, %v4043_v11 }
 0x365   :  { %7316 = vmatpush2.bf16.msra.mxu0 %v16070_v26  ;;  %v4350_v26 = vld [vmem:[#allocation7 + $0xd48] sm:$0xff] }
 0x366   :  { %7367 = vmatprep.subr.bf16.mxu0 %v15809_v58  ;;  %v3943_v58 = vld [vmem:[#allocation7 + $0x90] sm:$0xff]  ;;  %v16175_v36 = vcombine.high %v4350_v26, %v4354_v37  ;;  %v16174_v32 = vcombine.low %v4350_v26, %v4354_v37  ;;  %v15864_v37 = vcombine.low %v4039_v9, %v4043_v11 }
 0x367   :  { %7271 = vmatpush2.bf16.msra.mxu1 %v15958_v34  ;;  %v3947_v34 = vld [vmem:[#allocation7 + $0xb0] sm:$0xff] }
 0x368   :  { %v7073_v49 = vpop.f32.mrf.mxu0  ;;  %7318 = vmatmul.mubr.bf16.vlgmr.msra.gmra.mxu0 %v17735_v6  ;;  %7272 = vmatprep.subr.bf16.mxu1 %v15951_v59  ;;  %v4342_v59 = vld [vmem:[#allocation7 + $0xd08] sm:$0xff] }
 0x369   :  { %v7074_v50 = vadd.f32 %v7073_v49, %v4442_v38  ;;  %v7114_v52 = vpop.f32.mrf.mxu1  ;;  %7368 = vmatpush1.bf16.msra.mxu0 %v15808_v40  ;;  %7399 = vmatprep.mubr.bf16.mxu0 %v17686_v33  ;;  %v4346_v38 = vld [vmem:[#allocation7 + $0xd28] sm:$0xff]  ;;  %v15769_v40 = vcombine.high %v3943_v58, %v3947_v34 }
 0x36a   :  { %v7075_v63 = vpop.f32.mrf.mxu0  ;;  %7369 = vmatprep.subr.bf16.mxu0 %v15801_v46  ;;  %v3939_v46 = vld [vmem:[#allocation7 + $0x70] sm:$0xff] }
 0x36b   :  { %v17775_v2 = vadd.f32 %v7114_v52, %v7074_v50  ;;  %v7076_v23 = vadd.f32 %v7075_v63, %v4446_v54  ;;  %v7116_v14 = vpop.f32.mrf.mxu1  ;;  %7273 = vmatpush2.bf16.msra.mxu1 %v15950_v60  ;;  %v16167_v60 = vcombine.high %v4342_v59, %v4346_v38  ;;  %v15768_v54 = vcombine.low %v3943_v58, %v3947_v34  ;;  %v3927_v50 = vld [vmem:[#allocation7 + $0x10] sm:$0xff]  ;;  %v4330_v63 = vld [vmem:[#allocation7 + $0xca8] sm:$0xff] }
 0x36c   :  { %v7077_v4 = vpop.f32.mrf.mxu0  ;;  %7274 = vmatprep.subr.bf16.mxu1 %v15943_v39  ;;  %v15761_v49 = vcombine.high %v3935_v42, %v3939_v46  ;;  %v16166_v39 = vcombine.low %v4342_v59, %v4346_v38  ;;  %v3931_v52 = vld [vmem:[#allocation7 + $0x30] sm:$0xff]  ;;  %v15760_v56 = vcombine.low %v3935_v42, %v3939_v46  ;;  %v16151_v7 = vcombine.high %v4326_v62, %v4330_v63 }
 0x36d   :  { %v17777_v44 = vadd.f32 %v7116_v14, %v7076_v23  ;;  %v7118_v31 = vpop.f32.mrf.mxu1  ;;  %7370 = vmatpush1.bf16.msra.mxu0 %v15800_v53  ;;  %v16159_v53 = vcombine.high %v4334_v55, %v4338_v57  ;;  %v16158_v23 = vcombine.low %v4334_v55, %v4338_v57  ;;  %v4047_v14 = vld [vmem:[#allocation7 + $0x3d0] sm:$0xff]  ;;  %v15752_v20 = vcombine.low %v3927_v50, %v3931_v52  ;;  %v4318_v4 = vld [vmem:[#allocation7 + $0xc48] sm:$0xff] }
 0x36e   :  { %v7078_v28 = vpop.f32.mrf.mxu0  ;;  %7371 = vmatprep.subr.bf16.mxu0 %v15793_v16  ;;  %v15753_v16 = vcombine.high %v3927_v50, %v3931_v52 }
 0x36f   :  { %v7119_v18 = vpop.f32.mrf.mxu1  ;;  %7275 = vmatpush2.bf16.msra.mxu1 %v15942_v3  ;;  %v4051_v3 = vld [vmem:[#allocation7 + $0x3f0] sm:$0xff] }
 0x370   :  { %7326 = vmatprep.subr.bf16.mxu1 %v16191_v12  ;;  %v4322_v12 = vld [vmem:[#allocation7 + $0xc68] sm:$0xff]  ;;  %v15873_v31 = vcombine.high %v4047_v14, %v4051_v3 }
 0x371   :  { %7372 = vmatpush1.bf16.msra.mxu0 %v15792_v8  ;;  %v16150_v8 = vcombine.low %v4326_v62, %v4330_v63  ;;  %v16143_v28 = vcombine.high %v4318_v4, %v4322_v12  ;;  %v4310_v18 = vld [vmem:[#allocation7 + $0xc08] sm:$0xff]  ;;  %v16142_v22 = vcombine.low %v4318_v4, %v4322_v12 }
 0x372   :  { %7277 = vmatmul.mubr.bf16.vlgmr.msra.gmra.mxu1 %v17712_v17  ;;  %7373 = vmatprep.subr.bf16.mxu0 %v15785_v24  ;;  %v15872_v24 = vcombine.low %v4047_v14, %v4051_v3 }
 0x373   :  { %7327 = vmatpush1.bf16.msra.mxu1 %v16190_v19  ;;  %7358 = vmatprep.mubr.bf16.mxu1 %v17761_v41  ;;  %v4314_v19 = vld [vmem:[#allocation7 + $0xc28] sm:$0xff] }
 0x374   :  { %7328 = vmatprep.subr.bf16.mxu1 %v16183_v61  ;;  %v4031_v61 = vld [vmem:[#allocation7 + $0x350] sm:$0xff]  ;;  %v16135_v26 = vcombine.high %v4310_v18, %v4314_v19  ;;  %v16134_v34 = vcombine.low %v4310_v18, %v4314_v19 }
 0x375   :  { %7374 = vmatpush1.bf16.msra.mxu0 %v15784_v25  ;;  %v4035_v25 = vld [vmem:[#allocation7 + $0x370] sm:$0xff] }
 0x376   :  { %7375 = vmatprep.subr.bf16.mxu0 %v15777_v29  ;;  %v4430_v29 = vld [vmem:[#allocation7 + $0xfc8] sm:$0xff]  ;;  %v15857_v58 = vcombine.high %v4031_v61, %v4035_v25  ;;  %v15856_v38 = vcombine.low %v4031_v61, %v4035_v25 }
 0x377   :  { %7329 = vmatpush1.bf16.msra.mxu1 %v16182_v1  ;;  %v4434_v1 = vld [vmem:[#allocation7 + $0xfe8] sm:$0xff] }
 0x378   :  { %7330 = vmatprep.subr.bf16.mxu1 %v16175_v36  ;;  %v4023_v36 = vld [vmem:[#allocation7 + $0x310] sm:$0xff]  ;;  %v16255_v59 = vcombine.high %v4430_v29, %v4434_v1  ;;  %v16254_v46 = vcombine.low %v4430_v29, %v4434_v1 }
 0x379   :  { %7376 = vmatpush1.bf16.msra.mxu0 %v15776_v35  ;;  %v4027_v35 = vld [vmem:[#allocation7 + $0x330] sm:$0xff] }
 0x37a   :  { %7377 = vmatprep.subr.bf16.mxu0 %v15769_v40  ;;  %v4422_v40 = vld [vmem:[#allocation7 + $0xf88] sm:$0xff]  ;;  %v15849_v42 = vcombine.high %v4023_v36, %v4027_v35  ;;  %v15848_v57 = vcombine.low %v4023_v36, %v4027_v35 }
 0x37b   :  { %7331 = vmatpush1.bf16.msra.mxu1 %v16174_v32  ;;  %v4426_v32 = vld [vmem:[#allocation7 + $0xfa8] sm:$0xff] }
 0x37c   :  { %7332 = vmatprep.subr.bf16.mxu1 %v16167_v60  ;;  %v4015_v60 = vld [vmem:[#allocation7 + $0x2d0] sm:$0xff]  ;;  %v16247_v55 = vcombine.high %v4422_v40, %v4426_v32  ;;  %v16246_v52 = vcombine.low %v4422_v40, %v4426_v32 }
 0x37d   :  { %7378 = vmatpush1.bf16.msra.mxu0 %v15768_v54  ;;  %v4019_v54 = vld [vmem:[#allocation7 + $0x2f0] sm:$0xff] }
 0x37e   :  { %7379 = vmatprep.subr.bf16.mxu0 %v15761_v49  ;;  %v4414_v49 = vld [vmem:[#allocation7 + $0xf48] sm:$0xff]  ;;  %v15841_v50 = vcombine.high %v4015_v60, %v4019_v54  ;;  %v15840_v63 = vcombine.low %v4015_v60, %v4019_v54 }
 0x37f   :  { %7333 = vmatpush1.bf16.msra.mxu1 %v16166_v39  ;;  %v4418_v39 = vld [vmem:[#allocation7 + $0xf68] sm:$0xff] }
 0x380   :  { %7334 = vmatprep.subr.bf16.mxu1 %v16159_v53  ;;  %v4007_v53 = vld [vmem:[#allocation7 + $0x290] sm:$0xff]  ;;  %v16239_v62 = vcombine.high %v4414_v49, %v4418_v39  ;;  %v16238_v3 = vcombine.low %v4414_v49, %v4418_v39 }
 0x381   :  { %7380 = vmatpush1.bf16.msra.mxu0 %v15760_v56  ;;  %v4011_v56 = vld [vmem:[#allocation7 + $0x2b0] sm:$0xff] }
 0x382   :  { %7381 = vmatprep.subr.bf16.mxu0 %v15753_v16  ;;  %v4406_v16 = vld [vmem:[#allocation7 + $0xf08] sm:$0xff]  ;;  %v15833_v14 = vcombine.high %v4007_v53, %v4011_v56  ;;  %v15832_v12 = vcombine.low %v4007_v53, %v4011_v56  ;;  %v4111_v53 = vld [vmem:[#allocation7 + $0x5d0] sm:$0xff] }
 0x383   :  { %7335 = vmatpush1.bf16.msra.mxu1 %v16158_v23  ;;  %v4410_v23 = vld [vmem:[#allocation7 + $0xf28] sm:$0xff]  ;;  %v4115_v56 = vld [vmem:[#allocation7 + $0x5f0] sm:$0xff] }
 0x384   :  { %7336 = vmatprep.subr.bf16.mxu1 %v16151_v7  ;;  %v3999_v7 = vld [vmem:[#allocation7 + $0x250] sm:$0xff]  ;;  %v16231_v4 = vcombine.high %v4406_v16, %v4410_v23  ;;  %v16230_v11 = vcombine.low %v4406_v16, %v4410_v23 }
 0x385   :  { %7382 = vmatpush1.bf16.msra.mxu0 %v15752_v20  ;;  %v4003_v20 = vld [vmem:[#allocation7 + $0x270] sm:$0xff] }
 0x386   :  { %7383 = vmatprep.subr.bf16.mxu0 %v15873_v31  ;;  %v4398_v31 = vld [vmem:[#allocation7 + $0xec8] sm:$0xff]  ;;  %v15825_v9 = vcombine.high %v3999_v7, %v4003_v20  ;;  %v15824_v19 = vcombine.low %v3999_v7, %v4003_v20 }
 0x387   :  { %7337 = vmatpush1.bf16.msra.mxu1 %v16150_v8  ;;  %v4402_v8 = vld [vmem:[#allocation7 + $0xee8] sm:$0xff] }
 0x388   :  { %7338 = vmatprep.subr.bf16.mxu1 %v16143_v28  ;;  %v3991_v28 = vld [vmem:[#allocation7 + $0x210] sm:$0xff]  ;;  %v16223_v18 = vcombine.high %v4398_v31, %v4402_v8  ;;  %v16222_v25 = vcombine.low %v4398_v31, %v4402_v8 }
 0x389   :  { %7384 = vmatpush2.bf16.msra.mxu0 %v15872_v24  ;;  %v3995_v24 = vld [vmem:[#allocation7 + $0x230] sm:$0xff] }
 0x38a   :  { %7385 = vmatprep.subr.bf16.mxu0 %v15865_v21  ;;  %v4390_v21 = vld [vmem:[#allocation7 + $0xe88] sm:$0xff]  ;;  %v15817_v61 = vcombine.high %v3991_v28, %v3995_v24  ;;  %v15816_v1 = vcombine.low %v3991_v28, %v3995_v24  ;;  %v4211_v28 = vld [vmem:[#allocation7 + $0x8f0] sm:$0xff] }
 0x38b   :  { %7339 = vmatpush1.bf16.msra.mxu1 %v16142_v22  ;;  %v4394_v22 = vld [vmem:[#allocation7 + $0xea8] sm:$0xff] }
 0x38c   :  { %7340 = vmatprep.subr.bf16.mxu1 %v16135_v26  ;;  %v4239_v26 = vld [vmem:[#allocation7 + $0x9d0] sm:$0xff]  ;;  %v16215_v29 = vcombine.high %v4390_v21, %v4394_v22  ;;  %v16214_v35 = vcombine.low %v4390_v21, %v4394_v22 }
 0x38d   :  { %7386 = vmatpush2.bf16.msra.mxu0 %v15864_v37  ;;  %v4243_v37 = vld [vmem:[#allocation7 + $0x9f0] sm:$0xff] }
 0x38e   :  { %7387 = vmatprep.subr.bf16.mxu0 %v15857_v58  ;;  %v4382_v58 = vld [vmem:[#allocation7 + $0xe48] sm:$0xff]  ;;  %v16065_v36 = vcombine.high %v4239_v26, %v4243_v37  ;;  %v16064_v32 = vcombine.low %v4239_v26, %v4243_v37 }
 0x38f   :  { %7341 = vmatpush1.bf16.msra.mxu1 %v16134_v34  ;;  %v4386_v34 = vld [vmem:[#allocation7 + $0xe68] sm:$0xff] }
 0x390   :  { %7342 = vmatprep.subr.bf16.mxu1 %v16255_v59  ;;  %v4231_v59 = vld [vmem:[#allocation7 + $0x990] sm:$0xff]  ;;  %v16207_v40 = vcombine.high %v4382_v58, %v4386_v34  ;;  %v16206_v54 = vcombine.low %v4382_v58, %v4386_v34 }
 0x391   :  { %7388 = vmatpush2.bf16.msra.mxu0 %v15856_v38  ;;  %v4235_v38 = vld [vmem:[#allocation7 + $0x9b0] sm:$0xff] }
 0x392   :  { %7389 = vmatprep.subr.bf16.mxu0 %v15849_v42  ;;  %v4374_v42 = vld [vmem:[#allocation7 + $0xe08] sm:$0xff]  ;;  %v16057_v60 = vcombine.high %v4231_v59, %v4235_v38 }
 0x393   :  { %7343 = vmatpush2.bf16.msra.mxu1 %v16254_v46  ;;  %v4378_v46 = vld [vmem:[#allocation7 + $0xe28] sm:$0xff] }
 0x394   :  { %7344 = vmatprep.subr.bf16.mxu1 %v16247_v55  ;;  %v4223_v55 = vld [vmem:[#allocation7 + $0x950] sm:$0xff]  ;;  %v16199_v39 = vcombine.high %v4374_v42, %v4378_v46  ;;  %v16198_v23 = vcombine.low %v4374_v42, %v4378_v46 }
 0x395   :  { %7390 = vmatpush2.bf16.msra.mxu0 %v15848_v57  ;;  %v4227_v57 = vld [vmem:[#allocation7 + $0x970] sm:$0xff] }
 0x396   :  { %7391 = vmatprep.subr.bf16.mxu0 %v15841_v50  ;;  %v16048_v20 = vcombine.low %v4223_v55, %v4227_v57 }
 0x397   :  { %7345 = vmatpush2.bf16.msra.mxu1 %v16246_v52  ;;  %v16056_v52 = vcombine.low %v4231_v59, %v4235_v38 }
 0x398   :  { %7346 = vmatprep.subr.bf16.mxu1 %v16239_v62 }
 0x399   :  { %7392 = vmatpush2.bf16.msra.mxu0 %v15840_v63  ;;  %v16049_v63 = vcombine.high %v4223_v55, %v4227_v57 }
 0x39a   :  { %7393 = vmatprep.subr.bf16.mxu0 %v15833_v14  ;;  %v4215_v14 = vld [vmem:[#allocation7 + $0x910] sm:$0xff] }
 0x39b   :  { %7347 = vmatpush2.bf16.msra.mxu1 %v16238_v3  ;;  %v4219_v3 = vld [vmem:[#allocation7 + $0x930] sm:$0xff] }
 0x39c   :  { %7348 = vmatprep.subr.bf16.mxu1 %v16231_v4  ;;  %v4103_v4 = vld [vmem:[#allocation7 + $0x590] sm:$0xff]  ;;  %v16041_v8 = vcombine.high %v4215_v14, %v4219_v3  ;;  %v16040_v24 = vcombine.low %v4215_v14, %v4219_v3 }
 0x39d   :  { %7394 = vmatpush2.bf16.msra.mxu0 %v15832_v12  ;;  %v4107_v12 = vld [vmem:[#allocation7 + $0x5b0] sm:$0xff] }
 0x39e   :  { %7395 = vmatprep.subr.bf16.mxu0 %v15825_v9  ;;  %v15936_v9 = vcombine.low %v4111_v53, %v4115_v56  ;;  %v15928_v22 = vcombine.low %v4103_v4, %v4107_v12  ;;  %v4063_v14 = vld [vmem:[#allocation7 + $0x450] sm:$0xff] }
 0x39f   :  { %7349 = vmatpush2.bf16.msra.mxu1 %v16230_v11  ;;  %v4207_v11 = vld [vmem:[#allocation7 + $0x8d0] sm:$0xff] }
 0x3a0   :  { %7350 = vmatprep.subr.bf16.mxu1 %v16223_v18  ;;  %v4095_v18 = vld [vmem:[#allocation7 + $0x550] sm:$0xff]  ;;  %v16033_v21 = vcombine.high %v4207_v11, %v4211_v28  ;;  %v16032_v37 = vcombine.low %v4207_v11, %v4211_v28 }
 0x3a1   :  { %7396 = vmatpush2.bf16.msra.mxu0 %v15824_v19  ;;  %v4099_v19 = vld [vmem:[#allocation7 + $0x570] sm:$0xff] }
 0x3a2   :  { %7397 = vmatprep.subr.bf16.mxu0 %v15817_v61  ;;  %v4199_v61 = vld [vmem:[#allocation7 + $0x890] sm:$0xff]  ;;  %v15921_v26 = vcombine.high %v4095_v18, %v4099_v19  ;;  %v15920_v34 = vcombine.low %v4095_v18, %v4099_v19 }
 0x3a3   :  { %7351 = vmatpush2.bf16.msra.mxu1 %v16222_v25  ;;  %v4203_v25 = vld [vmem:[#allocation7 + $0x8b0] sm:$0xff] }
 0x3a4   :  { %7352 = vmatprep.subr.bf16.mxu1 %v16215_v29  ;;  %v4087_v29 = vld [vmem:[#allocation7 + $0x510] sm:$0xff]  ;;  %v16025_v58 = vcombine.high %v4199_v61, %v4203_v25  ;;  %v16024_v38 = vcombine.low %v4199_v61, %v4203_v25 }
 0x3a5   :  { %7398 = vmatpush2.bf16.msra.mxu0 %v15816_v1  ;;  %v4091_v1 = vld [vmem:[#allocation7 + $0x530] sm:$0xff] }
 0x3a6   :  { %7449 = vmatprep.subr.bf16.mxu0 %v16065_v36  ;;  %v4191_v36 = vld [vmem:[#allocation7 + $0x850] sm:$0xff]  ;;  %v15913_v59 = vcombine.high %v4087_v29, %v4091_v1  ;;  %v15912_v46 = vcombine.low %v4087_v29, %v4091_v1 }
 0x3a7   :  { %7353 = vmatpush2.bf16.msra.mxu1 %v16214_v35  ;;  %v4195_v35 = vld [vmem:[#allocation7 + $0x870] sm:$0xff] }
 0x3a8   :  { %v7155_v49 = vpop.f32.mrf.mxu0  ;;  %7400 = vmatmul.mubr.bf16.vlgmr.msra.gmra.mxu0 %v17708_v13  ;;  %7354 = vmatprep.subr.bf16.mxu1 %v16207_v40  ;;  %v4079_v40 = vld [vmem:[#allocation7 + $0x4d0] sm:$0xff]  ;;  %v16017_v42 = vcombine.high %v4191_v36, %v4195_v35  ;;  %v16016_v57 = vcombine.low %v4191_v36, %v4195_v35 }
 0x3a9   :  { %v17783_v50 = vadd.f32 %v7155_v49, %v17775_v2  ;;  %7450 = vmatpush1.bf16.msra.mxu0 %v16064_v32  ;;  %7481 = vmatprep.mubr.bf16.mxu0 %v17721_v45  ;;  %v15937_v2 = vcombine.high %v4111_v53, %v4115_v56  ;;  %v4083_v32 = vld [vmem:[#allocation7 + $0x4f0] sm:$0xff] }
 0x3aa   :  { %v7157_v62 = vpop.f32.mrf.mxu0  ;;  %7451 = vmatprep.subr.bf16.mxu0 %v16057_v60  ;;  %v4183_v60 = vld [vmem:[#allocation7 + $0x810] sm:$0xff]  ;;  %v15905_v55 = vcombine.high %v4079_v40, %v4083_v32  ;;  %v15904_v53 = vcombine.low %v4079_v40, %v4083_v32 }
 0x3ab   :  { %v17787_v16 = vadd.f32 %v7157_v62, %v17777_v44  ;;  %7355 = vmatpush2.bf16.msra.mxu1 %v16206_v54  ;;  %v15929_v44 = vcombine.high %v4103_v4, %v4107_v12  ;;  %v4187_v54 = vld [vmem:[#allocation7 + $0x830] sm:$0xff] }
 0x3ac   :  { %v7159_v7 = vpop.f32.mrf.mxu0  ;;  %7356 = vmatprep.subr.bf16.mxu1 %v16199_v39  ;;  %v4071_v49 = vld [vmem:[#allocation7 + $0x490] sm:$0xff] }
 0x3ad   :  { %7452 = vmatpush1.bf16.msra.mxu0 %v16056_v52  ;;  %v4075_v39 = vld [vmem:[#allocation7 + $0x4b0] sm:$0xff]  ;;  %v16009_v52 = vcombine.high %v4183_v60, %v4187_v54 }
 0x3ae   :  { %v7160_v31 = vpop.f32.mrf.mxu0  ;;  %7453 = vmatprep.subr.bf16.mxu0 %v16049_v63  ;;  %v4303_v56 = vld [vmem:[#allocation7 + $0xbd0] sm:$0xff]  ;;  %v15897_v63 = vcombine.high %v4071_v49, %v4075_v39 }
 0x3af   :  { %7357 = vmatpush2.bf16.msra.mxu1 %v16198_v23  ;;  %v4307_v62 = vld [vmem:[#allocation7 + $0xbf0] sm:$0xff]  ;;  %v16008_v23 = vcombine.low %v4183_v60, %v4187_v54 }
 0x3b0   :  { %7408 = vmatprep.subr.bf16.mxu1 %v15937_v2  ;;  %v4067_v3 = vld [vmem:[#allocation7 + $0x470] sm:$0xff]  ;;  %v16129_v7 = vcombine.high %v4303_v56, %v4307_v62  ;;  %v15896_v2 = vcombine.low %v4071_v49, %v4075_v39  ;;  %v16128_v31 = vcombine.low %v4303_v56, %v4307_v62 }
 0x3b1   :  { %7454 = vmatpush1.bf16.msra.mxu0 %v16048_v20  ;;  %v4295_v20 = vld [vmem:[#allocation7 + $0xb90] sm:$0xff]  ;;  %v15889_v12 = vcombine.high %v4063_v14, %v4067_v3  ;;  %v15888_v28 = vcombine.low %v4063_v14, %v4067_v3 }
 0x3b2   :  { %7359 = vmatmul.mubr.bf16.vlgmr.msra.gmra.mxu1 %v17763_v0  ;;  %7455 = vmatprep.subr.bf16.mxu0 %v16041_v8  ;;  %v4299_v4 = vld [vmem:[#allocation7 + $0xbb0] sm:$0xff] }
 0x3b3   :  { %7409 = vmatpush1.bf16.msra.mxu1 %v15936_v9  ;;  %7440 = vmatprep.mubr.bf16.mxu1 %v17689_v47  ;;  %v4055_v8 = vld [vmem:[#allocation7 + $0x410] sm:$0xff]  ;;  %v16121_v11 = vcombine.high %v4295_v20, %v4299_v4  ;;  %v16120_v19 = vcombine.low %v4295_v20, %v4299_v4 }
 0x3b4   :  { %7410 = vmatprep.subr.bf16.mxu1 %v15929_v44  ;;  %v4059_v9 = vld [vmem:[#allocation7 + $0x430] sm:$0xff] }
 0x3b5   :  { %7456 = vmatpush1.bf16.msra.mxu0 %v16040_v24  ;;  %v4287_v44 = vld [vmem:[#allocation7 + $0xb50] sm:$0xff]  ;;  %v15881_v18 = vcombine.high %v4055_v8, %v4059_v9  ;;  %v15880_v25 = vcombine.low %v4055_v8, %v4059_v9 }
 0x3b6   :  { %7457 = vmatprep.subr.bf16.mxu0 %v16033_v21  ;;  %v4291_v24 = vld [vmem:[#allocation7 + $0xb70] sm:$0xff] }
 0x3b7   :  { %7411 = vmatpush1.bf16.msra.mxu1 %v15928_v22  ;;  %v4175_v21 = vld [vmem:[#allocation7 + $0x7d0] sm:$0xff]  ;;  %v16113_v61 = vcombine.high %v4287_v44, %v4291_v24  ;;  %v16112_v1 = vcombine.low %v4287_v44, %v4291_v24 }
 0x3b8   :  { %7412 = vmatprep.subr.bf16.mxu1 %v15921_v26  ;;  %v4179_v22 = vld [vmem:[#allocation7 + $0x7f0] sm:$0xff] }
 0x3b9   :  { %7458 = vmatpush1.bf16.msra.mxu0 %v16032_v37  ;;  %v4279_v26 = vld [vmem:[#allocation7 + $0xb10] sm:$0xff]  ;;  %v16001_v29 = vcombine.high %v4175_v21, %v4179_v22  ;;  %v16000_v35 = vcombine.low %v4175_v21, %v4179_v22 }
 0x3ba   :  { %7459 = vmatprep.subr.bf16.mxu0 %v16025_v58  ;;  %v4283_v37 = vld [vmem:[#allocation7 + $0xb30] sm:$0xff] }
 0x3bb   :  { %7413 = vmatpush1.bf16.msra.mxu1 %v15920_v34  ;;  %v4167_v58 = vld [vmem:[#allocation7 + $0x790] sm:$0xff]  ;;  %v16105_v36 = vcombine.high %v4279_v26, %v4283_v37  ;;  %v16104_v32 = vcombine.low %v4279_v26, %v4283_v37 }
 0x3bc   :  { %7414 = vmatprep.subr.bf16.mxu1 %v15913_v59  ;;  %v4171_v34 = vld [vmem:[#allocation7 + $0x7b0] sm:$0xff] }
 0x3bd   :  { %7460 = vmatpush1.bf16.msra.mxu0 %v16024_v38  ;;  %v4271_v59 = vld [vmem:[#allocation7 + $0xad0] sm:$0xff]  ;;  %v15993_v40 = vcombine.high %v4167_v58, %v4171_v34  ;;  %v15992_v54 = vcombine.low %v4167_v58, %v4171_v34 }
 0x3be   :  { %7461 = vmatprep.subr.bf16.mxu0 %v16017_v42  ;;  %v4275_v38 = vld [vmem:[#allocation7 + $0xaf0] sm:$0xff] }
 0x3bf   :  { %7415 = vmatpush1.bf16.msra.mxu1 %v15912_v46  ;;  %v4159_v42 = vld [vmem:[#allocation7 + $0x750] sm:$0xff]  ;;  %v16097_v60 = vcombine.high %v4271_v59, %v4275_v38  ;;  %v16096_v39 = vcombine.low %v4271_v59, %v4275_v38 }
 0x3c0   :  { %7416 = vmatprep.subr.bf16.mxu1 %v15905_v55  ;;  %v4163_v46 = vld [vmem:[#allocation7 + $0x770] sm:$0xff] }
 0x3c1   :  { %7462 = vmatpush1.bf16.msra.mxu0 %v16016_v57  ;;  %v4263_v55 = vld [vmem:[#allocation7 + $0xa90] sm:$0xff]  ;;  %v15985_v49 = vcombine.high %v4159_v42, %v4163_v46  ;;  %v15984_v62 = vcombine.low %v4159_v42, %v4163_v46 }
 0x3c2   :  { %7463 = vmatprep.subr.bf16.mxu0 %v16009_v52  ;;  %v4267_v57 = vld [vmem:[#allocation7 + $0xab0] sm:$0xff] }
 0x3c3   :  { %7417 = vmatpush1.bf16.msra.mxu1 %v15904_v53  ;;  %v4151_v52 = vld [vmem:[#allocation7 + $0x710] sm:$0xff]  ;;  %v16089_v56 = vcombine.high %v4263_v55, %v4267_v57  ;;  %v16088_v3 = vcombine.low %v4263_v55, %v4267_v57 }
 0x3c4   :  { %7418 = vmatprep.subr.bf16.mxu1 %v15897_v63  ;;  %v4155_v53 = vld [vmem:[#allocation7 + $0x730] sm:$0xff] }
 0x3c5   :  { %7464 = vmatpush1.bf16.msra.mxu0 %v16008_v23  ;;  %v4255_v63 = vld [vmem:[#allocation7 + $0xa50] sm:$0xff]  ;;  %v15977_v14 = vcombine.high %v4151_v52, %v4155_v53  ;;  %v15976_v4 = vcombine.low %v4151_v52, %v4155_v53  ;;  %v3960_v52 = vld [vmem:[#allocation7 + $0x118] sm:$0xff] }
 0x3c6   :  { %7465 = vmatprep.subr.bf16.mxu0 %v16129_v7  ;;  %v4259_v23 = vld [vmem:[#allocation7 + $0xa70] sm:$0xff]  ;;  %v3964_v53 = vld [vmem:[#allocation7 + $0x138] sm:$0xff] }
 0x3c7   :  { %7419 = vmatpush1.bf16.msra.mxu1 %v15896_v2  ;;  %v4143_v7 = vld [vmem:[#allocation7 + $0x6d0] sm:$0xff]  ;;  %v16081_v20 = vcombine.high %v4255_v63, %v4259_v23  ;;  %v16080_v9 = vcombine.low %v4255_v63, %v4259_v23 }
 0x3c8   :  { %7420 = vmatprep.subr.bf16.mxu1 %v15889_v12  ;;  %v4147_v2 = vld [vmem:[#allocation7 + $0x6f0] sm:$0xff] }
 0x3c9   :  { %7466 = vmatpush2.bf16.msra.mxu0 %v16128_v31  ;;  %v4247_v12 = vld [vmem:[#allocation7 + $0xa10] sm:$0xff]  ;;  %v15969_v8 = vcombine.high %v4143_v7, %v4147_v2  ;;  %v15968_v24 = vcombine.low %v4143_v7, %v4147_v2  ;;  %v15787_v7 = vcombine.high %v3960_v52, %v3964_v53 }
 0x3ca   :  { %7467 = vmatprep.subr.bf16.mxu0 %v16121_v11  ;;  %v4251_v31 = vld [vmem:[#allocation7 + $0xa30] sm:$0xff] }
 0x3cb   :  { %7421 = vmatpush1.bf16.msra.mxu1 %v15888_v28  ;;  %v4135_v11 = vld [vmem:[#allocation7 + $0x690] sm:$0xff]  ;;  %v16073_v44 = vcombine.high %v4247_v12, %v4251_v31  ;;  %v16072_v22 = vcombine.low %v4247_v12, %v4251_v31  ;;  %v15786_v31 = vcombine.low %v3960_v52, %v3964_v53 }
 0x3cc   :  { %7422 = vmatprep.subr.bf16.mxu1 %v15881_v18  ;;  %v4139_v28 = vld [vmem:[#allocation7 + $0x6b0] sm:$0xff]  ;;  %v3984_v18 = vld [vmem:[#allocation7 + $0x1d8] sm:$0xff] }
 0x3cd   :  { %7468 = vmatpush2.bf16.msra.mxu0 %v16120_v19  ;;  %v3988_v19 = vld [vmem:[#allocation7 + $0x1f8] sm:$0xff]  ;;  %v15961_v21 = vcombine.high %v4135_v11, %v4139_v28  ;;  %v15960_v37 = vcombine.low %v4135_v11, %v4139_v28  ;;  %v4371_v55 = vld [vmem:[#allocation7 + $0xdf0] sm:$0xff] }
 0x3ce   :  { %7469 = vmatprep.subr.bf16.mxu0 %v16113_v61  ;;  %v4127_v61 = vld [vmem:[#allocation7 + $0x650] sm:$0xff]  ;;  %v15811_v26 = vcombine.high %v3984_v18, %v3988_v19  ;;  %v15810_v34 = vcombine.low %v3984_v18, %v3988_v19  ;;  %v3944_v18 = vld [vmem:[#allocation7 + $0x98] sm:$0xff] }
 0x3cf   :  { %7423 = vmatpush1.bf16.msra.mxu1 %v15880_v25  ;;  %v4131_v25 = vld [vmem:[#allocation7 + $0x670] sm:$0xff]  ;;  %v3948_v19 = vld [vmem:[#allocation7 + $0xb8] sm:$0xff] }
 0x3d0   :  { %7424 = vmatprep.subr.bf16.mxu1 %v16001_v29  ;;  %v3976_v29 = vld [vmem:[#allocation7 + $0x198] sm:$0xff]  ;;  %v15953_v58 = vcombine.high %v4127_v61, %v4131_v25  ;;  %v15952_v38 = vcombine.low %v4127_v61, %v4131_v25  ;;  %v4359_v23 = vld [vmem:[#allocation7 + $0xd90] sm:$0xff] }
 0x3d1   :  { %7470 = vmatpush2.bf16.msra.mxu0 %v16112_v1  ;;  %v3980_v1 = vld [vmem:[#allocation7 + $0x1b8] sm:$0xff] }
 0x3d2   :  { %7471 = vmatprep.subr.bf16.mxu0 %v16105_v36  ;;  %v4119_v36 = vld [vmem:[#allocation7 + $0x610] sm:$0xff]  ;;  %v15803_v59 = vcombine.high %v3976_v29, %v3980_v1 }
 0x3d3   :  { %7425 = vmatpush2.bf16.msra.mxu1 %v16000_v35  ;;  %v4123_v35 = vld [vmem:[#allocation7 + $0x630] sm:$0xff] }
 0x3d4   :  { %7426 = vmatprep.subr.bf16.mxu1 %v15993_v40  ;;  %v3968_v40 = vld [vmem:[#allocation7 + $0x158] sm:$0xff]  ;;  %v15945_v46 = vcombine.high %v4119_v36, %v4123_v35 }
 0x3d5   :  { %7472 = vmatpush2.bf16.msra.mxu0 %v16104_v32  ;;  %v3972_v32 = vld [vmem:[#allocation7 + $0x178] sm:$0xff] }
 0x3d6   :  { %7473 = vmatprep.subr.bf16.mxu0 %v16097_v60  ;;  %v15802_v60 = vcombine.low %v3976_v29, %v3980_v1  ;;  %v15794_v63 = vcombine.low %v3968_v40, %v3972_v32 }
 0x3d7   :  { %7427 = vmatpush2.bf16.msra.mxu1 %v15992_v54  ;;  %v4367_v54 = vld [vmem:[#allocation7 + $0xdd0] sm:$0xff] }
 0x3d8   :  { %7428 = vmatprep.subr.bf16.mxu1 %v15985_v49  ;;  %v15795_v49 = vcombine.high %v3968_v40, %v3972_v32  ;;  %v16192_v2 = vcombine.low %v4367_v54, %v4371_v55  ;;  %v4339_v40 = vld [vmem:[#allocation7 + $0xcf0] sm:$0xff] }
 0x3d9   :  { %7474 = vmatpush2.bf16.msra.mxu0 %v16096_v39  ;;  %v15944_v39 = vcombine.low %v4119_v36, %v4123_v35 }
 0x3da   :  { %7475 = vmatprep.subr.bf16.mxu0 %v16089_v56 }
 0x3db   :  { %7429 = vmatpush2.bf16.msra.mxu1 %v15984_v62  ;;  %v16193_v62 = vcombine.high %v4367_v54, %v4371_v55 }
 0x3dc   :  { %7430 = vmatprep.subr.bf16.mxu1 %v15977_v14  ;;  %v4363_v14 = vld [vmem:[#allocation7 + $0xdb0] sm:$0xff] }
 0x3dd   :  { %7476 = vmatpush2.bf16.msra.mxu0 %v16088_v3  ;;  %v16185_v12 = vcombine.high %v4359_v23, %v4363_v14 }
 0x3de   :  { %7477 = vmatprep.subr.bf16.mxu0 %v16081_v20  ;;  %v3952_v20 = vld [vmem:[#allocation7 + $0xd8] sm:$0xff] }
 0x3df   :  { %7431 = vmatpush2.bf16.msra.mxu1 %v15976_v4  ;;  %v3956_v4 = vld [vmem:[#allocation7 + $0xf8] sm:$0xff] }
 0x3e0   :  { %7432 = vmatprep.subr.bf16.mxu1 %v15969_v8  ;;  %v4351_v8 = vld [vmem:[#allocation7 + $0xd50] sm:$0xff]  ;;  %v15779_v28 = vcombine.high %v3952_v20, %v3956_v4  ;;  %v15778_v25 = vcombine.low %v3952_v20, %v3956_v4  ;;  %v4040_v20 = vld [vmem:[#allocation7 + $0x398] sm:$0xff] }
 0x3e1   :  { %7478 = vmatpush2.bf16.msra.mxu0 %v16080_v9  ;;  %v4355_v9 = vld [vmem:[#allocation7 + $0xd70] sm:$0xff]  ;;  %v4044_v4 = vld [vmem:[#allocation7 + $0x3b8] sm:$0xff] }
 0x3e2   :  { %7479 = vmatprep.subr.bf16.mxu0 %v16073_v44  ;;  %v16176_v1 = vcombine.low %v4351_v8, %v4355_v9 }
 0x3e3   :  { %7433 = vmatpush2.bf16.msra.mxu1 %v15968_v24  ;;  %v16184_v24 = vcombine.low %v4359_v23, %v4363_v14  ;;  %v4319_v14 = vld [vmem:[#allocation7 + $0xc50] sm:$0xff] }
 0x3e4   :  { %7434 = vmatprep.subr.bf16.mxu1 %v15961_v21 }
 0x3e5   :  { %7480 = vmatpush2.bf16.msra.mxu0 %v16072_v22  ;;  %v16177_v22 = vcombine.high %v4351_v8, %v4355_v9  ;;  %v4311_v8 = vld [vmem:[#allocation7 + $0xc10] sm:$0xff] }
 0x3e6   :  { %7531 = vmatprep.subr.bf16.mxu0 %v15811_v26  ;;  %v4343_v26 = vld [vmem:[#allocation7 + $0xd10] sm:$0xff] }
 0x3e7   :  { %7435 = vmatpush2.bf16.msra.mxu1 %v15960_v37  ;;  %v4347_v37 = vld [vmem:[#allocation7 + $0xd30] sm:$0xff] }
 0x3e8   :  { %v17791_v42 = vpop.f32.mrf.mxu0  ;;  %7482 = vmatmul.mubr.bf16.vlgmr.msra.gmra.mxu0 %v17735_v6  ;;  %7436 = vmatprep.subr.bf16.mxu1 %v15953_v58  ;;  %v3936_v58 = vld [vmem:[#allocation7 + $0x58] sm:$0xff]  ;;  %v16169_v35 = vcombine.high %v4343_v26, %v4347_v37  ;;  %v16168_v32 = vcombine.low %v4343_v26, %v4347_v37  ;;  %v4315_v9 = vld [vmem:[#allocation7 + $0xc30] sm:$0xff] }
 0x3e9   :  { %7532 = vmatpush1.bf16.msra.mxu0 %v15810_v34  ;;  %7563 = vmatprep.mubr.bf16.mxu0 %v17686_v33  ;;  %v3940_v34 = vld [vmem:[#allocation7 + $0x78] sm:$0xff]  ;;  %v16136_v37 = vcombine.low %v4311_v8, %v4315_v9 }
 0x3ea   :  { %v17795_v57 = vpop.f32.mrf.mxu0  ;;  %7533 = vmatprep.subr.bf16.mxu0 %v15803_v59  ;;  %v15770_v59 = vcombine.low %v3944_v18, %v3948_v19  ;;  %v15762_v55 = vcombine.low %v3936_v58, %v3940_v34 }
 0x3eb   :  { %7437 = vmatpush2.bf16.msra.mxu1 %v15952_v38  ;;  %v4335_v38 = vld [vmem:[#allocation7 + $0xcd0] sm:$0xff] }
 0x3ec   :  { %v7241_v56 = vpop.f32.mrf.mxu0  ;;  %7438 = vmatprep.subr.bf16.mxu1 %v15945_v46  ;;  %v3928_v46 = vld [vmem:[#allocation7 + $0x18] sm:$0xff]  ;;  %v16161_v54 = vcombine.high %v4335_v38, %v4339_v40  ;;  %v16160_v53 = vcombine.low %v4335_v38, %v4339_v40 }
 0x3ed   :  { %7534 = vmatpush1.bf16.msra.mxu0 %v15802_v60  ;;  %v3932_v60 = vld [vmem:[#allocation7 + $0x38] sm:$0xff] }
 0x3ee   :  { %v7242_v3 = vpop.f32.mrf.mxu0  ;;  %7535 = vmatprep.subr.bf16.mxu0 %v15795_v49  ;;  %v4327_v49 = vld [vmem:[#allocation7 + $0xc90] sm:$0xff]  ;;  %v15755_v52 = vcombine.high %v3928_v46, %v3932_v60  ;;  %v4048_v56 = vld [vmem:[#allocation7 + $0x3d8] sm:$0xff]  ;;  %v15754_v23 = vcombine.low %v3928_v46, %v3932_v60 }
 0x3ef   :  { %7439 = vmatpush2.bf16.msra.mxu1 %v15944_v39  ;;  %v4331_v39 = vld [vmem:[#allocation7 + $0xcb0] sm:$0xff]  ;;  %v4016_v38 = vld [vmem:[#allocation7 + $0x2d8] sm:$0xff] }
 0x3f0   :  { %7490 = vmatprep.subr.bf16.mxu1 %v16193_v62  ;;  %v4052_v62 = vld [vmem:[#allocation7 + $0x3f8] sm:$0xff]  ;;  %v4323_v3 = vld [vmem:[#allocation7 + $0xc70] sm:$0xff] }
 0x3f1   :  { %7536 = vmatpush1.bf16.msra.mxu0 %v15794_v63  ;;  %v16153_v63 = vcombine.high %v4327_v49, %v4331_v39  ;;  %v4020_v40 = vld [vmem:[#allocation7 + $0x2f8] sm:$0xff]  ;;  %v4415_v46 = vld [vmem:[#allocation7 + $0xf50] sm:$0xff] }
 0x3f2   :  { %7441 = vmatmul.mubr.bf16.vlgmr.msra.gmra.mxu1 %v17712_v17  ;;  %v7196_v11 = vpop.f32.mrf.mxu1  ;;  %7537 = vmatprep.subr.bf16.mxu0 %v15787_v7  ;;  %v15875_v7 = vcombine.high %v4048_v56, %v4052_v62  ;;  %v4419_v60 = vld [vmem:[#allocation7 + $0xf70] sm:$0xff] }
 0x3f3   :  { %v17799_v44 = vadd.f32 %v7196_v11, %v17783_v50  ;;  %7491 = vmatpush1.bf16.msra.mxu1 %v16192_v2  ;;  %7522 = vmatprep.mubr.bf16.mxu1 %v17761_v41  ;;  %v15771_v50 = vcombine.high %v3944_v18, %v3948_v19  ;;  %v16152_v2 = vcombine.low %v4327_v49, %v4331_v39  ;;  %v4036_v18 = vld [vmem:[#allocation7 + $0x378] sm:$0xff] }
 0x3f4   :  { %v7198_v21 = vpop.f32.mrf.mxu1  ;;  %7492 = vmatprep.subr.bf16.mxu1 %v16185_v12  ;;  %v16145_v12 = vcombine.high %v4319_v14, %v4323_v3  ;;  %v15867_v11 = vcombine.high %v4040_v20, %v4044_v4  ;;  %v16137_v19 = vcombine.high %v4311_v8, %v4315_v9  ;;  %v4008_v49 = vld [vmem:[#allocation7 + $0x298] sm:$0xff] }
 0x3f5   :  { %v17803_v61 = vadd.f32 %v7198_v21, %v17787_v16  ;;  %7538 = vmatpush1.bf16.msra.mxu0 %v15786_v31  ;;  %v15763_v16 = vcombine.high %v3936_v58, %v3940_v34  ;;  %v15874_v31 = vcombine.low %v4048_v56, %v4052_v62  ;;  %v15866_v21 = vcombine.low %v4040_v20, %v4044_v4  ;;  %v4423_v34 = vld [vmem:[#allocation7 + $0xf90] sm:$0xff]  ;;  %v4012_v39 = vld [vmem:[#allocation7 + $0x2b8] sm:$0xff] }
 0x3f6   :  { %v7200_v29 = vpop.f32.mrf.mxu1  ;;  %7539 = vmatprep.subr.bf16.mxu0 %v15779_v28  ;;  %v16144_v28 = vcombine.low %v4319_v14, %v4323_v3  ;;  %v4407_v56 = vld [vmem:[#allocation7 + $0xf10] sm:$0xff]  ;;  %v4000_v14 = vld [vmem:[#allocation7 + $0x258] sm:$0xff] }
 0x3f7   :  { %7493 = vmatpush1.bf16.msra.mxu1 %v16184_v24  ;;  %v4032_v24 = vld [vmem:[#allocation7 + $0x358] sm:$0xff]  ;;  %v4411_v62 = vld [vmem:[#allocation7 + $0xf30] sm:$0xff] }
 0x3f8   :  { %v7201_v36 = vpop.f32.mrf.mxu1  ;;  %7494 = vmatprep.subr.bf16.mxu1 %v16177_v22  ;;  %v4431_v22 = vld [vmem:[#allocation7 + $0xfd0] sm:$0xff]  ;;  %v15859_v26 = vcombine.high %v4032_v24, %v4036_v18  ;;  %v4024_v29 = vld [vmem:[#allocation7 + $0x318] sm:$0xff]  ;;  %v15858_v58 = vcombine.low %v4032_v24, %v4036_v18 }
 0x3f9   :  { %7540 = vmatpush1.bf16.msra.mxu0 %v15778_v25  ;;  %v4435_v25 = vld [vmem:[#allocation7 + $0xff0] sm:$0xff]  ;;  %v4004_v3 = vld [vmem:[#allocation7 + $0x278] sm:$0xff] }
 0x3fa   :  { %7541 = vmatprep.subr.bf16.mxu0 %v15771_v50  ;;  %v4028_v50 = vld [vmem:[#allocation7 + $0x338] sm:$0xff]  ;;  %v4427_v36 = vld [vmem:[#allocation7 + $0xfb0] sm:$0xff] }
 0x3fb   :  { %7495 = vmatpush1.bf16.msra.mxu1 %v16176_v1  ;;  %v16257_v1 = vcombine.high %v4431_v22, %v4435_v25  ;;  %v4399_v20 = vld [vmem:[#allocation7 + $0xed0] sm:$0xff]  ;;  %v3992_v8 = vld [vmem:[#allocation7 + $0x218] sm:$0xff] }
 0x3fc   :  { %7496 = vmatprep.subr.bf16.mxu1 %v16169_v35  ;;  %v15851_v35 = vcombine.high %v4024_v29, %v4028_v50  ;;  %v4403_v4 = vld [vmem:[#allocation7 + $0xef0] sm:$0xff]  ;;  %v3996_v9 = vld [vmem:[#allocation7 + $0x238] sm:$0xff] }
 0x3fd   :  { %7542 = vmatpush1.bf16.msra.mxu0 %v15770_v59  ;;  %v16256_v59 = vcombine.low %v4431_v22, %v4435_v25  ;;  %v4391_v24 = vld [vmem:[#allocation7 + $0xe90] sm:$0xff]  ;;  %v4240_v22 = vld [vmem:[#allocation7 + $0x9d8] sm:$0xff] }
 0x3fe   :  { %7543 = vmatprep.subr.bf16.mxu0 %v15763_v16  ;;  %v16249_v16 = vcombine.high %v4423_v34, %v4427_v36  ;;  %v4395_v18 = vld [vmem:[#allocation7 + $0xeb0] sm:$0xff]  ;;  %v4244_v25 = vld [vmem:[#allocation7 + $0x9f8] sm:$0xff] }
 0x3ff   :  { %7497 = vmatpush1.bf16.msra.mxu1 %v16168_v32  ;;  %v15850_v32 = vcombine.low %v4024_v29, %v4028_v50  ;;  %v4383_v29 = vld [vmem:[#allocation7 + $0xe50] sm:$0xff] }
 0x400   :  { %7498 = vmatprep.subr.bf16.mxu1 %v16161_v54  ;;  %v15843_v54 = vcombine.high %v4016_v38, %v4020_v40  ;;  %v4387_v50 = vld [vmem:[#allocation7 + $0xe70] sm:$0xff] }
 0x401   :  { %7544 = vmatpush1.bf16.msra.mxu0 %v15762_v55  ;;  %v16248_v55 = vcombine.low %v4423_v34, %v4427_v36  ;;  %v4232_v34 = vld [vmem:[#allocation7 + $0x998] sm:$0xff] }
 0x402   :  { %7545 = vmatprep.subr.bf16.mxu0 %v15755_v52  ;;  %v16241_v52 = vcombine.high %v4415_v46, %v4419_v60  ;;  %v4236_v36 = vld [vmem:[#allocation7 + $0x9b8] sm:$0xff] }
 0x403   :  { %7499 = vmatpush1.bf16.msra.mxu1 %v16160_v53  ;;  %v15842_v53 = vcombine.low %v4016_v38, %v4020_v40  ;;  %v4375_v38 = vld [vmem:[#allocation7 + $0xe10] sm:$0xff] }
 0x404   :  { %7500 = vmatprep.subr.bf16.mxu1 %v16153_v63  ;;  %v15835_v63 = vcombine.high %v4008_v49, %v4012_v39  ;;  %v4379_v40 = vld [vmem:[#allocation7 + $0xe30] sm:$0xff] }
 0x405   :  { %7546 = vmatpush1.bf16.msra.mxu0 %v15754_v23  ;;  %v16240_v23 = vcombine.low %v4415_v46, %v4419_v60  ;;  %v4224_v46 = vld [vmem:[#allocation7 + $0x958] sm:$0xff] }
 0x406   :  { %7547 = vmatprep.subr.bf16.mxu0 %v15875_v7  ;;  %v16233_v7 = vcombine.high %v4407_v56, %v4411_v62  ;;  %v4228_v60 = vld [vmem:[#allocation7 + $0x978] sm:$0xff] }
 0x407   :  { %7501 = vmatpush1.bf16.msra.mxu1 %v16152_v2  ;;  %v15834_v2 = vcombine.low %v4008_v49, %v4012_v39  ;;  %v16058_v49 = vcombine.low %v4232_v34, %v4236_v36  ;;  %v4112_v39 = vld [vmem:[#allocation7 + $0x5d8] sm:$0xff] }
 0x408   :  { %7502 = vmatprep.subr.bf16.mxu1 %v16145_v12  ;;  %v15827_v12 = vcombine.high %v4000_v14, %v4004_v3 }
 0x409   :  { %7548 = vmatpush2.bf16.msra.mxu0 %v15874_v31  ;;  %v16232_v31 = vcombine.low %v4407_v56, %v4411_v62  ;;  %v16051_v56 = vcombine.high %v4224_v46, %v4228_v60  ;;  %v16200_v62 = vcombine.low %v4375_v38, %v4379_v40 }
 0x40a   :  { %7549 = vmatprep.subr.bf16.mxu0 %v15867_v11  ;;  %v16225_v11 = vcombine.high %v4399_v20, %v4403_v4 }
 0x40b   :  { %7503 = vmatpush1.bf16.msra.mxu1 %v16144_v28  ;;  %v15826_v28 = vcombine.low %v4000_v14, %v4004_v3 }
 0x40c   :  { %7504 = vmatprep.subr.bf16.mxu1 %v16137_v19  ;;  %v15819_v19 = vcombine.high %v3992_v8, %v3996_v9 }
 0x40d   :  { %7550 = vmatpush2.bf16.msra.mxu0 %v15866_v21  ;;  %v16224_v21 = vcombine.low %v4399_v20, %v4403_v4  ;;  %v16050_v20 = vcombine.low %v4224_v46, %v4228_v60  ;;  %v4104_v4 = vld [vmem:[#allocation7 + $0x598] sm:$0xff] }
 0x40e   :  { %7551 = vmatprep.subr.bf16.mxu0 %v15859_v26  ;;  %v16217_v26 = vcombine.high %v4391_v24, %v4395_v18  ;;  %v4192_v60 = vld [vmem:[#allocation7 + $0x858] sm:$0xff] }
 0x40f   :  { %7505 = vmatpush1.bf16.msra.mxu1 %v16136_v37  ;;  %v15818_v37 = vcombine.low %v3992_v8, %v3996_v9 }
 0x410   :  { %7506 = vmatprep.subr.bf16.mxu1 %v16257_v1  ;;  %v16067_v1 = vcombine.high %v4240_v22, %v4244_v25 }
 0x411   :  { %7552 = vmatpush2.bf16.msra.mxu0 %v15858_v58  ;;  %v16216_v58 = vcombine.low %v4391_v24, %v4395_v18  ;;  %v4212_v24 = vld [vmem:[#allocation7 + $0x8f8] sm:$0xff] }
 0x412   :  { %7553 = vmatprep.subr.bf16.mxu0 %v15851_v35  ;;  %v16209_v35 = vcombine.high %v4383_v29, %v4387_v50 }
 0x413   :  { %7507 = vmatpush2.bf16.msra.mxu1 %v16256_v59  ;;  %v16066_v59 = vcombine.low %v4240_v22, %v4244_v25  ;;  %v4096_v22 = vld [vmem:[#allocation7 + $0x558] sm:$0xff] }
 0x414   :  { %7508 = vmatprep.subr.bf16.mxu1 %v16249_v16  ;;  %v16059_v16 = vcombine.high %v4232_v34, %v4236_v36  ;;  %v4100_v25 = vld [vmem:[#allocation7 + $0x578] sm:$0xff] }
 0x415   :  { %7554 = vmatpush2.bf16.msra.mxu0 %v15850_v32  ;;  %v16208_v32 = vcombine.low %v4383_v29, %v4387_v50  ;;  %v4204_v34 = vld [vmem:[#allocation7 + $0x8b8] sm:$0xff]  ;;  %v15922_v46 = vcombine.low %v4096_v22, %v4100_v25 }
 0x416   :  { %7555 = vmatprep.subr.bf16.mxu0 %v15843_v54 }
 0x417   :  { %7509 = vmatpush2.bf16.msra.mxu1 %v16248_v55  ;;  %v16201_v55 = vcombine.high %v4375_v38, %v4379_v40  ;;  %v4088_v38 = vld [vmem:[#allocation7 + $0x518] sm:$0xff] }
 0x418   :  { %7510 = vmatprep.subr.bf16.mxu1 %v16241_v52  ;;  %v4116_v52 = vld [vmem:[#allocation7 + $0x5f8] sm:$0xff] }
 0x419   :  { %7556 = vmatpush2.bf16.msra.mxu0 %v15842_v53  ;;  %v15939_v3 = vcombine.high %v4112_v39, %v4116_v52  ;;  %v4092_v40 = vld [vmem:[#allocation7 + $0x538] sm:$0xff] }
 0x41a   :  { %7557 = vmatprep.subr.bf16.mxu0 %v15835_v63  ;;  %v4216_v63 = vld [vmem:[#allocation7 + $0x918] sm:$0xff] }
 0x41b   :  { %7511 = vmatpush2.bf16.msra.mxu1 %v16240_v23  ;;  %v4220_v23 = vld [vmem:[#allocation7 + $0x938] sm:$0xff] }
 0x41c   :  { %7512 = vmatprep.subr.bf16.mxu1 %v16233_v7  ;;  %v17807_v7 = vld [vmem:[#allocation13] sm:$0xff]  ;;  %v16043_v8 = vcombine.high %v4216_v63, %v4220_v23 }
 0x41d   :  { %7558 = vmatpush2.bf16.msra.mxu0 %v15834_v2  ;;  %v4450_v2 = vrot.slane %v17807_v7, %v17646_v43  ;;  %v4454_v9 = vrot.slane %v17807_v7, %v17649_v48 }
 0x41e   :  { %7559 = vmatprep.subr.bf16.mxu0 %v15827_v12  ;;  %v4108_v12 = vld [vmem:[#allocation7 + $0x5b8] sm:$0xff] }
 0x41f   :  { %7513 = vmatpush2.bf16.msra.mxu1 %v16232_v31  ;;  %v15931_v18 = vcombine.high %v4104_v4, %v4108_v12  ;;  %v7240_v29 = vadd.f32 %v17795_v57, %v4454_v9  ;;  %v4308_v9 = vld [vmem:[#allocation7 + $0xbf8] sm:$0xff] }
 0x420   :  { %7514 = vmatprep.subr.bf16.mxu1 %v16225_v11  ;;  %v15938_v11 = vcombine.low %v4112_v39, %v4116_v52  ;;  %v15915_v52 = vcombine.high %v4088_v38, %v4092_v40 }
 0x421   :  { %7560 = vmatpush2.bf16.msra.mxu0 %v15826_v28  ;;  %v4208_v28 = vld [vmem:[#allocation7 + $0x8d8] sm:$0xff] }
 0x422   :  { %7561 = vmatprep.subr.bf16.mxu0 %v15819_v19  ;;  %v7238_v19 = vadd.f32 %v17791_v42, %v4450_v2  ;;  %v15923_v42 = vcombine.high %v4096_v22, %v4100_v25  ;;  %v4296_v22 = vld [vmem:[#allocation7 + $0xb98] sm:$0xff] }
 0x423   :  { %7515 = vmatpush2.bf16.msra.mxu1 %v16224_v21  ;;  %v16042_v21 = vcombine.low %v4216_v63, %v4220_v23  ;;  %v4084_v63 = vld [vmem:[#allocation7 + $0x4f8] sm:$0xff] }
 0x424   :  { %7516 = vmatprep.subr.bf16.mxu1 %v16217_v26  ;;  %v4300_v25 = vld [vmem:[#allocation7 + $0xbb8] sm:$0xff] }
 0x425   :  { %7562 = vmatpush2.bf16.msra.mxu0 %v15818_v37  ;;  %v16035_v37 = vcombine.high %v4208_v28, %v4212_v24 }
 0x426   :  { %7613 = vmatprep.subr.bf16.mxu0 %v16067_v1  ;;  %v15930_v1 = vcombine.low %v4104_v4, %v4108_v12  ;;  %v4072_v4 = vld [vmem:[#allocation7 + $0x498] sm:$0xff] }
 0x427   :  { %7517 = vmatpush2.bf16.msra.mxu1 %v16216_v58  ;;  %v4200_v58 = vld [vmem:[#allocation7 + $0x898] sm:$0xff] }
 0x428   :  { %v7319_v54 = vpop.f32.mrf.mxu0  ;;  %7564 = vmatmul.mubr.bf16.vlgmr.msra.gmra.mxu0 %v17708_v13  ;;  %7518 = vmatprep.subr.bf16.mxu1 %v16209_v35  ;;  %v16027_v57 = vcombine.high %v4200_v58, %v4204_v34 }
 0x429   :  { %7614 = vmatpush1.bf16.msra.mxu0 %v16066_v59  ;;  %7645 = vmatprep.mubr.bf16.mxu0 %v17721_v45  ;;  %v16034_v59 = vcombine.low %v4208_v28, %v4212_v24  ;;  %v4064_v24 = vld [vmem:[#allocation7 + $0x458] sm:$0xff] }
 0x42a   :  { %v7321_v53 = vpop.f32.mrf.mxu0  ;;  %7615 = vmatprep.subr.bf16.mxu0 %v16059_v16 }
 0x42b   :  { %7519 = vmatpush2.bf16.msra.mxu1 %v16208_v32 }
 0x42c   :  { %v7323_v14 = vpop.f32.mrf.mxu0  ;;  %7520 = vmatprep.subr.bf16.mxu1 %v16201_v55  ;;  %v4196_v55 = vld [vmem:[#allocation7 + $0x878] sm:$0xff] }
 0x42d   :  { %7616 = vmatpush1.bf16.msra.mxu0 %v16058_v49  ;;  %v16019_v23 = vcombine.high %v4192_v60, %v4196_v55  ;;  %v4184_v14 = vld [vmem:[#allocation7 + $0x818] sm:$0xff] }
 0x42e   :  { %v7324_v31 = vpop.f32.mrf.mxu0  ;;  %7617 = vmatprep.subr.bf16.mxu0 %v16051_v56  ;;  %v16026_v56 = vcombine.low %v4200_v58, %v4204_v34  ;;  %v4288_v34 = vld [vmem:[#allocation7 + $0xb58] sm:$0xff] }
 0x42f   :  { %7521 = vmatpush2.bf16.msra.mxu1 %v16200_v62  ;;  %v4080_v62 = vld [vmem:[#allocation7 + $0x4d8] sm:$0xff] }
 0x430   :  { %7572 = vmatprep.subr.bf16.mxu1 %v15939_v3  ;;  %v4188_v3 = vld [vmem:[#allocation7 + $0x838] sm:$0xff]  ;;  %v15907_v2 = vcombine.high %v4080_v62, %v4084_v63  ;;  %v15906_v31 = vcombine.low %v4080_v62, %v4084_v63 }
 0x431   :  { %7618 = vmatpush1.bf16.msra.mxu0 %v16050_v20  ;;  %v16018_v20 = vcombine.low %v4192_v60, %v4196_v55  ;;  %v16011_v12 = vcombine.high %v4184_v14, %v4188_v3  ;;  %v16010_v28 = vcombine.low %v4184_v14, %v4188_v3  ;;  %v4272_v63 = vld [vmem:[#allocation7 + $0xad8] sm:$0xff] }
 0x432   :  { %v7278_v26 = vpop.f32.mrf.mxu1  ;;  %7523 = vmatmul.mubr.bf16.vlgmr.msra.gmra.mxu1 %v17763_v0  ;;  %7619 = vmatprep.subr.bf16.mxu0 %v16043_v8  ;;  %v4304_v8 = vld [vmem:[#allocation7 + $0xbd8] sm:$0xff] }
 0x433   :  { %v7279_v50 = vadd.f32 %v7278_v26, %v7238_v19  ;;  %7573 = vmatpush1.bf16.msra.mxu1 %v15938_v11  ;;  %7604 = vmatprep.mubr.bf16.mxu1 %v17689_v47  ;;  %v16131_v19 = vcombine.high %v4304_v8, %v4308_v9  ;;  %v4160_v3 = vld [vmem:[#allocation7 + $0x758] sm:$0xff] }
 0x434   :  { %v7280_v36 = vpop.f32.mrf.mxu1  ;;  %7574 = vmatprep.subr.bf16.mxu1 %v15931_v18  ;;  %v4068_v18 = vld [vmem:[#allocation7 + $0x478] sm:$0xff] }
 0x435   :  { %v7281_v35 = vadd.f32 %v7280_v36, %v7240_v29  ;;  %7620 = vmatpush1.bf16.msra.mxu0 %v16042_v21  ;;  %v17817_v16 = vadd.f32 %v7319_v54, %v7279_v50  ;;  %v15914_v54 = vcombine.low %v4088_v38, %v4092_v40  ;;  %v15891_v26 = vcombine.high %v4064_v24, %v4068_v18  ;;  %v4056_v29 = vld [vmem:[#allocation7 + $0x418] sm:$0xff] }
 0x436   :  { %v7282_v32 = vpop.f32.mrf.mxu1  ;;  %7621 = vmatprep.subr.bf16.mxu0 %v16035_v37  ;;  %v16130_v37 = vcombine.low %v4304_v8, %v4308_v9  ;;  %v4060_v50 = vld [vmem:[#allocation7 + $0x438] sm:$0xff]  ;;  %v15890_v58 = vcombine.low %v4064_v24, %v4068_v18 }
 0x437   :  { %7575 = vmatpush1.bf16.msra.mxu1 %v15930_v1  ;;  %v17819_v49 = vadd.f32 %v7321_v53, %v7281_v35  ;;  %v4076_v53 = vld [vmem:[#allocation7 + $0x4b8] sm:$0xff]  ;;  %v16123_v1 = vcombine.high %v4296_v22, %v4300_v25  ;;  %v16122_v35 = vcombine.low %v4296_v22, %v4300_v25  ;;  %v15882_v32 = vcombine.low %v4056_v29, %v4060_v50 }
 0x438   :  { %v7283_v39 = vpop.f32.mrf.mxu1  ;;  %7576 = vmatprep.subr.bf16.mxu1 %v15923_v42  ;;  %v15899_v11 = vcombine.high %v4072_v4, %v4076_v53  ;;  %v15898_v21 = vcombine.low %v4072_v4, %v4076_v53  ;;  %v4292_v36 = vld [vmem:[#allocation7 + $0xb78] sm:$0xff]  ;;  %v15883_v42 = vcombine.high %v4056_v29, %v4060_v50 }
 0x439   :  { %7622 = vmatpush1.bf16.msra.mxu0 %v16034_v59  ;;  %v4176_v59 = vld [vmem:[#allocation7 + $0x7d8] sm:$0xff]  ;;  %v16115_v40 = vcombine.high %v4288_v34, %v4292_v36  ;;  %v16114_v55 = vcombine.low %v4288_v34, %v4292_v36 }
 0x43a   :  { %7623 = vmatprep.subr.bf16.mxu0 %v16027_v57  ;;  %v4180_v38 = vld [vmem:[#allocation7 + $0x7f8] sm:$0xff] }
 0x43b   :  { %7577 = vmatpush1.bf16.msra.mxu1 %v15922_v46  ;;  %v4280_v57 = vld [vmem:[#allocation7 + $0xb18] sm:$0xff]  ;;  %v16003_v60 = vcombine.high %v4176_v59, %v4180_v38  ;;  %v16002_v62 = vcombine.low %v4176_v59, %v4180_v38  ;;  %v8271_v38 = vld [vmem:[#allocation10 + $0x1c0] sm:$0xff] }
 0x43c   :  { %7578 = vmatprep.subr.bf16.mxu1 %v15915_v52  ;;  %v4284_v46 = vld [vmem:[#allocation7 + $0xb38] sm:$0xff] }
 0x43d   :  { %7624 = vmatpush1.bf16.msra.mxu0 %v16026_v56  ;;  %v4168_v39 = vld [vmem:[#allocation7 + $0x798] sm:$0xff]  ;;  %v16107_v56 = vcombine.high %v4280_v57, %v4284_v46  ;;  %v16106_v14 = vcombine.low %v4280_v57, %v4284_v46 }
 0x43e   :  { %7625 = vmatprep.subr.bf16.mxu0 %v16019_v23  ;;  %v4172_v52 = vld [vmem:[#allocation7 + $0x7b8] sm:$0xff] }
 0x43f   :  { %7579 = vmatpush1.bf16.msra.mxu1 %v15914_v54  ;;  %v4276_v23 = vld [vmem:[#allocation7 + $0xaf8] sm:$0xff]  ;;  %v15995_v54 = vcombine.high %v4168_v39, %v4172_v52  ;;  %v15994_v4 = vcombine.low %v4168_v39, %v4172_v52  ;;  %v8263_v52 = vld [vmem:[#allocation10 + $0x180] sm:$0xff] }
 0x440   :  { %7580 = vmatprep.subr.bf16.mxu1 %v15907_v2  ;;  %v4164_v2 = vld [vmem:[#allocation7 + $0x778] sm:$0xff]  ;;  %v16098_v8 = vcombine.low %v4272_v63, %v4276_v23 }
 0x441   :  { %7626 = vmatpush1.bf16.msra.mxu0 %v16018_v20  ;;  %v16099_v20 = vcombine.high %v4272_v63, %v4276_v23  ;;  %v4264_v53 = vld [vmem:[#allocation7 + $0xa98] sm:$0xff]  ;;  %v15986_v24 = vcombine.low %v4160_v3, %v4164_v2 }
 0x442   :  { %7627 = vmatprep.subr.bf16.mxu0 %v16011_v12  ;;  %v4268_v12 = vld [vmem:[#allocation7 + $0xab8] sm:$0xff] }
 0x443   :  { %7581 = vmatpush1.bf16.msra.mxu1 %v15906_v31  ;;  %v15987_v31 = vcombine.high %v4160_v3, %v4164_v2  ;;  %v4152_v9 = vld [vmem:[#allocation7 + $0x718] sm:$0xff]  ;;  %v16090_v22 = vcombine.low %v4264_v53, %v4268_v12  ;;  %v17823_v3 = vpack.c.bf16 %v17803_v61, %v17803_v61 }
 0x444   :  { %7582 = vmatprep.subr.bf16.mxu1 %v15899_v11  ;;  %v4156_v11 = vld [vmem:[#allocation7 + $0x738] sm:$0xff] }
 0x445   :  { %7628 = vmatpush1.bf16.msra.mxu0 %v16010_v28  ;;  %v16091_v28 = vcombine.high %v4264_v53, %v4268_v12  ;;  %v4256_v18 = vld [vmem:[#allocation7 + $0xa58] sm:$0xff]  ;;  %v15978_v29 = vcombine.low %v4152_v9, %v4156_v11 }
 0x446   :  { %7629 = vmatprep.subr.bf16.mxu0 %v16131_v19  ;;  %v4260_v19 = vld [vmem:[#allocation7 + $0xa78] sm:$0xff] }
 0x447   :  { %7583 = vmatpush1.bf16.msra.mxu1 %v15898_v21  ;;  %v15979_v21 = vcombine.high %v4152_v9, %v4156_v11  ;;  %v4144_v25 = vld [vmem:[#allocation7 + $0x6d8] sm:$0xff]  ;;  %v16082_v34 = vcombine.low %v4256_v18, %v4260_v19 }
 0x448   :  { %7584 = vmatprep.subr.bf16.mxu1 %v15891_v26  ;;  %v4148_v26 = vld [vmem:[#allocation7 + $0x6f8] sm:$0xff] }
 0x449   :  { %7630 = vmatpush2.bf16.msra.mxu0 %v16130_v37  ;;  %v16083_v37 = vcombine.high %v4256_v18, %v4260_v19  ;;  %v4248_v50 = vld [vmem:[#allocation7 + $0xa18] sm:$0xff]  ;;  %v15970_v59 = vcombine.low %v4144_v25, %v4148_v26  ;;  %v8251_v18 = vld [vmem:[#allocation10 + $0x120] sm:$0xff] }
 0x44a   :  { %7631 = vmatprep.subr.bf16.mxu0 %v16123_v1  ;;  %v4252_v1 = vld [vmem:[#allocation7 + $0xa38] sm:$0xff] }
 0x44b   :  { %7585 = vmatpush1.bf16.msra.mxu1 %v15890_v58  ;;  %v15971_v58 = vcombine.high %v4144_v25, %v4148_v26  ;;  %v4136_v36 = vld [vmem:[#allocation7 + $0x698] sm:$0xff]  ;;  %v16074_v57 = vcombine.low %v4248_v50, %v4252_v1 }
 0x44c   :  { %7586 = vmatprep.subr.bf16.mxu1 %v15883_v42  ;;  %v4140_v42 = vld [vmem:[#allocation7 + $0x6b8] sm:$0xff] }
 0x44d   :  { %7632 = vmatpush2.bf16.msra.mxu0 %v16122_v35  ;;  %v16075_v35 = vcombine.high %v4248_v50, %v4252_v1  ;;  %v4128_v46 = vld [vmem:[#allocation7 + $0x658] sm:$0xff]  ;;  %v15962_v39 = vcombine.low %v4136_v36, %v4140_v42  ;;  %v8239_v1 = vld [vmem:[#allocation10 + $0xc0] sm:$0xff] }
 0x44e   :  { %7633 = vmatprep.subr.bf16.mxu0 %v16115_v40  ;;  %v8275_v40 = vld [vmem:[#allocation10 + $0x1e0] sm:$0xff]  ;;  %v4120_v23 = vld [vmem:[#allocation7 + $0x618] sm:$0xff] }
 0x44f   :  { %7587 = vmatpush1.bf16.msra.mxu1 %v15882_v32  ;;  %v15963_v32 = vcombine.high %v4136_v36, %v4140_v42  ;;  %v16316_v63 = vcombine.low %v8271_v38, %v8275_v40  ;;  %v4372_v9 = vld [vmem:[#allocation7 + $0xdf8] sm:$0xff] }
 0x450   :  { %7588 = vmatprep.subr.bf16.mxu1 %v16003_v60  ;;  %v4132_v60 = vld [vmem:[#allocation7 + $0x678] sm:$0xff] }
 0x451   :  { %7634 = vmatpush2.bf16.msra.mxu0 %v16114_v55  ;;  %v16317_v55 = vcombine.high %v8271_v38, %v8275_v40  ;;  %v15954_v2 = vcombine.low %v4128_v46, %v4132_v60  ;;  %v4360_v25 = vld [vmem:[#allocation7 + $0xd98] sm:$0xff] }
 0x452   :  { %7635 = vmatprep.subr.bf16.mxu0 %v16107_v56  ;;  %v8267_v56 = vld [vmem:[#allocation10 + $0x1a0] sm:$0xff]  ;;  %v4364_v26 = vld [vmem:[#allocation7 + $0xdb8] sm:$0xff] }
 0x453   :  { %7589 = vmatpush2.bf16.msra.mxu1 %v16002_v62  ;;  %v15955_v62 = vcombine.high %v4128_v46, %v4132_v60  ;;  %v4352_v42 = vld [vmem:[#allocation7 + $0xd58] sm:$0xff]  ;;  %v8235_v46 = vld [vmem:[#allocation10 + $0xa0] sm:$0xff] }
 0x454   :  { %7590 = vmatprep.subr.bf16.mxu1 %v15995_v54  ;;  %v4124_v54 = vld [vmem:[#allocation7 + $0x638] sm:$0xff] }
 0x455   :  { %7636 = vmatpush2.bf16.msra.mxu0 %v16106_v14  ;;  %v16309_v14 = vcombine.high %v8263_v52, %v8267_v56  ;;  %v15947_v12 = vcombine.high %v4120_v23, %v4124_v54 }
 0x456   :  { %7637 = vmatprep.subr.bf16.mxu0 %v16099_v20  ;;  %v8255_v20 = vld [vmem:[#allocation10 + $0x140] sm:$0xff] }
 0x457   :  { %7591 = vmatpush2.bf16.msra.mxu1 %v15994_v4  ;;  %v8259_v4 = vld [vmem:[#allocation10 + $0x160] sm:$0xff] }
 0x458   :  { %7592 = vmatprep.subr.bf16.mxu1 %v15987_v31  ;;  %v16308_v31 = vcombine.low %v8263_v52, %v8267_v56  ;;  %v16301_v61 = vcombine.high %v8255_v20, %v8259_v4  ;;  %v4344_v52 = vld [vmem:[#allocation7 + $0xd18] sm:$0xff] }
 0x459   :  { %7638 = vmatpush2.bf16.msra.mxu0 %v16098_v8  ;;  %v4368_v8 = vld [vmem:[#allocation7 + $0xdd8] sm:$0xff] }
 0x45a   :  { %7639 = vmatprep.subr.bf16.mxu0 %v16091_v28  ;;  %v15946_v28 = vcombine.low %v4120_v23, %v4124_v54  ;;  %v16194_v50 = vcombine.low %v4368_v8, %v4372_v9  ;;  %v4348_v56 = vld [vmem:[#allocation7 + $0xd38] sm:$0xff]  ;;  %v8223_v23 = vld [vmem:[#allocation10 + $0x40] sm:$0xff] }
 0x45b   :  { %7593 = vmatpush2.bf16.msra.mxu1 %v15986_v24  ;;  %v8247_v24 = vld [vmem:[#allocation10 + $0x100] sm:$0xff] }
 0x45c   :  { %7594 = vmatprep.subr.bf16.mxu1 %v15979_v21  ;;  %v16195_v21 = vcombine.high %v4368_v8, %v4372_v9  ;;  %v16292_v36 = vcombine.low %v8247_v24, %v8251_v18  ;;  %v8227_v54 = vld [vmem:[#allocation10 + $0x60] sm:$0xff]  ;;  %v16170_v8 = vcombine.low %v4344_v52, %v4348_v56 }
 0x45d   :  { %7640 = vmatpush2.bf16.msra.mxu0 %v16090_v22  ;;  %v16300_v22 = vcombine.low %v8255_v20, %v8259_v4  ;;  %v4336_v4 = vld [vmem:[#allocation7 + $0xcd8] sm:$0xff]  ;;  %v8215_v9 = vld [vmem:[#allocation10] sm:$0xff] }
 0x45e   :  { %7641 = vmatprep.subr.bf16.mxu0 %v16083_v37 }
 0x45f   :  { %7595 = vmatpush2.bf16.msra.mxu1 %v15978_v29  ;;  %v16293_v29 = vcombine.high %v8247_v24, %v8251_v18  ;;  %v16268_v24 = vcombine.low %v8223_v23, %v8227_v54  ;;  %v4328_v18 = vld [vmem:[#allocation7 + $0xc98] sm:$0xff] }
 0x460   :  { %7596 = vmatprep.subr.bf16.mxu1 %v15971_v58  ;;  %v8243_v58 = vld [vmem:[#allocation10 + $0xe0] sm:$0xff] }
 0x461   :  { %7642 = vmatpush2.bf16.msra.mxu0 %v16082_v34  ;;  %v16187_v34 = vcombine.high %v4360_v25, %v4364_v26  ;;  %v16285_v38 = vcombine.high %v8239_v1, %v8243_v58 }
 0x462   :  { %7643 = vmatprep.subr.bf16.mxu0 %v16075_v35  ;;  %v4356_v35 = vld [vmem:[#allocation7 + $0xd78] sm:$0xff] }
 0x463   :  { %7597 = vmatpush2.bf16.msra.mxu1 %v15970_v59 }
 0x464   :  { %7598 = vmatprep.subr.bf16.mxu1 %v15963_v32  ;;  %v16186_v32 = vcombine.low %v4360_v25, %v4364_v26  ;;  %v8335_v25 = vld [vmem:[#allocation10 + $0x3c0] sm:$0xff] }
 0x465   :  { %7644 = vmatpush2.bf16.msra.mxu0 %v16074_v57  ;;  %v8231_v57 = vld [vmem:[#allocation10 + $0x80] sm:$0xff] }
 0x466   :  { %11287 = vmatprep.subr.bf16.mxu0 %v16317_v55  ;;  %v16179_v55 = vcombine.high %v4352_v42, %v4356_v35  ;;  %v16276_v20 = vcombine.low %v8231_v57, %v8235_v46  ;;  %v8339_v26 = vld [vmem:[#allocation10 + $0x3e0] sm:$0xff] }
 0x467   :  { %7599 = vmatpush2.bf16.msra.mxu1 %v15962_v39  ;;  %v16284_v39 = vcombine.low %v8239_v1, %v8243_v58  ;;  %v4324_v1 = vld [vmem:[#allocation7 + $0xc78] sm:$0xff]  ;;  %v16381_v58 = vcombine.high %v8335_v25, %v8339_v26 }
 0x468   :  { %v17825_v53 = vpop.f32.mrf.mxu0  ;;  %7646 = vmatmul.mubr.bf16.vlgmr.msra.gmra.mxu0 %v17735_v6  ;;  %7600 = vmatprep.subr.bf16.mxu1 %v15955_v62 }
 0x469   :  { %11288 = vmatpush1.bf16.msra.mxu0 %v16316_v63  ;;  %11319 = vmatprep.mubr.bf16.mxu0 %v17823_v3  ;;  %v16277_v63 = vcombine.high %v8231_v57, %v8235_v46 }
 0x46a   :  { %v17829_v11 = vpop.f32.mrf.mxu0  ;;  %11289 = vmatprep.subr.bf16.mxu0 %v16309_v14 }
 0x46b   :  { %7601 = vmatpush2.bf16.msra.mxu1 %v15954_v2  ;;  %v16171_v2 = vcombine.high %v4344_v52, %v4348_v56 }
 0x46c   :  { %v7405_v19 = vpop.f32.mrf.mxu0  ;;  %7602 = vmatprep.subr.bf16.mxu1 %v15947_v12  ;;  %v4340_v12 = vld [vmem:[#allocation7 + $0xcf8] sm:$0xff] }
 0x46d   :  { %11290 = vmatpush1.bf16.msra.mxu0 %v16308_v31  ;;  %v16269_v31 = vcombine.high %v8223_v23, %v8227_v54  ;;  %v4332_v19 = vld [vmem:[#allocation7 + $0xcb8] sm:$0xff]  ;;  %v8311_v54 = vld [vmem:[#allocation10 + $0x300] sm:$0xff] }
 0x46e   :  { %v7406_v37 = vpop.f32.mrf.mxu0  ;;  %11291 = vmatprep.subr.bf16.mxu0 %v16301_v61  ;;  %v8219_v61 = vld [vmem:[#allocation10 + $0x20] sm:$0xff] }
 0x46f   :  { %7603 = vmatpush2.bf16.msra.mxu1 %v15946_v28  ;;  %v16163_v28 = vcombine.high %v4336_v4, %v4340_v12  ;;  %v16155_v37 = vcombine.high %v4328_v18, %v4332_v19 }
 0x470   :  { %7654 = vmatprep.subr.bf16.mxu1 %v16195_v21  ;;  %v16261_v21 = vcombine.high %v8215_v9, %v8219_v61 }
 0x471   :  { %11292 = vmatpush1.bf16.msra.mxu0 %v16300_v22  ;;  %v16162_v22 = vcombine.low %v4336_v4, %v4340_v12  ;;  %v4424_v4 = vld [vmem:[#allocation7 + $0xf98] sm:$0xff] }
 0x472   :  { %v7360_v59 = vpop.f32.mrf.mxu1  ;;  %7605 = vmatmul.mubr.bf16.vlgmr.msra.gmra.mxu1 %v17712_v17  ;;  %11293 = vmatprep.subr.bf16.mxu0 %v16293_v29  ;;  %v16260_v29 = vcombine.low %v8215_v9, %v8219_v61  ;;  %v4428_v12 = vld [vmem:[#allocation7 + $0xfb8] sm:$0xff]  ;;  %v8303_v9 = vld [vmem:[#allocation10 + $0x2c0] sm:$0xff] }
 0x473   :  { %v17833_v40 = vadd.f32 %v7360_v59, %v17817_v16  ;;  %7655 = vmatpush1.bf16.msra.mxu1 %v16194_v50  ;;  %7686 = vmatprep.mubr.bf16.mxu1 %v17761_v41  ;;  %v16178_v16 = vcombine.low %v4352_v42, %v4356_v35  ;;  %v4320_v50 = vld [vmem:[#allocation7 + $0xc58] sm:$0xff]  ;;  %v8331_v42 = vld [vmem:[#allocation10 + $0x3a0] sm:$0xff]  ;;  %v16380_v59 = vcombine.low %v8335_v25, %v8339_v26 }
 0x474   :  { %v17836_v60 = vpop.f32.mrf.mxu1  ;;  %7656 = vmatprep.subr.bf16.mxu1 %v16187_v34  ;;  %v16154_v34 = vcombine.low %v4328_v18, %v4332_v19  ;;  %v16147_v35 = vcombine.high %v4320_v50, %v4324_v1  ;;  %v16146_v46 = vcombine.low %v4320_v50, %v4324_v1  ;;  %v8307_v61 = vld [vmem:[#allocation10 + $0x2e0] sm:$0xff]  ;;  %v4416_v18 = vld [vmem:[#allocation7 + $0xf58] sm:$0xff] }
 0x475   :  { %11294 = vmatpush1.bf16.msra.mxu0 %v16292_v36  ;;  %v8327_v36 = vld [vmem:[#allocation10 + $0x380] sm:$0xff]  ;;  %v4420_v19 = vld [vmem:[#allocation7 + $0xf78] sm:$0xff] }
 0x476   :  { %v7364_v62 = vpop.f32.mrf.mxu1  ;;  %11295 = vmatprep.subr.bf16.mxu0 %v16285_v38  ;;  %v4312_v38 = vld [vmem:[#allocation7 + $0xc18] sm:$0xff]  ;;  %v16373_v57 = vcombine.high %v8327_v36, %v8331_v42  ;;  %v16372_v56 = vcombine.low %v8327_v36, %v8331_v42  ;;  %v8295_v25 = vld [vmem:[#allocation10 + $0x280] sm:$0xff] }
 0x477   :  { %7657 = vmatpush1.bf16.msra.mxu1 %v16186_v32  ;;  %v4316_v32 = vld [vmem:[#allocation7 + $0xc38] sm:$0xff]  ;;  %v8299_v26 = vld [vmem:[#allocation10 + $0x2a0] sm:$0xff] }
 0x478   :  { %v7365_v14 = vpop.f32.mrf.mxu1  ;;  %7658 = vmatprep.subr.bf16.mxu1 %v16179_v55  ;;  %v8319_v55 = vld [vmem:[#allocation10 + $0x340] sm:$0xff]  ;;  %v16139_v52 = vcombine.high %v4312_v38, %v4316_v32  ;;  %v4432_v62 = vld [vmem:[#allocation7 + $0xfd8] sm:$0xff]  ;;  %v16138_v23 = vcombine.low %v4312_v38, %v4316_v32 }
 0x479   :  { %11296 = vmatpush1.bf16.msra.mxu0 %v16284_v39  ;;  %v8323_v39 = vld [vmem:[#allocation10 + $0x360] sm:$0xff]  ;;  %v4408_v50 = vld [vmem:[#allocation7 + $0xf18] sm:$0xff] }
 0x47a   :  { %11297 = vmatprep.subr.bf16.mxu0 %v16277_v63  ;;  %v4436_v63 = vld [vmem:[#allocation7 + $0xff8] sm:$0xff]  ;;  %v8315_v14 = vld [vmem:[#allocation10 + $0x320] sm:$0xff] }
 0x47b   :  { %7659 = vmatpush1.bf16.msra.mxu1 %v16178_v16  ;;  %v16365_v16 = vcombine.high %v8319_v55, %v8323_v39  ;;  %v4412_v1 = vld [vmem:[#allocation7 + $0xf38] sm:$0xff]  ;;  %v8287_v36 = vld [vmem:[#allocation10 + $0x240] sm:$0xff] }
 0x47c   :  { %7660 = vmatprep.subr.bf16.mxu1 %v16171_v2  ;;  %v16259_v2 = vcombine.high %v4432_v62, %v4436_v63  ;;  %v8291_v42 = vld [vmem:[#allocation10 + $0x260] sm:$0xff]  ;;  %v4400_v38 = vld [vmem:[#allocation7 + $0xed8] sm:$0xff] }
 0x47d   :  { %11298 = vmatpush1.bf16.msra.mxu0 %v16276_v20  ;;  %v16364_v20 = vcombine.low %v8319_v55, %v8323_v39  ;;  %v4404_v32 = vld [vmem:[#allocation7 + $0xef8] sm:$0xff]  ;;  %v8279_v55 = vld [vmem:[#allocation10 + $0x200] sm:$0xff] }
 0x47e   :  { %11299 = vmatprep.subr.bf16.mxu0 %v16269_v31  ;;  %v16357_v31 = vcombine.high %v8311_v54, %v8315_v14  ;;  %v8283_v39 = vld [vmem:[#allocation10 + $0x220] sm:$0xff] }
 0x47f   :  { %7661 = vmatpush1.bf16.msra.mxu1 %v16170_v8  ;;  %v16258_v8 = vcombine.low %v4432_v62, %v4436_v63  ;;  %v4392_v62 = vld [vmem:[#allocation7 + $0xe98] sm:$0xff] }
 0x480   :  { %7662 = vmatprep.subr.bf16.mxu1 %v16163_v28  ;;  %v16251_v28 = vcombine.high %v4424_v4, %v4428_v12  ;;  %v4396_v63 = vld [vmem:[#allocation7 + $0xeb8] sm:$0xff] }
 0x481   :  { %11300 = vmatpush1.bf16.msra.mxu0 %v16268_v24  ;;  %v16356_v24 = vcombine.low %v8311_v54, %v8315_v14  ;;  %v8527_v54 = vld [vmem:[#allocation10 + $0x9c0] sm:$0xff] }
 0x482   :  { %11301 = vmatprep.subr.bf16.mxu0 %v16261_v21  ;;  %v16349_v21 = vcombine.high %v8303_v9, %v8307_v61  ;;  %v8531_v14 = vld [vmem:[#allocation10 + $0x9e0] sm:$0xff] }
 0x483   :  { %7663 = vmatpush1.bf16.msra.mxu1 %v16162_v22  ;;  %v16250_v22 = vcombine.low %v4424_v4, %v4428_v12  ;;  %v4384_v4 = vld [vmem:[#allocation7 + $0xe58] sm:$0xff] }
 0x484   :  { %7664 = vmatprep.subr.bf16.mxu1 %v16155_v37  ;;  %v16243_v37 = vcombine.high %v4416_v18, %v4420_v19  ;;  %v4388_v12 = vld [vmem:[#allocation7 + $0xe78] sm:$0xff] }
 0x485   :  { %11302 = vmatpush1.bf16.msra.mxu0 %v16260_v29  ;;  %v16348_v29 = vcombine.low %v8303_v9, %v8307_v61  ;;  %v8519_v9 = vld [vmem:[#allocation10 + $0x980] sm:$0xff] }
 0x486   :  { %11303 = vmatprep.subr.bf16.mxu0 %v16381_v58  ;;  %v16341_v58 = vcombine.high %v8295_v25, %v8299_v26  ;;  %v8523_v61 = vld [vmem:[#allocation10 + $0x9a0] sm:$0xff] }
 0x487   :  { %7665 = vmatpush1.bf16.msra.mxu1 %v16154_v34  ;;  %v16242_v34 = vcombine.low %v4416_v18, %v4420_v19  ;;  %v4380_v18 = vld [vmem:[#allocation7 + $0xe38] sm:$0xff]  ;;  %v16572_v19 = vcombine.low %v8527_v54, %v8531_v14 }
 0x488   :  { %7666 = vmatprep.subr.bf16.mxu1 %v16147_v35  ;;  %v16235_v35 = vcombine.high %v4408_v50, %v4412_v1 }
 0x489   :  { %11304 = vmatpush2.bf16.msra.mxu0 %v16380_v59  ;;  %v16340_v59 = vcombine.low %v8295_v25, %v8299_v26  ;;  %v16210_v25 = vcombine.low %v4384_v4, %v4388_v12  ;;  %v8511_v26 = vld [vmem:[#allocation10 + $0x940] sm:$0xff] }
 0x48a   :  { %11305 = vmatprep.subr.bf16.mxu0 %v16373_v57  ;;  %v16333_v57 = vcombine.high %v8287_v36, %v8291_v42 }
 0x48b   :  { %7667 = vmatpush1.bf16.msra.mxu1 %v16146_v46  ;;  %v16234_v46 = vcombine.low %v4408_v50, %v4412_v1  ;;  %v8399_v1 = vld [vmem:[#allocation10 + $0x5c0] sm:$0xff] }
 0x48c   :  { %7668 = vmatprep.subr.bf16.mxu1 %v16139_v52  ;;  %v16227_v52 = vcombine.high %v4400_v38, %v4404_v32 }
 0x48d   :  { %11306 = vmatpush2.bf16.msra.mxu0 %v16372_v56  ;;  %v16332_v56 = vcombine.low %v8287_v36, %v8291_v42 }
 0x48e   :  { %11307 = vmatprep.subr.bf16.mxu0 %v16365_v16  ;;  %v16325_v16 = vcombine.high %v8279_v55, %v8283_v39 }
 0x48f   :  { %7669 = vmatpush1.bf16.msra.mxu1 %v16138_v23  ;;  %v16226_v23 = vcombine.low %v4400_v38, %v4404_v32 }
 0x490   :  { %7670 = vmatprep.subr.bf16.mxu1 %v16259_v2  ;;  %v16219_v2 = vcombine.high %v4392_v62, %v4396_v63 }
 0x491   :  { %11308 = vmatpush2.bf16.msra.mxu0 %v16364_v20  ;;  %v16324_v20 = vcombine.low %v8279_v55, %v8283_v39  ;;  %v8391_v55 = vld [vmem:[#allocation10 + $0x580] sm:$0xff] }
 0x492   :  { %11309 = vmatprep.subr.bf16.mxu0 %v16357_v31  ;;  %v16573_v31 = vcombine.high %v8527_v54, %v8531_v14  ;;  %v8395_v39 = vld [vmem:[#allocation10 + $0x5a0] sm:$0xff] }
 0x493   :  { %7671 = vmatpush2.bf16.msra.mxu1 %v16258_v8  ;;  %v16218_v8 = vcombine.low %v4392_v62, %v4396_v63  ;;  %v4462_v63 = vrot.slane %v17807_v7, %v17701_v51  ;;  %v8499_v54 = vld [vmem:[#allocation10 + $0x8e0] sm:$0xff]  ;;  %v16437_v14 = vcombine.high %v8391_v55, %v8395_v39 }
 0x494   :  { %7672 = vmatprep.subr.bf16.mxu1 %v16251_v28  ;;  %v16211_v28 = vcombine.high %v4384_v4, %v4388_v12 }
 0x495   :  { %11310 = vmatpush2.bf16.msra.mxu0 %v16356_v24  ;;  %v4376_v24 = vld [vmem:[#allocation7 + $0xe18] sm:$0xff] }
 0x496   :  { %11311 = vmatprep.subr.bf16.mxu0 %v16349_v21  ;;  %v17840_v21 = vpack.c.bf16 %v17799_v44, %v17799_v44  ;;  %v16203_v50 = vcombine.high %v4376_v24, %v4380_v18  ;;  %v16202_v44 = vcombine.low %v4376_v24, %v4380_v18 }
 0x497   :  { %7673 = vmatpush2.bf16.msra.mxu1 %v16250_v22  ;;  %v16565_v22 = vcombine.high %v8519_v9, %v8523_v61 }
 0x498   :  { %7674 = vmatprep.subr.bf16.mxu1 %v16243_v37  ;;  %v8515_v37 = vld [vmem:[#allocation10 + $0x960] sm:$0xff] }
 0x499   :  { %11312 = vmatpush2.bf16.msra.mxu0 %v16348_v29  ;;  %v16557_v42 = vcombine.high %v8511_v26, %v8515_v37 }
 0x49a   :  { %11313 = vmatprep.subr.bf16.mxu0 %v16341_v58  ;;  %v8403_v58 = vld [vmem:[#allocation10 + $0x5e0] sm:$0xff] }
 0x49b   :  { %7675 = vmatpush2.bf16.msra.mxu1 %v16242_v34  ;;  %v16564_v34 = vcombine.low %v8519_v9, %v8523_v61  ;;  %v16445_v32 = vcombine.high %v8399_v1, %v8403_v58  ;;  %v16436_v9 = vcombine.low %v8391_v55, %v8395_v39  ;;  %v8487_v61 = vld [vmem:[#allocation10 + $0x880] sm:$0xff] }
 0x49c   :  { %7676 = vmatprep.subr.bf16.mxu1 %v16235_v35  ;;  %v8503_v35 = vld [vmem:[#allocation10 + $0x900] sm:$0xff] }
 0x49d   :  { %11314 = vmatpush2.bf16.msra.mxu0 %v16340_v59  ;;  %v8507_v59 = vld [vmem:[#allocation10 + $0x920] sm:$0xff] }
 0x49e   :  { %11315 = vmatprep.subr.bf16.mxu0 %v16333_v57  ;;  %v4458_v57 = vrot.slane %v17807_v7, %v17677_v15  ;;  %v16549_v62 = vcombine.high %v8503_v35, %v8507_v59  ;;  %v16548_v4 = vcombine.low %v8503_v35, %v8507_v59  ;;  %v7404_v7 = vadd.f32 %v17829_v11, %v4462_v63  ;;  %v8367_v35 = vld [vmem:[#allocation10 + $0x4c0] sm:$0xff] }
 0x49f   :  { %7677 = vmatpush2.bf16.msra.mxu1 %v16234_v46  ;;  %v7363_v46 = vadd.f32 %v17836_v60, %v17819_v49  ;;  %v8383_v49 = vld [vmem:[#allocation10 + $0x540] sm:$0xff] }
 0x4a0   :  { %7678 = vmatprep.subr.bf16.mxu1 %v16227_v52  ;;  %v16556_v52 = vcombine.low %v8511_v26, %v8515_v37  ;;  %v8387_v60 = vld [vmem:[#allocation10 + $0x560] sm:$0xff] }
 0x4a1   :  { %11316 = vmatpush2.bf16.msra.mxu0 %v16332_v56  ;;  %v16429_v24 = vcombine.high %v8383_v49, %v8387_v60  ;;  %v8371_v59 = vld [vmem:[#allocation10 + $0x4e0] sm:$0xff] }
 0x4a2   :  { %11317 = vmatprep.subr.bf16.mxu0 %v16325_v16  ;;  %v16444_v16 = vcombine.low %v8399_v1, %v8403_v58  ;;  %v8479_v1 = vld [vmem:[#allocation10 + $0x840] sm:$0xff]  ;;  %v16413_v55 = vcombine.high %v8367_v35, %v8371_v59 }
 0x4a3   :  { %7679 = vmatpush2.bf16.msra.mxu1 %v16226_v23  ;;  %v8495_v23 = vld [vmem:[#allocation10 + $0x8c0] sm:$0xff] }
 0x4a4   :  { %7680 = vmatprep.subr.bf16.mxu1 %v16219_v2  ;;  %v7402_v2 = vadd.f32 %v17825_v53, %v4458_v57  ;;  %v8491_v53 = vld [vmem:[#allocation10 + $0x8a0] sm:$0xff] }
 0x4a5   :  { %11318 = vmatpush2.bf16.msra.mxu0 %v16324_v20  ;;  %v17850_v20 = vpack.c.bf16 %v7363_v46, %v7363_v46  ;;  %v16533_v11 = vcombine.high %v8487_v61, %v8491_v53  ;;  %v8483_v58 = vld [vmem:[#allocation10 + $0x860] sm:$0xff] }
 0x4a6   :  { %11369 = vmatprep.subr.bf16.mxu0 %v16573_v31  ;;  %v16541_v31 = vcombine.high %v8495_v23, %v8499_v54  ;;  %v8471_v57 = vld [vmem:[#allocation10 + $0x800] sm:$0xff] }
 0x4a7   :  { %7681 = vmatpush2.bf16.msra.mxu1 %v16218_v8  ;;  %v8475_v46 = vld [vmem:[#allocation10 + $0x820] sm:$0xff] }
 0x4a8   :  { %v7483_v29 = vpop.f32.mrf.mxu0  ;;  %11320 = vmatmul.mubr.bf16.vlgmr.msra.gmra.mxu0 %v17840_v21  ;;  %7682 = vmatprep.subr.bf16.mxu1 %v16211_v28  ;;  %v8359_v39 = vld [vmem:[#allocation10 + $0x480] sm:$0xff] }
 0x4a9   :  { %11370 = vmatpush1.bf16.msra.mxu0 %v16572_v19  ;;  %v8375_v19 = vld [vmem:[#allocation10 + $0x500] sm:$0xff] }
 0x4aa   :  { %v7485_v36 = vpop.f32.mrf.mxu0  ;;  %11371 = vmatprep.subr.bf16.mxu0 %v16565_v22  ;;  %v8379_v22 = vld [vmem:[#allocation10 + $0x520] sm:$0xff] }
 0x4ab   :  { %7683 = vmatpush2.bf16.msra.mxu1 %v16210_v25  ;;  %v16540_v25 = vcombine.low %v8495_v23, %v8499_v54  ;;  %v8591_v63 = vld [vmem:[#allocation10 + $0xbc0] sm:$0xff] }
 0x4ac   :  { %v7487_v38 = vpop.f32.mrf.mxu0  ;;  %7684 = vmatprep.subr.bf16.mxu1 %v16203_v50  ;;  %v16428_v50 = vcombine.low %v8383_v49, %v8387_v60  ;;  %v8351_v54 = vld [vmem:[#allocation10 + $0x440] sm:$0xff] }
 0x4ad   :  { %11372 = vmatpush1.bf16.msra.mxu0 %v16564_v34  ;;  %v16532_v38 = vcombine.low %v8487_v61, %v8491_v53 }
 0x4ae   :  { %v7488_v56 = vpop.f32.mrf.mxu0  ;;  %11373 = vmatprep.subr.bf16.mxu0 %v16557_v42 }
 0x4af   :  { %7685 = vmatpush2.bf16.msra.mxu1 %v16202_v44  ;;  %v16421_v44 = vcombine.high %v8375_v19, %v8379_v22  ;;  %v16517_v56 = vcombine.high %v8471_v57, %v8475_v46 }
 0x4b0   :  { %11328 = vmatprep.subr.bf16.mxu1 %v16445_v32  ;;  %v16525_v32 = vcombine.high %v8479_v1, %v8483_v58 }
 0x4b1   :  { %11374 = vmatpush1.bf16.msra.mxu0 %v16556_v52  ;;  %v8363_v52 = vld [vmem:[#allocation10 + $0x4a0] sm:$0xff] }
 0x4b2   :  { %v7442_v12 = vpop.f32.mrf.mxu1  ;;  %7687 = vmatmul.mubr.bf16.vlgmr.msra.gmra.mxu1 %v17763_v0  ;;  %11375 = vmatprep.subr.bf16.mxu0 %v16549_v62  ;;  %v16412_v62 = vcombine.low %v8367_v35, %v8371_v59  ;;  %v16405_v23 = vcombine.high %v8359_v39, %v8363_v52  ;;  %v16404_v60 = vcombine.low %v8359_v39, %v8363_v52 }
 0x4b3   :  { %v7443_v8 = vadd.f32 %v7442_v12, %v7402_v2  ;;  %11329 = vmatpush1.bf16.msra.mxu1 %v16444_v16  ;;  %11360 = vmatprep.mubr.bf16.mxu1 %v17850_v20  ;;  %v8595_v16 = vld [vmem:[#allocation10 + $0xbe0] sm:$0xff]  ;;  %v16516_v2 = vcombine.low %v8471_v57, %v8475_v46 }
 0x4b4   :  { %v7444_v28 = vpop.f32.mrf.mxu1  ;;  %11330 = vmatprep.subr.bf16.mxu1 %v16437_v14  ;;  %v8355_v14 = vld [vmem:[#allocation10 + $0x460] sm:$0xff]  ;;  %v16637_v49 = vcombine.high %v8591_v63, %v8595_v16 }
 0x4b5   :  { %v7445_v18 = vadd.f32 %v7444_v28, %v7404_v7  ;;  %11376 = vmatpush1.bf16.msra.mxu0 %v16548_v4  ;;  %v17855_v26 = vadd.f32 %v7483_v29, %v7443_v8  ;;  %v16420_v29 = vcombine.low %v8375_v19, %v8379_v22  ;;  %v8583_v4 = vld [vmem:[#allocation10 + $0xb80] sm:$0xff]  ;;  %v16396_v53 = vcombine.low %v8351_v54, %v8355_v14 }
 0x4b6   :  { %v7446_v37 = vpop.f32.mrf.mxu1  ;;  %11377 = vmatprep.subr.bf16.mxu0 %v16541_v31  ;;  %v8587_v12 = vld [vmem:[#allocation10 + $0xba0] sm:$0xff]  ;;  %v16397_v31 = vcombine.high %v8351_v54, %v8355_v14 }
 0x4b7   :  { %11331 = vmatpush1.bf16.msra.mxu1 %v16436_v9  ;;  %v17857_v34 = vadd.f32 %v7485_v36, %v7445_v18  ;;  %v16524_v36 = vcombine.low %v8479_v1, %v8483_v58  ;;  %v8343_v7 = vld [vmem:[#allocation10 + $0x400] sm:$0xff]  ;;  %v16636_v9 = vcombine.low %v8591_v63, %v8595_v16  ;;  %v16629_v61 = vcombine.high %v8583_v4, %v8587_v12 }
 0x4b8   :  { %v7447_v42 = vpop.f32.mrf.mxu1  ;;  %11332 = vmatprep.subr.bf16.mxu1 %v16429_v24  ;;  %v8347_v8 = vld [vmem:[#allocation10 + $0x420] sm:$0xff] }
 0x4b9   :  { %11378 = vmatpush1.bf16.msra.mxu0 %v16540_v25  ;;  %v8575_v28 = vld [vmem:[#allocation10 + $0xb40] sm:$0xff]  ;;  %v16389_v18 = vcombine.high %v8343_v7, %v8347_v8  ;;  %v16628_v25 = vcombine.low %v8583_v4, %v8587_v12 }
 0x4ba   :  { %11379 = vmatprep.subr.bf16.mxu0 %v16533_v11  ;;  %v8579_v24 = vld [vmem:[#allocation10 + $0xb60] sm:$0xff]  ;;  %v16388_v11 = vcombine.low %v8343_v7, %v8347_v8 }
 0x4bb   :  { %11333 = vmatpush1.bf16.msra.mxu1 %v16428_v50  ;;  %v8463_v19 = vld [vmem:[#allocation10 + $0x7c0] sm:$0xff]  ;;  %v16621_v37 = vcombine.high %v8575_v28, %v8579_v24  ;;  %v16620_v35 = vcombine.low %v8575_v28, %v8579_v24 }
 0x4bc   :  { %11334 = vmatprep.subr.bf16.mxu1 %v16421_v44  ;;  %v8467_v22 = vld [vmem:[#allocation10 + $0x7e0] sm:$0xff] }
 0x4bd   :  { %11380 = vmatpush1.bf16.msra.mxu0 %v16532_v38  ;;  %v8567_v50 = vld [vmem:[#allocation10 + $0xb00] sm:$0xff]  ;;  %v16509_v58 = vcombine.high %v8463_v19, %v8467_v22  ;;  %v16508_v38 = vcombine.low %v8463_v19, %v8467_v22 }
 0x4be   :  { %11381 = vmatprep.subr.bf16.mxu0 %v16525_v32  ;;  %v8571_v1 = vld [vmem:[#allocation10 + $0xb20] sm:$0xff] }
 0x4bf   :  { %11335 = vmatpush1.bf16.msra.mxu1 %v16420_v29  ;;  %v8455_v42 = vld [vmem:[#allocation10 + $0x780] sm:$0xff]  ;;  %v16613_v59 = vcombine.high %v8567_v50, %v8571_v1  ;;  %v16612_v39 = vcombine.low %v8567_v50, %v8571_v1 }
 0x4c0   :  { %11336 = vmatprep.subr.bf16.mxu1 %v16413_v55  ;;  %v8459_v44 = vld [vmem:[#allocation10 + $0x7a0] sm:$0xff] }
 0x4c1   :  { %11382 = vmatpush1.bf16.msra.mxu0 %v16524_v36  ;;  %v8559_v32 = vld [vmem:[#allocation10 + $0xac0] sm:$0xff]  ;;  %v16501_v57 = vcombine.high %v8455_v42, %v8459_v44  ;;  %v16500_v36 = vcombine.low %v8455_v42, %v8459_v44 }
 0x4c2   :  { %11383 = vmatprep.subr.bf16.mxu0 %v16517_v56  ;;  %v8563_v29 = vld [vmem:[#allocation10 + $0xae0] sm:$0xff] }
 0x4c3   :  { %11337 = vmatpush1.bf16.msra.mxu1 %v16412_v62  ;;  %v8447_v46 = vld [vmem:[#allocation10 + $0x740] sm:$0xff]  ;;  %v16605_v52 = vcombine.high %v8559_v32, %v8563_v29  ;;  %v16604_v54 = vcombine.low %v8559_v32, %v8563_v29 }
 0x4c4   :  { %11338 = vmatprep.subr.bf16.mxu1 %v16405_v23  ;;  %v8451_v55 = vld [vmem:[#allocation10 + $0x760] sm:$0xff] }
 0x4c5   :  { %11384 = vmatpush1.bf16.msra.mxu0 %v16516_v2  ;;  %v8551_v56 = vld [vmem:[#allocation10 + $0xa80] sm:$0xff]  ;;  %v16493_v63 = vcombine.high %v8447_v46, %v8451_v55  ;;  %v16492_v2 = vcombine.low %v8447_v46, %v8451_v55 }
 0x4c6   :  { %11385 = vmatprep.subr.bf16.mxu0 %v16637_v49  ;;  %v8555_v62 = vld [vmem:[#allocation10 + $0xaa0] sm:$0xff] }
 0x4c7   :  { %11339 = vmatpush1.bf16.msra.mxu1 %v16404_v60  ;;  %v8439_v16 = vld [vmem:[#allocation10 + $0x700] sm:$0xff]  ;;  %v16597_v14 = vcombine.high %v8551_v56, %v8555_v62  ;;  %v16596_v7 = vcombine.low %v8551_v56, %v8555_v62 }
 0x4c8   :  { %11340 = vmatprep.subr.bf16.mxu1 %v16397_v31  ;;  %v8443_v23 = vld [vmem:[#allocation10 + $0x720] sm:$0xff] }
 0x4c9   :  { %11386 = vmatpush2.bf16.msra.mxu0 %v16636_v9  ;;  %v8543_v49 = vld [vmem:[#allocation10 + $0xa40] sm:$0xff]  ;;  %v16485_v4 = vcombine.high %v8439_v16, %v8443_v23  ;;  %v16484_v9 = vcombine.low %v8439_v16, %v8443_v23 }
 0x4ca   :  { %11387 = vmatprep.subr.bf16.mxu0 %v16629_v61  ;;  %v8547_v60 = vld [vmem:[#allocation10 + $0xa60] sm:$0xff] }
 0x4cb   :  { %11341 = vmatpush1.bf16.msra.mxu1 %v16396_v53  ;;  %v8431_v12 = vld [vmem:[#allocation10 + $0x6c0] sm:$0xff]  ;;  %v16589_v8 = vcombine.high %v8543_v49, %v8547_v60  ;;  %v16588_v19 = vcombine.low %v8543_v49, %v8547_v60 }
 0x4cc   :  { %11342 = vmatprep.subr.bf16.mxu1 %v16389_v18  ;;  %v8435_v31 = vld [vmem:[#allocation10 + $0x6e0] sm:$0xff] }
 0x4cd   :  { %11388 = vmatpush2.bf16.msra.mxu0 %v16628_v25  ;;  %v8535_v61 = vld [vmem:[#allocation10 + $0xa00] sm:$0xff]  ;;  %v16477_v28 = vcombine.high %v8431_v12, %v8435_v31  ;;  %v16476_v25 = vcombine.low %v8431_v12, %v8435_v31 }
 0x4ce   :  { %11389 = vmatprep.subr.bf16.mxu0 %v16621_v37  ;;  %v8539_v53 = vld [vmem:[#allocation10 + $0xa20] sm:$0xff]  ;;  %v17859_v37 = vld [vmem:[#allocation10 + $0x1c8] sm:$0xff] }
 0x4cf   :  { %11343 = vmatpush1.bf16.msra.mxu1 %v16388_v11  ;;  %v8423_v24 = vld [vmem:[#allocation10 + $0x680] sm:$0xff]  ;;  %v16581_v22 = vcombine.high %v8535_v61, %v8539_v53  ;;  %v17861_v11 = vld [vmem:[#allocation10 + $0x1e8] sm:$0xff]  ;;  %v16580_v42 = vcombine.low %v8535_v61, %v8539_v53 }
 0x4d0   :  { %11344 = vmatprep.subr.bf16.mxu1 %v16509_v58  ;;  %v8427_v18 = vld [vmem:[#allocation10 + $0x6a0] sm:$0xff]  ;;  %v16319_v44 = vcombine.high %v17859_v37, %v17861_v11  ;;  %v8264_v61 = vld [vmem:[#allocation10 + $0x188] sm:$0xff] }
 0x4d1   :  { %11390 = vmatpush2.bf16.msra.mxu0 %v16620_v35  ;;  %v16469_v50 = vcombine.high %v8423_v24, %v8427_v18  ;;  %v8415_v1 = vld [vmem:[#allocation10 + $0x640] sm:$0xff]  ;;  %v16468_v35 = vcombine.low %v8423_v24, %v8427_v18  ;;  %v8268_v53 = vld [vmem:[#allocation10 + $0x1a8] sm:$0xff] }
 0x4d2   :  { %11391 = vmatprep.subr.bf16.mxu0 %v16613_v59  ;;  %v8419_v58 = vld [vmem:[#allocation10 + $0x660] sm:$0xff] }
 0x4d3   :  { %11345 = vmatpush2.bf16.msra.mxu1 %v16508_v38  ;;  %v16461_v59 = vcombine.high %v8415_v1, %v8419_v58  ;;  %v8407_v38 = vld [vmem:[#allocation10 + $0x600] sm:$0xff]  ;;  %v16460_v29 = vcombine.low %v8415_v1, %v8419_v58  ;;  %v16311_v1 = vcombine.high %v8264_v61, %v8268_v53  ;;  %v8256_v58 = vld [vmem:[#allocation10 + $0x148] sm:$0xff] }
 0x4d4   :  { %11346 = vmatprep.subr.bf16.mxu1 %v16501_v57  ;;  %v8411_v32 = vld [vmem:[#allocation10 + $0x620] sm:$0xff] }
 0x4d5   :  { %11392 = vmatpush2.bf16.msra.mxu0 %v16612_v39  ;;  %v16453_v46 = vcombine.high %v8407_v38, %v8411_v32  ;;  %v8655_v55 = vld [vmem:[#allocation10 + $0xdc0] sm:$0xff] }
 0x4d6   :  { %11393 = vmatprep.subr.bf16.mxu0 %v16605_v52  ;;  %v8659_v39 = vld [vmem:[#allocation10 + $0xde0] sm:$0xff] }
 0x4d7   :  { %11347 = vmatpush2.bf16.msra.mxu1 %v16500_v36  ;;  %v16452_v36 = vcombine.low %v8407_v38, %v8411_v32  ;;  %v16701_v62 = vcombine.high %v8655_v55, %v8659_v39  ;;  %v8651_v16 = vld [vmem:[#allocation10 + $0xda0] sm:$0xff] }
 0x4d8   :  { %11348 = vmatprep.subr.bf16.mxu1 %v16493_v63  ;;  %v8647_v63 = vld [vmem:[#allocation10 + $0xd80] sm:$0xff] }
 0x4d9   :  { %11394 = vmatpush2.bf16.msra.mxu0 %v16604_v54  ;;  %v16700_v54 = vcombine.low %v8655_v55, %v8659_v39  ;;  %v8639_v49 = vld [vmem:[#allocation10 + $0xd40] sm:$0xff]  ;;  %v16692_v12 = vcombine.low %v8647_v63, %v8651_v16 }
 0x4da   :  { %11395 = vmatprep.subr.bf16.mxu0 %v16597_v14  ;;  %v17871_v14 = vpack.c.bf16 %v17833_v40, %v17833_v40  ;;  %v8643_v60 = vld [vmem:[#allocation10 + $0xd60] sm:$0xff] }
 0x4db   :  { %11349 = vmatpush2.bf16.msra.mxu1 %v16492_v2  ;;  %v16693_v2 = vcombine.high %v8647_v63, %v8651_v16  ;;  %v8635_v24 = vld [vmem:[#allocation10 + $0xd20] sm:$0xff]  ;;  %v8240_v16 = vld [vmem:[#allocation10 + $0xc8] sm:$0xff] }
 0x4dc   :  { %11350 = vmatprep.subr.bf16.mxu1 %v16485_v4  ;;  %v8615_v39 = vld [vmem:[#allocation10 + $0xc80] sm:$0xff] }
 0x4dd   :  { %11396 = vmatpush2.bf16.msra.mxu0 %v16596_v7 }
 0x4de   :  { %11397 = vmatprep.subr.bf16.mxu0 %v16589_v8  ;;  %v16685_v8 = vcombine.high %v8639_v49, %v8643_v60 }
 0x4df   :  { %11351 = vmatpush2.bf16.msra.mxu1 %v16484_v9 }
 0x4e0   :  { %11352 = vmatprep.subr.bf16.mxu1 %v16477_v28  ;;  %v8631_v28 = vld [vmem:[#allocation10 + $0xd00] sm:$0xff] }
 0x4e1   :  { %11398 = vmatpush2.bf16.msra.mxu0 %v16588_v19  ;;  %v16318_v19 = vcombine.low %v17859_v37, %v17861_v11  ;;  %v8623_v37 = vld [vmem:[#allocation10 + $0xcc0] sm:$0xff]  ;;  %v16676_v32 = vcombine.low %v8631_v28, %v8635_v24 }
 0x4e2   :  { %11399 = vmatprep.subr.bf16.mxu0 %v16581_v22  ;;  %v17880_v22 = vld [vmem:[#allocation10 + $0x5c8] sm:$0xff]  ;;  %v8627_v11 = vld [vmem:[#allocation10 + $0xce0] sm:$0xff] }
 0x4e3   :  { %11353 = vmatpush2.bf16.msra.mxu1 %v16476_v25  ;;  %v17882_v25 = vld [vmem:[#allocation10 + $0x5e8] sm:$0xff]  ;;  %v16669_v55 = vcombine.high %v8623_v37, %v8627_v11  ;;  %v16668_v63 = vcombine.low %v8623_v37, %v8627_v11 }
 0x4e4   :  { %11354 = vmatprep.subr.bf16.mxu1 %v16469_v50  ;;  %v8216_v37 = vld [vmem:[#allocation10 + $0x8] sm:$0xff] }
 0x4e5   :  { %11400 = vmatpush2.bf16.msra.mxu0 %v16580_v42  ;;  %v8260_v42 = vld [vmem:[#allocation10 + $0x168] sm:$0xff] }
 0x4e6   :  { %11451 = vmatprep.subr.bf16.mxu0 %v16319_v44  ;;  %v16677_v44 = vcombine.high %v8631_v28, %v8635_v24  ;;  %v16303_v38 = vcombine.high %v8256_v58, %v8260_v42  ;;  %v8224_v24 = vld [vmem:[#allocation10 + $0x48] sm:$0xff] }
 0x4e7   :  { %11355 = vmatpush2.bf16.msra.mxu1 %v16468_v35  ;;  %v16446_v35 = vcombine.low %v17880_v22, %v17882_v25  ;;  %v8220_v11 = vld [vmem:[#allocation10 + $0x28] sm:$0xff] }
 0x4e8   :  { %v17865_v57 = vpop.f32.mrf.mxu0  ;;  %11356 = vmatprep.subr.bf16.mxu1 %v16461_v59  ;;  %v16310_v59 = vcombine.low %v8264_v61, %v8268_v53  ;;  %v8603_v61 = vld [vmem:[#allocation10 + $0xc20] sm:$0xff] }
 0x4ea   :  { %v17867_v52 = vpop.f32.mrf.mxu0 }
 0x4eb   :  { %11357 = vmatpush2.bf16.msra.mxu1 %v16460_v29  ;;  %v8248_v29 = vld [vmem:[#allocation10 + $0x108] sm:$0xff] }
 0x4ec   :  { %v7569_v56 = vpop.f32.mrf.mxu0  ;;  %11358 = vmatprep.subr.bf16.mxu1 %v16453_v46  ;;  %v8252_v46 = vld [vmem:[#allocation10 + $0x128] sm:$0xff] }
 0x4ed   :  { %v16302_v56 = vcombine.low %v8256_v58, %v8260_v42 }
 0x4ee   :  { %v7570_v23 = vpop.f32.mrf.mxu0 }
 0x4ef   :  { %11359 = vmatpush2.bf16.msra.mxu1 %v16452_v36  ;;  %v8619_v36 = vld [vmem:[#allocation10 + $0xca0] sm:$0xff]  ;;  %v8244_v23 = vld [vmem:[#allocation10 + $0xe8] sm:$0xff] }
 0x4f0   :  { %11410 = vmatprep.subr.bf16.mxu1 %v16701_v62  ;;  %v16295_v62 = vcombine.high %v8248_v29, %v8252_v46  ;;  %v16286_v53 = vcombine.low %v8240_v16, %v8244_v23 }
 0x4f2   :  { %v7524_v4 = vpop.f32.mrf.mxu1  ;;  %11361 = vmatmul.mubr.bf16.vlgmr.msra.gmra.mxu1 %v17871_v14 }
 0x4f3   :  { %11411 = vmatpush1.bf16.msra.mxu1 %v16700_v54  ;;  %v7525_v31 = vadd.f32 %v7524_v4, %v17855_v26  ;;  %v16661_v54 = vcombine.high %v8615_v39, %v8619_v36  ;;  %v16287_v4 = vcombine.high %v8240_v16, %v8244_v23  ;;  %v16262_v16 = vcombine.low %v8216_v37, %v8220_v11 }
 0x4f4   :  { %v7526_v7 = vpop.f32.mrf.mxu1  ;;  %11412 = vmatprep.subr.bf16.mxu1 %v16693_v2  ;;  %v8607_v2 = vld [vmem:[#allocation10 + $0xc40] sm:$0xff] }
 0x4f5   :  { %v7527_v9 = vadd.f32 %v7526_v7, %v17857_v34  ;;  %v17884_v26 = vpack.c.bf16 %v7525_v31, %v7525_v31  ;;  %v16684_v34 = vcombine.low %v8639_v49, %v8643_v60  ;;  %v8611_v49 = vld [vmem:[#allocation10 + $0xc60] sm:$0xff]  ;;  %v16294_v60 = vcombine.low %v8248_v29, %v8252_v46  ;;  %v8232_v31 = vld [vmem:[#allocation10 + $0x88] sm:$0xff] }
 0x4f6   :  { %v7528_v40 = vpop.f32.mrf.mxu1  ;;  %v8236_v7 = vld [vmem:[#allocation10 + $0xa8] sm:$0xff]  ;;  %v16652_v28 = vcombine.low %v8607_v2, %v8611_v49  ;;  %v16263_v46 = vcombine.high %v8216_v37, %v8220_v11 }
 0x4f7   :  { %v17876_v18 = vpack.c.bf16 %v7527_v9, %v7527_v9  ;;  %11413 = vmatpush1.bf16.msra.mxu1 %v16692_v12  ;;  %v16660_v12 = vcombine.low %v8615_v39, %v8619_v36  ;;  %v8599_v9 = vld [vmem:[#allocation10 + $0xc00] sm:$0xff]  ;;  %v16279_v40 = vcombine.high %v8232_v31, %v8236_v7  ;;  %v16278_v58 = vcombine.low %v8232_v31, %v8236_v7  ;;  %v8336_v39 = vld [vmem:[#allocation10 + $0x3c8] sm:$0xff] }
 0x4f8   :  { %v7529_v50 = vpop.f32.mrf.mxu1  ;;  %11414 = vmatprep.subr.bf16.mxu1 %v16685_v8  ;;  %v16653_v8 = vcombine.high %v8607_v2, %v8611_v49  ;;  %v8340_v36 = vld [vmem:[#allocation10 + $0x3e8] sm:$0xff] }
 0x4f9   :  { %11401 = vmatprep.mubr.bf16.mxu0 %v17876_v18  ;;  %v16645_v50 = vcombine.high %v8599_v9, %v8603_v61  ;;  %v16383_v23 = vcombine.high %v8336_v39, %v8340_v36  ;;  %v8328_v2 = vld [vmem:[#allocation10 + $0x388] sm:$0xff]  ;;  %v16382_v31 = vcombine.low %v8336_v39, %v8340_v36 }
 0x4fa   :  { %11402 = vmatmul.mubr.bf16.vlgmr.msra.gmra.mxu0 %v17884_v26  ;;  %v8332_v49 = vld [vmem:[#allocation10 + $0x3a8] sm:$0xff] }
 0x4fb   :  { %11452 = vmatpush1.bf16.msra.mxu0 %v16318_v19  ;;  %11483 = vmatprep.mubr.bf16.mxu0 %v17823_v3  ;;  %v8228_v19 = vld [vmem:[#allocation10 + $0x68] sm:$0xff]  ;;  %v16375_v7 = vcombine.high %v8328_v2, %v8332_v49 }
 0x4fc   :  { %11453 = vmatprep.subr.bf16.mxu0 %v16311_v1  ;;  %11415 = vmatpush1.bf16.msra.mxu1 %v16684_v34  ;;  %v8719_v1 = vld [vmem:[#allocation10 + $0xfc0] sm:$0xff]  ;;  %v16271_v42 = vcombine.high %v8224_v24, %v8228_v19  ;;  %v16270_v29 = vcombine.low %v8224_v24, %v8228_v19  ;;  %v16374_v24 = vcombine.low %v8328_v2, %v8332_v49 }
 0x4fd   :  { %11416 = vmatprep.subr.bf16.mxu1 %v16677_v44  ;;  %v8723_v34 = vld [vmem:[#allocation10 + $0xfe0] sm:$0xff]  ;;  %v16644_v44 = vcombine.low %v8599_v9, %v8603_v61  ;;  %v8320_v9 = vld [vmem:[#allocation10 + $0x348] sm:$0xff] }
 0x4fe   :  { %v8324_v61 = vld [vmem:[#allocation10 + $0x368] sm:$0xff] }
 0x4ff   :  { %11454 = vmatpush1.bf16.msra.mxu0 %v16310_v59  ;;  %v16765_v59 = vcombine.high %v8719_v1, %v8723_v34  ;;  %v16367_v19 = vcombine.high %v8320_v9, %v8324_v61  ;;  %v16366_v37 = vcombine.low %v8320_v9, %v8324_v61 }
 0x500   :  { %11455 = vmatprep.subr.bf16.mxu0 %v16303_v38  ;;  %11417 = vmatpush1.bf16.msra.mxu1 %v16676_v32  ;;  %v8711_v38 = vld [vmem:[#allocation10 + $0xf80] sm:$0xff] }
 0x501   :  { %11418 = vmatprep.subr.bf16.mxu1 %v16669_v55  ;;  %v8715_v32 = vld [vmem:[#allocation10 + $0xfa0] sm:$0xff]  ;;  %v16764_v55 = vcombine.low %v8719_v1, %v8723_v34  ;;  %v8312_v1 = vld [vmem:[#allocation10 + $0x308] sm:$0xff] }
 0x502   :  { %v8316_v34 = vld [vmem:[#allocation10 + $0x328] sm:$0xff] }
 0x503   :  { %11456 = vmatpush1.bf16.msra.mxu0 %v16302_v56  ;;  %v16757_v56 = vcombine.high %v8711_v38, %v8715_v32  ;;  %v16359_v11 = vcombine.high %v8312_v1, %v8316_v34  ;;  %v16358_v39 = vcombine.low %v8312_v1, %v8316_v34  ;;  %v16447_v1 = vcombine.high %v17880_v22, %v17882_v25 }
 0x504   :  { %11457 = vmatprep.subr.bf16.mxu0 %v16295_v62  ;;  %11419 = vmatpush1.bf16.msra.mxu1 %v16668_v63  ;;  %v8703_v62 = vld [vmem:[#allocation10 + $0xf40] sm:$0xff] }
 0x505   :  { %11420 = vmatprep.subr.bf16.mxu1 %v16661_v54  ;;  %v8707_v63 = vld [vmem:[#allocation10 + $0xf60] sm:$0xff]  ;;  %v16756_v54 = vcombine.low %v8711_v38, %v8715_v32  ;;  %v8304_v38 = vld [vmem:[#allocation10 + $0x2c8] sm:$0xff] }
 0x506   :  { %v8308_v32 = vld [vmem:[#allocation10 + $0x2e8] sm:$0xff] }
 0x507   :  { %11458 = vmatpush1.bf16.msra.mxu0 %v16294_v60  ;;  %v16749_v60 = vcombine.high %v8703_v62, %v8707_v63  ;;  %v16351_v36 = vcombine.high %v8304_v38, %v8308_v32  ;;  %v16350_v2 = vcombine.low %v8304_v38, %v8308_v32 }
 0x508   :  { %11459 = vmatprep.subr.bf16.mxu0 %v16287_v4  ;;  %11421 = vmatpush1.bf16.msra.mxu1 %v16660_v12  ;;  %v8695_v4 = vld [vmem:[#allocation10 + $0xf00] sm:$0xff] }
 0x509   :  { %11422 = vmatprep.subr.bf16.mxu1 %v16653_v8  ;;  %v8699_v12 = vld [vmem:[#allocation10 + $0xf20] sm:$0xff]  ;;  %v16748_v8 = vcombine.low %v8703_v62, %v8707_v63  ;;  %v8296_v62 = vld [vmem:[#allocation10 + $0x288] sm:$0xff] }
 0x50a   :  { %v8300_v63 = vld [vmem:[#allocation10 + $0x2a8] sm:$0xff] }
 0x50b   :  { %11460 = vmatpush1.bf16.msra.mxu0 %v16286_v53  ;;  %v16741_v53 = vcombine.high %v8695_v4, %v8699_v12  ;;  %v16342_v9 = vcombine.low %v8296_v62, %v8300_v63 }
 0x50c   :  { %11461 = vmatprep.subr.bf16.mxu0 %v16279_v40  ;;  %11423 = vmatpush1.bf16.msra.mxu1 %v16652_v28  ;;  %v8687_v40 = vld [vmem:[#allocation10 + $0xec0] sm:$0xff] }
 0x50d   :  { %11424 = vmatprep.subr.bf16.mxu1 %v16645_v50  ;;  %v8691_v28 = vld [vmem:[#allocation10 + $0xee0] sm:$0xff]  ;;  %v16740_v50 = vcombine.low %v8695_v4, %v8699_v12  ;;  %v8288_v12 = vld [vmem:[#allocation10 + $0x248] sm:$0xff] }
 0x50f   :  { %11462 = vmatpush1.bf16.msra.mxu0 %v16278_v58  ;;  %v16733_v58 = vcombine.high %v8687_v40, %v8691_v28 }
 0x510   :  { %11463 = vmatprep.subr.bf16.mxu0 %v16271_v42  ;;  %11425 = vmatpush1.bf16.msra.mxu1 %v16644_v44  ;;  %v8679_v42 = vld [vmem:[#allocation10 + $0xe80] sm:$0xff] }
 0x511   :  { %11426 = vmatprep.subr.bf16.mxu1 %v16765_v59  ;;  %v8683_v44 = vld [vmem:[#allocation10 + $0xea0] sm:$0xff]  ;;  %v16732_v59 = vcombine.low %v8687_v40, %v8691_v28  ;;  %v17298_v28 = vld [vmem:[#allocation13] sm:$0xff] }
 0x513   :  { %11464 = vmatpush1.bf16.msra.mxu0 %v16270_v29  ;;  %v16725_v29 = vcombine.high %v8679_v42, %v8683_v44 }
 0x514   :  { %11465 = vmatprep.subr.bf16.mxu0 %v16263_v46  ;;  %11427 = vmatpush2.bf16.msra.mxu1 %v16764_v55  ;;  %v8671_v46 = vld [vmem:[#allocation10 + $0xe40] sm:$0xff] }
 0x515   :  { %11428 = vmatprep.subr.bf16.mxu1 %v16757_v56  ;;  %v8675_v55 = vld [vmem:[#allocation10 + $0xe60] sm:$0xff]  ;;  %v16724_v56 = vcombine.low %v8679_v42, %v8683_v44 }
 0x516   :  { %v16716_v4 = vcombine.low %v8671_v46, %v8675_v55 }
 0x517   :  { %11466 = vmatpush1.bf16.msra.mxu0 %v16262_v16  ;;  %v16717_v16 = vcombine.high %v8671_v46, %v8675_v55 }
 0x518   :  { %11467 = vmatprep.subr.bf16.mxu0 %v16383_v23  ;;  %11429 = vmatpush2.bf16.msra.mxu1 %v16756_v54  ;;  %v8663_v23 = vld [vmem:[#allocation10 + $0xe00] sm:$0xff] }
 0x519   :  { %11430 = vmatprep.subr.bf16.mxu1 %v16749_v60  ;;  %v8667_v54 = vld [vmem:[#allocation10 + $0xe20] sm:$0xff]  ;;  %v16343_v60 = vcombine.high %v8296_v62, %v8300_v63  ;;  %v8524_v62 = vld [vmem:[#allocation10 + $0x9a8] sm:$0xff] }
 0x51a   :  { %v16708_v40 = vcombine.low %v8663_v23, %v8667_v54 }
 0x51b   :  { %11468 = vmatpush2.bf16.msra.mxu0 %v16382_v31  ;;  %v8292_v31 = vld [vmem:[#allocation10 + $0x268] sm:$0xff] }
 0x51c   :  { %11469 = vmatprep.subr.bf16.mxu0 %v16375_v7  ;;  %11431 = vmatpush2.bf16.msra.mxu1 %v16748_v8  ;;  %v16709_v7 = vcombine.high %v8663_v23, %v8667_v54  ;;  %v16334_v42 = vcombine.low %v8288_v12, %v8292_v31 }
 0x51d   :  { %11432 = vmatprep.subr.bf16.mxu1 %v16741_v53  ;;  %v16335_v53 = vcombine.high %v8288_v12, %v8292_v31  ;;  %v8508_v31 = vld [vmem:[#allocation10 + $0x928] sm:$0xff] }
 0x51f   :  { %11470 = vmatpush2.bf16.msra.mxu0 %v16374_v24  ;;  %v4466_v24 = vrot.slane %v17298_v28, %v17748_v27 }
 0x520   :  { %11471 = vmatprep.subr.bf16.mxu0 %v16367_v19  ;;  %11433 = vmatpush2.bf16.msra.mxu1 %v16740_v50  ;;  %v8280_v19 = vld [vmem:[#allocation10 + $0x208] sm:$0xff] }
 0x521   :  { %11434 = vmatprep.subr.bf16.mxu1 %v16733_v58  ;;  %v8284_v50 = vld [vmem:[#allocation10 + $0x228] sm:$0xff]  ;;  %v4470_v58 = vrot.slane %v17298_v28, %v17751_v30 }
 0x522   :  { %v16327_v44 = vcombine.high %v8280_v19, %v8284_v50  ;;  %v16326_v46 = vcombine.low %v8280_v19, %v8284_v50  ;;  %v8488_v28 = vld [vmem:[#allocation10 + $0x888] sm:$0xff] }
 0x523   :  { %11472 = vmatpush2.bf16.msra.mxu0 %v16366_v37  ;;  %v7566_v37 = vadd.f32 %v17865_v57, %v4466_v24  ;;  %v7568_v32 = vadd.f32 %v17867_v52, %v4470_v58  ;;  %v8512_v52 = vld [vmem:[#allocation10 + $0x948] sm:$0xff] }
 0x524   :  { %11473 = vmatprep.subr.bf16.mxu0 %v16359_v11  ;;  %11435 = vmatpush2.bf16.msra.mxu1 %v16732_v59  ;;  %v8528_v11 = vld [vmem:[#allocation10 + $0x9c8] sm:$0xff] }
 0x525   :  { %11436 = vmatprep.subr.bf16.mxu1 %v16725_v29  ;;  %v8532_v59 = vld [vmem:[#allocation10 + $0x9e8] sm:$0xff] }
 0x526   :  { %v16574_v57 = vcombine.low %v8528_v11, %v8532_v59  ;;  %v8492_v24 = vld [vmem:[#allocation10 + $0x8a8] sm:$0xff] }
 0x527   :  { %11474 = vmatpush2.bf16.msra.mxu0 %v16358_v39  ;;  %v16575_v39 = vcombine.high %v8528_v11, %v8532_v59  ;;  %v16535_v50 = vcombine.high %v8488_v28, %v8492_v24  ;;  %v16534_v58 = vcombine.low %v8488_v28, %v8492_v24  ;;  %v8544_v28 = vld [vmem:[#allocation10 + $0xa48] sm:$0xff] }
 0x528   :  { %v7647_v49 = vpop.f32.mrf.mxu0  ;;  %11475 = vmatprep.subr.bf16.mxu0 %v16351_v36  ;;  %11437 = vmatpush2.bf16.msra.mxu1 %v16724_v56  ;;  %v8520_v56 = vld [vmem:[#allocation10 + $0x988] sm:$0xff] }
 0x529   :  { %11438 = vmatprep.subr.bf16.mxu1 %v16717_v16  ;;  %v8548_v24 = vld [vmem:[#allocation10 + $0xa68] sm:$0xff] }
 0x52a   :  { %v7649_v8 = vpop.f32.mrf.mxu0 }
 0x52b   :  { %11476 = vmatpush2.bf16.msra.mxu0 %v16350_v2  ;;  %v16567_v2 = vcombine.high %v8520_v56, %v8524_v62 }
 0x52c   :  { %v7651_v61 = vpop.f32.mrf.mxu0  ;;  %11477 = vmatprep.subr.bf16.mxu0 %v16343_v60  ;;  %11439 = vmatpush2.bf16.msra.mxu1 %v16716_v4  ;;  %v8516_v60 = vld [vmem:[#allocation10 + $0x968] sm:$0xff]  ;;  %v16566_v4 = vcombine.low %v8520_v56, %v8524_v62 }
 0x52d   :  { %11440 = vmatprep.subr.bf16.mxu1 %v16709_v7  ;;  %v16559_v12 = vcombine.high %v8512_v52, %v8516_v60  ;;  %v16558_v7 = vcombine.low %v8512_v52, %v8516_v60  ;;  %v8500_v61 = vld [vmem:[#allocation10 + $0x8e8] sm:$0xff] }
 0x52e   :  { %v7652_v34 = vpop.f32.mrf.mxu0  ;;  %v8576_v62 = vld [vmem:[#allocation10 + $0xb48] sm:$0xff] }
 0x52f   :  { %11478 = vmatpush2.bf16.msra.mxu0 %v16342_v9  ;;  %v8496_v9 = vld [vmem:[#allocation10 + $0x8c8] sm:$0xff] }
 0x530   :  { %11479 = vmatprep.subr.bf16.mxu0 %v16335_v53  ;;  %11441 = vmatpush2.bf16.msra.mxu1 %v16708_v40  ;;  %v16543_v40 = vcombine.high %v8496_v9, %v8500_v61  ;;  %v16542_v19 = vcombine.low %v8496_v9, %v8500_v61  ;;  %v8484_v34 = vld [vmem:[#allocation10 + $0x868] sm:$0xff] }
 0x531   :  { %11492 = vmatprep.subr.bf16.mxu1 %v16447_v1  ;;  %v8480_v1 = vld [vmem:[#allocation10 + $0x848] sm:$0xff] }
 0x532   :  { %v7606_v38 = vpop.f32.mrf.mxu1  ;;  %v16526_v11 = vcombine.low %v8480_v1, %v8484_v34  ;;  %v8572_v52 = vld [vmem:[#allocation10 + $0xb28] sm:$0xff] }
 0x533   :  { %v7607_v29 = vadd.f32 %v7606_v38, %v7566_v37  ;;  %11480 = vmatpush2.bf16.msra.mxu0 %v16334_v42  ;;  %v16527_v42 = vcombine.high %v8480_v1, %v8484_v34  ;;  %v8476_v37 = vld [vmem:[#allocation10 + $0x828] sm:$0xff]  ;;  %v16591_v34 = vcombine.high %v8544_v28, %v8548_v24 }
 0x534   :  { %v7608_v55 = vpop.f32.mrf.mxu1  ;;  %11481 = vmatprep.subr.bf16.mxu0 %v16327_v44  ;;  %v8472_v44 = vld [vmem:[#allocation10 + $0x808] sm:$0xff] }
 0x535   :  { %v7609_v36 = vadd.f32 %v7608_v55, %v7568_v32  ;;  %v17897_v63 = vadd.f32 %v7647_v49, %v7607_v29  ;;  %v8504_v49 = vld [vmem:[#allocation10 + $0x908] sm:$0xff]  ;;  %v16519_v59 = vcombine.high %v8472_v44, %v8476_v37  ;;  %v16518_v29 = vcombine.low %v8472_v44, %v8476_v37 }
 0x536   :  { %v7610_v16 = vpop.f32.mrf.mxu1  ;;  %v16550_v53 = vcombine.low %v8504_v49, %v8508_v31  ;;  %v8592_v38 = vld [vmem:[#allocation10 + $0xbc8] sm:$0xff]  ;;  %v16590_v37 = vcombine.low %v8544_v28, %v8548_v24 }
 0x537   :  { %11482 = vmatpush2.bf16.msra.mxu0 %v16326_v46  ;;  %v17899_v23 = vadd.f32 %v7649_v8, %v7609_v36  ;;  %v16551_v8 = vcombine.high %v8504_v49, %v8508_v31  ;;  %v8596_v32 = vld [vmem:[#allocation10 + $0xbe8] sm:$0xff] }
 0x538   :  { %v7611_v54 = vpop.f32.mrf.mxu1  ;;  %11533 = vmatprep.subr.bf16.mxu0 %v16575_v39  ;;  %v16639_v46 = vcombine.high %v8592_v38, %v8596_v32  ;;  %v8584_v55 = vld [vmem:[#allocation10 + $0xb88] sm:$0xff]  ;;  %v16638_v36 = vcombine.low %v8592_v38, %v8596_v32  ;;  %v8277_v38 = vld [vmem:[#allocation10 + $0x1f0] sm:$0xff] }
 0x539   :  { %v8588_v39 = vld [vmem:[#allocation10 + $0xba8] sm:$0xff] }
 0x53a   :  { %11484 = vmatmul.mubr.bf16.vlgmr.msra.gmra.mxu0 %v17840_v21  ;;  %v16631_v56 = vcombine.high %v8584_v55, %v8588_v39  ;;  %v8580_v16 = vld [vmem:[#allocation10 + $0xb68] sm:$0xff] }
 0x53b   :  { %11534 = vmatpush1.bf16.msra.mxu0 %v16574_v57  ;;  %11565 = vmatprep.mubr.bf16.mxu0 %v17876_v18  ;;  %v16630_v57 = vcombine.low %v8584_v55, %v8588_v39  ;;  %v16623_v54 = vcombine.high %v8576_v62, %v8580_v16  ;;  %v16622_v60 = vcombine.low %v8576_v62, %v8580_v16  ;;  %v8564_v49 = vld [vmem:[#allocation10 + $0xae8] sm:$0xff] }
 0x53c   :  { %11535 = vmatprep.subr.bf16.mxu0 %v16567_v2  ;;  %v8568_v2 = vld [vmem:[#allocation10 + $0xb08] sm:$0xff] }
 0x53d   :  { %v16614_v31 = vcombine.low %v8568_v2, %v8572_v52  ;;  %v8556_v9 = vld [vmem:[#allocation10 + $0xaa8] sm:$0xff] }
 0x53e   :  { %v8396_v16 = vld [vmem:[#allocation10 + $0x5a8] sm:$0xff] }
 0x53f   :  { %11536 = vmatpush1.bf16.msra.mxu0 %v16566_v4  ;;  %v16615_v4 = vcombine.high %v8568_v2, %v8572_v52  ;;  %v8376_v28 = vld [vmem:[#allocation10 + $0x508] sm:$0xff] }
 0x540   :  { %11537 = vmatprep.subr.bf16.mxu0 %v16559_v12  ;;  %v8560_v12 = vld [vmem:[#allocation10 + $0xac8] sm:$0xff] }
 0x541   :  { %v16606_v61 = vcombine.low %v8560_v12, %v8564_v49  ;;  %v8380_v24 = vld [vmem:[#allocation10 + $0x528] sm:$0xff] }
 0x542   :  { %v16423_v25 = vcombine.high %v8376_v28, %v8380_v24 }
 0x543   :  { %11538 = vmatpush1.bf16.msra.mxu0 %v16558_v7  ;;  %v16607_v7 = vcombine.high %v8560_v12, %v8564_v49  ;;  %v8384_v12 = vld [vmem:[#allocation10 + $0x548] sm:$0xff] }
 0x544   :  { %11539 = vmatprep.subr.bf16.mxu0 %v16551_v8  ;;  %v8552_v8 = vld [vmem:[#allocation10 + $0xa88] sm:$0xff] }
 0x547   :  { %11540 = vmatpush1.bf16.msra.mxu0 %v16550_v53 }
 0x548   :  { %11541 = vmatprep.subr.bf16.mxu0 %v16543_v40  ;;  %v16599_v40 = vcombine.high %v8552_v8, %v8556_v9 }
 0x54b   :  { %11542 = vmatpush1.bf16.msra.mxu0 %v16542_v19 }
 0x54c   :  { %11543 = vmatprep.subr.bf16.mxu0 %v16535_v50  ;;  %v16598_v50 = vcombine.low %v8552_v8, %v8556_v9 }
 0x54f   :  { %11544 = vmatpush1.bf16.msra.mxu0 %v16534_v58  ;;  %v8536_v58 = vld [vmem:[#allocation10 + $0xa08] sm:$0xff] }
 0x550   :  { %11545 = vmatprep.subr.bf16.mxu0 %v16527_v42  ;;  %v8540_v42 = vld [vmem:[#allocation10 + $0xa28] sm:$0xff] }
 0x553   :  { %11546 = vmatpush1.bf16.msra.mxu0 %v16526_v11  ;;  %v16583_v11 = vcombine.high %v8536_v58, %v8540_v42 }
 0x554   :  { %11547 = vmatprep.subr.bf16.mxu0 %v16519_v59  ;;  %v8273_v59 = vld [vmem:[#allocation10 + $0x1d0] sm:$0xff] }
 0x555   :  { %v16321_v39 = vcombine.high %v8273_v59, %v8277_v38  ;;  %v16320_v52 = vcombine.low %v8273_v59, %v8277_v38 }
 0x557   :  { %11548 = vmatpush1.bf16.msra.mxu0 %v16518_v29  ;;  %v16582_v29 = vcombine.low %v8536_v58, %v8540_v42  ;;  %v8368_v58 = vld [vmem:[#allocation10 + $0x4c8] sm:$0xff] }
 0x558   :  { %11549 = vmatprep.subr.bf16.mxu0 %v16639_v46  ;;  %v8372_v42 = vld [vmem:[#allocation10 + $0x4e8] sm:$0xff] }
 0x559   :  { %v16415_v38 = vcombine.high %v8368_v58, %v8372_v42 }
 0x55b   :  { %11550 = vmatpush2.bf16.msra.mxu0 %v16638_v36 }
 0x55c   :  { %11551 = vmatprep.subr.bf16.mxu0 %v16631_v56  ;;  %v8392_v56 = vld [vmem:[#allocation10 + $0x588] sm:$0xff] }
 0x55d   :  { %v16438_v8 = vcombine.low %v8392_v56, %v8396_v16 }
 0x55f   :  { %11552 = vmatpush2.bf16.msra.mxu0 %v16630_v57  ;;  %v8265_v57 = vld [vmem:[#allocation10 + $0x190] sm:$0xff] }
 0x560   :  { %11553 = vmatprep.subr.bf16.mxu0 %v16623_v54  ;;  %v8269_v54 = vld [vmem:[#allocation10 + $0x1b0] sm:$0xff] }
 0x561   :  { %v16313_v49 = vcombine.high %v8265_v57, %v8269_v54  ;;  %v16312_v9 = vcombine.low %v8265_v57, %v8269_v54  ;;  %v8352_v57 = vld [vmem:[#allocation10 + $0x448] sm:$0xff] }
 0x562   :  { %v8356_v54 = vld [vmem:[#allocation10 + $0x468] sm:$0xff] }
 0x563   :  { %11554 = vmatpush2.bf16.msra.mxu0 %v16622_v60 }
 0x564   :  { %11555 = vmatprep.subr.bf16.mxu0 %v16615_v4 }
 0x567   :  { %11556 = vmatpush2.bf16.msra.mxu0 %v16614_v31  ;;  %v8388_v31 = vld [vmem:[#allocation10 + $0x568] sm:$0xff] }
 0x568   :  { %v17903_v53 = vpop.f32.mrf.mxu0  ;;  %11557 = vmatprep.subr.bf16.mxu0 %v16607_v7  ;;  %v8261_v7 = vld [vmem:[#allocation10 + $0x170] sm:$0xff] }
 0x56a   :  { %v17905_v19 = vpop.f32.mrf.mxu0 }
 0x56b   :  { %11558 = vmatpush2.bf16.msra.mxu0 %v16606_v61  ;;  %v16431_v61 = vcombine.high %v8384_v12, %v8388_v31 }
 0x56c   :  { %v11325_v1 = vpop.f32.mrf.mxu0  ;;  %11559 = vmatprep.subr.bf16.mxu0 %v16599_v40 }
 0x56d   :  { %v8253_v1 = vld [vmem:[#allocation10 + $0x130] sm:$0xff] }
 0x56e   :  { %v11326_v44 = vpop.f32.mrf.mxu0 }
 0x56f   :  { %11560 = vmatpush2.bf16.msra.mxu0 %v16598_v50  ;;  %v8249_v50 = vld [vmem:[#allocation10 + $0x110] sm:$0xff] }
 0x570   :  { %11561 = vmatprep.subr.bf16.mxu0 %v16591_v34  ;;  %v16430_v34 = vcombine.low %v8384_v12, %v8388_v31  ;;  %v8241_v44 = vld [vmem:[#allocation10 + $0xd0] sm:$0xff]  ;;  %v16296_v59 = vcombine.low %v8249_v50, %v8253_v1 }
 0x572   :  { %v7688_v32 = vpop.f32.mrf.mxu1 }
 0x573   :  { %11562 = vmatpush2.bf16.msra.mxu0 %v16590_v37  ;;  %v7689_v46 = vadd.f32 %v7688_v32, %v17897_v63  ;;  %v16439_v63 = vcombine.high %v8392_v56, %v8396_v16  ;;  %v8245_v37 = vld [vmem:[#allocation10 + $0xf0] sm:$0xff] }
 0x574   :  { %v7690_v55 = vpop.f32.mrf.mxu1  ;;  %11563 = vmatprep.subr.bf16.mxu0 %v16583_v11  ;;  %v16422_v11 = vcombine.low %v8376_v28, %v8380_v24  ;;  %v16289_v32 = vcombine.high %v8241_v44, %v8245_v37  ;;  %v16288_v56 = vcombine.low %v8241_v44, %v8245_v37  ;;  %v8456_v44 = vld [vmem:[#allocation10 + $0x788] sm:$0xff] }
 0x575   :  { %v7691_v36 = vadd.f32 %v7690_v55, %v17899_v23  ;;  %v17911_v60 = vpack.c.bf16 %v7689_v46, %v7689_v46  ;;  %v8257_v23 = vld [vmem:[#allocation10 + $0x150] sm:$0xff]  ;;  %v8364_v46 = vld [vmem:[#allocation10 + $0x4a8] sm:$0xff] }
 0x576   :  { %v7692_v62 = vpop.f32.mrf.mxu1  ;;  %v16305_v40 = vcombine.high %v8257_v23, %v8261_v7  ;;  %v16304_v22 = vcombine.low %v8257_v23, %v8261_v7  ;;  %v8233_v55 = vld [vmem:[#allocation10 + $0x90] sm:$0xff]  ;;  %v8344_v23 = vld [vmem:[#allocation10 + $0x408] sm:$0xff] }
 0x577   :  { %v17909_v2 = vpack.c.bf16 %v7691_v36, %v7691_v36  ;;  %11564 = vmatpush2.bf16.msra.mxu0 %v16582_v29  ;;  %v8360_v29 = vld [vmem:[#allocation10 + $0x488] sm:$0xff]  ;;  %v16414_v36 = vcombine.low %v8368_v58, %v8372_v42 }
 0x578   :  { %v7693_v4 = vpop.f32.mrf.mxu1  ;;  %11615 = vmatprep.subr.bf16.mxu0 %v16321_v39  ;;  %v8237_v39 = vld [vmem:[#allocation10 + $0xb0] sm:$0xff]  ;;  %v16407_v62 = vcombine.high %v8360_v29, %v8364_v46  ;;  %v16406_v12 = vcombine.low %v8360_v29, %v8364_v46  ;;  %v8348_v7 = vld [vmem:[#allocation10 + $0x428] sm:$0xff] }
 0x579   :  { %11442 = vmatprep.mubr.bf16.mxu1 %v17909_v2  ;;  %v16281_v16 = vcombine.high %v8233_v55, %v8237_v39  ;;  %v8229_v4 = vld [vmem:[#allocation10 + $0x70] sm:$0xff]  ;;  %v16391_v28 = vcombine.high %v8344_v23, %v8348_v7  ;;  %v8460_v37 = vld [vmem:[#allocation10 + $0x7a8] sm:$0xff] }
 0x57a   :  { %11566 = vmatmul.mubr.bf16.vlgmr.msra.gmra.mxu0 %v17884_v26  ;;  %11443 = vmatmul.mubr.bf16.vlgmr.msra.gmra.mxu1 %v17911_v60  ;;  %v16503_v29 = vcombine.high %v8456_v44, %v8460_v37 }
 0x57b   :  { %11493 = vmatpush1.bf16.msra.mxu1 %v16446_v35  ;;  %11616 = vmatpush1.bf16.msra.mxu0 %v16320_v52  ;;  %v16297_v35 = vcombine.high %v8249_v50, %v8253_v1  ;;  %v8225_v52 = vld [vmem:[#allocation10 + $0x50] sm:$0xff]  ;;  %v8464_v50 = vld [vmem:[#allocation10 + $0x7c8] sm:$0xff] }
 0x57c   :  { %11647 = vmatprep.mubr.bf16.mxu0 %v17823_v3  ;;  %11524 = vmatprep.mubr.bf16.mxu1 %v17850_v20  ;;  %v16273_v31 = vcombine.high %v8225_v52, %v8229_v4  ;;  %v8468_v1 = vld [vmem:[#allocation10 + $0x7e8] sm:$0xff] }
 0x57d   :  { %11494 = vmatprep.subr.bf16.mxu1 %v16439_v63  ;;  %11617 = vmatprep.subr.bf16.mxu0 %v16313_v49  ;;  %v16280_v63 = vcombine.low %v8233_v55, %v8237_v39  ;;  %v16399_v49 = vcombine.high %v8352_v57, %v8356_v54  ;;  %v16511_v58 = vcombine.high %v8464_v50, %v8468_v1  ;;  %v8448_v55 = vld [vmem:[#allocation10 + $0x748] sm:$0xff] }
 0x57e   :  { %v8452_v39 = vld [vmem:[#allocation10 + $0x768] sm:$0xff] }
 0x57f   :  { %11495 = vmatpush1.bf16.msra.mxu1 %v16438_v8  ;;  %11618 = vmatpush1.bf16.msra.mxu0 %v16312_v9  ;;  %v8217_v8 = vld [vmem:[#allocation10 + $0x10] sm:$0xff] }
 0x580   :  { %11496 = vmatprep.subr.bf16.mxu1 %v16431_v61  ;;  %11619 = vmatprep.subr.bf16.mxu0 %v16305_v40  ;;  %v8221_v9 = vld [vmem:[#allocation10 + $0x30] sm:$0xff]  ;;  %v16398_v61 = vcombine.low %v8352_v57, %v8356_v54  ;;  %v16272_v40 = vcombine.low %v8225_v52, %v8229_v4  ;;  %v16495_v57 = vcombine.high %v8448_v55, %v8452_v39  ;;  %v8440_v52 = vld [vmem:[#allocation10 + $0x708] sm:$0xff] }
 0x581   :  { %v16265_v24 = vcombine.high %v8217_v8, %v8221_v9  ;;  %v8444_v4 = vld [vmem:[#allocation10 + $0x728] sm:$0xff] }
 0x583   :  { %11497 = vmatpush1.bf16.msra.mxu1 %v16430_v34  ;;  %11620 = vmatpush1.bf16.msra.mxu0 %v16304_v22  ;;  %v8337_v34 = vld [vmem:[#allocation10 + $0x3d0] sm:$0xff] }
 0x584   :  { %11498 = vmatprep.subr.bf16.mxu1 %v16423_v25  ;;  %11621 = vmatprep.subr.bf16.mxu0 %v16297_v35  ;;  %v8341_v22 = vld [vmem:[#allocation10 + $0x3f0] sm:$0xff]  ;;  %v16390_v25 = vcombine.low %v8344_v23, %v8348_v7  ;;  %v16264_v35 = vcombine.low %v8217_v8, %v8221_v9  ;;  %v16487_v23 = vcombine.high %v8440_v52, %v8444_v4  ;;  %v8432_v8 = vld [vmem:[#allocation10 + $0x6c8] sm:$0xff] }
 0x585   :  { %v16385_v42 = vcombine.high %v8337_v34, %v8341_v22  ;;  %v8436_v9 = vld [vmem:[#allocation10 + $0x6e8] sm:$0xff] }
 0x587   :  { %11499 = vmatpush1.bf16.msra.mxu1 %v16422_v11  ;;  %11622 = vmatpush1.bf16.msra.mxu0 %v16296_v59  ;;  %v8329_v11 = vld [vmem:[#allocation10 + $0x390] sm:$0xff] }
 0x588   :  { %11500 = vmatprep.subr.bf16.mxu1 %v16415_v38  ;;  %11623 = vmatprep.subr.bf16.mxu0 %v16289_v32  ;;  %v8333_v59 = vld [vmem:[#allocation10 + $0x3b0] sm:$0xff]  ;;  %v16510_v38 = vcombine.low %v8464_v50, %v8468_v1  ;;  %v16384_v32 = vcombine.low %v8337_v34, %v8341_v22  ;;  %v16479_v50 = vcombine.high %v8432_v8, %v8436_v9  ;;  %v8424_v34 = vld [vmem:[#allocation10 + $0x688] sm:$0xff] }
 0x589   :  { %v16377_v46 = vcombine.high %v8329_v11, %v8333_v59  ;;  %v8428_v22 = vld [vmem:[#allocation10 + $0x6a8] sm:$0xff] }
 0x58b   :  { %11501 = vmatpush1.bf16.msra.mxu1 %v16414_v36  ;;  %11624 = vmatpush1.bf16.msra.mxu0 %v16288_v56  ;;  %v8321_v36 = vld [vmem:[#allocation10 + $0x350] sm:$0xff] }
 0x58c   :  { %11502 = vmatprep.subr.bf16.mxu1 %v16407_v62  ;;  %11625 = vmatprep.subr.bf16.mxu0 %v16281_v16  ;;  %v8325_v56 = vld [vmem:[#allocation10 + $0x370] sm:$0xff]  ;;  %v16502_v62 = vcombine.low %v8456_v44, %v8460_v37  ;;  %v16376_v16 = vcombine.low %v8329_v11, %v8333_v59  ;;  %v16471_v44 = vcombine.high %v8424_v34, %v8428_v22  ;;  %v8416_v11 = vld [vmem:[#allocation10 + $0x648] sm:$0xff] }
 0x58d   :  { %v16369_v54 = vcombine.high %v8321_v36, %v8325_v56  ;;  %v8420_v59 = vld [vmem:[#allocation10 + $0x668] sm:$0xff] }
 0x58f   :  { %11503 = vmatpush1.bf16.msra.mxu1 %v16406_v12  ;;  %11626 = vmatpush1.bf16.msra.mxu0 %v16280_v63  ;;  %v8313_v12 = vld [vmem:[#allocation10 + $0x310] sm:$0xff] }
 0x590   :  { %11504 = vmatprep.subr.bf16.mxu1 %v16399_v49  ;;  %11627 = vmatprep.subr.bf16.mxu0 %v16273_v31  ;;  %v8317_v63 = vld [vmem:[#allocation10 + $0x330] sm:$0xff]  ;;  %v16494_v49 = vcombine.low %v8448_v55, %v8452_v39  ;;  %v16368_v31 = vcombine.low %v8321_v36, %v8325_v56  ;;  %v16463_v55 = vcombine.high %v8416_v11, %v8420_v59  ;;  %v8408_v36 = vld [vmem:[#allocation10 + $0x608] sm:$0xff] }
 0x591   :  { %v16361_v7 = vcombine.high %v8313_v12, %v8317_v63  ;;  %v8412_v56 = vld [vmem:[#allocation10 + $0x628] sm:$0xff] }
 0x593   :  { %11505 = vmatpush1.bf16.msra.mxu1 %v16398_v61  ;;  %11628 = vmatpush1.bf16.msra.mxu0 %v16272_v40  ;;  %v8305_v61 = vld [vmem:[#allocation10 + $0x2d0] sm:$0xff] }
 0x594   :  { %11506 = vmatprep.subr.bf16.mxu1 %v16391_v28  ;;  %11629 = vmatprep.subr.bf16.mxu0 %v16265_v24  ;;  %v8309_v40 = vld [vmem:[#allocation10 + $0x2f0] sm:$0xff]  ;;  %v16486_v28 = vcombine.low %v8440_v52, %v8444_v4  ;;  %v16360_v24 = vcombine.low %v8313_v12, %v8317_v63  ;;  %v16455_v52 = vcombine.high %v8408_v36, %v8412_v56  ;;  %v8656_v12 = vld [vmem:[#allocation10 + $0xdc8] sm:$0xff] }
 0x595   :  { %v16353_v1 = vcombine.high %v8305_v61, %v8309_v40  ;;  %v8660_v63 = vld [vmem:[#allocation10 + $0xde8] sm:$0xff] }
 0x597   :  { %11507 = vmatpush1.bf16.msra.mxu1 %v16390_v25  ;;  %11630 = vmatpush1.bf16.msra.mxu0 %v16264_v35  ;;  %v8297_v25 = vld [vmem:[#allocation10 + $0x290] sm:$0xff] }
 0x598   :  { %11508 = vmatprep.subr.bf16.mxu1 %v16511_v58  ;;  %11631 = vmatprep.subr.bf16.mxu0 %v16385_v42  ;;  %v8301_v35 = vld [vmem:[#allocation10 + $0x2b0] sm:$0xff]  ;;  %v16478_v58 = vcombine.low %v8432_v8, %v8436_v9  ;;  %v16352_v42 = vcombine.low %v8305_v61, %v8309_v40  ;;  %v16703_v61 = vcombine.high %v8656_v12, %v8660_v63 }
 0x599   :  { %v16345_v37 = vcombine.high %v8297_v25, %v8301_v35 }
 0x59b   :  { %11509 = vmatpush2.bf16.msra.mxu1 %v16510_v38  ;;  %11632 = vmatpush2.bf16.msra.mxu0 %v16384_v32  ;;  %v8289_v38 = vld [vmem:[#allocation10 + $0x250] sm:$0xff] }
 0x59c   :  { %11510 = vmatprep.subr.bf16.mxu1 %v16503_v29  ;;  %11633 = vmatprep.subr.bf16.mxu0 %v16377_v46  ;;  %v8293_v32 = vld [vmem:[#allocation10 + $0x270] sm:$0xff]  ;;  %v16470_v29 = vcombine.low %v8424_v34, %v8428_v22  ;;  %v16344_v46 = vcombine.low %v8297_v25, %v8301_v35  ;;  %v16702_v22 = vcombine.low %v8656_v12, %v8660_v63 }
 0x59d   :  { %v16337_v39 = vcombine.high %v8289_v38, %v8293_v32  ;;  %v8525_v34 = vld [vmem:[#allocation10 + $0x9b0] sm:$0xff] }
 0x59f   :  { %11511 = vmatpush2.bf16.msra.mxu1 %v16502_v62  ;;  %11634 = vmatpush2.bf16.msra.mxu0 %v16376_v16  ;;  %v8281_v62 = vld [vmem:[#allocation10 + $0x210] sm:$0xff] }
 0x5a0   :  { %11512 = vmatprep.subr.bf16.mxu1 %v16495_v57  ;;  %11635 = vmatprep.subr.bf16.mxu0 %v16369_v54  ;;  %v8285_v16 = vld [vmem:[#allocation10 + $0x230] sm:$0xff]  ;;  %v16462_v57 = vcombine.low %v8416_v11, %v8420_v59  ;;  %v16336_v54 = vcombine.low %v8289_v38, %v8293_v32  ;;  %v8644_v11 = vld [vmem:[#allocation10 + $0xd68] sm:$0xff] }
 0x5a1   :  { %v16329_v4 = vcombine.high %v8281_v62, %v8285_v16  ;;  %v16328_v8 = vcombine.low %v8281_v62, %v8285_v16  ;;  %v8513_v38 = vld [vmem:[#allocation10 + $0x950] sm:$0xff]  ;;  %v8632_v16 = vld [vmem:[#allocation10 + $0xd08] sm:$0xff] }
 0x5a2   :  { %v8517_v32 = vld [vmem:[#allocation10 + $0x970] sm:$0xff] }
 0x5a3   :  { %11513 = vmatpush2.bf16.msra.mxu1 %v16494_v49  ;;  %11636 = vmatpush2.bf16.msra.mxu0 %v16368_v31  ;;  %v8529_v49 = vld [vmem:[#allocation10 + $0x9d0] sm:$0xff]  ;;  %v16561_v62 = vcombine.high %v8513_v38, %v8517_v32  ;;  %v16560_v63 = vcombine.low %v8513_v38, %v8517_v32 }
 0x5a4   :  { %11514 = vmatprep.subr.bf16.mxu1 %v16487_v23  ;;  %11637 = vmatprep.subr.bf16.mxu0 %v16361_v7  ;;  %v8533_v31 = vld [vmem:[#allocation10 + $0x9f0] sm:$0xff]  ;;  %v16454_v7 = vcombine.low %v8408_v36, %v8412_v56 }
 0x5a5   :  { %v16577_v40 = vcombine.high %v8529_v49, %v8533_v31  ;;  %v16576_v35 = vcombine.low %v8529_v49, %v8533_v31 }
 0x5a7   :  { %11515 = vmatpush2.bf16.msra.mxu1 %v16486_v28  ;;  %11638 = vmatpush2.bf16.msra.mxu0 %v16360_v24  ;;  %v8648_v28 = vld [vmem:[#allocation10 + $0xd88] sm:$0xff] }
 0x5a8   :  { %11516 = vmatprep.subr.bf16.mxu1 %v16479_v50  ;;  %11639 = vmatprep.subr.bf16.mxu0 %v16353_v1  ;;  %v8652_v50 = vld [vmem:[#allocation10 + $0xda8] sm:$0xff]  ;;  %v8521_v1 = vld [vmem:[#allocation10 + $0x990] sm:$0xff] }
 0x5ab   :  { %11517 = vmatpush2.bf16.msra.mxu1 %v16478_v58  ;;  %11640 = vmatpush2.bf16.msra.mxu0 %v16352_v42  ;;  %v16695_v42 = vcombine.high %v8648_v28, %v8652_v50 }
 0x5ac   :  { %11518 = vmatprep.subr.bf16.mxu1 %v16471_v44  ;;  %11641 = vmatprep.subr.bf16.mxu0 %v16345_v37  ;;  %v16569_v44 = vcombine.high %v8521_v1, %v8525_v34  ;;  %v8640_v37 = vld [vmem:[#allocation10 + $0xd48] sm:$0xff] }
 0x5ad   :  { %v16687_v36 = vcombine.high %v8640_v37, %v8644_v11 }
 0x5af   :  { %11519 = vmatpush2.bf16.msra.mxu1 %v16470_v29  ;;  %11642 = vmatpush2.bf16.msra.mxu0 %v16344_v46 }
 0x5b0   :  { %11520 = vmatprep.subr.bf16.mxu1 %v16463_v55  ;;  %11643 = vmatprep.subr.bf16.mxu0 %v16337_v39  ;;  %v16694_v55 = vcombine.low %v8648_v28, %v8652_v50  ;;  %v16568_v39 = vcombine.low %v8521_v1, %v8525_v34  ;;  %v8616_v50 = vld [vmem:[#allocation10 + $0xc88] sm:$0xff]  ;;  %v8489_v34 = vld [vmem:[#allocation10 + $0x890] sm:$0xff] }
 0x5b1   :  { %v8620_v1 = vld [vmem:[#allocation10 + $0xca8] sm:$0xff] }
 0x5b2   :  { %v11362_v23 = vpop.f32.mrf.mxu1  ;;  %v16662_v38 = vcombine.low %v8616_v50, %v8620_v1 }
 0x5b3   :  { %11521 = vmatpush2.bf16.msra.mxu1 %v16462_v57  ;;  %11644 = vmatpush2.bf16.msra.mxu0 %v16336_v54  ;;  %v11363_v58 = vadd.f32 %v11362_v23, %v17903_v53  ;;  %v8636_v57 = vld [vmem:[#allocation10 + $0xd28] sm:$0xff]  ;;  %v8505_v54 = vld [vmem:[#allocation10 + $0x910] sm:$0xff] }
 0x5b4   :  { %v11364_v9 = vpop.f32.mrf.mxu1  ;;  %11522 = vmatprep.subr.bf16.mxu1 %v16455_v52  ;;  %11645 = vmatprep.subr.bf16.mxu0 %v16329_v4  ;;  %v8509_v52 = vld [vmem:[#allocation10 + $0x930] sm:$0xff]  ;;  %v16686_v4 = vcombine.low %v8640_v37, %v8644_v11  ;;  %v16679_v49 = vcombine.high %v8632_v16, %v8636_v57  ;;  %v8624_v23 = vld [vmem:[#allocation10 + $0xcc8] sm:$0xff] }
 0x5b5   :  { %v11365_v29 = vadd.f32 %v11364_v9, %v17905_v19  ;;  %v16553_v31 = vcombine.high %v8505_v54, %v8509_v52  ;;  %v8501_v9 = vld [vmem:[#allocation10 + $0x8f0] sm:$0xff]  ;;  %v8612_v37 = vld [vmem:[#allocation10 + $0xc68] sm:$0xff] }
 0x5b6   :  { %v11366_v24 = vpop.f32.mrf.mxu1  ;;  %v8481_v11 = vld [vmem:[#allocation10 + $0x850] sm:$0xff] }
 0x5b7   :  { %11523 = vmatpush2.bf16.msra.mxu1 %v16454_v7  ;;  %11646 = vmatpush2.bf16.msra.mxu0 %v16328_v8  ;;  %v8628_v7 = vld [vmem:[#allocation10 + $0xce8] sm:$0xff]  ;;  %v8497_v8 = vld [vmem:[#allocation10 + $0x8d0] sm:$0xff] }
 0x5b8   :  { %v11367_v25 = vpop.f32.mrf.mxu1  ;;  %11574 = vmatprep.subr.bf16.mxu1 %v16703_v61  ;;  %11697 = vmatprep.subr.bf16.mxu0 %v16577_v40  ;;  %v16678_v61 = vcombine.low %v8632_v16, %v8636_v57  ;;  %v16552_v40 = vcombine.low %v8505_v54, %v8509_v52  ;;  %v16671_v28 = vcombine.high %v8624_v23, %v8628_v7  ;;  %v8720_v52 = vld [vmem:[#allocation10 + $0xfc8] sm:$0xff] }
 0x5b9   :  { %v16545_v24 = vcombine.high %v8497_v8, %v8501_v9  ;;  %v16670_v25 = vcombine.low %v8624_v23, %v8628_v7 }
 0x5ba   :  { %11525 = vmatmul.mubr.bf16.vlgmr.msra.gmra.mxu1 %v17871_v14  ;;  %11648 = vmatmul.mubr.bf16.vlgmr.msra.gmra.mxu0 %v17840_v21  ;;  %v11403_v59 = vpop.f32.mrf.mxu0 }
 0x5bb   :  { %v17925_v46 = vadd.f32 %v11403_v59, %v11363_v58  ;;  %11575 = vmatpush1.bf16.msra.mxu1 %v16702_v22  ;;  %11606 = vmatprep.mubr.bf16.mxu1 %v17909_v2  ;;  %v8493_v22 = vld [vmem:[#allocation10 + $0x8b0] sm:$0xff]  ;;  %v16663_v58 = vcombine.high %v8616_v50, %v8620_v1 }
 0x5bc   :  { %11698 = vmatpush1.bf16.msra.mxu0 %v16576_v35  ;;  %11729 = vmatprep.mubr.bf16.mxu0 %v17876_v18  ;;  %v11405_v53 = vpop.f32.mrf.mxu0  ;;  %v16544_v35 = vcombine.low %v8497_v8, %v8501_v9  ;;  %v8485_v59 = vld [vmem:[#allocation10 + $0x870] sm:$0xff]  ;;  %v16536_v32 = vcombine.low %v8489_v34, %v8493_v22  ;;  %v8712_v8 = vld [vmem:[#allocation10 + $0xf88] sm:$0xff] }
 0x5bd   :  { %v17929_v56 = vadd.f32 %v11405_v53, %v11365_v29  ;;  %11576 = vmatprep.subr.bf16.mxu1 %v16695_v42  ;;  %11699 = vmatprep.subr.bf16.mxu0 %v16569_v44  ;;  %v16537_v42 = vcombine.high %v8489_v34, %v8493_v22  ;;  %v8608_v44 = vld [vmem:[#allocation10 + $0xc48] sm:$0xff]  ;;  %v16528_v57 = vcombine.low %v8481_v11, %v8485_v59 }
 0x5be   :  { %v11407_v19 = vpop.f32.mrf.mxu0  ;;  %v16655_v29 = vcombine.high %v8608_v44, %v8612_v37  ;;  %v8600_v53 = vld [vmem:[#allocation10 + $0xc08] sm:$0xff]  ;;  %v16654_v16 = vcombine.low %v8608_v44, %v8612_v37 }
 0x5bf   :  { %11577 = vmatpush1.bf16.msra.mxu1 %v16694_v55  ;;  %v16529_v55 = vcombine.high %v8481_v11, %v8485_v59  ;;  %v8716_v9 = vld [vmem:[#allocation10 + $0xfa8] sm:$0xff] }
 0x5c0   :  { %11700 = vmatpush1.bf16.msra.mxu0 %v16568_v39  ;;  %v11408_v12 = vpop.f32.mrf.mxu0  ;;  %11578 = vmatprep.subr.bf16.mxu1 %v16687_v36  ;;  %v8604_v39 = vld [vmem:[#allocation10 + $0xc28] sm:$0xff]  ;;  %v8473_v36 = vld [vmem:[#allocation10 + $0x810] sm:$0xff]  ;;  %v16759_v50 = vcombine.high %v8712_v8, %v8716_v9 }
 0x5c1   :  { %11701 = vmatprep.subr.bf16.mxu0 %v16561_v62  ;;  %v8477_v62 = vld [vmem:[#allocation10 + $0x830] sm:$0xff]  ;;  %v16647_v19 = vcombine.high %v8600_v53, %v8604_v39  ;;  %v8704_v34 = vld [vmem:[#allocation10 + $0xf48] sm:$0xff] }
 0x5c2   :  { %v16521_v54 = vcombine.high %v8473_v36, %v8477_v62  ;;  %v8593_v12 = vld [vmem:[#allocation10 + $0xbd0] sm:$0xff]  ;;  %v8708_v22 = vld [vmem:[#allocation10 + $0xf68] sm:$0xff] }
 0x5c3   :  { %11579 = vmatpush1.bf16.msra.mxu1 %v16686_v4  ;;  %v8724_v4 = vld [vmem:[#allocation10 + $0xfe8] sm:$0xff]  ;;  %v16751_v44 = vcombine.high %v8704_v34, %v8708_v22 }
 0x5c4   :  { %11702 = vmatpush1.bf16.msra.mxu0 %v16560_v63  ;;  %11580 = vmatprep.subr.bf16.mxu1 %v16679_v49  ;;  %v8597_v63 = vld [vmem:[#allocation10 + $0xbf0] sm:$0xff]  ;;  %v16646_v49 = vcombine.low %v8600_v53, %v8604_v39  ;;  %v16767_v23 = vcombine.high %v8720_v52, %v8724_v4  ;;  %v8696_v11 = vld [vmem:[#allocation10 + $0xf08] sm:$0xff] }
 0x5c5   :  { %11703 = vmatprep.subr.bf16.mxu0 %v16553_v31  ;;  %v16520_v31 = vcombine.low %v8473_v36, %v8477_v62  ;;  %v16641_v7 = vcombine.high %v8593_v12, %v8597_v63  ;;  %v8700_v59 = vld [vmem:[#allocation10 + $0xf28] sm:$0xff] }
 0x5c6   :  { %v16743_v53 = vcombine.high %v8696_v11, %v8700_v59  ;;  %v8688_v36 = vld [vmem:[#allocation10 + $0xec8] sm:$0xff] }
 0x5c7   :  { %11581 = vmatpush1.bf16.msra.mxu1 %v16678_v61  ;;  %v8585_v61 = vld [vmem:[#allocation10 + $0xb90] sm:$0xff]  ;;  %v8692_v62 = vld [vmem:[#allocation10 + $0xee8] sm:$0xff] }
 0x5c8   :  { %11704 = vmatpush1.bf16.msra.mxu0 %v16552_v40  ;;  %11582 = vmatprep.subr.bf16.mxu1 %v16671_v28  ;;  %v8589_v40 = vld [vmem:[#allocation10 + $0xbb0] sm:$0xff]  ;;  %v16766_v28 = vcombine.low %v8720_v52, %v8724_v4  ;;  %v16735_v52 = vcombine.high %v8688_v36, %v8692_v62 }
 0x5c9   :  { %11705 = vmatprep.subr.bf16.mxu0 %v16545_v24  ;;  %v16640_v24 = vcombine.low %v8593_v12, %v8597_v63  ;;  %v16633_v1 = vcombine.high %v8585_v61, %v8589_v40  ;;  %v8680_v12 = vld [vmem:[#allocation10 + $0xe88] sm:$0xff] }
 0x5ca   :  { %v8684_v63 = vld [vmem:[#allocation10 + $0xea8] sm:$0xff] }
 0x5cb   :  { %11583 = vmatpush1.bf16.msra.mxu1 %v16670_v25  ;;  %v8577_v25 = vld [vmem:[#allocation10 + $0xb50] sm:$0xff] }
 0x5cc   :  { %11706 = vmatpush1.bf16.msra.mxu0 %v16544_v35  ;;  %11584 = vmatprep.subr.bf16.mxu1 %v16663_v58  ;;  %v8581_v35 = vld [vmem:[#allocation10 + $0xb70] sm:$0xff]  ;;  %v16758_v58 = vcombine.low %v8712_v8, %v8716_v9  ;;  %v16727_v8 = vcombine.high %v8680_v12, %v8684_v63 }
 0x5cd   :  { %11707 = vmatprep.subr.bf16.mxu0 %v16537_v42  ;;  %v16632_v42 = vcombine.low %v8585_v61, %v8589_v40  ;;  %v16625_v37 = vcombine.high %v8577_v25, %v8581_v35  ;;  %v8672_v61 = vld [vmem:[#allocation10 + $0xe48] sm:$0xff] }
 0x5ce   :  { %v8676_v40 = vld [vmem:[#allocation10 + $0xe68] sm:$0xff] }
 0x5cf   :  { %11585 = vmatpush1.bf16.msra.mxu1 %v16662_v38  ;;  %v8569_v38 = vld [vmem:[#allocation10 + $0xb10] sm:$0xff] }
 0x5d0   :  { %11708 = vmatpush1.bf16.msra.mxu0 %v16536_v32  ;;  %11586 = vmatprep.subr.bf16.mxu1 %v16655_v29  ;;  %v8573_v32 = vld [vmem:[#allocation10 + $0xb30] sm:$0xff]  ;;  %v16750_v29 = vcombine.low %v8704_v34, %v8708_v22  ;;  %v16719_v34 = vcombine.high %v8672_v61, %v8676_v40 }
 0x5d1   :  { %11709 = vmatprep.subr.bf16.mxu0 %v16529_v55  ;;  %v16624_v55 = vcombine.low %v8577_v25, %v8581_v35  ;;  %v16617_v39 = vcombine.high %v8569_v38, %v8573_v32  ;;  %v8664_v25 = vld [vmem:[#allocation10 + $0xe08] sm:$0xff] }
 0x5d2   :  { %v8668_v35 = vld [vmem:[#allocation10 + $0xe28] sm:$0xff] }
 0x5d3   :  { %11587 = vmatpush1.bf16.msra.mxu1 %v16654_v16  ;;  %v8561_v16 = vld [vmem:[#allocation10 + $0xad0] sm:$0xff] }
 0x5d4   :  { %11710 = vmatpush1.bf16.msra.mxu0 %v16528_v57  ;;  %11588 = vmatprep.subr.bf16.mxu1 %v16647_v19  ;;  %v8565_v57 = vld [vmem:[#allocation10 + $0xaf0] sm:$0xff]  ;;  %v16742_v19 = vcombine.low %v8696_v11, %v8700_v59  ;;  %v16711_v11 = vcombine.high %v8664_v25, %v8668_v35 }
 0x5d5   :  { %11711 = vmatprep.subr.bf16.mxu0 %v16521_v54  ;;  %v16616_v54 = vcombine.low %v8569_v38, %v8573_v32  ;;  %v16609_v4 = vcombine.high %v8561_v16, %v8565_v57  ;;  %v8401_v38 = vld [vmem:[#allocation10 + $0x5d0] sm:$0xff] }
 0x5d6   :  { %v8405_v32 = vld [vmem:[#allocation10 + $0x5f0] sm:$0xff] }
 0x5d7   :  { %11589 = vmatpush1.bf16.msra.mxu1 %v16646_v49  ;;  %v8553_v49 = vld [vmem:[#allocation10 + $0xa90] sm:$0xff] }
 0x5d8   :  { %11712 = vmatpush1.bf16.msra.mxu0 %v16520_v31  ;;  %11590 = vmatprep.subr.bf16.mxu1 %v16767_v23  ;;  %v8557_v31 = vld [vmem:[#allocation10 + $0xab0] sm:$0xff]  ;;  %v16734_v23 = vcombine.low %v8688_v36, %v8692_v62  ;;  %v16449_v36 = vcombine.high %v8401_v38, %v8405_v32 }
 0x5d9   :  { %11713 = vmatprep.subr.bf16.mxu0 %v16641_v7  ;;  %v16608_v7 = vcombine.low %v8561_v16, %v8565_v57  ;;  %v16601_v9 = vcombine.high %v8553_v49, %v8557_v31  ;;  %v8393_v16 = vld [vmem:[#allocation10 + $0x590] sm:$0xff] }
 0x5da   :  { %v8397_v57 = vld [vmem:[#allocation10 + $0x5b0] sm:$0xff] }
 0x5db   :  { %11591 = vmatpush2.bf16.msra.mxu1 %v16766_v28  ;;  %v8545_v28 = vld [vmem:[#allocation10 + $0xa50] sm:$0xff] }
 0x5dc   :  { %11714 = vmatpush2.bf16.msra.mxu0 %v16640_v24  ;;  %11592 = vmatprep.subr.bf16.mxu1 %v16759_v50  ;;  %v8549_v24 = vld [vmem:[#allocation10 + $0xa70] sm:$0xff]  ;;  %v16726_v50 = vcombine.low %v8680_v12, %v8684_v63  ;;  %v16441_v12 = vcombine.high %v8393_v16, %v8397_v57 }
 0x5dd   :  { %11715 = vmatprep.subr.bf16.mxu0 %v16633_v1  ;;  %v16600_v1 = vcombine.low %v8553_v49, %v8557_v31  ;;  %v16593_v22 = vcombine.high %v8545_v28, %v8549_v24  ;;  %v8385_v63 = vld [vmem:[#allocation10 + $0x550] sm:$0xff] }
 0x5de   :  { %v8389_v49 = vld [vmem:[#allocation10 + $0x570] sm:$0xff] }
 0x5df   :  { %11593 = vmatpush2.bf16.msra.mxu1 %v16758_v58  ;;  %v8537_v58 = vld [vmem:[#allocation10 + $0xa10] sm:$0xff] }
 0x5e0   :  { %11716 = vmatpush2.bf16.msra.mxu0 %v16632_v42  ;;  %11594 = vmatprep.subr.bf16.mxu1 %v16751_v44  ;;  %v8541_v42 = vld [vmem:[#allocation10 + $0xa30] sm:$0xff]  ;;  %v16718_v44 = vcombine.low %v8672_v61, %v8676_v40 }
 0x5e1   :  { %11717 = vmatprep.subr.bf16.mxu0 %v16625_v37  ;;  %v16592_v37 = vcombine.low %v8545_v28, %v8549_v24  ;;  %v16585_v59 = vcombine.high %v8537_v58, %v8541_v42  ;;  %v16433_v28 = vcombine.high %v8385_v63, %v8389_v49 }
 0x5e3   :  { %11595 = vmatpush2.bf16.msra.mxu1 %v16750_v29  ;;  %v8274_v29 = vld [vmem:[#allocation10 + $0x1d8] sm:$0xff] }
 0x5e4   :  { %11718 = vmatpush2.bf16.msra.mxu0 %v16624_v55  ;;  %11596 = vmatprep.subr.bf16.mxu1 %v16743_v53  ;;  %v8278_v55 = vld [vmem:[#allocation10 + $0x1f8] sm:$0xff]  ;;  %v16710_v53 = vcombine.low %v8664_v25, %v8668_v35  ;;  %v16432_v35 = vcombine.low %v8385_v63, %v8389_v49 }
 0x5e5   :  { %11719 = vmatprep.subr.bf16.mxu0 %v16617_v39  ;;  %v16584_v39 = vcombine.low %v8537_v58, %v8541_v42  ;;  %v16323_v62 = vcombine.high %v8274_v29, %v8278_v55  ;;  %v8254_v25 = vld [vmem:[#allocation10 + $0x138] sm:$0xff] }
 0x5e6   :  { %v8226_v63 = vld [vmem:[#allocation10 + $0x58] sm:$0xff] }
 0x5e7   :  { %11597 = vmatpush2.bf16.msra.mxu1 %v16742_v19  ;;  %v16448_v19 = vcombine.low %v8401_v38, %v8405_v32  ;;  %v8246_v38 = vld [vmem:[#allocation10 + $0xf8] sm:$0xff] }
 0x5e8   :  { %11720 = vmatpush2.bf16.msra.mxu0 %v16616_v54  ;;  %11598 = vmatprep.subr.bf16.mxu1 %v16735_v52  ;;  %v8266_v54 = vld [vmem:[#allocation10 + $0x198] sm:$0xff] }
 0x5e9   :  { %11721 = vmatprep.subr.bf16.mxu0 %v16609_v4  ;;  %v8270_v52 = vld [vmem:[#allocation10 + $0x1b8] sm:$0xff]  ;;  %v16322_v4 = vcombine.low %v8274_v29, %v8278_v55 }
 0x5ea   :  { %v16314_v40 = vcombine.low %v8266_v54, %v8270_v52  ;;  %v8230_v49 = vld [vmem:[#allocation10 + $0x78] sm:$0xff] }
 0x5eb   :  { %11599 = vmatpush2.bf16.msra.mxu1 %v16734_v23  ;;  %v16315_v23 = vcombine.high %v8266_v54, %v8270_v52 }
 0x5ec   :  { %11722 = vmatpush2.bf16.msra.mxu0 %v16608_v7  ;;  %11600 = vmatprep.subr.bf16.mxu1 %v16727_v8  ;;  %v8258_v7 = vld [vmem:[#allocation10 + $0x158] sm:$0xff] }
 0x5ed   :  { %11723 = vmatprep.subr.bf16.mxu0 %v16601_v9  ;;  %v8262_v8 = vld [vmem:[#allocation10 + $0x178] sm:$0xff]  ;;  %v16440_v9 = vcombine.low %v8393_v16, %v8397_v57 }
 0x5ee   :  { %v16307_v24 = vcombine.high %v8258_v7, %v8262_v8  ;;  %v16306_v42 = vcombine.low %v8258_v7, %v8262_v8  ;;  %v8238_v16 = vld [vmem:[#allocation10 + $0xb8] sm:$0xff] }
 0x5ef   :  { %11601 = vmatpush2.bf16.msra.mxu1 %v16726_v50  ;;  %v8377_v50 = vld [vmem:[#allocation10 + $0x510] sm:$0xff] }
 0x5f0   :  { %11724 = vmatpush2.bf16.msra.mxu0 %v16600_v1  ;;  %11602 = vmatprep.subr.bf16.mxu1 %v16719_v34  ;;  %v8381_v1 = vld [vmem:[#allocation10 + $0x530] sm:$0xff] }
 0x5f1   :  { %11725 = vmatprep.subr.bf16.mxu0 %v16593_v22  ;;  %v8250_v22 = vld [vmem:[#allocation10 + $0x118] sm:$0xff]  ;;  %v16424_v32 = vcombine.low %v8377_v50, %v8381_v1 }
 0x5f2   :  { %v16298_v29 = vcombine.low %v8250_v22, %v8254_v25 }
 0x5f3   :  { %11603 = vmatpush2.bf16.msra.mxu1 %v16718_v44  ;;  %v16425_v44 = vcombine.high %v8377_v50, %v8381_v1  ;;  %v8222_v50 = vld [vmem:[#allocation10 + $0x38] sm:$0xff] }
 0x5f4   :  { %11726 = vmatpush2.bf16.msra.mxu0 %v16592_v37  ;;  %11604 = vmatprep.subr.bf16.mxu1 %v16711_v11  ;;  %v16299_v37 = vcombine.high %v8250_v22, %v8254_v25  ;;  %v8369_v11 = vld [vmem:[#allocation10 + $0x4d0] sm:$0xff] }
 0x5f5   :  { %11727 = vmatprep.subr.bf16.mxu0 %v16585_v59  ;;  %v8373_v59 = vld [vmem:[#allocation10 + $0x4f0] sm:$0xff] }
 0x5f6   :  { %v16417_v55 = vcombine.high %v8369_v11, %v8373_v59  ;;  %v16416_v57 = vcombine.low %v8369_v11, %v8373_v59 }
 0x5f7   :  { %11605 = vmatpush2.bf16.msra.mxu1 %v16710_v53 }
 0x5f8   :  { %11728 = vmatpush2.bf16.msra.mxu0 %v16584_v39  ;;  %11656 = vmatprep.subr.bf16.mxu1 %v16449_v36  ;;  %v8361_v39 = vld [vmem:[#allocation10 + $0x490] sm:$0xff] }
 0x5f9   :  { %11779 = vmatprep.subr.bf16.mxu0 %v16323_v62  ;;  %v8365_v36 = vld [vmem:[#allocation10 + $0x4b0] sm:$0xff]  ;;  %v8234_v62 = vld [vmem:[#allocation10 + $0x98] sm:$0xff] }
 0x5fa   :  { %v17931_v31 = vpop.f32.mrf.mxu0  ;;  %11607 = vmatmul.mubr.bf16.vlgmr.msra.gmra.mxu1 %v17911_v60  ;;  %v16409_v54 = vcombine.high %v8361_v39, %v8365_v36  ;;  %v16283_v52 = vcombine.high %v8234_v62, %v8238_v16  ;;  %v16282_v7 = vcombine.low %v8234_v62, %v8238_v16  ;;  %v8449_v16 = vld [vmem:[#allocation10 + $0x750] sm:$0xff] }
 0x5fb   :  { %11730 = vmatmul.mubr.bf16.vlgmr.msra.gmra.mxu0 %v17884_v26  ;;  %11657 = vmatpush1.bf16.msra.mxu1 %v16448_v19 }
 0x5fc   :  { %11688 = vmatprep.mubr.bf16.mxu1 %v17850_v20  ;;  %11780 = vmatpush1.bf16.msra.mxu0 %v16322_v4  ;;  %v17936_v61 = vpop.f32.mrf.mxu0  ;;  %v8353_v4 = vld [vmem:[#allocation10 + $0x450] sm:$0xff] }
 0x5fd   :  { %11811 = vmatprep.mubr.bf16.mxu0 %v17823_v3  ;;  %11658 = vmatprep.subr.bf16.mxu1 %v16441_v12  ;;  %v8242_v3 = vld [vmem:[#allocation10 + $0xd8] sm:$0xff]  ;;  %v8357_v12 = vld [vmem:[#allocation10 + $0x470] sm:$0xff] }
 0x5fe   :  { %v11489_v34 = vpop.f32.mrf.mxu0  ;;  %11781 = vmatprep.subr.bf16.mxu0 %v16315_v23  ;;  %v16291_v53 = vcombine.high %v8242_v3, %v8246_v38  ;;  %v16290_v19 = vcombine.low %v8242_v3, %v8246_v38  ;;  %v16408_v23 = vcombine.low %v8361_v39, %v8365_v36  ;;  %v16401_v8 = vcombine.high %v8353_v4, %v8357_v12  ;;  %v8457_v38 = vld [vmem:[#allocation10 + $0x790] sm:$0xff] }
 0x5ff   :  { %11659 = vmatpush1.bf16.msra.mxu1 %v16440_v9  ;;  %v16275_v9 = vcombine.high %v8226_v63, %v8230_v49  ;;  %v16400_v1 = vcombine.low %v8353_v4, %v8357_v12  ;;  %v16274_v34 = vcombine.low %v8226_v63, %v8230_v49  ;;  %v8441_v49 = vld [vmem:[#allocation10 + $0x710] sm:$0xff] }
 0x600   :  { %11782 = vmatpush1.bf16.msra.mxu0 %v16314_v40  ;;  %v11490_v58 = vpop.f32.mrf.mxu0  ;;  %11660 = vmatprep.subr.bf16.mxu1 %v16433_v28  ;;  %v8345_v40 = vld [vmem:[#allocation10 + $0x410] sm:$0xff] }
 0x601   :  { %11783 = vmatprep.subr.bf16.mxu0 %v16307_v24  ;;  %v8349_v28 = vld [vmem:[#allocation10 + $0x430] sm:$0xff]  ;;  %v8218_v24 = vld [vmem:[#allocation10 + $0x18] sm:$0xff] }
 0x602   :  { %v16393_v22 = vcombine.high %v8345_v40, %v8349_v28  ;;  %v16267_v25 = vcombine.high %v8218_v24, %v8222_v50  ;;  %v8469_v58 = vld [vmem:[#allocation10 + $0x7f0] sm:$0xff]  ;;  %v16266_v11 = vcombine.low %v8218_v24, %v8222_v50 }
 0x603   :  { %11661 = vmatpush1.bf16.msra.mxu1 %v16432_v35  ;;  %v8465_v35 = vld [vmem:[#allocation10 + $0x7d0] sm:$0xff] }
 0x604   :  { %11784 = vmatpush1.bf16.msra.mxu0 %v16306_v42  ;;  %11662 = vmatprep.subr.bf16.mxu1 %v16425_v44  ;;  %v8338_v42 = vld [vmem:[#allocation10 + $0x3d8] sm:$0xff]  ;;  %v16513_v59 = vcombine.high %v8465_v35, %v8469_v58  ;;  %v8433_v50 = vld [vmem:[#allocation10 + $0x6d0] sm:$0xff] }
 0x605   :  { %11785 = vmatprep.subr.bf16.mxu0 %v16299_v37  ;;  %v8342_v44 = vld [vmem:[#allocation10 + $0x3f8] sm:$0xff]  ;;  %v16392_v37 = vcombine.low %v8345_v40, %v8349_v28 }
 0x606   :  { %v16387_v3 = vcombine.high %v8338_v42, %v8342_v44  ;;  %v16386_v39 = vcombine.low %v8338_v42, %v8342_v44  ;;  %v8425_v44 = vld [vmem:[#allocation10 + $0x690] sm:$0xff] }
 0x607   :  { %11663 = vmatpush1.bf16.msra.mxu1 %v16424_v32  ;;  %v8461_v32 = vld [vmem:[#allocation10 + $0x7b0] sm:$0xff] }
 0x608   :  { %11786 = vmatpush1.bf16.msra.mxu0 %v16298_v29  ;;  %11664 = vmatprep.subr.bf16.mxu1 %v16417_v55  ;;  %v8330_v29 = vld [vmem:[#allocation10 + $0x398] sm:$0xff]  ;;  %v16505_v36 = vcombine.high %v8457_v38, %v8461_v32 }
 0x609   :  { %11787 = vmatprep.subr.bf16.mxu0 %v16291_v53  ;;  %v8334_v55 = vld [vmem:[#allocation10 + $0x3b8] sm:$0xff]  ;;  %v16512_v53 = vcombine.low %v8465_v35, %v8469_v58 }
 0x60a   :  { %v16379_v62 = vcombine.high %v8330_v29, %v8334_v55  ;;  %v16378_v4 = vcombine.low %v8330_v29, %v8334_v55  ;;  %v8417_v55 = vld [vmem:[#allocation10 + $0x650] sm:$0xff] }
 0x60b   :  { %11665 = vmatpush1.bf16.msra.mxu1 %v16416_v57  ;;  %v8453_v57 = vld [vmem:[#allocation10 + $0x770] sm:$0xff] }
 0x60c   :  { %11788 = vmatpush1.bf16.msra.mxu0 %v16290_v19  ;;  %11666 = vmatprep.subr.bf16.mxu1 %v16409_v54  ;;  %v8322_v19 = vld [vmem:[#allocation10 + $0x358] sm:$0xff]  ;;  %v16497_v12 = vcombine.high %v8449_v16, %v8453_v57 }
 0x60d   :  { %11789 = vmatprep.subr.bf16.mxu0 %v16283_v52  ;;  %v8326_v54 = vld [vmem:[#allocation10 + $0x378] sm:$0xff]  ;;  %v16504_v52 = vcombine.low %v8457_v38, %v8461_v32 }
 0x60e   :  { %v16371_v63 = vcombine.high %v8322_v19, %v8326_v54  ;;  %v16370_v40 = vcombine.low %v8322_v19, %v8326_v54  ;;  %v8409_v54 = vld [vmem:[#allocation10 + $0x610] sm:$0xff] }
 0x60f   :  { %11667 = vmatpush1.bf16.msra.mxu1 %v16408_v23  ;;  %v8445_v23 = vld [vmem:[#allocation10 + $0x730] sm:$0xff] }
 0x610   :  { %11790 = vmatpush1.bf16.msra.mxu0 %v16282_v7  ;;  %11668 = vmatprep.subr.bf16.mxu1 %v16401_v8  ;;  %v8314_v7 = vld [vmem:[#allocation10 + $0x318] sm:$0xff]  ;;  %v16489_v28 = vcombine.high %v8441_v49, %v8445_v23 }
 0x611   :  { %11791 = vmatprep.subr.bf16.mxu0 %v16275_v9  ;;  %v8318_v8 = vld [vmem:[#allocation10 + $0x338] sm:$0xff]  ;;  %v16496_v9 = vcombine.low %v8449_v16, %v8453_v57 }
 0x612   :  { %v16363_v24 = vcombine.high %v8314_v7, %v8318_v8  ;;  %v16362_v35 = vcombine.low %v8314_v7, %v8318_v8  ;;  %v8657_v8 = vld [vmem:[#allocation10 + $0xdd0] sm:$0xff] }
 0x613   :  { %11669 = vmatpush1.bf16.msra.mxu1 %v16400_v1  ;;  %v8437_v1 = vld [vmem:[#allocation10 + $0x6f0] sm:$0xff] }
 0x614   :  { %11792 = vmatpush1.bf16.msra.mxu0 %v16274_v34  ;;  %11670 = vmatprep.subr.bf16.mxu1 %v16393_v22  ;;  %v8306_v34 = vld [vmem:[#allocation10 + $0x2d8] sm:$0xff]  ;;  %v16481_v58 = vcombine.high %v8433_v50, %v8437_v1 }
 0x615   :  { %11793 = vmatprep.subr.bf16.mxu0 %v16267_v25  ;;  %v8310_v22 = vld [vmem:[#allocation10 + $0x2f8] sm:$0xff]  ;;  %v16488_v25 = vcombine.low %v8441_v49, %v8445_v23 }
 0x616   :  { %v16355_v42 = vcombine.high %v8306_v34, %v8310_v22  ;;  %v16354_v38 = vcombine.low %v8306_v34, %v8310_v22  ;;  %v8649_v22 = vld [vmem:[#allocation10 + $0xd90] sm:$0xff] }
 0x617   :  { %11671 = vmatpush1.bf16.msra.mxu1 %v16392_v37  ;;  %v8429_v37 = vld [vmem:[#allocation10 + $0x6b0] sm:$0xff] }
 0x618   :  { %11794 = vmatpush1.bf16.msra.mxu0 %v16266_v11  ;;  %11672 = vmatprep.subr.bf16.mxu1 %v16513_v59  ;;  %v8298_v11 = vld [vmem:[#allocation10 + $0x298] sm:$0xff]  ;;  %v16473_v32 = vcombine.high %v8425_v44, %v8429_v37 }
 0x619   :  { %11795 = vmatprep.subr.bf16.mxu0 %v16387_v3  ;;  %v8302_v59 = vld [vmem:[#allocation10 + $0x2b8] sm:$0xff]  ;;  %v16480_v3 = vcombine.low %v8433_v50, %v8437_v1 }
 0x61a   :  { %v16347_v29 = vcombine.high %v8298_v11, %v8302_v59  ;;  %v16346_v16 = vcombine.low %v8298_v11, %v8302_v59  ;;  %v8641_v11 = vld [vmem:[#allocation10 + $0xd50] sm:$0xff] }
 0x61b   :  { %11673 = vmatpush2.bf16.msra.mxu1 %v16512_v53  ;;  %v8421_v53 = vld [vmem:[#allocation10 + $0x670] sm:$0xff] }
 0x61c   :  { %11796 = vmatpush2.bf16.msra.mxu0 %v16386_v39  ;;  %11674 = vmatprep.subr.bf16.mxu1 %v16505_v36  ;;  %v8290_v39 = vld [vmem:[#allocation10 + $0x258] sm:$0xff]  ;;  %v16465_v57 = vcombine.high %v8417_v55, %v8421_v53  ;;  %v8645_v59 = vld [vmem:[#allocation10 + $0xd70] sm:$0xff] }
 0x61d   :  { %11797 = vmatprep.subr.bf16.mxu0 %v16379_v62  ;;  %v8294_v36 = vld [vmem:[#allocation10 + $0x278] sm:$0xff]  ;;  %v16472_v62 = vcombine.low %v8425_v44, %v8429_v37 }
 0x61e   :  { %v16339_v19 = vcombine.high %v8290_v39, %v8294_v36  ;;  %v16338_v49 = vcombine.low %v8290_v39, %v8294_v36 }
 0x61f   :  { %11675 = vmatpush2.bf16.msra.mxu1 %v16504_v52  ;;  %v8413_v52 = vld [vmem:[#allocation10 + $0x630] sm:$0xff] }
 0x620   :  { %11798 = vmatpush2.bf16.msra.mxu0 %v16378_v4  ;;  %11676 = vmatprep.subr.bf16.mxu1 %v16497_v12  ;;  %v8282_v4 = vld [vmem:[#allocation10 + $0x218] sm:$0xff]  ;;  %v16457_v23 = vcombine.high %v8409_v54, %v8413_v52 }
 0x621   :  { %11799 = vmatprep.subr.bf16.mxu0 %v16371_v63  ;;  %v8286_v12 = vld [vmem:[#allocation10 + $0x238] sm:$0xff]  ;;  %v16464_v63 = vcombine.low %v8417_v55, %v8421_v53 }
 0x622   :  { %v16331_v7 = vcombine.high %v8282_v4, %v8286_v12  ;;  %v16330_v50 = vcombine.low %v8282_v4, %v8286_v12  ;;  %v8518_v55 = vld [vmem:[#allocation10 + $0x978] sm:$0xff] }
 0x623   :  { %11677 = vmatpush2.bf16.msra.mxu1 %v16496_v9  ;;  %v8661_v9 = vld [vmem:[#allocation10 + $0xdf0] sm:$0xff]  ;;  %v8506_v12 = vld [vmem:[#allocation10 + $0x918] sm:$0xff] }
 0x624   :  { %11800 = vmatpush2.bf16.msra.mxu0 %v16370_v40  ;;  %11678 = vmatprep.subr.bf16.mxu1 %v16489_v28  ;;  %v8530_v40 = vld [vmem:[#allocation10 + $0x9d8] sm:$0xff]  ;;  %v16705_v1 = vcombine.high %v8657_v8, %v8661_v9 }
 0x625   :  { %11801 = vmatprep.subr.bf16.mxu0 %v16363_v24  ;;  %v8534_v28 = vld [vmem:[#allocation10 + $0x9f8] sm:$0xff]  ;;  %v16456_v24 = vcombine.low %v8409_v54, %v8413_v52  ;;  %v8633_v54 = vld [vmem:[#allocation10 + $0xd10] sm:$0xff] }
 0x626   :  { %v16579_v34 = vcombine.high %v8530_v40, %v8534_v28  ;;  %v16578_v44 = vcombine.low %v8530_v40, %v8534_v28  ;;  %v8629_v40 = vld [vmem:[#allocation10 + $0xcf0] sm:$0xff]  ;;  %v8498_v28 = vld [vmem:[#allocation10 + $0x8d8] sm:$0xff] }
 0x627   :  { %11679 = vmatpush2.bf16.msra.mxu1 %v16488_v25  ;;  %v8653_v25 = vld [vmem:[#allocation10 + $0xdb0] sm:$0xff] }
 0x628   :  { %11802 = vmatpush2.bf16.msra.mxu0 %v16362_v35  ;;  %11680 = vmatprep.subr.bf16.mxu1 %v16481_v58  ;;  %v16704_v35 = vcombine.low %v8657_v8, %v8661_v9  ;;  %v8522_v58 = vld [vmem:[#allocation10 + $0x998] sm:$0xff]  ;;  %v16697_v37 = vcombine.high %v8649_v22, %v8653_v25  ;;  %v16696_v39 = vcombine.low %v8649_v22, %v8653_v25  ;;  %v8625_v9 = vld [vmem:[#allocation10 + $0xcd0] sm:$0xff] }
 0x629   :  { %11803 = vmatprep.subr.bf16.mxu0 %v16355_v42  ;;  %v8526_v42 = vld [vmem:[#allocation10 + $0x9b8] sm:$0xff]  ;;  %v8617_v25 = vld [vmem:[#allocation10 + $0xc90] sm:$0xff] }
 0x62b   :  { %11681 = vmatpush2.bf16.msra.mxu1 %v16480_v3 }
 0x62c   :  { %11804 = vmatpush2.bf16.msra.mxu0 %v16354_v38  ;;  %11682 = vmatprep.subr.bf16.mxu1 %v16473_v32  ;;  %v16571_v32 = vcombine.high %v8522_v58, %v8526_v42 }
 0x62d   :  { %11805 = vmatprep.subr.bf16.mxu0 %v16347_v29  ;;  %v8514_v29 = vld [vmem:[#allocation10 + $0x958] sm:$0xff] }
 0x62e   :  { %v16562_v8 = vcombine.low %v8514_v29, %v8518_v55 }
 0x62f   :  { %11683 = vmatpush2.bf16.msra.mxu1 %v16472_v62 }
 0x630   :  { %11806 = vmatpush2.bf16.msra.mxu0 %v16346_v16  ;;  %11684 = vmatprep.subr.bf16.mxu1 %v16465_v57  ;;  %v16570_v16 = vcombine.low %v8522_v58, %v8526_v42  ;;  %v16689_v57 = vcombine.high %v8641_v11, %v8645_v59  ;;  %v8490_v58 = vld [vmem:[#allocation10 + $0x898] sm:$0xff] }
 0x631   :  { %11807 = vmatprep.subr.bf16.mxu0 %v16339_v19  ;;  %v8494_v42 = vld [vmem:[#allocation10 + $0x8b8] sm:$0xff] }
 0x633   :  { %11685 = vmatpush2.bf16.msra.mxu1 %v16464_v63  ;;  %v8510_v63 = vld [vmem:[#allocation10 + $0x938] sm:$0xff] }
 0x634   :  { %11808 = vmatpush2.bf16.msra.mxu0 %v16338_v49  ;;  %11686 = vmatprep.subr.bf16.mxu1 %v16457_v23  ;;  %v16688_v49 = vcombine.low %v8641_v11, %v8645_v59  ;;  %v16539_v59 = vcombine.high %v8490_v58, %v8494_v42 }
 0x635   :  { %11809 = vmatprep.subr.bf16.mxu0 %v16331_v7 }
 0x637   :  { %11687 = vmatpush2.bf16.msra.mxu1 %v16456_v24  ;;  %v8502_v24 = vld [vmem:[#allocation10 + $0x8f8] sm:$0xff] }
 0x638   :  { %11810 = vmatpush2.bf16.msra.mxu0 %v16330_v50  ;;  %11738 = vmatprep.subr.bf16.mxu1 %v16705_v1  ;;  %v16554_v1 = vcombine.low %v8506_v12, %v8510_v63  ;;  %v16547_v22 = vcombine.high %v8498_v28, %v8502_v24 }
 0x639   :  { %11861 = vmatprep.subr.bf16.mxu0 %v16579_v34  ;;  %v16673_v34 = vcombine.high %v8625_v9, %v8629_v40 }
 0x63a   :  { %v17939_v3 = vpop.f32.mrf.mxu0  ;;  %11689 = vmatmul.mubr.bf16.vlgmr.msra.gmra.mxu1 %v17871_v14  ;;  %v11444_v38 = vpop.f32.mrf.mxu1 }
 0x63b   :  { %11812 = vmatmul.mubr.bf16.vlgmr.msra.gmra.mxu0 %v17840_v21  ;;  %v17944_v53 = vadd.f32 %v11444_v38, %v17925_v46  ;;  %11739 = vmatpush1.bf16.msra.mxu1 %v16704_v35  ;;  %v16563_v21 = vcombine.high %v8514_v29, %v8518_v55  ;;  %v8637_v46 = vld [vmem:[#allocation10 + $0xd30] sm:$0xff]  ;;  %v8482_v29 = vld [vmem:[#allocation10 + $0x858] sm:$0xff] }
 0x63c   :  { %11770 = vmatprep.mubr.bf16.mxu1 %v17909_v2  ;;  %11862 = vmatpush1.bf16.msra.mxu0 %v16578_v44  ;;  %v17947_v36 = vpop.f32.mrf.mxu0  ;;  %v11446_v62 = vpop.f32.mrf.mxu1  ;;  %v16680_v50 = vcombine.low %v8633_v54, %v8637_v46  ;;  %v8621_v35 = vld [vmem:[#allocation10 + $0xcb0] sm:$0xff]  ;;  %v16672_v44 = vcombine.low %v8625_v9, %v8629_v40  ;;  %v8486_v55 = vld [vmem:[#allocation10 + $0x878] sm:$0xff] }
 0x63d   :  { %11893 = vmatprep.mubr.bf16.mxu0 %v17876_v18  ;;  %v17951_v19 = vadd.f32 %v11446_v62, %v17929_v56  ;;  %11740 = vmatprep.subr.bf16.mxu1 %v16697_v37  ;;  %v16681_v18 = vcombine.high %v8633_v54, %v8637_v46  ;;  %v16555_v56 = vcombine.high %v8506_v12, %v8510_v63  ;;  %v8609_v38 = vld [vmem:[#allocation10 + $0xc50] sm:$0xff]  ;;  %v8474_v46 = vld [vmem:[#allocation10 + $0x818] sm:$0xff] }
 0x63e   :  { %v11571_v52 = vpop.f32.mrf.mxu0  ;;  %11863 = vmatprep.subr.bf16.mxu0 %v16571_v32  ;;  %v11448_v4 = vpop.f32.mrf.mxu1  ;;  %v16546_v37 = vcombine.low %v8498_v28, %v8502_v24  ;;  %v16665_v11 = vcombine.high %v8617_v25, %v8621_v35  ;;  %v8613_v32 = vld [vmem:[#allocation10 + $0xc70] sm:$0xff]  ;;  %v16538_v62 = vcombine.low %v8490_v58, %v8494_v42  ;;  %v16530_v12 = vcombine.low %v8482_v29, %v8486_v55 }
 0x63f   :  { %11741 = vmatpush1.bf16.msra.mxu1 %v16696_v39  ;;  %v16664_v39 = vcombine.low %v8617_v25, %v8621_v35  ;;  %v8605_v54 = vld [vmem:[#allocation10 + $0xc30] sm:$0xff]  ;;  %v8478_v52 = vld [vmem:[#allocation10 + $0x838] sm:$0xff]  ;;  %v16656_v4 = vcombine.low %v8609_v38, %v8613_v32 }
 0x640   :  { %11864 = vmatpush1.bf16.msra.mxu0 %v16570_v16  ;;  %v11572_v23 = vpop.f32.mrf.mxu0  ;;  %v11449_v7 = vpop.f32.mrf.mxu1  ;;  %11742 = vmatprep.subr.bf16.mxu1 %v16689_v57  ;;  %v16657_v16 = vcombine.high %v8609_v38, %v8613_v32  ;;  %v16531_v57 = vcombine.high %v8482_v29, %v8486_v55  ;;  %v16522_v9 = vcombine.low %v8474_v46, %v8478_v52  ;;  %v8713_v24 = vld [vmem:[#allocation10 + $0xf90] sm:$0xff] }
 0x641   :  { %11865 = vmatprep.subr.bf16.mxu0 %v16563_v21  ;;  %v8601_v21 = vld [vmem:[#allocation10 + $0xc10] sm:$0xff] }
 0x642   :  { %v16649_v63 = vcombine.high %v8601_v21, %v8605_v54  ;;  %v8721_v23 = vld [vmem:[#allocation10 + $0xfd0] sm:$0xff] }
 0x643   :  { %11743 = vmatpush1.bf16.msra.mxu1 %v16688_v49  ;;  %v16523_v49 = vcombine.high %v8474_v46, %v8478_v52  ;;  %v8725_v7 = vld [vmem:[#allocation10 + $0xff0] sm:$0xff] }
 0x644   :  { %11866 = vmatpush1.bf16.msra.mxu0 %v16562_v8  ;;  %11744 = vmatprep.subr.bf16.mxu1 %v16681_v18  ;;  %v8594_v8 = vld [vmem:[#allocation10 + $0xbd8] sm:$0xff]  ;;  %v16769_v40 = vcombine.high %v8721_v23, %v8725_v7  ;;  %v8705_v42 = vld [vmem:[#allocation10 + $0xf50] sm:$0xff] }
 0x645   :  { %11867 = vmatprep.subr.bf16.mxu0 %v16555_v56  ;;  %v8598_v18 = vld [vmem:[#allocation10 + $0xbf8] sm:$0xff]  ;;  %v16648_v56 = vcombine.low %v8601_v21, %v8605_v54  ;;  %v8697_v55 = vld [vmem:[#allocation10 + $0xf10] sm:$0xff] }
 0x646   :  { %v16643_v28 = vcombine.high %v8594_v8, %v8598_v18  ;;  %v16642_v25 = vcombine.low %v8594_v8, %v8598_v18  ;;  %v8689_v52 = vld [vmem:[#allocation10 + $0xed0] sm:$0xff] }
 0x647   :  { %11745 = vmatpush1.bf16.msra.mxu1 %v16680_v50  ;;  %v8717_v50 = vld [vmem:[#allocation10 + $0xfb0] sm:$0xff] }
 0x648   :  { %11868 = vmatpush1.bf16.msra.mxu0 %v16554_v1  ;;  %11746 = vmatprep.subr.bf16.mxu1 %v16673_v34  ;;  %v8586_v1 = vld [vmem:[#allocation10 + $0xb98] sm:$0xff]  ;;  %v16761_v35 = vcombine.high %v8713_v24, %v8717_v50  ;;  %v8681_v18 = vld [vmem:[#allocation10 + $0xe90] sm:$0xff] }
 0x649   :  { %11869 = vmatprep.subr.bf16.mxu0 %v16547_v22  ;;  %v8590_v34 = vld [vmem:[#allocation10 + $0xbb8] sm:$0xff]  ;;  %v16768_v22 = vcombine.low %v8721_v23, %v8725_v7 }
 0x64a   :  { %v16635_v58 = vcombine.high %v8586_v1, %v8590_v34  ;;  %v16634_v38 = vcombine.low %v8586_v1, %v8590_v34  ;;  %v8673_v34 = vld [vmem:[#allocation10 + $0xe50] sm:$0xff] }
 0x64b   :  { %11747 = vmatpush1.bf16.msra.mxu1 %v16672_v44  ;;  %v8709_v44 = vld [vmem:[#allocation10 + $0xf70] sm:$0xff] }
 0x64c   :  { %11870 = vmatpush1.bf16.msra.mxu0 %v16546_v37  ;;  %11748 = vmatprep.subr.bf16.mxu1 %v16665_v11  ;;  %v8578_v37 = vld [vmem:[#allocation10 + $0xb58] sm:$0xff]  ;;  %v16753_v32 = vcombine.high %v8705_v42, %v8709_v44 }
 0x64d   :  { %11871 = vmatprep.subr.bf16.mxu0 %v16539_v59  ;;  %v8582_v11 = vld [vmem:[#allocation10 + $0xb78] sm:$0xff]  ;;  %v16760_v59 = vcombine.low %v8713_v24, %v8717_v50 }
 0x64e   :  { %v16627_v29 = vcombine.high %v8578_v37, %v8582_v11  ;;  %v16626_v21 = vcombine.low %v8578_v37, %v8582_v11  ;;  %v8665_v11 = vld [vmem:[#allocation10 + $0xe10] sm:$0xff] }
 0x64f   :  { %11749 = vmatpush1.bf16.msra.mxu1 %v16664_v39  ;;  %v8701_v39 = vld [vmem:[#allocation10 + $0xf30] sm:$0xff] }
 0x650   :  { %11872 = vmatpush1.bf16.msra.mxu0 %v16538_v62  ;;  %11750 = vmatprep.subr.bf16.mxu1 %v16657_v16  ;;  %v8570_v62 = vld [vmem:[#allocation10 + $0xb18] sm:$0xff]  ;;  %v16745_v54 = vcombine.high %v8697_v55, %v8701_v39 }
 0x651   :  { %11873 = vmatprep.subr.bf16.mxu0 %v16531_v57  ;;  %v8574_v16 = vld [vmem:[#allocation10 + $0xb38] sm:$0xff]  ;;  %v16752_v57 = vcombine.low %v8705_v42, %v8709_v44 }
 0x652   :  { %v16619_v46 = vcombine.high %v8570_v62, %v8574_v16  ;;  %v16618_v23 = vcombine.low %v8570_v62, %v8574_v16  ;;  %v8402_v16 = vld [vmem:[#allocation10 + $0x5d8] sm:$0xff] }
 0x653   :  { %11751 = vmatpush1.bf16.msra.mxu1 %v16656_v4  ;;  %v8693_v4 = vld [vmem:[#allocation10 + $0xef0] sm:$0xff] }
 0x654   :  { %11874 = vmatpush1.bf16.msra.mxu0 %v16530_v12  ;;  %11752 = vmatprep.subr.bf16.mxu1 %v16649_v63  ;;  %v8562_v12 = vld [vmem:[#allocation10 + $0xad8] sm:$0xff]  ;;  %v16737_v7 = vcombine.high %v8689_v52, %v8693_v4 }
 0x655   :  { %11875 = vmatprep.subr.bf16.mxu0 %v16523_v49  ;;  %v8566_v63 = vld [vmem:[#allocation10 + $0xaf8] sm:$0xff]  ;;  %v16744_v49 = vcombine.low %v8697_v55, %v8701_v39 }
 0x656   :  { %v16611_v8 = vcombine.high %v8562_v12, %v8566_v63  ;;  %v16610_v24 = vcombine.low %v8562_v12, %v8566_v63  ;;  %v8394_v63 = vld [vmem:[#allocation10 + $0x598] sm:$0xff] }
 0x657   :  { %11753 = vmatpush1.bf16.msra.mxu1 %v16648_v56  ;;  %v8685_v56 = vld [vmem:[#allocation10 + $0xeb0] sm:$0xff] }
 0x658   :  { %11876 = vmatpush1.bf16.msra.mxu0 %v16522_v9  ;;  %11754 = vmatprep.subr.bf16.mxu1 %v16769_v40  ;;  %v8554_v9 = vld [vmem:[#allocation10 + $0xa98] sm:$0xff]  ;;  %v16729_v50 = vcombine.high %v8681_v18, %v8685_v56 }
 0x659   :  { %11877 = vmatprep.subr.bf16.mxu0 %v16643_v28  ;;  %v8558_v40 = vld [vmem:[#allocation10 + $0xab8] sm:$0xff]  ;;  %v16736_v28 = vcombine.low %v8689_v52, %v8693_v4 }
 0x65a   :  { %v16603_v1 = vcombine.high %v8554_v9, %v8558_v40  ;;  %v16602_v42 = vcombine.low %v8554_v9, %v8558_v40  ;;  %v8386_v9 = vld [vmem:[#allocation10 + $0x558] sm:$0xff] }
 0x65b   :  { %11755 = vmatpush2.bf16.msra.mxu1 %v16768_v22  ;;  %v8677_v22 = vld [vmem:[#allocation10 + $0xe70] sm:$0xff]  ;;  %v8390_v40 = vld [vmem:[#allocation10 + $0x578] sm:$0xff] }
 0x65c   :  { %11878 = vmatpush2.bf16.msra.mxu0 %v16642_v25  ;;  %11756 = vmatprep.subr.bf16.mxu1 %v16761_v35  ;;  %v8546_v25 = vld [vmem:[#allocation10 + $0xa58] sm:$0xff]  ;;  %v16721_v44 = vcombine.high %v8673_v34, %v8677_v22 }
 0x65d   :  { %11879 = vmatprep.subr.bf16.mxu0 %v16635_v58  ;;  %v8550_v35 = vld [vmem:[#allocation10 + $0xa78] sm:$0xff]  ;;  %v16728_v58 = vcombine.low %v8681_v18, %v8685_v56 }
 0x65e   :  { %v16595_v37 = vcombine.high %v8546_v25, %v8550_v35  ;;  %v16594_v55 = vcombine.low %v8546_v25, %v8550_v35 }
 0x65f   :  { %11757 = vmatpush2.bf16.msra.mxu1 %v16760_v59  ;;  %v8669_v59 = vld [vmem:[#allocation10 + $0xe30] sm:$0xff] }
 0x660   :  { %11880 = vmatpush2.bf16.msra.mxu0 %v16634_v38  ;;  %11758 = vmatprep.subr.bf16.mxu1 %v16753_v32  ;;  %v8538_v38 = vld [vmem:[#allocation10 + $0xa18] sm:$0xff]  ;;  %v16713_v39 = vcombine.high %v8665_v11, %v8669_v59 }
 0x661   :  { %11881 = vmatprep.subr.bf16.mxu0 %v16627_v29  ;;  %v8542_v32 = vld [vmem:[#allocation10 + $0xa38] sm:$0xff]  ;;  %v16720_v29 = vcombine.low %v8673_v34, %v8677_v22  ;;  %v7747_v34 = vld [vmem:[#allocation8 + $0x160] sm:$0xff] }
 0x662   :  { %v16587_v62 = vcombine.high %v8538_v38, %v8542_v32  ;;  %v16586_v52 = vcombine.low %v8538_v38, %v8542_v32  ;;  %v7739_v32 = vld [vmem:[#allocation8 + $0x120] sm:$0xff] }
 0x663   :  { %11759 = vmatpush2.bf16.msra.mxu1 %v16752_v57  ;;  %v8406_v57 = vld [vmem:[#allocation10 + $0x5f8] sm:$0xff] }
 0x664   :  { %11882 = vmatpush2.bf16.msra.mxu0 %v16626_v21  ;;  %11760 = vmatprep.subr.bf16.mxu1 %v16745_v54  ;;  %v7759_v21 = vld [vmem:[#allocation8 + $0x1c0] sm:$0xff]  ;;  %v16451_v4 = vcombine.high %v8402_v16, %v8406_v57 }
 0x665   :  { %11883 = vmatprep.subr.bf16.mxu0 %v16619_v46  ;;  %v7763_v54 = vld [vmem:[#allocation8 + $0x1e0] sm:$0xff]  ;;  %v16712_v46 = vcombine.low %v8665_v11, %v8669_v59  ;;  %v8382_v11 = vld [vmem:[#allocation10 + $0x538] sm:$0xff] }
 0x666   :  { %v16829_v12 = vcombine.high %v7759_v21, %v7763_v54  ;;  %v16828_v18 = vcombine.low %v7759_v21, %v7763_v54  ;;  %v8374_v21 = vld [vmem:[#allocation10 + $0x4f8] sm:$0xff]  ;;  %v7727_v54 = vld [vmem:[#allocation8 + $0xc0] sm:$0xff] }
 0x667   :  { %11761 = vmatpush2.bf16.msra.mxu1 %v16744_v49  ;;  %v8398_v49 = vld [vmem:[#allocation10 + $0x5b8] sm:$0xff] }
 0x668   :  { %11884 = vmatpush2.bf16.msra.mxu0 %v16618_v23  ;;  %11762 = vmatprep.subr.bf16.mxu1 %v16737_v7  ;;  %v16450_v23 = vcombine.low %v8402_v16, %v8406_v57  ;;  %v7751_v7 = vld [vmem:[#allocation8 + $0x180] sm:$0xff]  ;;  %v16443_v56 = vcombine.high %v8394_v63, %v8398_v49  ;;  %v16442_v22 = vcombine.low %v8394_v63, %v8398_v49  ;;  %v8370_v57 = vld [vmem:[#allocation10 + $0x4d8] sm:$0xff] }
 0x669   :  { %11885 = vmatprep.subr.bf16.mxu0 %v16611_v8  ;;  %v7755_v8 = vld [vmem:[#allocation8 + $0x1a0] sm:$0xff]  ;;  %v8362_v49 = vld [vmem:[#allocation10 + $0x498] sm:$0xff] }
 0x66b   :  { %11763 = vmatpush2.bf16.msra.mxu1 %v16736_v28 }
 0x66c   :  { %11886 = vmatpush2.bf16.msra.mxu0 %v16610_v24  ;;  %11764 = vmatprep.subr.bf16.mxu1 %v16729_v50  ;;  %v16821_v50 = vcombine.high %v7751_v7, %v7755_v8 }
 0x66d   :  { %11887 = vmatprep.subr.bf16.mxu0 %v16603_v1  ;;  %v7743_v1 = vld [vmem:[#allocation8 + $0x140] sm:$0xff] }
 0x66f   :  { %11765 = vmatpush2.bf16.msra.mxu1 %v16728_v58  ;;  %v16820_v58 = vcombine.low %v7751_v7, %v7755_v8  ;;  %v7719_v7 = vld [vmem:[#allocation8 + $0x80] sm:$0xff] }
 0x670   :  { %11888 = vmatpush2.bf16.msra.mxu0 %v16602_v42  ;;  %11766 = vmatprep.subr.bf16.mxu1 %v16721_v44  ;;  %v16435_v42 = vcombine.high %v8386_v9, %v8390_v40  ;;  %v16813_v44 = vcombine.high %v7743_v1, %v7747_v34  ;;  %v7723_v8 = vld [vmem:[#allocation8 + $0xa0] sm:$0xff] }
 0x671   :  { %11889 = vmatprep.subr.bf16.mxu0 %v16595_v37  ;;  %v8378_v37 = vld [vmem:[#allocation10 + $0x518] sm:$0xff] }
 0x673   :  { %11767 = vmatpush2.bf16.msra.mxu1 %v16720_v29 }
 0x674   :  { %11890 = vmatpush2.bf16.msra.mxu0 %v16594_v55  ;;  %11768 = vmatprep.subr.bf16.mxu1 %v16713_v39  ;;  %v16812_v39 = vcombine.low %v7743_v1, %v7747_v34  ;;  %v8358_v1 = vld [vmem:[#allocation10 + $0x478] sm:$0xff]  ;;  %v7711_v34 = vld [vmem:[#allocation8 + $0x40] sm:$0xff] }
 0x675   :  { %11891 = vmatprep.subr.bf16.mxu0 %v16587_v62  ;;  %v16427_v62 = vcombine.high %v8378_v37, %v8382_v11 }
 0x677   :  { %11769 = vmatpush2.bf16.msra.mxu1 %v16712_v46  ;;  %v7731_v46 = vld [vmem:[#allocation8 + $0xe0] sm:$0xff] }
 0x678   :  { %11892 = vmatpush2.bf16.msra.mxu0 %v16586_v52  ;;  %11820 = vmatprep.subr.bf16.mxu1 %v16451_v4  ;;  %v16426_v52 = vcombine.low %v8378_v37, %v8382_v11  ;;  %v16797_v63 = vcombine.high %v7727_v54, %v7731_v46  ;;  %v8346_v11 = vld [vmem:[#allocation10 + $0x418] sm:$0xff] }
 0x679   :  { %14503 = vmatprep.subr.bf16.mxu0 %v16829_v12  ;;  %v16419_v12 = vcombine.high %v8370_v57, %v8374_v21 }
 0x67a   :  { %v17953_v28 = vpop.f32.mrf.mxu1  ;;  %v17955_v24 = vpop.f32.mrf.mxu0  ;;  %11771 = vmatmul.mubr.bf16.vlgmr.msra.gmra.mxu1 %v17911_v60 }
 0x67b   :  { %11894 = vmatmul.mubr.bf16.vlgmr.msra.gmra.mxu0 %v17884_v26  ;;  %11821 = vmatpush1.bf16.msra.mxu1 %v16450_v23  ;;  %v7735_v26 = vld [vmem:[#allocation8 + $0x100] sm:$0xff]  ;;  %v8366_v23 = vld [vmem:[#allocation10 + $0x4b8] sm:$0xff] }
 0x67c   :  { %11852 = vmatprep.mubr.bf16.mxu1 %v17850_v20  ;;  %14504 = vmatpush1.bf16.msra.mxu0 %v16828_v18  ;;  %v17960_v25 = vpop.f32.mrf.mxu1  ;;  %v17962_v35 = vpop.f32.mrf.mxu0  ;;  %v16434_v20 = vcombine.low %v8386_v9, %v8390_v40  ;;  %v16805_v16 = vcombine.high %v7735_v26, %v7739_v32  ;;  %v16804_v4 = vcombine.low %v7735_v26, %v7739_v32  ;;  %v7707_v26 = vld [vmem:[#allocation8 + $0x20] sm:$0xff] }
 0x67d   :  { %14535 = vmatprep.mubr.bf16.mxu0 %v17686_v33  ;;  %11822 = vmatprep.subr.bf16.mxu1 %v16443_v56  ;;  %v16418_v18 = vcombine.low %v8370_v57, %v8374_v21  ;;  %v16796_v56 = vcombine.low %v7727_v54, %v7731_v46  ;;  %v16411_v9 = vcombine.high %v8362_v49, %v8366_v23  ;;  %v7827_v57 = vld [vmem:[#allocation8 + $0x3e0] sm:$0xff] }
 0x67e   :  { %v11530_v59 = vpop.f32.mrf.mxu1  ;;  %v11653_v38 = vpop.f32.mrf.mxu0  ;;  %14505 = vmatprep.subr.bf16.mxu0 %v16821_v50  ;;  %v16789_v40 = vcombine.high %v7719_v7, %v7723_v8  ;;  %v8354_v50 = vld [vmem:[#allocation10 + $0x458] sm:$0xff] }
 0x67f   :  { %11823 = vmatpush1.bf16.msra.mxu1 %v16442_v22  ;;  %v7715_v22 = vld [vmem:[#allocation8 + $0x60] sm:$0xff]  ;;  %v8350_v59 = vld [vmem:[#allocation10 + $0x438] sm:$0xff]  ;;  %v16402_v32 = vcombine.low %v8354_v50, %v8358_v1 }
 0x680   :  { %14506 = vmatpush1.bf16.msra.mxu0 %v16820_v58  ;;  %v11531_v29 = vpop.f32.mrf.mxu1  ;;  %v11654_v55 = vpop.f32.mrf.mxu0  ;;  %11824 = vmatprep.subr.bf16.mxu1 %v16435_v42  ;;  %v16410_v58 = vcombine.low %v8362_v49, %v8366_v23  ;;  %v16788_v42 = vcombine.low %v7719_v7, %v7723_v8  ;;  %v16781_v37 = vcombine.high %v7711_v34, %v7715_v22  ;;  %v7703_v38 = vld [vmem:[#allocation8] sm:$0xff] }
 0x681   :  { %14507 = vmatprep.subr.bf16.mxu0 %v16813_v44  ;;  %v16403_v44 = vcombine.high %v8354_v50, %v8358_v1  ;;  %v16395_v29 = vcombine.high %v8346_v11, %v8350_v59  ;;  %v16773_v55 = vcombine.high %v7703_v38, %v7707_v26  ;;  %v16394_v21 = vcombine.low %v8346_v11, %v8350_v59  ;;  %v7819_v49 = vld [vmem:[#allocation8 + $0x3a0] sm:$0xff] }
 0x682   :  { %v16772_v54 = vcombine.low %v7703_v38, %v7707_v26  ;;  %v7811_v50 = vld [vmem:[#allocation8 + $0x360] sm:$0xff] }
 0x683   :  { %11825 = vmatpush1.bf16.msra.mxu1 %v16434_v20  ;;  %v16780_v20 = vcombine.low %v7711_v34, %v7715_v22  ;;  %v7803_v11 = vld [vmem:[#allocation8 + $0x320] sm:$0xff] }
 0x684   :  { %14508 = vmatpush1.bf16.msra.mxu0 %v16812_v39  ;;  %11826 = vmatprep.subr.bf16.mxu1 %v16427_v62  ;;  %v8466_v39 = vld [vmem:[#allocation10 + $0x7d8] sm:$0xff] }
 0x685   :  { %14509 = vmatprep.subr.bf16.mxu0 %v16805_v16  ;;  %v8470_v62 = vld [vmem:[#allocation10 + $0x7f8] sm:$0xff]  ;;  %v7823_v16 = vld [vmem:[#allocation8 + $0x3c0] sm:$0xff] }
 0x686   :  { %v16515_v46 = vcombine.high %v8466_v39, %v8470_v62  ;;  %v16514_v23 = vcombine.low %v8466_v39, %v8470_v62  ;;  %v16892_v7 = vcombine.low %v7823_v16, %v7827_v57  ;;  %v7795_v39 = vld [vmem:[#allocation8 + $0x2e0] sm:$0xff] }
 0x687   :  { %11827 = vmatpush1.bf16.msra.mxu1 %v16426_v52  ;;  %v16893_v52 = vcombine.high %v7823_v16, %v7827_v57 }
 0x688   :  { %14510 = vmatpush1.bf16.msra.mxu0 %v16804_v4  ;;  %11828 = vmatprep.subr.bf16.mxu1 %v16419_v12  ;;  %v8458_v4 = vld [vmem:[#allocation10 + $0x798] sm:$0xff] }
 0x689   :  { %14511 = vmatprep.subr.bf16.mxu0 %v16797_v63  ;;  %v8462_v12 = vld [vmem:[#allocation10 + $0x7b8] sm:$0xff]  ;;  %v7815_v63 = vld [vmem:[#allocation8 + $0x380] sm:$0xff] }
 0x68a   :  { %v16507_v8 = vcombine.high %v8458_v4, %v8462_v12  ;;  %v16506_v1 = vcombine.low %v8458_v4, %v8462_v12  ;;  %v16884_v34 = vcombine.low %v7815_v63, %v7819_v49  ;;  %v7787_v4 = vld [vmem:[#allocation8 + $0x2a0] sm:$0xff] }
 0x68b   :  { %11829 = vmatpush1.bf16.msra.mxu1 %v16418_v18  ;;  %v16885_v18 = vcombine.high %v7815_v63, %v7819_v49 }
 0x68c   :  { %14512 = vmatpush1.bf16.msra.mxu0 %v16796_v56  ;;  %11830 = vmatprep.subr.bf16.mxu1 %v16411_v9  ;;  %v8450_v56 = vld [vmem:[#allocation10 + $0x758] sm:$0xff] }
 0x68d   :  { %14513 = vmatprep.subr.bf16.mxu0 %v16789_v40  ;;  %v8454_v9 = vld [vmem:[#allocation10 + $0x778] sm:$0xff]  ;;  %v7807_v40 = vld [vmem:[#allocation8 + $0x340] sm:$0xff] }
 0x68e   :  { %v16499_v22 = vcombine.high %v8450_v56, %v8454_v9  ;;  %v16498_v59 = vcombine.low %v8450_v56, %v8454_v9  ;;  %v16876_v38 = vcombine.low %v7807_v40, %v7811_v50  ;;  %v7779_v56 = vld [vmem:[#allocation8 + $0x260] sm:$0xff] }
 0x68f   :  { %11831 = vmatpush1.bf16.msra.mxu1 %v16410_v58  ;;  %v16877_v58 = vcombine.high %v7807_v40, %v7811_v50 }
 0x690   :  { %14514 = vmatpush1.bf16.msra.mxu0 %v16788_v42  ;;  %11832 = vmatprep.subr.bf16.mxu1 %v16403_v44  ;;  %v8442_v42 = vld [vmem:[#allocation10 + $0x718] sm:$0xff] }
 0x691   :  { %14515 = vmatprep.subr.bf16.mxu0 %v16781_v37  ;;  %v8446_v44 = vld [vmem:[#allocation10 + $0x738] sm:$0xff]  ;;  %v7799_v37 = vld [vmem:[#allocation8 + $0x300] sm:$0xff] }
 0x692   :  { %v16491_v26 = vcombine.high %v8442_v42, %v8446_v44  ;;  %v16490_v62 = vcombine.low %v8442_v42, %v8446_v44  ;;  %v16868_v16 = vcombine.low %v7799_v37, %v7803_v11  ;;  %v7771_v42 = vld [vmem:[#allocation8 + $0x220] sm:$0xff] }
 0x693   :  { %11833 = vmatpush1.bf16.msra.mxu1 %v16402_v32  ;;  %v16869_v32 = vcombine.high %v7799_v37, %v7803_v11 }
 0x694   :  { %14516 = vmatpush1.bf16.msra.mxu0 %v16780_v20  ;;  %11834 = vmatprep.subr.bf16.mxu1 %v16395_v29  ;;  %v8434_v20 = vld [vmem:[#allocation10 + $0x6d8] sm:$0xff] }
 0x695   :  { %14517 = vmatprep.subr.bf16.mxu0 %v16773_v55  ;;  %v8438_v29 = vld [vmem:[#allocation10 + $0x6f8] sm:$0xff]  ;;  %v7791_v55 = vld [vmem:[#allocation8 + $0x2c0] sm:$0xff] }
 0x696   :  { %v16483_v57 = vcombine.high %v8434_v20, %v8438_v29  ;;  %v16482_v12 = vcombine.low %v8434_v20, %v8438_v29  ;;  %v16860_v63 = vcombine.low %v7791_v55, %v7795_v39  ;;  %v8019_v20 = vld [vmem:[#allocation8 + $0x9e0] sm:$0xff] }
 0x697   :  { %11835 = vmatpush1.bf16.msra.mxu1 %v16394_v21  ;;  %v16861_v21 = vcombine.high %v7791_v55, %v7795_v39 }
 0x698   :  { %14518 = vmatpush1.bf16.msra.mxu0 %v16772_v54  ;;  %11836 = vmatprep.subr.bf16.mxu1 %v16515_v46  ;;  %v8426_v54 = vld [vmem:[#allocation10 + $0x698] sm:$0xff] }
 0x699   :  { %14519 = vmatprep.subr.bf16.mxu0 %v16893_v52  ;;  %v8430_v46 = vld [vmem:[#allocation10 + $0x6b8] sm:$0xff]  ;;  %v7783_v52 = vld [vmem:[#allocation8 + $0x280] sm:$0xff] }
 0x69a   :  { %v16475_v49 = vcombine.high %v8426_v54, %v8430_v46  ;;  %v16474_v9 = vcombine.low %v8426_v54, %v8430_v46  ;;  %v16852_v40 = vcombine.low %v7783_v52, %v7787_v4  ;;  %v11529_v54 = vadd.f32 %v17960_v25, %v17936_v61 }
 0x69b   :  { %11837 = vmatpush2.bf16.msra.mxu1 %v16514_v23  ;;  %v16853_v23 = vcombine.high %v7783_v52, %v7787_v4  ;;  %v8007_v52 = vld [vmem:[#allocation8 + $0x980] sm:$0xff] }
 0x69c   :  { %14520 = vmatpush2.bf16.msra.mxu0 %v16892_v7  ;;  %11838 = vmatprep.subr.bf16.mxu1 %v16507_v8  ;;  %v8418_v7 = vld [vmem:[#allocation10 + $0x658] sm:$0xff]  ;;  %v8011_v4 = vld [vmem:[#allocation8 + $0x9a0] sm:$0xff] }
 0x69d   :  { %14521 = vmatprep.subr.bf16.mxu0 %v16885_v18  ;;  %v8422_v8 = vld [vmem:[#allocation10 + $0x678] sm:$0xff]  ;;  %v7775_v18 = vld [vmem:[#allocation8 + $0x240] sm:$0xff] }
 0x69e   :  { %v16467_v50 = vcombine.high %v8418_v7, %v8422_v8  ;;  %v16466_v44 = vcombine.low %v8418_v7, %v8422_v8  ;;  %v16844_v37 = vcombine.low %v7775_v18, %v7779_v56  ;;  %v17077_v7 = vcombine.high %v8007_v52, %v8011_v4  ;;  %v7999_v8 = vld [vmem:[#allocation8 + $0x940] sm:$0xff] }
 0x69f   :  { %11839 = vmatpush2.bf16.msra.mxu1 %v16506_v1  ;;  %v16845_v1 = vcombine.high %v7775_v18, %v7779_v56  ;;  %v8003_v18 = vld [vmem:[#allocation8 + $0x960] sm:$0xff]  ;;  %v11570_v56 = vadd.f32 %v17947_v36, %v11529_v54  ;;  %v8618_v54 = vld [vmem:[#allocation10 + $0xc98] sm:$0xff] }
 0x6a0   :  { %14522 = vmatpush2.bf16.msra.mxu0 %v16884_v34  ;;  %11840 = vmatprep.subr.bf16.mxu1 %v16499_v22  ;;  %v8410_v34 = vld [vmem:[#allocation10 + $0x618] sm:$0xff]  ;;  %v7991_v36 = vld [vmem:[#allocation8 + $0x900] sm:$0xff] }
 0x6a1   :  { %14523 = vmatprep.subr.bf16.mxu0 %v16877_v58  ;;  %v8414_v22 = vld [vmem:[#allocation10 + $0x638] sm:$0xff]  ;;  %v7767_v58 = vld [vmem:[#allocation8 + $0x200] sm:$0xff] }
 0x6a2   :  { %v16459_v11 = vcombine.high %v8410_v34, %v8414_v22  ;;  %v16458_v29 = vcombine.low %v8410_v34, %v8414_v22  ;;  %v16836_v55 = vcombine.low %v7767_v58, %v7771_v42  ;;  %v17069_v34 = vcombine.high %v7999_v8, %v8003_v18  ;;  %v8634_v22 = vld [vmem:[#allocation10 + $0xd18] sm:$0xff] }
 0x6a3   :  { %11841 = vmatpush2.bf16.msra.mxu1 %v16498_v59  ;;  %v16837_v59 = vcombine.high %v7767_v58, %v7771_v42  ;;  %v8638_v58 = vld [vmem:[#allocation10 + $0xd38] sm:$0xff] }
 0x6a4   :  { %14524 = vmatpush2.bf16.msra.mxu0 %v16876_v38  ;;  %11842 = vmatprep.subr.bf16.mxu1 %v16491_v26  ;;  %v8658_v38 = vld [vmem:[#allocation10 + $0xdd8] sm:$0xff] }
 0x6a5   :  { %14525 = vmatprep.subr.bf16.mxu0 %v16869_v32  ;;  %v8662_v26 = vld [vmem:[#allocation10 + $0xdf8] sm:$0xff]  ;;  %v8015_v32 = vld [vmem:[#allocation8 + $0x9c0] sm:$0xff] }
 0x6a6   :  { %v16707_v39 = vcombine.high %v8658_v38, %v8662_v26  ;;  %v16706_v46 = vcombine.low %v8658_v38, %v8662_v26  ;;  %v16683_v38 = vcombine.high %v8634_v22, %v8638_v58 }
 0x6a7   :  { %11843 = vmatpush2.bf16.msra.mxu1 %v16490_v62  ;;  %v11527_v62 = vadd.f32 %v17953_v28, %v17931_v31  ;;  %v8646_v31 = vld [vmem:[#allocation10 + $0xd78] sm:$0xff] }
 0x6a8   :  { %14526 = vmatpush2.bf16.msra.mxu0 %v16868_v16  ;;  %11844 = vmatprep.subr.bf16.mxu1 %v16483_v57  ;;  %v17085_v16 = vcombine.high %v8015_v32, %v8019_v20  ;;  %v8650_v57 = vld [vmem:[#allocation10 + $0xd98] sm:$0xff] }
 0x6a9   :  { %14527 = vmatprep.subr.bf16.mxu0 %v16861_v21  ;;  %v8654_v21 = vld [vmem:[#allocation10 + $0xdb8] sm:$0xff] }
 0x6ab   :  { %11845 = vmatpush2.bf16.msra.mxu1 %v16482_v12  ;;  %v17084_v12 = vcombine.low %v8015_v32, %v8019_v20  ;;  %v8626_v20 = vld [vmem:[#allocation10 + $0xcd8] sm:$0xff] }
 0x6ac   :  { %14528 = vmatpush2.bf16.msra.mxu0 %v16860_v63  ;;  %11846 = vmatprep.subr.bf16.mxu1 %v16475_v49  ;;  %v11568_v63 = vadd.f32 %v17939_v3, %v11527_v62  ;;  %v16699_v49 = vcombine.high %v8650_v57, %v8654_v21  ;;  %v16698_v3 = vcombine.low %v8650_v57, %v8654_v21 }
 0x6ad   :  { %14529 = vmatprep.subr.bf16.mxu0 %v16853_v23  ;;  %v8642_v23 = vld [vmem:[#allocation10 + $0xd58] sm:$0xff]  ;;  %v16682_v62 = vcombine.low %v8634_v22, %v8638_v58  ;;  %v7963_v22 = vld [vmem:[#allocation8 + $0x820] sm:$0xff] }
 0x6af   :  { %11847 = vmatpush2.bf16.msra.mxu1 %v16474_v9 }
 0x6b0   :  { %14530 = vmatpush2.bf16.msra.mxu0 %v16852_v40  ;;  %11848 = vmatprep.subr.bf16.mxu1 %v16467_v50  ;;  %v17076_v40 = vcombine.low %v8007_v52, %v8011_v4  ;;  %v16691_v50 = vcombine.high %v8642_v23, %v8646_v31  ;;  %v7975_v52 = vld [vmem:[#allocation8 + $0x880] sm:$0xff] }
 0x6b1   :  { %14531 = vmatprep.subr.bf16.mxu0 %v16845_v1  ;;  %v7979_v4 = vld [vmem:[#allocation8 + $0x8a0] sm:$0xff] }
 0x6b3   :  { %11849 = vmatpush2.bf16.msra.mxu1 %v16466_v44  ;;  %v7995_v44 = vld [vmem:[#allocation8 + $0x920] sm:$0xff] }
 0x6b4   :  { %14532 = vmatpush2.bf16.msra.mxu0 %v16844_v37  ;;  %11850 = vmatprep.subr.bf16.mxu1 %v16459_v11  ;;  %v17061_v32 = vcombine.high %v7991_v36, %v7995_v44 }
 0x6b5   :  { %14533 = vmatprep.subr.bf16.mxu0 %v16837_v59  ;;  %v17068_v59 = vcombine.low %v7999_v8, %v8003_v18  ;;  %v7971_v8 = vld [vmem:[#allocation8 + $0x860] sm:$0xff] }
 0x6b7   :  { %11851 = vmatpush2.bf16.msra.mxu1 %v16458_v29  ;;  %v8630_v29 = vld [vmem:[#allocation10 + $0xcf8] sm:$0xff] }
 0x6b8   :  { %14534 = vmatpush2.bf16.msra.mxu0 %v16836_v55  ;;  %11902 = vmatprep.subr.bf16.mxu1 %v16707_v39  ;;  %v7983_v55 = vld [vmem:[#allocation8 + $0x8c0] sm:$0xff]  ;;  %v16675_v57 = vcombine.high %v8626_v20, %v8630_v29 }
 0x6b9   :  { %14585 = vmatprep.subr.bf16.mxu0 %v17085_v16  ;;  %v7987_v39 = vld [vmem:[#allocation8 + $0x8e0] sm:$0xff]  ;;  %v17060_v16 = vcombine.low %v7991_v36, %v7995_v44 }
 0x6ba   :  { %v11608_v28 = vpop.f32.mrf.mxu1  ;;  %11853 = vmatmul.mubr.bf16.vlgmr.msra.gmra.mxu1 %v17871_v14  ;;  %v17053_v21 = vcombine.high %v7983_v55, %v7987_v39 }
 0x6bb   :  { %v17971_v61 = vadd.f32 %v11608_v28, %v11568_v63  ;;  %v17973_v25 = vpop.f32.mrf.mxu0  ;;  %14536 = vmatmul.mubr.bf16.vlgmr.msra.gmra.mxu0 %v17708_v13  ;;  %11903 = vmatpush1.bf16.msra.mxu1 %v16706_v46  ;;  %v8622_v46 = vld [vmem:[#allocation10 + $0xcb8] sm:$0xff]  ;;  %v17052_v63 = vcombine.low %v7983_v55, %v7987_v39  ;;  %v8071_v39 = vld [vmem:[#allocation8 + $0xb80] sm:$0xff] }
 0x6bc   :  { %11934 = vmatprep.mubr.bf16.mxu1 %v17909_v2  ;;  %14586 = vmatpush1.bf16.msra.mxu0 %v17084_v12  ;;  %v11610_v9 = vpop.f32.mrf.mxu1  ;;  %v16690_v2 = vcombine.low %v8642_v23, %v8646_v31  ;;  %v16674_v12 = vcombine.low %v8626_v20, %v8630_v29  ;;  %v17045_v23 = vcombine.high %v7975_v52, %v7979_v4  ;;  %v8610_v31 = vld [vmem:[#allocation10 + $0xc58] sm:$0xff] }
 0x6bd   :  { %14617 = vmatprep.mubr.bf16.mxu0 %v17721_v45  ;;  %v17979_v14 = vadd.f32 %v11610_v9, %v11570_v56  ;;  %v17981_v1 = vpop.f32.mrf.mxu0  ;;  %11904 = vmatprep.subr.bf16.mxu1 %v16699_v49  ;;  %v16667_v49 = vcombine.high %v8618_v54, %v8622_v46  ;;  %v8614_v28 = vld [vmem:[#allocation10 + $0xc78] sm:$0xff]  ;;  %v16666_v18 = vcombine.low %v8618_v54, %v8622_v46 }
 0x6be   :  { %v11612_v42 = vpop.f32.mrf.mxu1  ;;  %14587 = vmatprep.subr.bf16.mxu0 %v17077_v7  ;;  %v7967_v7 = vld [vmem:[#allocation8 + $0x840] sm:$0xff]  ;;  %v17044_v56 = vcombine.low %v7975_v52, %v7979_v4  ;;  %v16658_v58 = vcombine.low %v8610_v31, %v8614_v28  ;;  %v8714_v29 = vld [vmem:[#allocation10 + $0xf98] sm:$0xff] }
 0x6bf   :  { %v11735_v37 = vpop.f32.mrf.mxu0  ;;  %11905 = vmatpush1.bf16.msra.mxu1 %v16698_v3  ;;  %v16659_v3 = vcombine.high %v8610_v31, %v8614_v28  ;;  %v17037_v9 = vcombine.high %v7967_v7, %v7971_v8  ;;  %v17036_v42 = vcombine.low %v7967_v7, %v7971_v8  ;;  %v8718_v55 = vld [vmem:[#allocation10 + $0xfb8] sm:$0xff]  ;;  %v8063_v4 = vld [vmem:[#allocation8 + $0xb40] sm:$0xff] }
 0x6c0   :  { %14588 = vmatpush1.bf16.msra.mxu0 %v17076_v40  ;;  %v11613_v11 = vpop.f32.mrf.mxu1  ;;  %11906 = vmatprep.subr.bf16.mxu1 %v16691_v50  ;;  %v8602_v40 = vld [vmem:[#allocation10 + $0xc18] sm:$0xff]  ;;  %v8055_v8 = vld [vmem:[#allocation8 + $0xb00] sm:$0xff] }
 0x6c1   :  { %v11736_v26 = vpop.f32.mrf.mxu0  ;;  %14589 = vmatprep.subr.bf16.mxu0 %v17069_v34  ;;  %v8606_v50 = vld [vmem:[#allocation10 + $0xc38] sm:$0xff]  ;;  %v7959_v34 = vld [vmem:[#allocation8 + $0x800] sm:$0xff] }
 0x6c2   :  { %v16651_v36 = vcombine.high %v8602_v40, %v8606_v50  ;;  %v17029_v44 = vcombine.high %v7959_v34, %v7963_v22  ;;  %v8722_v37 = vld [vmem:[#allocation10 + $0xfd8] sm:$0xff]  ;;  %v8079_v11 = vld [vmem:[#allocation8 + $0xbc0] sm:$0xff]  ;;  %v17028_v26 = vcombine.low %v7959_v34, %v7963_v22 }
 0x6c3   :  { %11907 = vmatpush1.bf16.msra.mxu1 %v16690_v2  ;;  %v8726_v2 = vld [vmem:[#allocation10 + $0xff8] sm:$0xff]  ;;  %v8047_v22 = vld [vmem:[#allocation8 + $0xac0] sm:$0xff] }
 0x6c4   :  { %14590 = vmatpush1.bf16.msra.mxu0 %v17068_v59  ;;  %11908 = vmatprep.subr.bf16.mxu1 %v16683_v38  ;;  %v8083_v59 = vld [vmem:[#allocation8 + $0xbe0] sm:$0xff]  ;;  %v16650_v38 = vcombine.low %v8602_v40, %v8606_v50  ;;  %v8706_v46 = vld [vmem:[#allocation10 + $0xf58] sm:$0xff] }
 0x6c5   :  { %14591 = vmatprep.subr.bf16.mxu0 %v17061_v32  ;;  %v16771_v32 = vcombine.high %v8722_v37, %v8726_v2  ;;  %v17149_v20 = vcombine.high %v8079_v11, %v8083_v59  ;;  %v8710_v52 = vld [vmem:[#allocation10 + $0xf78] sm:$0xff] }
 0x6c6   :  { %v8698_v28 = vld [vmem:[#allocation10 + $0xf18] sm:$0xff] }
 0x6c7   :  { %11909 = vmatpush1.bf16.msra.mxu1 %v16682_v62  ;;  %v8075_v62 = vld [vmem:[#allocation8 + $0xba0] sm:$0xff]  ;;  %v8702_v7 = vld [vmem:[#allocation10 + $0xf38] sm:$0xff] }
 0x6c8   :  { %14592 = vmatpush1.bf16.msra.mxu0 %v17060_v16  ;;  %11910 = vmatprep.subr.bf16.mxu1 %v16675_v57  ;;  %v16770_v16 = vcombine.low %v8722_v37, %v8726_v2  ;;  %v17148_v57 = vcombine.low %v8079_v11, %v8083_v59  ;;  %v17141_v54 = vcombine.high %v8071_v39, %v8075_v62  ;;  %v8690_v50 = vld [vmem:[#allocation10 + $0xed8] sm:$0xff]  ;;  %v8039_v59 = vld [vmem:[#allocation8 + $0xa80] sm:$0xff] }
 0x6c9   :  { %14593 = vmatprep.subr.bf16.mxu0 %v17053_v21  ;;  %v16763_v21 = vcombine.high %v8714_v29, %v8718_v55  ;;  %v8694_v34 = vld [vmem:[#allocation10 + $0xef8] sm:$0xff] }
 0x6ca   :  { %v8682_v2 = vld [vmem:[#allocation10 + $0xe98] sm:$0xff] }
 0x6cb   :  { %11911 = vmatpush1.bf16.msra.mxu1 %v16674_v12  ;;  %v8067_v12 = vld [vmem:[#allocation8 + $0xb60] sm:$0xff]  ;;  %v8686_v11 = vld [vmem:[#allocation10 + $0xeb8] sm:$0xff] }
 0x6cc   :  { %14594 = vmatpush1.bf16.msra.mxu0 %v17052_v63  ;;  %11912 = vmatprep.subr.bf16.mxu1 %v16667_v49  ;;  %v16762_v63 = vcombine.low %v8714_v29, %v8718_v55  ;;  %v17140_v49 = vcombine.low %v8071_v39, %v8075_v62  ;;  %v17133_v31 = vcombine.high %v8063_v4, %v8067_v12  ;;  %v8674_v55 = vld [vmem:[#allocation10 + $0xe58] sm:$0xff]  ;;  %v8031_v62 = vld [vmem:[#allocation8 + $0xa40] sm:$0xff] }
 0x6cd   :  { %14595 = vmatprep.subr.bf16.mxu0 %v17045_v23  ;;  %v16755_v23 = vcombine.high %v8706_v46, %v8710_v52  ;;  %v8678_v39 = vld [vmem:[#allocation10 + $0xe78] sm:$0xff] }
 0x6cf   :  { %11913 = vmatpush1.bf16.msra.mxu1 %v16666_v18  ;;  %v8059_v18 = vld [vmem:[#allocation8 + $0xb20] sm:$0xff] }
 0x6d0   :  { %14596 = vmatpush1.bf16.msra.mxu0 %v17044_v56  ;;  %11914 = vmatprep.subr.bf16.mxu1 %v16659_v3  ;;  %v16754_v56 = vcombine.low %v8706_v46, %v8710_v52  ;;  %v17132_v3 = vcombine.low %v8063_v4, %v8067_v12  ;;  %v17125_v40 = vcombine.high %v8055_v8, %v8059_v18  ;;  %v8666_v52 = vld [vmem:[#allocation10 + $0xe18] sm:$0xff]  ;;  %v8023_v12 = vld [vmem:[#allocation8 + $0xa00] sm:$0xff] }
 0x6d1   :  { %14597 = vmatprep.subr.bf16.mxu0 %v17037_v9  ;;  %v16747_v9 = vcombine.high %v8698_v28, %v8702_v7  ;;  %v8670_v4 = vld [vmem:[#allocation10 + $0xe38] sm:$0xff] }
 0x6d3   :  { %11915 = vmatpush1.bf16.msra.mxu1 %v16658_v58  ;;  %v8051_v58 = vld [vmem:[#allocation8 + $0xae0] sm:$0xff] }
 0x6d4   :  { %14598 = vmatpush1.bf16.msra.mxu0 %v17036_v42  ;;  %11916 = vmatprep.subr.bf16.mxu1 %v16651_v36  ;;  %v16746_v42 = vcombine.low %v8698_v28, %v8702_v7  ;;  %v17124_v36 = vcombine.low %v8055_v8, %v8059_v18  ;;  %v17117_v37 = vcombine.high %v8047_v22, %v8051_v58  ;;  %v7887_v7 = vld [vmem:[#allocation8 + $0x5c0] sm:$0xff]  ;;  %v7760_v18 = vld [vmem:[#allocation8 + $0x1c8] sm:$0xff] }
 0x6d5   :  { %14599 = vmatprep.subr.bf16.mxu0 %v17029_v44  ;;  %v16739_v44 = vcombine.high %v8690_v50, %v8694_v34  ;;  %v7891_v8 = vld [vmem:[#allocation8 + $0x5e0] sm:$0xff] }
 0x6d7   :  { %11917 = vmatpush1.bf16.msra.mxu1 %v16650_v38  ;;  %v8043_v38 = vld [vmem:[#allocation8 + $0xaa0] sm:$0xff] }
 0x6d8   :  { %14600 = vmatpush1.bf16.msra.mxu0 %v17028_v26  ;;  %11918 = vmatprep.subr.bf16.mxu1 %v16771_v32  ;;  %v16738_v26 = vcombine.low %v8690_v50, %v8694_v34  ;;  %v17116_v32 = vcombine.low %v8047_v22, %v8051_v58  ;;  %v17109_v29 = vcombine.high %v8039_v59, %v8043_v38  ;;  %v7879_v34 = vld [vmem:[#allocation8 + $0x580] sm:$0xff] }
 0x6d9   :  { %14601 = vmatprep.subr.bf16.mxu0 %v17149_v20  ;;  %v16731_v20 = vcombine.high %v8682_v2, %v8686_v11  ;;  %v7883_v22 = vld [vmem:[#allocation8 + $0x5a0] sm:$0xff]  ;;  %v16956_v58 = vcombine.low %v7887_v7, %v7891_v8 }
 0x6db   :  { %11919 = vmatpush2.bf16.msra.mxu1 %v16770_v16  ;;  %v8035_v16 = vld [vmem:[#allocation8 + $0xa60] sm:$0xff] }
 0x6dc   :  { %14602 = vmatpush2.bf16.msra.mxu0 %v17148_v57  ;;  %11920 = vmatprep.subr.bf16.mxu1 %v16763_v21  ;;  %v16730_v57 = vcombine.low %v8682_v2, %v8686_v11  ;;  %v17108_v21 = vcombine.low %v8039_v59, %v8043_v38  ;;  %v17101_v46 = vcombine.high %v8031_v62, %v8035_v16  ;;  %v7871_v2 = vld [vmem:[#allocation8 + $0x540] sm:$0xff] }
 0x6dd   :  { %14603 = vmatprep.subr.bf16.mxu0 %v17141_v54  ;;  %v16723_v54 = vcombine.high %v8674_v55, %v8678_v39  ;;  %v7875_v11 = vld [vmem:[#allocation8 + $0x560] sm:$0xff] }
 0x6df   :  { %11921 = vmatpush2.bf16.msra.mxu1 %v16762_v63  ;;  %v8027_v63 = vld [vmem:[#allocation8 + $0xa20] sm:$0xff] }
 0x6e0   :  { %14604 = vmatpush2.bf16.msra.mxu0 %v17140_v49  ;;  %11922 = vmatprep.subr.bf16.mxu1 %v16755_v23  ;;  %v16722_v49 = vcombine.low %v8674_v55, %v8678_v39  ;;  %v17100_v23 = vcombine.low %v8031_v62, %v8035_v16  ;;  %v17093_v28 = vcombine.high %v8023_v12, %v8027_v63 }
 0x6e1   :  { %14605 = vmatprep.subr.bf16.mxu0 %v17133_v31  ;;  %v16715_v31 = vcombine.high %v8666_v52, %v8670_v4  ;;  %v16948_v55 = vcombine.low %v7879_v34, %v7883_v22  ;;  %v16941_v16 = vcombine.high %v7871_v2, %v7875_v11 }
 0x6e3   :  { %11923 = vmatpush2.bf16.msra.mxu1 %v16754_v56  ;;  %v7764_v56 = vld [vmem:[#allocation8 + $0x1e8] sm:$0xff] }
 0x6e4   :  { %14606 = vmatpush2.bf16.msra.mxu0 %v17132_v3  ;;  %11924 = vmatprep.subr.bf16.mxu1 %v16747_v9  ;;  %v16714_v3 = vcombine.low %v8666_v52, %v8670_v4  ;;  %v17092_v9 = vcombine.low %v8023_v12, %v8027_v63  ;;  %v16831_v50 = vcombine.high %v7760_v18, %v7764_v56  ;;  %v7736_v4 = vld [vmem:[#allocation8 + $0x108] sm:$0xff] }
 0x6e5   :  { %14607 = vmatprep.subr.bf16.mxu0 %v17125_v40  ;;  %v16957_v40 = vcombine.high %v7887_v7, %v7891_v8  ;;  %v7740_v12 = vld [vmem:[#allocation8 + $0x128] sm:$0xff] }
 0x6e6   :  { %v16807_v8 = vcombine.high %v7736_v4, %v7740_v12 }
 0x6e7   :  { %11925 = vmatpush2.bf16.msra.mxu1 %v16746_v42  ;;  %v7752_v42 = vld [vmem:[#allocation8 + $0x188] sm:$0xff] }
 0x6e8   :  { %14608 = vmatpush2.bf16.msra.mxu0 %v17124_v36  ;;  %11926 = vmatprep.subr.bf16.mxu1 %v16739_v44  ;;  %v7756_v36 = vld [vmem:[#allocation8 + $0x1a8] sm:$0xff]  ;;  %v16830_v44 = vcombine.low %v7760_v18, %v7764_v56  ;;  %v7859_v18 = vld [vmem:[#allocation8 + $0x4e0] sm:$0xff] }
 0x6e9   :  { %14609 = vmatprep.subr.bf16.mxu0 %v17117_v37  ;;  %v16949_v37 = vcombine.high %v7879_v34, %v7883_v22  ;;  %v16823_v38 = vcombine.high %v7752_v42, %v7756_v36  ;;  %v16822_v62 = vcombine.low %v7752_v42, %v7756_v36  ;;  %v7728_v56 = vld [vmem:[#allocation8 + $0xc8] sm:$0xff]  ;;  %v7847_v34 = vld [vmem:[#allocation8 + $0x480] sm:$0xff] }
 0x6ea   :  { %v7851_v22 = vld [vmem:[#allocation8 + $0x4a0] sm:$0xff]  ;;  %v7724_v42 = vld [vmem:[#allocation8 + $0xa8] sm:$0xff] }
 0x6eb   :  { %11927 = vmatpush2.bf16.msra.mxu1 %v16738_v26  ;;  %v7744_v26 = vld [vmem:[#allocation8 + $0x148] sm:$0xff] }
 0x6ec   :  { %14610 = vmatpush2.bf16.msra.mxu0 %v17116_v32  ;;  %11928 = vmatprep.subr.bf16.mxu1 %v16731_v20  ;;  %v7748_v32 = vld [vmem:[#allocation8 + $0x168] sm:$0xff] }
 0x6ed   :  { %14611 = vmatprep.subr.bf16.mxu0 %v17109_v29 }
 0x6ef   :  { %11929 = vmatpush2.bf16.msra.mxu1 %v16730_v57 }
 0x6f0   :  { %14612 = vmatpush2.bf16.msra.mxu0 %v17108_v21  ;;  %11930 = vmatprep.subr.bf16.mxu1 %v16723_v54  ;;  %v7863_v21 = vld [vmem:[#allocation8 + $0x500] sm:$0xff] }
 0x6f1   :  { %14613 = vmatprep.subr.bf16.mxu0 %v17101_v46  ;;  %v7867_v54 = vld [vmem:[#allocation8 + $0x520] sm:$0xff] }
 0x6f3   :  { %11931 = vmatpush2.bf16.msra.mxu1 %v16722_v49  ;;  %v16940_v49 = vcombine.low %v7871_v2, %v7875_v11  ;;  %v7839_v11 = vld [vmem:[#allocation8 + $0x440] sm:$0xff] }
 0x6f4   :  { %14614 = vmatpush2.bf16.msra.mxu0 %v17100_v23  ;;  %11932 = vmatprep.subr.bf16.mxu1 %v16715_v31  ;;  %v16814_v31 = vcombine.low %v7744_v26, %v7748_v32 }
 0x6f5   :  { %14615 = vmatprep.subr.bf16.mxu0 %v17093_v28  ;;  %v16933_v28 = vcombine.high %v7863_v21, %v7867_v54 }
 0x6f7   :  { %11933 = vmatpush2.bf16.msra.mxu1 %v16714_v3  ;;  %v7732_v3 = vld [vmem:[#allocation8 + $0xe8] sm:$0xff] }
 0x6f8   :  { %14616 = vmatpush2.bf16.msra.mxu0 %v17092_v9  ;;  %14544 = vmatprep.subr.bf16.mxu1 %v16957_v40  ;;  %v16932_v9 = vcombine.low %v7863_v21, %v7867_v54  ;;  %v16806_v40 = vcombine.low %v7736_v4, %v7740_v12  ;;  %v7951_v12 = vld [vmem:[#allocation8 + $0x7c0] sm:$0xff] }
 0x6f9   :  { %14667 = vmatprep.subr.bf16.mxu0 %v16831_v50 }
 0x6fa   :  { %v11690_v59 = vpop.f32.mrf.mxu1  ;;  %11935 = vmatmul.mubr.bf16.vlgmr.msra.gmra.mxu1 %v17911_v60 }
 0x6fb   :  { %v11691_v20 = vadd.f32 %v11690_v59, %v17955_v24  ;;  %v17985_v29 = vpop.f32.mrf.mxu0  ;;  %14618 = vmatmul.mubr.bf16.vlgmr.msra.gmra.mxu0 %v17735_v6  ;;  %14545 = vmatpush1.bf16.msra.mxu1 %v16956_v58  ;;  %v16815_v24 = vcombine.high %v7744_v26, %v7748_v32  ;;  %v7720_v58 = vld [vmem:[#allocation8 + $0x88] sm:$0xff]  ;;  %v7843_v59 = vld [vmem:[#allocation8 + $0x460] sm:$0xff]  ;;  %v16916_v32 = vcombine.low %v7847_v34, %v7851_v22 }
 0x6fc   :  { %14576 = vmatprep.mubr.bf16.mxu1 %v17689_v47  ;;  %14668 = vmatpush1.bf16.msra.mxu0 %v16830_v44  ;;  %v11692_v39 = vpop.f32.mrf.mxu1  ;;  %v16798_v44 = vcombine.low %v7728_v56, %v7732_v3  ;;  %v16791_v2 = vcombine.high %v7720_v58, %v7724_v42  ;;  %v7716_v26 = vld [vmem:[#allocation8 + $0x68] sm:$0xff]  ;;  %v16908_v21 = vcombine.low %v7839_v11, %v7843_v59 }
 0x6fd   :  { %14699 = vmatprep.mubr.bf16.mxu0 %v17686_v33  ;;  %v11693_v60 = vadd.f32 %v11692_v39, %v17962_v35  ;;  %v17991_v57 = vpop.f32.mrf.mxu0  ;;  %14546 = vmatprep.subr.bf16.mxu1 %v16949_v37  ;;  %v17994_v46 = vadd.f32 %v17973_v25, %v11691_v20  ;;  %v7855_v25 = vld [vmem:[#allocation8 + $0x4c0] sm:$0xff]  ;;  %v16917_v37 = vcombine.high %v7847_v34, %v7851_v22 }
 0x6fe   :  { %v11694_v52 = vpop.f32.mrf.mxu1  ;;  %14669 = vmatprep.subr.bf16.mxu0 %v16823_v38  ;;  %v16925_v50 = vcombine.high %v7855_v25, %v7859_v18  ;;  %v16924_v36 = vcombine.low %v7855_v25, %v7859_v18  ;;  %v7712_v38 = vld [vmem:[#allocation8 + $0x48] sm:$0xff]  ;;  %v16790_v20 = vcombine.low %v7720_v58, %v7724_v42  ;;  %v7943_v25 = vld [vmem:[#allocation8 + $0x780] sm:$0xff] }
 0x6ff   :  { %v11817_v63 = vpop.f32.mrf.mxu0  ;;  %14547 = vmatpush1.bf16.msra.mxu1 %v16948_v55  ;;  %v17997_v23 = vadd.f32 %v17981_v1, %v11693_v60  ;;  %v16799_v1 = vcombine.high %v7728_v56, %v7732_v3  ;;  %v16909_v55 = vcombine.high %v7839_v11, %v7843_v59  ;;  %v16783_v39 = vcombine.high %v7712_v38, %v7716_v26  ;;  %v7704_v60 = vld [vmem:[#allocation8 + $0x8] sm:$0xff]  ;;  %v7947_v18 = vld [vmem:[#allocation8 + $0x7a0] sm:$0xff] }
 0x700   :  { %14670 = vmatpush1.bf16.msra.mxu0 %v16822_v62  ;;  %v11695_v35 = vpop.f32.mrf.mxu1  ;;  %14548 = vmatprep.subr.bf16.mxu1 %v16941_v16  ;;  %v7831_v62 = vld [vmem:[#allocation8 + $0x400] sm:$0xff]  ;;  %v16782_v54 = vcombine.low %v7712_v38, %v7716_v26  ;;  %v7816_v56 = vld [vmem:[#allocation8 + $0x388] sm:$0xff] }
 0x701   :  { %v11818_v7 = vpop.f32.mrf.mxu0  ;;  %14671 = vmatprep.subr.bf16.mxu0 %v16815_v24  ;;  %v7835_v16 = vld [vmem:[#allocation8 + $0x420] sm:$0xff]  ;;  %v7708_v24 = vld [vmem:[#allocation8 + $0x28] sm:$0xff] }
 0x702   :  { %v16901_v52 = vcombine.high %v7831_v62, %v7835_v16  ;;  %v16775_v4 = vcombine.high %v7704_v60, %v7708_v24  ;;  %v7955_v63 = vld [vmem:[#allocation8 + $0x7e0] sm:$0xff]  ;;  %v7828_v35 = vld [vmem:[#allocation8 + $0x3e8] sm:$0xff] }
 0x703   :  { %14549 = vmatpush1.bf16.msra.mxu1 %v16940_v49  ;;  %v7824_v49 = vld [vmem:[#allocation8 + $0x3c8] sm:$0xff]  ;;  %v17021_v7 = vcombine.high %v7951_v12, %v7955_v63  ;;  %v7935_v34 = vld [vmem:[#allocation8 + $0x740] sm:$0xff] }
 0x704   :  { %14672 = vmatpush1.bf16.msra.mxu0 %v16814_v31  ;;  %14550 = vmatprep.subr.bf16.mxu1 %v16933_v28  ;;  %v16900_v31 = vcombine.low %v7831_v62, %v7835_v16  ;;  %v16774_v28 = vcombine.low %v7704_v60, %v7708_v24  ;;  %v7820_v3 = vld [vmem:[#allocation8 + $0x3a8] sm:$0xff]  ;;  %v7939_v22 = vld [vmem:[#allocation8 + $0x760] sm:$0xff] }
 0x705   :  { %14673 = vmatprep.subr.bf16.mxu0 %v16807_v8  ;;  %v16895_v8 = vcombine.high %v7824_v49, %v7828_v35  ;;  %v7808_v58 = vld [vmem:[#allocation8 + $0x348] sm:$0xff]  ;;  %v7927_v11 = vld [vmem:[#allocation8 + $0x700] sm:$0xff] }
 0x706   :  { %v7812_v42 = vld [vmem:[#allocation8 + $0x368] sm:$0xff]  ;;  %v7931_v59 = vld [vmem:[#allocation8 + $0x720] sm:$0xff] }
 0x707   :  { %14551 = vmatpush1.bf16.msra.mxu1 %v16932_v9  ;;  %v17020_v9 = vcombine.low %v7951_v12, %v7955_v63  ;;  %v7800_v38 = vld [vmem:[#allocation8 + $0x308] sm:$0xff]  ;;  %v7919_v62 = vld [vmem:[#allocation8 + $0x6c0] sm:$0xff] }
 0x708   :  { %14674 = vmatpush1.bf16.msra.mxu0 %v16806_v40  ;;  %14552 = vmatprep.subr.bf16.mxu1 %v16925_v50  ;;  %v16894_v40 = vcombine.low %v7824_v49, %v7828_v35  ;;  %v17013_v50 = vcombine.high %v7943_v25, %v7947_v18  ;;  %v7804_v26 = vld [vmem:[#allocation8 + $0x328] sm:$0xff]  ;;  %v7923_v16 = vld [vmem:[#allocation8 + $0x6e0] sm:$0xff] }
 0x709   :  { %14675 = vmatprep.subr.bf16.mxu0 %v16799_v1  ;;  %v16887_v1 = vcombine.high %v7816_v56, %v7820_v3  ;;  %v7792_v60 = vld [vmem:[#allocation8 + $0x2c8] sm:$0xff]  ;;  %v7911_v12 = vld [vmem:[#allocation8 + $0x680] sm:$0xff] }
 0x70a   :  { %v7796_v24 = vld [vmem:[#allocation8 + $0x2e8] sm:$0xff]  ;;  %v7915_v63 = vld [vmem:[#allocation8 + $0x6a0] sm:$0xff] }
 0x70b   :  { %14553 = vmatpush1.bf16.msra.mxu1 %v16924_v36  ;;  %v17012_v36 = vcombine.low %v7943_v25, %v7947_v18  ;;  %v7784_v49 = vld [vmem:[#allocation8 + $0x288] sm:$0xff]  ;;  %v7903_v25 = vld [vmem:[#allocation8 + $0x640] sm:$0xff] }
 0x70c   :  { %14676 = vmatpush1.bf16.msra.mxu0 %v16798_v44  ;;  %14554 = vmatprep.subr.bf16.mxu1 %v16917_v37  ;;  %v16886_v44 = vcombine.low %v7816_v56, %v7820_v3  ;;  %v17005_v37 = vcombine.high %v7935_v34, %v7939_v22  ;;  %v7788_v35 = vld [vmem:[#allocation8 + $0x2a8] sm:$0xff]  ;;  %v7907_v18 = vld [vmem:[#allocation8 + $0x660] sm:$0xff] }
 0x70d   :  { %14677 = vmatprep.subr.bf16.mxu0 %v16791_v2  ;;  %v16879_v2 = vcombine.high %v7808_v58, %v7812_v42  ;;  %v7776_v56 = vld [vmem:[#allocation8 + $0x248] sm:$0xff] }
 0x70e   :  { %v7780_v3 = vld [vmem:[#allocation8 + $0x268] sm:$0xff] }
 0x70f   :  { %14555 = vmatpush1.bf16.msra.mxu1 %v16916_v32  ;;  %v17004_v32 = vcombine.low %v7935_v34, %v7939_v22  ;;  %v7895_v34 = vld [vmem:[#allocation8 + $0x600] sm:$0xff] }
 0x710   :  { %14678 = vmatpush1.bf16.msra.mxu0 %v16790_v20  ;;  %14556 = vmatprep.subr.bf16.mxu1 %v16909_v55  ;;  %v16878_v20 = vcombine.low %v7808_v58, %v7812_v42  ;;  %v16997_v55 = vcombine.high %v7927_v11, %v7931_v59  ;;  %v7899_v22 = vld [vmem:[#allocation8 + $0x620] sm:$0xff]  ;;  %v7768_v58 = vld [vmem:[#allocation8 + $0x208] sm:$0xff] }
 0x711   :  { %14679 = vmatprep.subr.bf16.mxu0 %v16783_v39  ;;  %v16871_v39 = vcombine.high %v7800_v38, %v7804_v26  ;;  %v7772_v42 = vld [vmem:[#allocation8 + $0x228] sm:$0xff] }
 0x713   :  { %14557 = vmatpush1.bf16.msra.mxu1 %v16908_v21  ;;  %v16996_v21 = vcombine.low %v7927_v11, %v7931_v59  ;;  %v8143_v11 = vld [vmem:[#allocation8 + $0xdc0] sm:$0xff] }
 0x714   :  { %14680 = vmatpush1.bf16.msra.mxu0 %v16782_v54  ;;  %14558 = vmatprep.subr.bf16.mxu1 %v16901_v52  ;;  %v16870_v54 = vcombine.low %v7800_v38, %v7804_v26  ;;  %v16989_v52 = vcombine.high %v7919_v62, %v7923_v16  ;;  %v8147_v59 = vld [vmem:[#allocation8 + $0xde0] sm:$0xff]  ;;  %v8016_v38 = vld [vmem:[#allocation8 + $0x9c8] sm:$0xff] }
 0x715   :  { %14681 = vmatprep.subr.bf16.mxu0 %v16775_v4  ;;  %v16863_v4 = vcombine.high %v7792_v60, %v7796_v24  ;;  %v8020_v26 = vld [vmem:[#allocation8 + $0x9e8] sm:$0xff] }
 0x717   :  { %14559 = vmatpush1.bf16.msra.mxu1 %v16900_v31  ;;  %v16988_v31 = vcombine.low %v7919_v62, %v7923_v16  ;;  %v8135_v62 = vld [vmem:[#allocation8 + $0xd80] sm:$0xff] }
 0x718   :  { %14682 = vmatpush1.bf16.msra.mxu0 %v16774_v28  ;;  %14560 = vmatprep.subr.bf16.mxu1 %v17021_v7  ;;  %v16862_v28 = vcombine.low %v7792_v60, %v7796_v24  ;;  %v16981_v7 = vcombine.high %v7911_v12, %v7915_v63  ;;  %v8139_v16 = vld [vmem:[#allocation8 + $0xda0] sm:$0xff]  ;;  %v17212_v60 = vcombine.low %v8143_v11, %v8147_v59  ;;  %v8008_v24 = vld [vmem:[#allocation8 + $0x988] sm:$0xff] }
 0x719   :  { %14683 = vmatprep.subr.bf16.mxu0 %v16895_v8  ;;  %v16855_v8 = vcombine.high %v7784_v49, %v7788_v35 }
 0x71b   :  { %14561 = vmatpush2.bf16.msra.mxu1 %v17020_v9  ;;  %v16980_v9 = vcombine.low %v7911_v12, %v7915_v63  ;;  %v8131_v12 = vld [vmem:[#allocation8 + $0xd60] sm:$0xff] }
 0x71c   :  { %14684 = vmatpush2.bf16.msra.mxu0 %v16894_v40  ;;  %14562 = vmatprep.subr.bf16.mxu1 %v17013_v50  ;;  %v16854_v40 = vcombine.low %v7784_v49, %v7788_v35  ;;  %v16973_v50 = vcombine.high %v7903_v25, %v7907_v18  ;;  %v8000_v35 = vld [vmem:[#allocation8 + $0x948] sm:$0xff] }
 0x71d   :  { %14685 = vmatprep.subr.bf16.mxu0 %v16887_v1  ;;  %v16847_v1 = vcombine.high %v7776_v56, %v7780_v3 }
 0x71f   :  { %14563 = vmatpush2.bf16.msra.mxu1 %v17012_v36  ;;  %v16972_v36 = vcombine.low %v7903_v25, %v7907_v18 }
 0x720   :  { %14686 = vmatpush2.bf16.msra.mxu0 %v16886_v44  ;;  %14564 = vmatprep.subr.bf16.mxu1 %v17005_v37  ;;  %v16846_v44 = vcombine.low %v7776_v56, %v7780_v3  ;;  %v16965_v37 = vcombine.high %v7895_v34, %v7899_v22 }
 0x721   :  { %14687 = vmatprep.subr.bf16.mxu0 %v16879_v2  ;;  %v16839_v2 = vcombine.high %v7768_v58, %v7772_v42 }
 0x723   :  { %14565 = vmatpush2.bf16.msra.mxu1 %v17004_v32  ;;  %v16964_v32 = vcombine.low %v7895_v34, %v7899_v22  ;;  %v7992_v34 = vld [vmem:[#allocation8 + $0x908] sm:$0xff] }
 0x724   :  { %14688 = vmatpush2.bf16.msra.mxu0 %v16878_v20  ;;  %14566 = vmatprep.subr.bf16.mxu1 %v16997_v55  ;;  %v16838_v20 = vcombine.low %v7768_v58, %v7772_v42  ;;  %v17213_v55 = vcombine.high %v8143_v11, %v8147_v59  ;;  %v7996_v22 = vld [vmem:[#allocation8 + $0x928] sm:$0xff]  ;;  %v8111_v11 = vld [vmem:[#allocation8 + $0xcc0] sm:$0xff] }
 0x725   :  { %14689 = vmatprep.subr.bf16.mxu0 %v16871_v39  ;;  %v17087_v39 = vcombine.high %v8016_v38, %v8020_v26  ;;  %v8115_v59 = vld [vmem:[#allocation8 + $0xce0] sm:$0xff] }
 0x727   :  { %14567 = vmatpush2.bf16.msra.mxu1 %v16996_v21  ;;  %v8012_v21 = vld [vmem:[#allocation8 + $0x9a8] sm:$0xff] }
 0x728   :  { %14690 = vmatpush2.bf16.msra.mxu0 %v16870_v54  ;;  %14568 = vmatprep.subr.bf16.mxu1 %v16989_v52  ;;  %v17086_v54 = vcombine.low %v8016_v38, %v8020_v26  ;;  %v17205_v52 = vcombine.high %v8135_v62, %v8139_v16  ;;  %v17079_v49 = vcombine.high %v8008_v24, %v8012_v21  ;;  %v7984_v38 = vld [vmem:[#allocation8 + $0x8c8] sm:$0xff] }
 0x729   :  { %14691 = vmatprep.subr.bf16.mxu0 %v16863_v4  ;;  %v8127_v4 = vld [vmem:[#allocation8 + $0xd40] sm:$0xff]  ;;  %v17078_v18 = vcombine.low %v8008_v24, %v8012_v21  ;;  %v7988_v26 = vld [vmem:[#allocation8 + $0x8e8] sm:$0xff]  ;;  %v17180_v21 = vcombine.low %v8111_v11, %v8115_v59 }
 0x72a   :  { %v17197_v56 = vcombine.high %v8127_v4, %v8131_v12  ;;  %v17196_v42 = vcombine.low %v8127_v4, %v8131_v12  ;;  %v7980_v24 = vld [vmem:[#allocation8 + $0x8a8] sm:$0xff]  ;;  %v8095_v12 = vld [vmem:[#allocation8 + $0xc40] sm:$0xff] }
 0x72b   :  { %14569 = vmatpush2.bf16.msra.mxu1 %v16988_v31  ;;  %v8004_v31 = vld [vmem:[#allocation8 + $0x968] sm:$0xff] }
 0x72c   :  { %14692 = vmatpush2.bf16.msra.mxu0 %v16862_v28  ;;  %14570 = vmatprep.subr.bf16.mxu1 %v16981_v7 }
 0x72d   :  { %14693 = vmatprep.subr.bf16.mxu0 %v16855_v8  ;;  %v17204_v8 = vcombine.low %v8135_v62, %v8139_v16  ;;  %v8103_v62 = vld [vmem:[#allocation8 + $0xc80] sm:$0xff] }
 0x72e   :  { %v8107_v16 = vld [vmem:[#allocation8 + $0xca0] sm:$0xff] }
 0x72f   :  { %14571 = vmatpush2.bf16.msra.mxu1 %v16980_v9 }
 0x730   :  { %14694 = vmatpush2.bf16.msra.mxu0 %v16854_v40  ;;  %14572 = vmatprep.subr.bf16.mxu1 %v16973_v50  ;;  %v8119_v40 = vld [vmem:[#allocation8 + $0xd00] sm:$0xff] }
 0x731   :  { %14695 = vmatprep.subr.bf16.mxu0 %v16847_v1  ;;  %v8123_v50 = vld [vmem:[#allocation8 + $0xd20] sm:$0xff] }
 0x733   :  { %14573 = vmatpush2.bf16.msra.mxu1 %v16972_v36 }
 0x734   :  { %14696 = vmatpush2.bf16.msra.mxu0 %v16846_v44  ;;  %14574 = vmatprep.subr.bf16.mxu1 %v16965_v37  ;;  %v17070_v44 = vcombine.low %v8000_v35, %v8004_v31  ;;  %v17189_v37 = vcombine.high %v8119_v40, %v8123_v50 }
 0x735   :  { %14697 = vmatprep.subr.bf16.mxu0 %v16839_v2  ;;  %v17063_v2 = vcombine.high %v7992_v34, %v7996_v22 }
 0x737   :  { %14575 = vmatpush2.bf16.msra.mxu1 %v16964_v32  ;;  %v17188_v32 = vcombine.low %v8119_v40, %v8123_v50  ;;  %v7960_v40 = vld [vmem:[#allocation8 + $0x808] sm:$0xff] }
 0x738   :  { %14698 = vmatpush2.bf16.msra.mxu0 %v16838_v20  ;;  %14626 = vmatprep.subr.bf16.mxu1 %v17213_v55  ;;  %v17062_v20 = vcombine.low %v7992_v34, %v7996_v22  ;;  %v17181_v55 = vcombine.high %v8111_v11, %v8115_v59  ;;  %v7964_v50 = vld [vmem:[#allocation8 + $0x828] sm:$0xff] }
 0x739   :  { %14749 = vmatprep.subr.bf16.mxu0 %v17087_v39  ;;  %v17055_v39 = vcombine.high %v7984_v38, %v7988_v26 }
 0x73a   :  { %v11772_v63 = vpop.f32.mrf.mxu1  ;;  %14577 = vmatmul.mubr.bf16.vlgmr.msra.gmra.mxu1 %v17712_v17 }
 0x73b   :  { %v18001_v28 = vadd.f32 %v11772_v63, %v17994_v46  ;;  %v18003_v7 = vpop.f32.mrf.mxu0  ;;  %14700 = vmatmul.mubr.bf16.vlgmr.msra.gmra.mxu0 %v17708_v13  ;;  %14627 = vmatpush1.bf16.msra.mxu1 %v17212_v60  ;;  %v17071_v46 = vcombine.high %v8000_v35, %v8004_v31  ;;  %v7976_v60 = vld [vmem:[#allocation8 + $0x888] sm:$0xff]  ;;  %v8099_v63 = vld [vmem:[#allocation8 + $0xc60] sm:$0xff]  ;;  %v17172_v31 = vcombine.low %v8103_v62, %v8107_v16 }
 0x73c   :  { %14658 = vmatprep.mubr.bf16.mxu1 %v17761_v41  ;;  %14750 = vmatpush1.bf16.msra.mxu0 %v17086_v54  ;;  %v11774_v25 = vpop.f32.mrf.mxu1  ;;  %v17054_v54 = vcombine.low %v7984_v38, %v7988_v26  ;;  %v17047_v4 = vcombine.high %v7976_v60, %v7980_v24  ;;  %v7972_v35 = vld [vmem:[#allocation8 + $0x868] sm:$0xff]  ;;  %v8199_v38 = vld [vmem:[#allocation8 + $0xf80] sm:$0xff] }
 0x73d   :  { %14781 = vmatprep.mubr.bf16.mxu0 %v17721_v45  ;;  %v18009_v3 = vadd.f32 %v11774_v25, %v17997_v23  ;;  %v18011_v9 = vpop.f32.mrf.mxu0  ;;  %14628 = vmatprep.subr.bf16.mxu1 %v17205_v52  ;;  %v17173_v52 = vcombine.high %v8103_v62, %v8107_v16  ;;  %v17165_v25 = vcombine.high %v8095_v12, %v8099_v63  ;;  %v8203_v26 = vld [vmem:[#allocation8 + $0xfa0] sm:$0xff] }
 0x73e   :  { %v11776_v1 = vpop.f32.mrf.mxu1  ;;  %14751 = vmatprep.subr.bf16.mxu0 %v17079_v49  ;;  %v7968_v49 = vld [vmem:[#allocation8 + $0x848] sm:$0xff]  ;;  %v17269_v62 = vcombine.high %v8199_v38, %v8203_v26 }
 0x73f   :  { %v11899_v58 = vpop.f32.mrf.mxu0  ;;  %14629 = vmatpush1.bf16.msra.mxu1 %v17204_v8  ;;  %v17046_v8 = vcombine.low %v7976_v60, %v7980_v24  ;;  %v17164_v1 = vcombine.low %v8095_v12, %v8099_v63  ;;  %v17038_v34 = vcombine.low %v7968_v49, %v7972_v35  ;;  %v8191_v60 = vld [vmem:[#allocation8 + $0xf40] sm:$0xff] }
 0x740   :  { %14752 = vmatpush1.bf16.msra.mxu0 %v17078_v18  ;;  %v11777_v36 = vpop.f32.mrf.mxu1  ;;  %14630 = vmatprep.subr.bf16.mxu1 %v17197_v56  ;;  %v17039_v18 = vcombine.high %v7968_v49, %v7972_v35  ;;  %v8087_v56 = vld [vmem:[#allocation8 + $0xc00] sm:$0xff]  ;;  %v17031_v58 = vcombine.high %v7960_v40, %v7964_v50 }
 0x741   :  { %v11900_v23 = vpop.f32.mrf.mxu0  ;;  %14753 = vmatprep.subr.bf16.mxu0 %v17071_v46  ;;  %v8091_v46 = vld [vmem:[#allocation8 + $0xc20] sm:$0xff] }
 0x742   :  { %v17157_v22 = vcombine.high %v8087_v56, %v8091_v46  ;;  %v8211_v36 = vld [vmem:[#allocation8 + $0xfe0] sm:$0xff]  ;;  %v17156_v23 = vcombine.low %v8087_v56, %v8091_v46 }
 0x743   :  { %14631 = vmatpush1.bf16.msra.mxu1 %v17196_v42  ;;  %v8207_v42 = vld [vmem:[#allocation8 + $0xfc0] sm:$0xff] }
 0x744   :  { %14754 = vmatpush1.bf16.msra.mxu0 %v17070_v44  ;;  %14632 = vmatprep.subr.bf16.mxu1 %v17189_v37  ;;  %v8080_v44 = vld [vmem:[#allocation8 + $0xbc8] sm:$0xff]  ;;  %v17277_v11 = vcombine.high %v8207_v42, %v8211_v36  ;;  %v8195_v24 = vld [vmem:[#allocation8 + $0xf60] sm:$0xff] }
 0x745   :  { %14755 = vmatprep.subr.bf16.mxu0 %v17063_v2  ;;  %v8084_v37 = vld [vmem:[#allocation8 + $0xbe8] sm:$0xff]  ;;  %v17030_v2 = vcombine.low %v7960_v40, %v7964_v50  ;;  %v17261_v12 = vcombine.high %v8191_v60, %v8195_v24  ;;  %v8183_v49 = vld [vmem:[#allocation8 + $0xf00] sm:$0xff] }
 0x746   :  { %v17151_v59 = vcombine.high %v8080_v44, %v8084_v37  ;;  %v8187_v35 = vld [vmem:[#allocation8 + $0xf20] sm:$0xff] }
 0x747   :  { %14633 = vmatpush1.bf16.msra.mxu1 %v17188_v32  ;;  %v8072_v32 = vld [vmem:[#allocation8 + $0xb88] sm:$0xff]  ;;  %v17253_v56 = vcombine.high %v8183_v49, %v8187_v35  ;;  %v8175_v40 = vld [vmem:[#allocation8 + $0xec0] sm:$0xff] }
 0x748   :  { %14756 = vmatpush1.bf16.msra.mxu0 %v17062_v20  ;;  %14634 = vmatprep.subr.bf16.mxu1 %v17181_v55  ;;  %v8076_v20 = vld [vmem:[#allocation8 + $0xba8] sm:$0xff]  ;;  %v17276_v55 = vcombine.low %v8207_v42, %v8211_v36  ;;  %v8179_v50 = vld [vmem:[#allocation8 + $0xee0] sm:$0xff] }
 0x749   :  { %14757 = vmatprep.subr.bf16.mxu0 %v17055_v39  ;;  %v17150_v39 = vcombine.low %v8080_v44, %v8084_v37  ;;  %v17143_v16 = vcombine.high %v8072_v32, %v8076_v20  ;;  %v17245_v42 = vcombine.high %v8175_v40, %v8179_v50  ;;  %v8167_v44 = vld [vmem:[#allocation8 + $0xe80] sm:$0xff] }
 0x74a   :  { %v8171_v37 = vld [vmem:[#allocation8 + $0xea0] sm:$0xff] }
 0x74b   :  { %14635 = vmatpush1.bf16.msra.mxu1 %v17180_v21  ;;  %v8064_v21 = vld [vmem:[#allocation8 + $0xb48] sm:$0xff] }
 0x74c   :  { %14758 = vmatpush1.bf16.msra.mxu0 %v17054_v54  ;;  %14636 = vmatprep.subr.bf16.mxu1 %v17173_v52  ;;  %v8068_v54 = vld [vmem:[#allocation8 + $0xb68] sm:$0xff]  ;;  %v17268_v52 = vcombine.low %v8199_v38, %v8203_v26  ;;  %v17237_v38 = vcombine.high %v8167_v44, %v8171_v37 }
 0x74d   :  { %14759 = vmatprep.subr.bf16.mxu0 %v17047_v4  ;;  %v17142_v4 = vcombine.low %v8072_v32, %v8076_v20  ;;  %v17135_v63 = vcombine.high %v8064_v21, %v8068_v54  ;;  %v8159_v32 = vld [vmem:[#allocation8 + $0xe40] sm:$0xff] }
 0x74e   :  { %v8163_v20 = vld [vmem:[#allocation8 + $0xe60] sm:$0xff] }
 0x74f   :  { %14637 = vmatpush1.bf16.msra.mxu1 %v17172_v31  ;;  %v8056_v31 = vld [vmem:[#allocation8 + $0xb08] sm:$0xff] }
 0x750   :  { %14760 = vmatpush1.bf16.msra.mxu0 %v17046_v8  ;;  %14638 = vmatprep.subr.bf16.mxu1 %v17165_v25  ;;  %v8060_v8 = vld [vmem:[#allocation8 + $0xb28] sm:$0xff]  ;;  %v17260_v25 = vcombine.low %v8191_v60, %v8195_v24  ;;  %v17229_v60 = vcombine.high %v8159_v32, %v8163_v20 }
 0x751   :  { %14761 = vmatprep.subr.bf16.mxu0 %v17039_v18  ;;  %v17134_v18 = vcombine.low %v8064_v21, %v8068_v54  ;;  %v17127_v46 = vcombine.high %v8056_v31, %v8060_v8  ;;  %v8151_v21 = vld [vmem:[#allocation8 + $0xe00] sm:$0xff] }
 0x752   :  { %v8155_v54 = vld [vmem:[#allocation8 + $0xe20] sm:$0xff] }
 0x753   :  { %14639 = vmatpush1.bf16.msra.mxu1 %v17164_v1  ;;  %v8048_v1 = vld [vmem:[#allocation8 + $0xac8] sm:$0xff] }
 0x754   :  { %14762 = vmatpush1.bf16.msra.mxu0 %v17038_v34  ;;  %14640 = vmatprep.subr.bf16.mxu1 %v17157_v22  ;;  %v8052_v34 = vld [vmem:[#allocation8 + $0xae8] sm:$0xff]  ;;  %v17252_v22 = vcombine.low %v8183_v49, %v8187_v35  ;;  %v17221_v49 = vcombine.high %v8151_v21, %v8155_v54 }
 0x755   :  { %14763 = vmatprep.subr.bf16.mxu0 %v17031_v58  ;;  %v17126_v58 = vcombine.low %v8056_v31, %v8060_v8  ;;  %v17119_v36 = vcombine.high %v8048_v1, %v8052_v34  ;;  %v7888_v31 = vld [vmem:[#allocation8 + $0x5c8] sm:$0xff] }
 0x756   :  { %v7892_v8 = vld [vmem:[#allocation8 + $0x5e8] sm:$0xff] }
 0x757   :  { %14641 = vmatpush1.bf16.msra.mxu1 %v17156_v23  ;;  %v8040_v23 = vld [vmem:[#allocation8 + $0xa88] sm:$0xff] }
 0x758   :  { %14764 = vmatpush1.bf16.msra.mxu0 %v17030_v2  ;;  %14642 = vmatprep.subr.bf16.mxu1 %v17277_v11  ;;  %v8044_v2 = vld [vmem:[#allocation8 + $0xaa8] sm:$0xff]  ;;  %v17244_v11 = vcombine.low %v8175_v40, %v8179_v50  ;;  %v16959_v40 = vcombine.high %v7888_v31, %v7892_v8 }
 0x759   :  { %14765 = vmatprep.subr.bf16.mxu0 %v17151_v59  ;;  %v17118_v59 = vcombine.low %v8048_v1, %v8052_v34  ;;  %v17111_v26 = vcombine.high %v8040_v23, %v8044_v2  ;;  %v7880_v1 = vld [vmem:[#allocation8 + $0x588] sm:$0xff] }
 0x75a   :  { %v7884_v34 = vld [vmem:[#allocation8 + $0x5a8] sm:$0xff] }
 0x75b   :  { %14643 = vmatpush2.bf16.msra.mxu1 %v17276_v55  ;;  %v8032_v55 = vld [vmem:[#allocation8 + $0xa48] sm:$0xff] }
 0x75c   :  { %14766 = vmatpush2.bf16.msra.mxu0 %v17150_v39  ;;  %14644 = vmatprep.subr.bf16.mxu1 %v17269_v62  ;;  %v8036_v39 = vld [vmem:[#allocation8 + $0xa68] sm:$0xff]  ;;  %v17236_v62 = vcombine.low %v8167_v44, %v8171_v37  ;;  %v16951_v44 = vcombine.high %v7880_v1, %v7884_v34 }
 0x75d   :  { %14767 = vmatprep.subr.bf16.mxu0 %v17143_v16  ;;  %v17110_v16 = vcombine.low %v8040_v23, %v8044_v2  ;;  %v17103_v24 = vcombine.high %v8032_v55, %v8036_v39  ;;  %v7872_v37 = vld [vmem:[#allocation8 + $0x548] sm:$0xff] }
 0x75e   :  { %v7876_v23 = vld [vmem:[#allocation8 + $0x568] sm:$0xff] }
 0x75f   :  { %14645 = vmatpush2.bf16.msra.mxu1 %v17268_v52  ;;  %v8024_v52 = vld [vmem:[#allocation8 + $0xa08] sm:$0xff] }
 0x760   :  { %14768 = vmatpush2.bf16.msra.mxu0 %v17142_v4  ;;  %14646 = vmatprep.subr.bf16.mxu1 %v17261_v12  ;;  %v8028_v4 = vld [vmem:[#allocation8 + $0xa28] sm:$0xff]  ;;  %v17228_v12 = vcombine.low %v8159_v32, %v8163_v20  ;;  %v16950_v20 = vcombine.low %v7880_v1, %v7884_v34 }
 0x761   :  { %14769 = vmatprep.subr.bf16.mxu0 %v17135_v63  ;;  %v17102_v63 = vcombine.low %v8032_v55, %v8036_v39  ;;  %v17095_v35 = vcombine.high %v8024_v52, %v8028_v4 }
 0x763   :  { %14647 = vmatpush2.bf16.msra.mxu1 %v17260_v25  ;;  %v7761_v25 = vld [vmem:[#allocation8 + $0x1d0] sm:$0xff] }
 0x764   :  { %14770 = vmatpush2.bf16.msra.mxu0 %v17134_v18  ;;  %14648 = vmatprep.subr.bf16.mxu1 %v17253_v56  ;;  %v7765_v18 = vld [vmem:[#allocation8 + $0x1f0] sm:$0xff]  ;;  %v17220_v56 = vcombine.low %v8151_v21, %v8155_v54  ;;  %v7864_v21 = vld [vmem:[#allocation8 + $0x508] sm:$0xff] }
 0x765   :  { %14771 = vmatprep.subr.bf16.mxu0 %v17127_v46  ;;  %v17094_v46 = vcombine.low %v8024_v52, %v8028_v4  ;;  %v16833_v50 = vcombine.high %v7761_v25, %v7765_v18  ;;  %v7868_v54 = vld [vmem:[#allocation8 + $0x528] sm:$0xff] }
 0x767   :  { %14649 = vmatpush2.bf16.msra.mxu1 %v17252_v22  ;;  %v16958_v22 = vcombine.low %v7888_v31, %v7892_v8 }
 0x768   :  { %14772 = vmatpush2.bf16.msra.mxu0 %v17126_v58  ;;  %14650 = vmatprep.subr.bf16.mxu1 %v17245_v42  ;;  %v7753_v58 = vld [vmem:[#allocation8 + $0x190] sm:$0xff] }
 0x769   :  { %14773 = vmatprep.subr.bf16.mxu0 %v17119_v36  ;;  %v7757_v42 = vld [vmem:[#allocation8 + $0x1b0] sm:$0xff]  ;;  %v16832_v36 = vcombine.low %v7761_v25, %v7765_v18  ;;  %v16935_v25 = vcombine.high %v7864_v21, %v7868_v54 }
 0x76b   :  { %14651 = vmatpush2.bf16.msra.mxu1 %v17244_v11  ;;  %v16825_v11 = vcombine.high %v7753_v58, %v7757_v42 }
 0x76c   :  { %14774 = vmatpush2.bf16.msra.mxu0 %v17118_v59  ;;  %14652 = vmatprep.subr.bf16.mxu1 %v17237_v38  ;;  %v7745_v59 = vld [vmem:[#allocation8 + $0x150] sm:$0xff] }
 0x76d   :  { %14775 = vmatprep.subr.bf16.mxu0 %v17111_v26  ;;  %v7749_v38 = vld [vmem:[#allocation8 + $0x170] sm:$0xff] }
 0x76e   :  { %v16816_v8 = vcombine.low %v7745_v59, %v7749_v38 }
 0x76f   :  { %14653 = vmatpush2.bf16.msra.mxu1 %v17236_v62  ;;  %v16824_v62 = vcombine.low %v7753_v58, %v7757_v42  ;;  %v7852_v58 = vld [vmem:[#allocation8 + $0x4a8] sm:$0xff]  ;;  %v7721_v42 = vld [vmem:[#allocation8 + $0x90] sm:$0xff] }
 0x770   :  { %14776 = vmatpush2.bf16.msra.mxu0 %v17110_v16  ;;  %14654 = vmatprep.subr.bf16.mxu1 %v17229_v60  ;;  %v16943_v16 = vcombine.high %v7872_v37, %v7876_v23 }
 0x771   :  { %14777 = vmatprep.subr.bf16.mxu0 %v17103_v24 }
 0x773   :  { %14655 = vmatpush2.bf16.msra.mxu1 %v17228_v12  ;;  %v7737_v12 = vld [vmem:[#allocation8 + $0x110] sm:$0xff] }
 0x774   :  { %14778 = vmatpush2.bf16.msra.mxu0 %v17102_v63  ;;  %14656 = vmatprep.subr.bf16.mxu1 %v17221_v49  ;;  %v7741_v63 = vld [vmem:[#allocation8 + $0x130] sm:$0xff] }
 0x775   :  { %14779 = vmatprep.subr.bf16.mxu0 %v17095_v35  ;;  %v16942_v35 = vcombine.low %v7872_v37, %v7876_v23  ;;  %v16809_v18 = vcombine.high %v7737_v12, %v7741_v63  ;;  %v16808_v1 = vcombine.low %v7737_v12, %v7741_v63  ;;  %v7952_v63 = vld [vmem:[#allocation8 + $0x7c8] sm:$0xff] }
 0x777   :  { %14657 = vmatpush2.bf16.msra.mxu1 %v17220_v56  ;;  %v7860_v56 = vld [vmem:[#allocation8 + $0x4e8] sm:$0xff] }
 0x778   :  { %14780 = vmatpush2.bf16.msra.mxu0 %v17094_v46  ;;  %14708 = vmatprep.subr.bf16.mxu1 %v16959_v40  ;;  %v7729_v46 = vld [vmem:[#allocation8 + $0xd0] sm:$0xff] }
 0x779   :  { %14831 = vmatprep.subr.bf16.mxu0 %v16833_v50  ;;  %v7733_v40 = vld [vmem:[#allocation8 + $0xf0] sm:$0xff]  ;;  %v16934_v50 = vcombine.low %v7864_v21, %v7868_v54 }
 0x77a   :  { %v11854_v2 = vpop.f32.mrf.mxu1  ;;  %14659 = vmatmul.mubr.bf16.vlgmr.msra.gmra.mxu1 %v17763_v0  ;;  %v16800_v37 = vcombine.low %v7729_v46, %v7733_v40 }
 0x77b   :  { %v11855_v26 = vadd.f32 %v11854_v2, %v17985_v29  ;;  %v14537_v32 = vpop.f32.mrf.mxu0  ;;  %14782 = vmatmul.mubr.bf16.vlgmr.msra.gmra.mxu0 %v17735_v6  ;;  %14709 = vmatpush1.bf16.msra.mxu1 %v16958_v22  ;;  %v16817_v29 = vcombine.high %v7745_v59, %v7749_v38  ;;  %v7848_v22 = vld [vmem:[#allocation8 + $0x488] sm:$0xff]  ;;  %v7713_v38 = vld [vmem:[#allocation8 + $0x50] sm:$0xff] }
 0x77c   :  { %v18017_v55 = vadd.f32 %v14537_v32, %v17944_v53  ;;  %14740 = vmatprep.mubr.bf16.mxu1 %v17689_v47  ;;  %14832 = vmatpush1.bf16.msra.mxu0 %v16832_v36  ;;  %v11856_v39 = vpop.f32.mrf.mxu1  ;;  %v7725_v36 = vld [vmem:[#allocation8 + $0xb0] sm:$0xff]  ;;  %v16919_v23 = vcombine.high %v7848_v22, %v7852_v58  ;;  %v7844_v59 = vld [vmem:[#allocation8 + $0x468] sm:$0xff]  ;;  %v16918_v32 = vcombine.low %v7848_v22, %v7852_v58 }
 0x77d   :  { %14863 = vmatprep.mubr.bf16.mxu0 %v17686_v33  ;;  %v11857_v60 = vadd.f32 %v11856_v39, %v17991_v57  ;;  %v14539_v24 = vpop.f32.mrf.mxu0  ;;  %14710 = vmatprep.subr.bf16.mxu1 %v16951_v44  ;;  %v18023_v52 = vadd.f32 %v18003_v7, %v11855_v26  ;;  %v16793_v2 = vcombine.high %v7721_v42, %v7725_v36  ;;  %v7717_v26 = vld [vmem:[#allocation8 + $0x70] sm:$0xff]  ;;  %v7936_v22 = vld [vmem:[#allocation8 + $0x748] sm:$0xff] }
 0x77e   :  { %v18026_v53 = vadd.f32 %v14539_v24, %v17951_v19  ;;  %v11858_v4 = vpop.f32.mrf.mxu1  ;;  %14833 = vmatprep.subr.bf16.mxu0 %v16825_v11  ;;  %v7856_v19 = vld [vmem:[#allocation8 + $0x4c8] sm:$0xff]  ;;  %v7705_v24 = vld [vmem:[#allocation8 + $0x10] sm:$0xff]  ;;  %v16784_v54 = vcombine.low %v7713_v38, %v7717_v26 }
 0x77f   :  { %v14541_v49 = vpop.f32.mrf.mxu0  ;;  %14711 = vmatpush1.bf16.msra.mxu1 %v16950_v20  ;;  %v18029_v57 = vadd.f32 %v18011_v9, %v11857_v60  ;;  %v16927_v34 = vcombine.high %v7856_v19, %v7860_v56  ;;  %v16801_v9 = vcombine.high %v7729_v46, %v7733_v40  ;;  %v16926_v44 = vcombine.low %v7856_v19, %v7860_v56  ;;  %v7840_v11 = vld [vmem:[#allocation8 + $0x448] sm:$0xff]  ;;  %v7817_v46 = vld [vmem:[#allocation8 + $0x390] sm:$0xff] }
 0x780   :  { %14834 = vmatpush1.bf16.msra.mxu0 %v16824_v62  ;;  %v11859_v31 = vpop.f32.mrf.mxu1  ;;  %14712 = vmatprep.subr.bf16.mxu1 %v16943_v16  ;;  %v16792_v20 = vcombine.low %v7721_v42, %v7725_v36  ;;  %v16911_v39 = vcombine.high %v7840_v11, %v7844_v59  ;;  %v16785_v62 = vcombine.high %v7713_v38, %v7717_v26  ;;  %v7832_v16 = vld [vmem:[#allocation8 + $0x408] sm:$0xff]  ;;  %v7821_v40 = vld [vmem:[#allocation8 + $0x3b0] sm:$0xff] }
 0x781   :  { %v14542_v7 = vpop.f32.mrf.mxu0  ;;  %14835 = vmatprep.subr.bf16.mxu0 %v16817_v29  ;;  %v7836_v60 = vld [vmem:[#allocation8 + $0x428] sm:$0xff]  ;;  %v7709_v29 = vld [vmem:[#allocation8 + $0x30] sm:$0xff]  ;;  %v16910_v21 = vcombine.low %v7840_v11, %v7844_v59 }
 0x782   :  { %v16903_v4 = vcombine.high %v7832_v16, %v7836_v60  ;;  %v16777_v12 = vcombine.high %v7705_v24, %v7709_v29  ;;  %v7956_v49 = vld [vmem:[#allocation8 + $0x7e8] sm:$0xff]  ;;  %v7829_v31 = vld [vmem:[#allocation8 + $0x3f0] sm:$0xff] }
 0x783   :  { %14713 = vmatpush1.bf16.msra.mxu1 %v16942_v35  ;;  %v7825_v35 = vld [vmem:[#allocation8 + $0x3d0] sm:$0xff]  ;;  %v17023_v7 = vcombine.high %v7952_v63, %v7956_v49  ;;  %v7944_v19 = vld [vmem:[#allocation8 + $0x788] sm:$0xff] }
 0x784   :  { %14836 = vmatpush1.bf16.msra.mxu0 %v16816_v8  ;;  %14714 = vmatprep.subr.bf16.mxu1 %v16935_v25  ;;  %v16902_v8 = vcombine.low %v7832_v16, %v7836_v60  ;;  %v16776_v25 = vcombine.low %v7705_v24, %v7709_v29  ;;  %v7948_v56 = vld [vmem:[#allocation8 + $0x7a8] sm:$0xff]  ;;  %v7809_v42 = vld [vmem:[#allocation8 + $0x350] sm:$0xff] }
 0x785   :  { %14837 = vmatprep.subr.bf16.mxu0 %v16809_v18  ;;  %v16897_v18 = vcombine.high %v7825_v35, %v7829_v31  ;;  %v7940_v58 = vld [vmem:[#allocation8 + $0x768] sm:$0xff]  ;;  %v7813_v36 = vld [vmem:[#allocation8 + $0x370] sm:$0xff] }
 0x786   :  { %v7928_v11 = vld [vmem:[#allocation8 + $0x708] sm:$0xff]  ;;  %v7801_v38 = vld [vmem:[#allocation8 + $0x310] sm:$0xff] }
 0x787   :  { %14715 = vmatpush1.bf16.msra.mxu1 %v16934_v50  ;;  %v17022_v50 = vcombine.low %v7952_v63, %v7956_v49  ;;  %v7932_v59 = vld [vmem:[#allocation8 + $0x728] sm:$0xff]  ;;  %v7805_v26 = vld [vmem:[#allocation8 + $0x330] sm:$0xff] }
 0x788   :  { %14838 = vmatpush1.bf16.msra.mxu0 %v16808_v1  ;;  %14716 = vmatprep.subr.bf16.mxu1 %v16927_v34  ;;  %v16896_v1 = vcombine.low %v7825_v35, %v7829_v31  ;;  %v17015_v34 = vcombine.high %v7944_v19, %v7948_v56  ;;  %v7920_v16 = vld [vmem:[#allocation8 + $0x6c8] sm:$0xff]  ;;  %v7793_v24 = vld [vmem:[#allocation8 + $0x2d0] sm:$0xff] }
 0x789   :  { %14839 = vmatprep.subr.bf16.mxu0 %v16801_v9  ;;  %v16889_v9 = vcombine.high %v7817_v46, %v7821_v40  ;;  %v7924_v60 = vld [vmem:[#allocation8 + $0x6e8] sm:$0xff]  ;;  %v7797_v29 = vld [vmem:[#allocation8 + $0x2f0] sm:$0xff] }
 0x78a   :  { %v7912_v63 = vld [vmem:[#allocation8 + $0x688] sm:$0xff]  ;;  %v7785_v35 = vld [vmem:[#allocation8 + $0x290] sm:$0xff] }
 0x78b   :  { %14717 = vmatpush1.bf16.msra.mxu1 %v16926_v44  ;;  %v17014_v44 = vcombine.low %v7944_v19, %v7948_v56  ;;  %v7916_v49 = vld [vmem:[#allocation8 + $0x6a8] sm:$0xff]  ;;  %v7789_v31 = vld [vmem:[#allocation8 + $0x2b0] sm:$0xff] }
 0x78c   :  { %14840 = vmatpush1.bf16.msra.mxu0 %v16800_v37  ;;  %14718 = vmatprep.subr.bf16.mxu1 %v16919_v23  ;;  %v16888_v37 = vcombine.low %v7817_v46, %v7821_v40  ;;  %v17007_v23 = vcombine.high %v7936_v22, %v7940_v58  ;;  %v7904_v19 = vld [vmem:[#allocation8 + $0x648] sm:$0xff]  ;;  %v7777_v46 = vld [vmem:[#allocation8 + $0x250] sm:$0xff] }
 0x78d   :  { %14841 = vmatprep.subr.bf16.mxu0 %v16793_v2  ;;  %v16881_v2 = vcombine.high %v7809_v42, %v7813_v36  ;;  %v7908_v56 = vld [vmem:[#allocation8 + $0x668] sm:$0xff]  ;;  %v7781_v40 = vld [vmem:[#allocation8 + $0x270] sm:$0xff] }
 0x78f   :  { %14719 = vmatpush1.bf16.msra.mxu1 %v16918_v32  ;;  %v17006_v32 = vcombine.low %v7936_v22, %v7940_v58  ;;  %v7896_v22 = vld [vmem:[#allocation8 + $0x608] sm:$0xff] }
 0x790   :  { %14842 = vmatpush1.bf16.msra.mxu0 %v16792_v20  ;;  %14720 = vmatprep.subr.bf16.mxu1 %v16911_v39  ;;  %v16880_v20 = vcombine.low %v7809_v42, %v7813_v36  ;;  %v16999_v39 = vcombine.high %v7928_v11, %v7932_v59  ;;  %v7900_v58 = vld [vmem:[#allocation8 + $0x628] sm:$0xff]  ;;  %v7769_v42 = vld [vmem:[#allocation8 + $0x210] sm:$0xff] }
 0x791   :  { %14843 = vmatprep.subr.bf16.mxu0 %v16785_v62  ;;  %v16873_v62 = vcombine.high %v7801_v38, %v7805_v26  ;;  %v7773_v36 = vld [vmem:[#allocation8 + $0x230] sm:$0xff] }
 0x793   :  { %14721 = vmatpush1.bf16.msra.mxu1 %v16910_v21  ;;  %v16998_v21 = vcombine.low %v7928_v11, %v7932_v59  ;;  %v8144_v11 = vld [vmem:[#allocation8 + $0xdc8] sm:$0xff] }
 0x794   :  { %14844 = vmatpush1.bf16.msra.mxu0 %v16784_v54  ;;  %14722 = vmatprep.subr.bf16.mxu1 %v16903_v4  ;;  %v16872_v54 = vcombine.low %v7801_v38, %v7805_v26  ;;  %v16991_v4 = vcombine.high %v7920_v16, %v7924_v60  ;;  %v8148_v59 = vld [vmem:[#allocation8 + $0xde8] sm:$0xff]  ;;  %v8017_v38 = vld [vmem:[#allocation8 + $0x9d0] sm:$0xff] }
 0x795   :  { %14845 = vmatprep.subr.bf16.mxu0 %v16777_v12  ;;  %v16865_v12 = vcombine.high %v7793_v24, %v7797_v29  ;;  %v8021_v26 = vld [vmem:[#allocation8 + $0x9f0] sm:$0xff] }
 0x797   :  { %14723 = vmatpush1.bf16.msra.mxu1 %v16902_v8  ;;  %v16990_v8 = vcombine.low %v7920_v16, %v7924_v60  ;;  %v8136_v16 = vld [vmem:[#allocation8 + $0xd88] sm:$0xff] }
 0x798   :  { %14846 = vmatpush1.bf16.msra.mxu0 %v16776_v25  ;;  %14724 = vmatprep.subr.bf16.mxu1 %v17023_v7  ;;  %v16864_v25 = vcombine.low %v7793_v24, %v7797_v29  ;;  %v16983_v7 = vcombine.high %v7912_v63, %v7916_v49  ;;  %v8140_v60 = vld [vmem:[#allocation8 + $0xda8] sm:$0xff]  ;;  %v17214_v24 = vcombine.low %v8144_v11, %v8148_v59  ;;  %v8009_v29 = vld [vmem:[#allocation8 + $0x990] sm:$0xff] }
 0x799   :  { %14847 = vmatprep.subr.bf16.mxu0 %v16897_v18  ;;  %v16857_v18 = vcombine.high %v7785_v35, %v7789_v31 }
 0x79b   :  { %14725 = vmatpush2.bf16.msra.mxu1 %v17022_v50  ;;  %v16982_v50 = vcombine.low %v7912_v63, %v7916_v49  ;;  %v8132_v63 = vld [vmem:[#allocation8 + $0xd68] sm:$0xff] }
 0x79c   :  { %14848 = vmatpush2.bf16.msra.mxu0 %v16896_v1  ;;  %14726 = vmatprep.subr.bf16.mxu1 %v17015_v34  ;;  %v16856_v1 = vcombine.low %v7785_v35, %v7789_v31  ;;  %v16975_v34 = vcombine.high %v7904_v19, %v7908_v56  ;;  %v8001_v31 = vld [vmem:[#allocation8 + $0x950] sm:$0xff] }
 0x79d   :  { %14849 = vmatprep.subr.bf16.mxu0 %v16889_v9  ;;  %v16849_v9 = vcombine.high %v7777_v46, %v7781_v40 }
 0x79f   :  { %14727 = vmatpush2.bf16.msra.mxu1 %v17014_v44  ;;  %v16974_v44 = vcombine.low %v7904_v19, %v7908_v56 }
 0x7a0   :  { %14850 = vmatpush2.bf16.msra.mxu0 %v16888_v37  ;;  %14728 = vmatprep.subr.bf16.mxu1 %v17007_v23  ;;  %v16848_v37 = vcombine.low %v7777_v46, %v7781_v40  ;;  %v16967_v23 = vcombine.high %v7896_v22, %v7900_v58 }
 0x7a1   :  { %14851 = vmatprep.subr.bf16.mxu0 %v16881_v2  ;;  %v16841_v2 = vcombine.high %v7769_v42, %v7773_v36 }
 0x7a3   :  { %14729 = vmatpush2.bf16.msra.mxu1 %v17006_v32  ;;  %v16966_v32 = vcombine.low %v7896_v22, %v7900_v58  ;;  %v7993_v22 = vld [vmem:[#allocation8 + $0x910] sm:$0xff] }
 0x7a4   :  { %14852 = vmatpush2.bf16.msra.mxu0 %v16880_v20  ;;  %14730 = vmatprep.subr.bf16.mxu1 %v16999_v39  ;;  %v16840_v20 = vcombine.low %v7769_v42, %v7773_v36  ;;  %v17215_v39 = vcombine.high %v8144_v11, %v8148_v59  ;;  %v7997_v58 = vld [vmem:[#allocation8 + $0x930] sm:$0xff]  ;;  %v8112_v11 = vld [vmem:[#allocation8 + $0xcc8] sm:$0xff] }
 0x7a5   :  { %14853 = vmatprep.subr.bf16.mxu0 %v16873_v62  ;;  %v17089_v62 = vcombine.high %v8017_v38, %v8021_v26  ;;  %v8116_v59 = vld [vmem:[#allocation8 + $0xce8] sm:$0xff] }
 0x7a7   :  { %14731 = vmatpush2.bf16.msra.mxu1 %v16998_v21  ;;  %v8013_v21 = vld [vmem:[#allocation8 + $0x9b0] sm:$0xff] }
 0x7a8   :  { %14854 = vmatpush2.bf16.msra.mxu0 %v16872_v54  ;;  %14732 = vmatprep.subr.bf16.mxu1 %v16991_v4  ;;  %v17088_v54 = vcombine.low %v8017_v38, %v8021_v26  ;;  %v17207_v4 = vcombine.high %v8136_v16, %v8140_v60  ;;  %v17081_v35 = vcombine.high %v8009_v29, %v8013_v21  ;;  %v7985_v38 = vld [vmem:[#allocation8 + $0x8d0] sm:$0xff] }
 0x7a9   :  { %14855 = vmatprep.subr.bf16.mxu0 %v16865_v12  ;;  %v8128_v12 = vld [vmem:[#allocation8 + $0xd48] sm:$0xff]  ;;  %v17080_v56 = vcombine.low %v8009_v29, %v8013_v21  ;;  %v7989_v26 = vld [vmem:[#allocation8 + $0x8f0] sm:$0xff]  ;;  %v17182_v21 = vcombine.low %v8112_v11, %v8116_v59 }
 0x7aa   :  { %v17199_v46 = vcombine.high %v8128_v12, %v8132_v63  ;;  %v17198_v36 = vcombine.low %v8128_v12, %v8132_v63  ;;  %v7981_v29 = vld [vmem:[#allocation8 + $0x8b0] sm:$0xff]  ;;  %v8096_v63 = vld [vmem:[#allocation8 + $0xc48] sm:$0xff] }
 0x7ab   :  { %14733 = vmatpush2.bf16.msra.mxu1 %v16990_v8  ;;  %v8005_v8 = vld [vmem:[#allocation8 + $0x970] sm:$0xff] }
 0x7ac   :  { %14856 = vmatpush2.bf16.msra.mxu0 %v16864_v25  ;;  %14734 = vmatprep.subr.bf16.mxu1 %v16983_v7 }
 0x7ad   :  { %14857 = vmatprep.subr.bf16.mxu0 %v16857_v18  ;;  %v17206_v18 = vcombine.low %v8136_v16, %v8140_v60  ;;  %v8104_v16 = vld [vmem:[#allocation8 + $0xc88] sm:$0xff] }
 0x7ae   :  { %v8108_v60 = vld [vmem:[#allocation8 + $0xca8] sm:$0xff] }
 0x7af   :  { %14735 = vmatpush2.bf16.msra.mxu1 %v16982_v50 }
 0x7b0   :  { %14858 = vmatpush2.bf16.msra.mxu0 %v16856_v1  ;;  %14736 = vmatprep.subr.bf16.mxu1 %v16975_v34  ;;  %v8120_v1 = vld [vmem:[#allocation8 + $0xd08] sm:$0xff] }
 0x7b1   :  { %14859 = vmatprep.subr.bf16.mxu0 %v16849_v9  ;;  %v8124_v34 = vld [vmem:[#allocation8 + $0xd28] sm:$0xff] }
 0x7b3   :  { %14737 = vmatpush2.bf16.msra.mxu1 %v16974_v44 }
 0x7b4   :  { %14860 = vmatpush2.bf16.msra.mxu0 %v16848_v37  ;;  %14738 = vmatprep.subr.bf16.mxu1 %v16967_v23  ;;  %v17072_v37 = vcombine.low %v8001_v31, %v8005_v8  ;;  %v17191_v23 = vcombine.high %v8120_v1, %v8124_v34 }
 0x7b5   :  { %14861 = vmatprep.subr.bf16.mxu0 %v16841_v2  ;;  %v17065_v2 = vcombine.high %v7993_v22, %v7997_v58 }
 0x7b7   :  { %14739 = vmatpush2.bf16.msra.mxu1 %v16966_v32  ;;  %v17190_v32 = vcombine.low %v8120_v1, %v8124_v34  ;;  %v7961_v1 = vld [vmem:[#allocation8 + $0x810] sm:$0xff] }
 0x7b8   :  { %14862 = vmatpush2.bf16.msra.mxu0 %v16840_v20  ;;  %14790 = vmatprep.subr.bf16.mxu1 %v17215_v39  ;;  %v17064_v20 = vcombine.low %v7993_v22, %v7997_v58  ;;  %v17183_v39 = vcombine.high %v8112_v11, %v8116_v59  ;;  %v7965_v34 = vld [vmem:[#allocation8 + $0x830] sm:$0xff] }
 0x7b9   :  { %14913 = vmatprep.subr.bf16.mxu0 %v17089_v62  ;;  %v17057_v62 = vcombine.high %v7985_v38, %v7989_v26 }
 0x7ba   :  { %v11936_v49 = vpop.f32.mrf.mxu1  ;;  %14741 = vmatmul.mubr.bf16.vlgmr.msra.gmra.mxu1 %v17712_v17 }
 0x7bb   :  { %v18033_v25 = vadd.f32 %v11936_v49, %v18023_v52  ;;  %v18035_v7 = vpop.f32.mrf.mxu0  ;;  %14864 = vmatmul.mubr.bf16.vlgmr.msra.gmra.mxu0 %v17708_v13  ;;  %14791 = vmatpush1.bf16.msra.mxu1 %v17214_v24  ;;  %v17073_v52 = vcombine.high %v8001_v31, %v8005_v8  ;;  %v7977_v24 = vld [vmem:[#allocation8 + $0x890] sm:$0xff]  ;;  %v8100_v49 = vld [vmem:[#allocation8 + $0xc68] sm:$0xff]  ;;  %v17174_v8 = vcombine.low %v8104_v16, %v8108_v60 }
 0x7bc   :  { %14822 = vmatprep.mubr.bf16.mxu1 %v17761_v41  ;;  %14914 = vmatpush1.bf16.msra.mxu0 %v17088_v54  ;;  %v11938_v19 = vpop.f32.mrf.mxu1  ;;  %v17056_v54 = vcombine.low %v7985_v38, %v7989_v26  ;;  %v17049_v12 = vcombine.high %v7977_v24, %v7981_v29  ;;  %v7973_v31 = vld [vmem:[#allocation8 + $0x870] sm:$0xff]  ;;  %v8200_v38 = vld [vmem:[#allocation8 + $0xf88] sm:$0xff] }
 0x7bd   :  { %14945 = vmatprep.mubr.bf16.mxu0 %v17721_v45  ;;  %v18041_v40 = vadd.f32 %v11938_v19, %v18029_v57  ;;  %v18043_v50 = vpop.f32.mrf.mxu0  ;;  %14792 = vmatprep.subr.bf16.mxu1 %v17207_v4  ;;  %v17175_v4 = vcombine.high %v8104_v16, %v8108_v60  ;;  %v17167_v19 = vcombine.high %v8096_v63, %v8100_v49  ;;  %v8204_v26 = vld [vmem:[#allocation8 + $0xfa8] sm:$0xff] }
 0x7be   :  { %v11940_v9 = vpop.f32.mrf.mxu1  ;;  %14915 = vmatprep.subr.bf16.mxu0 %v17081_v35  ;;  %v7969_v35 = vld [vmem:[#allocation8 + $0x850] sm:$0xff]  ;;  %v17271_v16 = vcombine.high %v8200_v38, %v8204_v26 }
 0x7bf   :  { %v14623_v42 = vpop.f32.mrf.mxu0  ;;  %14793 = vmatpush1.bf16.msra.mxu1 %v17206_v18  ;;  %v17048_v18 = vcombine.low %v7977_v24, %v7981_v29  ;;  %v17166_v9 = vcombine.low %v8096_v63, %v8100_v49  ;;  %v17040_v22 = vcombine.low %v7969_v35, %v7973_v31  ;;  %v8192_v24 = vld [vmem:[#allocation8 + $0xf48] sm:$0xff] }
 0x7c0   :  { %14916 = vmatpush1.bf16.msra.mxu0 %v17080_v56  ;;  %v11941_v44 = vpop.f32.mrf.mxu1  ;;  %14794 = vmatprep.subr.bf16.mxu1 %v17199_v46  ;;  %v17041_v56 = vcombine.high %v7969_v35, %v7973_v31  ;;  %v8088_v46 = vld [vmem:[#allocation8 + $0xc08] sm:$0xff]  ;;  %v17033_v42 = vcombine.high %v7961_v1, %v7965_v34 }
 0x7c1   :  { %v14624_v57 = vpop.f32.mrf.mxu0  ;;  %14917 = vmatprep.subr.bf16.mxu0 %v17073_v52  ;;  %v8092_v52 = vld [vmem:[#allocation8 + $0xc28] sm:$0xff] }
 0x7c2   :  { %v17159_v58 = vcombine.high %v8088_v46, %v8092_v52  ;;  %v8212_v44 = vld [vmem:[#allocation8 + $0xfe8] sm:$0xff]  ;;  %v17158_v57 = vcombine.low %v8088_v46, %v8092_v52 }
 0x7c3   :  { %14795 = vmatpush1.bf16.msra.mxu1 %v17198_v36  ;;  %v8208_v36 = vld [vmem:[#allocation8 + $0xfc8] sm:$0xff] }
 0x7c4   :  { %14918 = vmatpush1.bf16.msra.mxu0 %v17072_v37  ;;  %14796 = vmatprep.subr.bf16.mxu1 %v17191_v23  ;;  %v8081_v37 = vld [vmem:[#allocation8 + $0xbd0] sm:$0xff]  ;;  %v17279_v11 = vcombine.high %v8208_v36, %v8212_v44  ;;  %v8196_v29 = vld [vmem:[#allocation8 + $0xf68] sm:$0xff] }
 0x7c5   :  { %14919 = vmatprep.subr.bf16.mxu0 %v17065_v2  ;;  %v8085_v23 = vld [vmem:[#allocation8 + $0xbf0] sm:$0xff]  ;;  %v17032_v2 = vcombine.low %v7961_v1, %v7965_v34  ;;  %v17263_v63 = vcombine.high %v8192_v24, %v8196_v29  ;;  %v8184_v35 = vld [vmem:[#allocation8 + $0xf08] sm:$0xff] }
 0x7c6   :  { %v17153_v59 = vcombine.high %v8081_v37, %v8085_v23  ;;  %v8188_v31 = vld [vmem:[#allocation8 + $0xf28] sm:$0xff] }
 0x7c7   :  { %14797 = vmatpush1.bf16.msra.mxu1 %v17190_v32  ;;  %v8073_v32 = vld [vmem:[#allocation8 + $0xb90] sm:$0xff]  ;;  %v17255_v46 = vcombine.high %v8184_v35, %v8188_v31  ;;  %v8176_v1 = vld [vmem:[#allocation8 + $0xec8] sm:$0xff] }
 0x7c8   :  { %14920 = vmatpush1.bf16.msra.mxu0 %v17064_v20  ;;  %14798 = vmatprep.subr.bf16.mxu1 %v17183_v39  ;;  %v8077_v20 = vld [vmem:[#allocation8 + $0xbb0] sm:$0xff]  ;;  %v17278_v39 = vcombine.low %v8208_v36, %v8212_v44  ;;  %v8180_v34 = vld [vmem:[#allocation8 + $0xee8] sm:$0xff] }
 0x7c9   :  { %14921 = vmatprep.subr.bf16.mxu0 %v17057_v62  ;;  %v17152_v62 = vcombine.low %v8081_v37, %v8085_v23  ;;  %v17145_v60 = vcombine.high %v8073_v32, %v8077_v20  ;;  %v17247_v36 = vcombine.high %v8176_v1, %v8180_v34  ;;  %v8168_v37 = vld [vmem:[#allocation8 + $0xe88] sm:$0xff] }
 0x7ca   :  { %v8172_v23 = vld [vmem:[#allocation8 + $0xea8] sm:$0xff] }
 0x7cb   :  { %14799 = vmatpush1.bf16.msra.mxu1 %v17182_v21  ;;  %v8065_v21 = vld [vmem:[#allocation8 + $0xb50] sm:$0xff] }
 0x7cc   :  { %14922 = vmatpush1.bf16.msra.mxu0 %v17056_v54  ;;  %14800 = vmatprep.subr.bf16.mxu1 %v17175_v4  ;;  %v8069_v54 = vld [vmem:[#allocation8 + $0xb70] sm:$0xff]  ;;  %v17270_v4 = vcombine.low %v8200_v38, %v8204_v26  ;;  %v17239_v38 = vcombine.high %v8168_v37, %v8172_v23 }
 0x7cd   :  { %14923 = vmatprep.subr.bf16.mxu0 %v17049_v12  ;;  %v17144_v12 = vcombine.low %v8073_v32, %v8077_v20  ;;  %v17137_v49 = vcombine.high %v8065_v21, %v8069_v54  ;;  %v8160_v32 = vld [vmem:[#allocation8 + $0xe48] sm:$0xff] }
 0x7ce   :  { %v8164_v20 = vld [vmem:[#allocation8 + $0xe68] sm:$0xff] }
 0x7cf   :  { %14801 = vmatpush1.bf16.msra.mxu1 %v17174_v8  ;;  %v8057_v8 = vld [vmem:[#allocation8 + $0xb10] sm:$0xff] }
 0x7d0   :  { %14924 = vmatpush1.bf16.msra.mxu0 %v17048_v18  ;;  %14802 = vmatprep.subr.bf16.mxu1 %v17167_v19  ;;  %v8061_v18 = vld [vmem:[#allocation8 + $0xb30] sm:$0xff]  ;;  %v17262_v19 = vcombine.low %v8192_v24, %v8196_v29  ;;  %v17231_v24 = vcombine.high %v8160_v32, %v8164_v20 }
 0x7d1   :  { %14925 = vmatprep.subr.bf16.mxu0 %v17041_v56  ;;  %v17136_v56 = vcombine.low %v8065_v21, %v8069_v54  ;;  %v17129_v52 = vcombine.high %v8057_v8, %v8061_v18  ;;  %v8152_v21 = vld [vmem:[#allocation8 + $0xe08] sm:$0xff] }
 0x7d2   :  { %v8156_v54 = vld [vmem:[#allocation8 + $0xe28] sm:$0xff] }
 0x7d3   :  { %14803 = vmatpush1.bf16.msra.mxu1 %v17166_v9  ;;  %v8049_v9 = vld [vmem:[#allocation8 + $0xad0] sm:$0xff] }
 0x7d4   :  { %14926 = vmatpush1.bf16.msra.mxu0 %v17040_v22  ;;  %14804 = vmatprep.subr.bf16.mxu1 %v17159_v58  ;;  %v8053_v22 = vld [vmem:[#allocation8 + $0xaf0] sm:$0xff]  ;;  %v17254_v58 = vcombine.low %v8184_v35, %v8188_v31  ;;  %v17223_v35 = vcombine.high %v8152_v21, %v8156_v54 }
 0x7d5   :  { %14927 = vmatprep.subr.bf16.mxu0 %v17033_v42  ;;  %v17128_v42 = vcombine.low %v8057_v8, %v8061_v18  ;;  %v17121_v44 = vcombine.high %v8049_v9, %v8053_v22  ;;  %v7889_v8 = vld [vmem:[#allocation8 + $0x5d0] sm:$0xff] }
 0x7d6   :  { %v7893_v18 = vld [vmem:[#allocation8 + $0x5f0] sm:$0xff] }
 0x7d7   :  { %14805 = vmatpush1.bf16.msra.mxu1 %v17158_v57  ;;  %v8041_v57 = vld [vmem:[#allocation8 + $0xa90] sm:$0xff] }
 0x7d8   :  { %14928 = vmatpush1.bf16.msra.mxu0 %v17032_v2  ;;  %14806 = vmatprep.subr.bf16.mxu1 %v17279_v11  ;;  %v8045_v2 = vld [vmem:[#allocation8 + $0xab0] sm:$0xff]  ;;  %v17246_v11 = vcombine.low %v8176_v1, %v8180_v34  ;;  %v16961_v1 = vcombine.high %v7889_v8, %v7893_v18 }
 0x7d9   :  { %14929 = vmatprep.subr.bf16.mxu0 %v17153_v59  ;;  %v17120_v59 = vcombine.low %v8049_v9, %v8053_v22  ;;  %v17113_v26 = vcombine.high %v8041_v57, %v8045_v2  ;;  %v7881_v9 = vld [vmem:[#allocation8 + $0x590] sm:$0xff] }
 0x7da   :  { %v7885_v22 = vld [vmem:[#allocation8 + $0x5b0] sm:$0xff] }
 0x7db   :  { %14807 = vmatpush2.bf16.msra.mxu1 %v17278_v39  ;;  %v8033_v39 = vld [vmem:[#allocation8 + $0xa50] sm:$0xff] }
 0x7dc   :  { %14930 = vmatpush2.bf16.msra.mxu0 %v17152_v62  ;;  %14808 = vmatprep.subr.bf16.mxu1 %v17271_v16  ;;  %v8037_v62 = vld [vmem:[#allocation8 + $0xa70] sm:$0xff]  ;;  %v17238_v16 = vcombine.low %v8168_v37, %v8172_v23  ;;  %v16953_v37 = vcombine.high %v7881_v9, %v7885_v22 }
 0x7dd   :  { %14931 = vmatprep.subr.bf16.mxu0 %v17145_v60  ;;  %v17112_v60 = vcombine.low %v8041_v57, %v8045_v2  ;;  %v17105_v29 = vcombine.high %v8033_v39, %v8037_v62  ;;  %v7873_v23 = vld [vmem:[#allocation8 + $0x550] sm:$0xff] }
 0x7de   :  { %v7877_v57 = vld [vmem:[#allocation8 + $0x570] sm:$0xff] }
 0x7df   :  { %14809 = vmatpush2.bf16.msra.mxu1 %v17270_v4  ;;  %v8025_v4 = vld [vmem:[#allocation8 + $0xa10] sm:$0xff] }
 0x7e0   :  { %14932 = vmatpush2.bf16.msra.mxu0 %v17144_v12  ;;  %14810 = vmatprep.subr.bf16.mxu1 %v17263_v63  ;;  %v8029_v12 = vld [vmem:[#allocation8 + $0xa30] sm:$0xff]  ;;  %v17230_v63 = vcombine.low %v8160_v32, %v8164_v20  ;;  %v16952_v20 = vcombine.low %v7881_v9, %v7885_v22 }
 0x7e1   :  { %14933 = vmatprep.subr.bf16.mxu0 %v17137_v49  ;;  %v17104_v49 = vcombine.low %v8033_v39, %v8037_v62  ;;  %v17097_v31 = vcombine.high %v8025_v4, %v8029_v12  ;;  %v7849_v22 = vld [vmem:[#allocation8 + $0x490] sm:$0xff] }
 0x7e3   :  { %14811 = vmatpush2.bf16.msra.mxu1 %v17262_v19  ;;  %v7762_v19 = vld [vmem:[#allocation8 + $0x1d8] sm:$0xff] }
 0x7e4   :  { %14934 = vmatpush2.bf16.msra.mxu0 %v17136_v56  ;;  %14812 = vmatprep.subr.bf16.mxu1 %v17255_v46  ;;  %v7766_v56 = vld [vmem:[#allocation8 + $0x1f8] sm:$0xff]  ;;  %v17222_v46 = vcombine.low %v8152_v21, %v8156_v54  ;;  %v7865_v21 = vld [vmem:[#allocation8 + $0x510] sm:$0xff] }
 0x7e5   :  { %14935 = vmatprep.subr.bf16.mxu0 %v17129_v52  ;;  %v17096_v52 = vcombine.low %v8025_v4, %v8029_v12  ;;  %v16835_v34 = vcombine.high %v7762_v19, %v7766_v56  ;;  %v7869_v54 = vld [vmem:[#allocation8 + $0x530] sm:$0xff] }
 0x7e7   :  { %14813 = vmatpush2.bf16.msra.mxu1 %v17254_v58  ;;  %v16960_v58 = vcombine.low %v7889_v8, %v7893_v18  ;;  %v16937_v18 = vcombine.high %v7865_v21, %v7869_v54 }
 0x7e8   :  { %14936 = vmatpush2.bf16.msra.mxu0 %v17128_v42  ;;  %14814 = vmatprep.subr.bf16.mxu1 %v17247_v36  ;;  %v7754_v42 = vld [vmem:[#allocation8 + $0x198] sm:$0xff] }
 0x7e9   :  { %14937 = vmatprep.subr.bf16.mxu0 %v17121_v44  ;;  %v7758_v36 = vld [vmem:[#allocation8 + $0x1b8] sm:$0xff]  ;;  %v16834_v44 = vcombine.low %v7762_v19, %v7766_v56  ;;  %v7861_v56 = vld [vmem:[#allocation8 + $0x4f0] sm:$0xff] }
 0x7eb   :  { %14815 = vmatpush2.bf16.msra.mxu1 %v17246_v11  ;;  %v16827_v11 = vcombine.high %v7754_v42, %v7758_v36 }
 0x7ec   :  { %14938 = vmatpush2.bf16.msra.mxu0 %v17120_v59  ;;  %14816 = vmatprep.subr.bf16.mxu1 %v17239_v38  ;;  %v7746_v59 = vld [vmem:[#allocation8 + $0x158] sm:$0xff] }
 0x7ed   :  { %14939 = vmatprep.subr.bf16.mxu0 %v17113_v26  ;;  %v7750_v38 = vld [vmem:[#allocation8 + $0x178] sm:$0xff] }
 0x7ee   :  { %v16818_v8 = vcombine.low %v7746_v59, %v7750_v38 }
 0x7ef   :  { %14817 = vmatpush2.bf16.msra.mxu1 %v17238_v16  ;;  %v16826_v16 = vcombine.low %v7754_v42, %v7758_v36  ;;  %v7722_v42 = vld [vmem:[#allocation8 + $0x98] sm:$0xff] }
 0x7f0   :  { %14940 = vmatpush2.bf16.msra.mxu0 %v17112_v60  ;;  %14818 = vmatprep.subr.bf16.mxu1 %v17231_v24  ;;  %v16945_v60 = vcombine.high %v7873_v23, %v7877_v57  ;;  %v7726_v36 = vld [vmem:[#allocation8 + $0xb8] sm:$0xff] }
 0x7f1   :  { %14941 = vmatprep.subr.bf16.mxu0 %v17105_v29 }
 0x7f3   :  { %14819 = vmatpush2.bf16.msra.mxu1 %v17230_v63  ;;  %v7738_v63 = vld [vmem:[#allocation8 + $0x118] sm:$0xff] }
 0x7f4   :  { %14942 = vmatpush2.bf16.msra.mxu0 %v17104_v49  ;;  %14820 = vmatprep.subr.bf16.mxu1 %v17223_v35  ;;  %v7742_v49 = vld [vmem:[#allocation8 + $0x138] sm:$0xff] }
 0x7f5   :  { %14943 = vmatprep.subr.bf16.mxu0 %v17097_v31  ;;  %v16811_v19 = vcombine.high %v7738_v63, %v7742_v49 }
 0x7f7   :  { %14821 = vmatpush2.bf16.msra.mxu1 %v17222_v46  ;;  %v7730_v46 = vld [vmem:[#allocation8 + $0xd8] sm:$0xff] }
 0x7f8   :  { %14944 = vmatpush2.bf16.msra.mxu0 %v17096_v52  ;;  %14872 = vmatprep.subr.bf16.mxu1 %v16961_v1  ;;  %v7734_v52 = vld [vmem:[#allocation8 + $0xf8] sm:$0xff]  ;;  %v16936_v1 = vcombine.low %v7865_v21, %v7869_v54 }
 0x7f9   :  { %14995 = vmatprep.subr.bf16.mxu0 %v16835_v34  ;;  %v16810_v34 = vcombine.low %v7738_v63, %v7742_v49  ;;  %v7953_v63 = vld [vmem:[#allocation8 + $0x7d0] sm:$0xff] }
 0x7fa   :  { %v14578_v2 = vpop.f32.mrf.mxu1  ;;  %14823 = vmatmul.mubr.bf16.vlgmr.msra.gmra.mxu1 %v17763_v0  ;;  %v7957_v49 = vld [vmem:[#allocation8 + $0x7f0] sm:$0xff] }
 0x7fb   :  { %v14579_v26 = vadd.f32 %v14578_v2, %v18017_v55  ;;  %v14701_v32 = vpop.f32.mrf.mxu0  ;;  %14946 = vmatmul.mubr.bf16.vlgmr.msra.gmra.mxu0 %v17735_v6  ;;  %14873 = vmatpush1.bf16.msra.mxu1 %v16960_v58  ;;  %v16819_v55 = vcombine.high %v7746_v59, %v7750_v38  ;;  %v7853_v58 = vld [vmem:[#allocation8 + $0x4b0] sm:$0xff]  ;;  %v7714_v59 = vld [vmem:[#allocation8 + $0x58] sm:$0xff] }
 0x7fc   :  { %v18049_v39 = vadd.f32 %v14701_v32, %v17971_v61  ;;  %14904 = vmatprep.mubr.bf16.mxu1 %v17689_v47  ;;  %14996 = vmatpush1.bf16.msra.mxu0 %v16834_v44  ;;  %v14580_v62 = vpop.f32.mrf.mxu1  ;;  %v7841_v2 = vld [vmem:[#allocation8 + $0x450] sm:$0xff]  ;;  %v7718_v38 = vld [vmem:[#allocation8 + $0x78] sm:$0xff]  ;;  %v16794_v32 = vcombine.low %v7722_v42, %v7726_v36 }
 0x7fd   :  { %15027 = vmatprep.mubr.bf16.mxu0 %v17686_v33  ;;  %v14581_v24 = vadd.f32 %v14580_v62, %v18026_v53  ;;  %v14703_v29 = vpop.f32.mrf.mxu0  ;;  %14874 = vmatprep.subr.bf16.mxu1 %v16953_v37  ;;  %v18055_v4 = vadd.f32 %v18035_v7, %v14579_v26  ;;  %v16944_v33 = vcombine.low %v7873_v23, %v7877_v57 }
 0x7fe   :  { %v18058_v61 = vadd.f32 %v14703_v29, %v17979_v14  ;;  %v14582_v12 = vpop.f32.mrf.mxu1  ;;  %14997 = vmatprep.subr.bf16.mxu0 %v16827_v11  ;;  %v7857_v14 = vld [vmem:[#allocation8 + $0x4d0] sm:$0xff]  ;;  %v16802_v37 = vcombine.low %v7730_v46, %v7734_v52  ;;  %v16921_v23 = vcombine.high %v7849_v22, %v7853_v58  ;;  %v16795_v57 = vcombine.high %v7722_v42, %v7726_v36  ;;  %v7710_v29 = vld [vmem:[#allocation8 + $0x38] sm:$0xff] }
 0x7ff   :  { %v14705_v35 = vpop.f32.mrf.mxu0  ;;  %14875 = vmatpush1.bf16.msra.mxu1 %v16952_v20  ;;  %v18061_v53 = vadd.f32 %v18043_v50, %v14581_v24  ;;  %v16929_v9 = vcombine.high %v7857_v14, %v7861_v56  ;;  %v16803_v50 = vcombine.high %v7730_v46, %v7734_v52  ;;  %v16928_v44 = vcombine.low %v7857_v14, %v7861_v56  ;;  %v7845_v11 = vld [vmem:[#allocation8 + $0x470] sm:$0xff]  ;;  %v7706_v24 = vld [vmem:[#allocation8 + $0x18] sm:$0xff] }
 0x800   :  { %14998 = vmatpush1.bf16.msra.mxu0 %v16826_v16  ;;  %v14583_v31 = vpop.f32.mrf.mxu1  ;;  %14876 = vmatprep.subr.bf16.mxu1 %v16945_v60  ;;  %v16920_v26 = vcombine.low %v7849_v22, %v7853_v58  ;;  %v16913_v20 = vcombine.high %v7841_v2, %v7845_v11  ;;  %v16787_v62 = vcombine.high %v7714_v59, %v7718_v38  ;;  %v7833_v16 = vld [vmem:[#allocation8 + $0x410] sm:$0xff]  ;;  %v7826_v35 = vld [vmem:[#allocation8 + $0x3d8] sm:$0xff] }
 0x801   :  { %v14706_v7 = vpop.f32.mrf.mxu0  ;;  %14999 = vmatprep.subr.bf16.mxu0 %v16819_v55  ;;  %v7837_v60 = vld [vmem:[#allocation8 + $0x430] sm:$0xff]  ;;  %v16912_v55 = vcombine.low %v7841_v2, %v7845_v11  ;;  %v16786_v21 = vcombine.low %v7714_v59, %v7718_v38  ;;  %v16779_v12 = vcombine.high %v7706_v24, %v7710_v29  ;;  %v7818_v56 = vld [vmem:[#allocation8 + $0x398] sm:$0xff]  ;;  %v17024_v52 = vcombine.low %v7953_v63, %v7957_v49 }
 0x802   :  { %v16905_v54 = vcombine.high %v7833_v16, %v7837_v60  ;;  %v16904_v31 = vcombine.low %v7833_v16, %v7837_v60  ;;  %v7949_v14 = vld [vmem:[#allocation8 + $0x7b0] sm:$0xff]  ;;  %v7822_v46 = vld [vmem:[#allocation8 + $0x3b8] sm:$0xff] }
 0x803   :  { %14877 = vmatpush1.bf16.msra.mxu1 %v16944_v33  ;;  %v7830_v33 = vld [vmem:[#allocation8 + $0x3f8] sm:$0xff]  ;;  %v7941_v22 = vld [vmem:[#allocation8 + $0x770] sm:$0xff] }
 0x804   :  { %15000 = vmatpush1.bf16.msra.mxu0 %v16818_v8  ;;  %14878 = vmatprep.subr.bf16.mxu1 %v16937_v18  ;;  %v16778_v8 = vcombine.low %v7706_v24, %v7710_v29  ;;  %v17025_v18 = vcombine.high %v7953_v63, %v7957_v49  ;;  %v16899_v7 = vcombine.high %v7826_v35, %v7830_v33  ;;  %v7810_v58 = vld [vmem:[#allocation8 + $0x358] sm:$0xff]  ;;  %v7933_v2 = vld [vmem:[#allocation8 + $0x730] sm:$0xff] }
 0x805   :  { %15001 = vmatprep.subr.bf16.mxu0 %v16811_v19  ;;  %v7945_v19 = vld [vmem:[#allocation8 + $0x790] sm:$0xff]  ;;  %v7814_v42 = vld [vmem:[#allocation8 + $0x378] sm:$0xff] }
 0x806   :  { %v17016_v36 = vcombine.low %v7945_v19, %v7949_v14  ;;  %v7802_v11 = vld [vmem:[#allocation8 + $0x318] sm:$0xff]  ;;  %v7925_v16 = vld [vmem:[#allocation8 + $0x6f0] sm:$0xff] }
 0x807   :  { %14879 = vmatpush1.bf16.msra.mxu1 %v16936_v1  ;;  %v16898_v1 = vcombine.low %v7826_v35, %v7830_v33  ;;  %v7806_v59 = vld [vmem:[#allocation8 + $0x338] sm:$0xff]  ;;  %v7917_v63 = vld [vmem:[#allocation8 + $0x6b0] sm:$0xff] }
 0x808   :  { %15002 = vmatpush1.bf16.msra.mxu0 %v16810_v34  ;;  %14880 = vmatprep.subr.bf16.mxu1 %v16929_v9  ;;  %v17017_v34 = vcombine.high %v7945_v19, %v7949_v14  ;;  %v16891_v9 = vcombine.high %v7818_v56, %v7822_v46  ;;  %v7794_v60 = vld [vmem:[#allocation8 + $0x2d8] sm:$0xff]  ;;  %v7909_v19 = vld [vmem:[#allocation8 + $0x670] sm:$0xff] }
 0x809   :  { %15003 = vmatprep.subr.bf16.mxu0 %v16803_v50  ;;  %v7937_v50 = vld [vmem:[#allocation8 + $0x750] sm:$0xff]  ;;  %v7798_v24 = vld [vmem:[#allocation8 + $0x2f8] sm:$0xff] }
 0x80a   :  { %v17008_v38 = vcombine.low %v7937_v50, %v7941_v22  ;;  %v7786_v49 = vld [vmem:[#allocation8 + $0x298] sm:$0xff] }
 0x80b   :  { %14881 = vmatpush1.bf16.msra.mxu1 %v16928_v44  ;;  %v16890_v44 = vcombine.low %v7818_v56, %v7822_v46  ;;  %v7790_v35 = vld [vmem:[#allocation8 + $0x2b8] sm:$0xff] }
 0x80c   :  { %15004 = vmatpush1.bf16.msra.mxu0 %v16802_v37  ;;  %14882 = vmatprep.subr.bf16.mxu1 %v16921_v23  ;;  %v17009_v37 = vcombine.high %v7937_v50, %v7941_v22  ;;  %v16883_v23 = vcombine.high %v7810_v58, %v7814_v42  ;;  %v7778_v14 = vld [vmem:[#allocation8 + $0x258] sm:$0xff]  ;;  %v7901_v50 = vld [vmem:[#allocation8 + $0x630] sm:$0xff] }
 0x80d   :  { %15005 = vmatprep.subr.bf16.mxu0 %v16795_v57  ;;  %v7929_v57 = vld [vmem:[#allocation8 + $0x710] sm:$0xff]  ;;  %v7782_v56 = vld [vmem:[#allocation8 + $0x278] sm:$0xff] }
 0x80e   :  { %v17000_v29 = vcombine.low %v7929_v57, %v7933_v2  ;;  %v7770_v22 = vld [vmem:[#allocation8 + $0x218] sm:$0xff] }
 0x80f   :  { %14883 = vmatpush1.bf16.msra.mxu1 %v16920_v26  ;;  %v16882_v26 = vcombine.low %v7810_v58, %v7814_v42  ;;  %v7774_v58 = vld [vmem:[#allocation8 + $0x238] sm:$0xff] }
 0x810   :  { %15006 = vmatpush1.bf16.msra.mxu0 %v16794_v32  ;;  %14884 = vmatprep.subr.bf16.mxu1 %v16913_v20  ;;  %v17001_v32 = vcombine.high %v7929_v57, %v7933_v2  ;;  %v16875_v20 = vcombine.high %v7802_v11, %v7806_v59  ;;  %v8149_v57 = vld [vmem:[#allocation8 + $0xdf0] sm:$0xff]  ;;  %v8018_v2 = vld [vmem:[#allocation8 + $0x9d8] sm:$0xff] }
 0x811   :  { %15007 = vmatprep.subr.bf16.mxu0 %v16787_v62  ;;  %v7921_v62 = vld [vmem:[#allocation8 + $0x6d0] sm:$0xff] }
 0x812   :  { %v16992_v33 = vcombine.low %v7921_v62, %v7925_v16 }
 0x813   :  { %14885 = vmatpush1.bf16.msra.mxu1 %v16912_v55  ;;  %v16874_v55 = vcombine.low %v7802_v11, %v7806_v59  ;;  %v8022_v11 = vld [vmem:[#allocation8 + $0x9f8] sm:$0xff] }
 0x814   :  { %15008 = vmatpush1.bf16.msra.mxu0 %v16786_v21  ;;  %14886 = vmatprep.subr.bf16.mxu1 %v16905_v54  ;;  %v16993_v21 = vcombine.high %v7921_v62, %v7925_v16  ;;  %v16867_v54 = vcombine.high %v7794_v60, %v7798_v24  ;;  %v8137_v62 = vld [vmem:[#allocation8 + $0xd90] sm:$0xff] }
 0x815   :  { %15009 = vmatprep.subr.bf16.mxu0 %v16779_v12  ;;  %v7913_v12 = vld [vmem:[#allocation8 + $0x690] sm:$0xff] }
 0x816   :  { %v16984_v46 = vcombine.low %v7913_v12, %v7917_v63  ;;  %v8141_v16 = vld [vmem:[#allocation8 + $0xdb0] sm:$0xff] }
 0x817   :  { %14887 = vmatpush1.bf16.msra.mxu1 %v16904_v31  ;;  %v16866_v31 = vcombine.low %v7794_v60, %v7798_v24  ;;  %v8010_v24 = vld [vmem:[#allocation8 + $0x998] sm:$0xff] }
 0x818   :  { %15010 = vmatpush1.bf16.msra.mxu0 %v16778_v8  ;;  %14888 = vmatprep.subr.bf16.mxu1 %v17025_v18  ;;  %v16985_v8 = vcombine.high %v7913_v12, %v7917_v63  ;;  %v16859_v18 = vcombine.high %v7786_v49, %v7790_v35  ;;  %v8129_v12 = vld [vmem:[#allocation8 + $0xd50] sm:$0xff] }
 0x819   :  { %15011 = vmatprep.subr.bf16.mxu0 %v16899_v7  ;;  %v7905_v7 = vld [vmem:[#allocation8 + $0x650] sm:$0xff] }
 0x81a   :  { %v16976_v42 = vcombine.low %v7905_v7, %v7909_v19  ;;  %v8133_v63 = vld [vmem:[#allocation8 + $0xd70] sm:$0xff] }
 0x81b   :  { %14889 = vmatpush2.bf16.msra.mxu1 %v17024_v52  ;;  %v16858_v52 = vcombine.low %v7786_v49, %v7790_v35 }
 0x81c   :  { %15012 = vmatpush2.bf16.msra.mxu0 %v16898_v1  ;;  %14890 = vmatprep.subr.bf16.mxu1 %v17017_v34  ;;  %v16977_v1 = vcombine.high %v7905_v7, %v7909_v19  ;;  %v16851_v34 = vcombine.high %v7778_v14, %v7782_v56  ;;  %v17208_v7 = vcombine.low %v8137_v62, %v8141_v16 }
 0x81d   :  { %15013 = vmatprep.subr.bf16.mxu0 %v16891_v9  ;;  %v7897_v9 = vld [vmem:[#allocation8 + $0x610] sm:$0xff] }
 0x81e   :  { %v16968_v59 = vcombine.low %v7897_v9, %v7901_v50 }
 0x81f   :  { %14891 = vmatpush2.bf16.msra.mxu1 %v17016_v36  ;;  %v16850_v36 = vcombine.low %v7778_v14, %v7782_v56  ;;  %v17201_v56 = vcombine.high %v8129_v12, %v8133_v63 }
 0x820   :  { %15014 = vmatpush2.bf16.msra.mxu0 %v16890_v44  ;;  %14892 = vmatprep.subr.bf16.mxu1 %v17009_v37  ;;  %v16969_v44 = vcombine.high %v7897_v9, %v7901_v50  ;;  %v16843_v37 = vcombine.high %v7770_v22, %v7774_v58  ;;  %v7998_v50 = vld [vmem:[#allocation8 + $0x938] sm:$0xff] }
 0x821   :  { %15015 = vmatprep.subr.bf16.mxu0 %v16883_v23  ;;  %v8145_v23 = vld [vmem:[#allocation8 + $0xdd0] sm:$0xff] }
 0x822   :  { %v17216_v60 = vcombine.low %v8145_v23, %v8149_v57 }
 0x823   :  { %14893 = vmatpush2.bf16.msra.mxu1 %v17008_v38  ;;  %v16842_v38 = vcombine.low %v7770_v22, %v7774_v58 }
 0x824   :  { %15016 = vmatpush2.bf16.msra.mxu0 %v16882_v26  ;;  %14894 = vmatprep.subr.bf16.mxu1 %v17001_v32  ;;  %v17217_v26 = vcombine.high %v8145_v23, %v8149_v57  ;;  %v17091_v32 = vcombine.high %v8018_v2, %v8022_v11  ;;  %v8113_v23 = vld [vmem:[#allocation8 + $0xcd0] sm:$0xff] }
 0x825   :  { %15017 = vmatprep.subr.bf16.mxu0 %v16875_v20  ;;  %v18063_v20 = vld [vmem:[#allocation14] sm:$0xff] }
 0x826   :  { %v8117_v57 = vld [vmem:[#allocation8 + $0xcf0] sm:$0xff] }
 0x827   :  { %14895 = vmatpush2.bf16.msra.mxu1 %v17000_v29  ;;  %v8014_v29 = vld [vmem:[#allocation8 + $0x9b8] sm:$0xff] }
 0x828   :  { %15018 = vmatpush2.bf16.msra.mxu0 %v16874_v55  ;;  %14896 = vmatprep.subr.bf16.mxu1 %v16993_v21  ;;  %v17090_v55 = vcombine.low %v8018_v2, %v8022_v11  ;;  %v15164_v21 = vrot.slane %v18063_v20, %v17616_v5  ;;  %v17083_v35 = vcombine.high %v8010_v24, %v8014_v29  ;;  %v7986_v2 = vld [vmem:[#allocation8 + $0x8d8] sm:$0xff] }
 0x829   :  { %15019 = vmatprep.subr.bf16.mxu0 %v16867_v54  ;;  %v17209_v54 = vcombine.high %v8137_v62, %v8141_v16  ;;  %v15168_v5 = vrot.slane %v18063_v20, %v17621_v10  ;;  %v17082_v14 = vcombine.low %v8010_v24, %v8014_v29  ;;  %v7994_v10 = vld [vmem:[#allocation8 + $0x918] sm:$0xff]  ;;  %v8105_v62 = vld [vmem:[#allocation8 + $0xc90] sm:$0xff]  ;;  %v17184_v29 = vcombine.low %v8113_v23, %v8117_v57 }
 0x82a   :  { %v7990_v11 = vld [vmem:[#allocation8 + $0x8f8] sm:$0xff]  ;;  %v8109_v16 = vld [vmem:[#allocation8 + $0xcb0] sm:$0xff] }
 0x82b   :  { %14897 = vmatpush2.bf16.msra.mxu1 %v16992_v33  ;;  %v8002_v33 = vld [vmem:[#allocation8 + $0x958] sm:$0xff] }
 0x82c   :  { %15020 = vmatpush2.bf16.msra.mxu0 %v16866_v31  ;;  %14898 = vmatprep.subr.bf16.mxu1 %v16985_v8  ;;  %v8006_v31 = vld [vmem:[#allocation8 + $0x978] sm:$0xff] }
 0x82d   :  { %15021 = vmatprep.subr.bf16.mxu0 %v16859_v18  ;;  %v7982_v24 = vld [vmem:[#allocation8 + $0x8b8] sm:$0xff] }
 0x82f   :  { %14899 = vmatpush2.bf16.msra.mxu1 %v16984_v46 }
 0x830   :  { %15022 = vmatpush2.bf16.msra.mxu0 %v16858_v52  ;;  %14900 = vmatprep.subr.bf16.mxu1 %v16977_v1  ;;  %v8121_v1 = vld [vmem:[#allocation8 + $0xd10] sm:$0xff] }
 0x831   :  { %15023 = vmatprep.subr.bf16.mxu0 %v16851_v34  ;;  %v8125_v34 = vld [vmem:[#allocation8 + $0xd30] sm:$0xff] }
 0x833   :  { %14901 = vmatpush2.bf16.msra.mxu1 %v16976_v42  ;;  %v17200_v42 = vcombine.low %v8129_v12, %v8133_v63  ;;  %v8097_v12 = vld [vmem:[#allocation8 + $0xc50] sm:$0xff] }
 0x834   :  { %15024 = vmatpush2.bf16.msra.mxu0 %v16850_v36  ;;  %14902 = vmatprep.subr.bf16.mxu1 %v16969_v44  ;;  %v8101_v63 = vld [vmem:[#allocation8 + $0xc70] sm:$0xff] }
 0x835   :  { %15025 = vmatprep.subr.bf16.mxu0 %v16843_v37  ;;  %v17067_v37 = vcombine.high %v7994_v10, %v7998_v50 }
 0x837   :  { %14903 = vmatpush2.bf16.msra.mxu1 %v16968_v59  ;;  %v17192_v59 = vcombine.low %v8121_v1, %v8125_v34 }
 0x838   :  { %15026 = vmatpush2.bf16.msra.mxu0 %v16842_v38  ;;  %14954 = vmatprep.subr.bf16.mxu1 %v17217_v26  ;;  %v17066_v38 = vcombine.low %v7994_v10, %v7998_v50  ;;  %v17185_v26 = vcombine.high %v8113_v23, %v8117_v57  ;;  %v8082_v10 = vld [vmem:[#allocation8 + $0xbd8] sm:$0xff] }
 0x839   :  { %15077 = vmatprep.subr.bf16.mxu0 %v17091_v32  ;;  %v17059_v32 = vcombine.high %v7986_v2, %v7990_v11  ;;  %v8086_v50 = vld [vmem:[#allocation8 + $0xbf8] sm:$0xff] }
 0x83a   :  { %v14660_v49 = vpop.f32.mrf.mxu1  ;;  %14905 = vmatmul.mubr.bf16.vlgmr.msra.gmra.mxu1 %v17712_v17  ;;  %v17154_v57 = vcombine.low %v8082_v10, %v8086_v50 }
 0x83b   :  { %v14661_v8 = vadd.f32 %v14660_v49, %v18055_v4  ;;  %v18069_v18 = vpop.f32.mrf.mxu0  ;;  %15028 = vmatmul.mubr.bf16.vlgmr.msra.gmra.mxu0 %v17708_v13  ;;  %14955 = vmatpush1.bf16.msra.mxu1 %v17216_v60  ;;  %v17075_v13 = vcombine.high %v8002_v33, %v8006_v31  ;;  %v7978_v60 = vld [vmem:[#allocation8 + $0x898] sm:$0xff] }
 0x83c   :  { %14986 = vmatprep.mubr.bf16.mxu1 %v17761_v41  ;;  %15078 = vmatpush1.bf16.msra.mxu0 %v17090_v55  ;;  %v14662_v19 = vpop.f32.mrf.mxu1  ;;  %v17058_v55 = vcombine.low %v7986_v2, %v7990_v11  ;;  %v7970_v49 = vld [vmem:[#allocation8 + $0x858] sm:$0xff] }
 0x83d   :  { %v15201_v46 = vadd.f32 %v15164_v21, %v14661_v8  ;;  %15109 = vmatprep.mubr.bf16.mxu0 %v17721_v45  ;;  %v14663_v4 = vadd.f32 %v14662_v19, %v18061_v53  ;;  %v18077_v52 = vpop.f32.mrf.mxu0  ;;  %14956 = vmatprep.subr.bf16.mxu1 %v17209_v54  ;;  %v17074_v45 = vcombine.low %v8002_v33, %v8006_v31  ;;  %v8093_v19 = vld [vmem:[#allocation8 + $0xc30] sm:$0xff] }
 0x83e   :  { %v14664_v9 = vpop.f32.mrf.mxu1  ;;  %15079 = vmatprep.subr.bf16.mxu0 %v17083_v35  ;;  %v17193_v53 = vcombine.high %v8121_v1, %v8125_v34  ;;  %v17177_v21 = vcombine.high %v8105_v62, %v8109_v16  ;;  %v17051_v54 = vcombine.high %v7978_v60, %v7982_v24  ;;  %v7974_v35 = vld [vmem:[#allocation8 + $0x878] sm:$0xff]  ;;  %v17176_v33 = vcombine.low %v8105_v62, %v8109_v16  ;;  %v8209_v34 = vld [vmem:[#allocation8 + $0xfd0] sm:$0xff] }
 0x83f   :  { %15209 = vst [vmem:[#allocation16] sm:$0xff] %v15201_v46  ;;  %v15202_v22 = vadd.f32 %v15168_v5, %v14663_v4  ;;  %v14787_v58 = vpop.f32.mrf.mxu0  ;;  %14957 = vmatpush1.bf16.msra.mxu1 %v17208_v7  ;;  %v17050_v31 = vcombine.low %v7978_v60, %v7982_v24  ;;  %v17169_v8 = vcombine.high %v8097_v12, %v8101_v63  ;;  %v8089_v7 = vld [vmem:[#allocation8 + $0xc10] sm:$0xff] }
 0x840   :  { %15080 = vmatpush1.bf16.msra.mxu0 %v17082_v14  ;;  %v14665_v36 = vpop.f32.mrf.mxu1  ;;  %14958 = vmatprep.subr.bf16.mxu1 %v17201_v56  ;;  %v17043_v5 = vcombine.high %v7970_v49, %v7974_v35  ;;  %v7962_v14 = vld [vmem:[#allocation8 + $0x818] sm:$0xff]  ;;  %v17168_v46 = vcombine.low %v8097_v12, %v8101_v63  ;;  %v17042_v4 = vcombine.low %v7970_v49, %v7974_v35  ;;  %v8213_v9 = vld [vmem:[#allocation8 + $0xff0] sm:$0xff] }
 0x841   :  { %15210 = vst [vmem:[#allocation16 + $0x8] sm:$0xff] %v15202_v22  ;;  %v14788_v44 = vpop.f32.mrf.mxu0  ;;  %15081 = vmatprep.subr.bf16.mxu0 %v17075_v13  ;;  %v7966_v56 = vld [vmem:[#allocation8 + $0x838] sm:$0xff]  ;;  %v17161_v13 = vcombine.high %v8089_v7, %v8093_v19  ;;  %v17160_v22 = vcombine.low %v8089_v7, %v8093_v19  ;;  %v17155_v36 = vcombine.high %v8082_v10, %v8086_v50 }
 0x842   :  { %v17035_v1 = vcombine.high %v7962_v14, %v7966_v56  ;;  %v17034_v58 = vcombine.low %v7962_v14, %v7966_v56  ;;  %v8074_v44 = vld [vmem:[#allocation8 + $0xb98] sm:$0xff]  ;;  %v17280_v23 = vcombine.low %v8209_v34, %v8213_v9 }
 0x843   :  { %14959 = vmatpush1.bf16.msra.mxu1 %v17200_v42  ;;  %v17281_v42 = vcombine.high %v8209_v34, %v8213_v9 }
 0x844   :  { %15082 = vmatpush1.bf16.msra.mxu0 %v17074_v45  ;;  %14960 = vmatprep.subr.bf16.mxu1 %v17193_v53  ;;  %v8201_v45 = vld [vmem:[#allocation8 + $0xf90] sm:$0xff] }
 0x845   :  { %15083 = vmatprep.subr.bf16.mxu0 %v17067_v37  ;;  %v8205_v53 = vld [vmem:[#allocation8 + $0xfb0] sm:$0xff]  ;;  %v8078_v37 = vld [vmem:[#allocation8 + $0xbb8] sm:$0xff] }
 0x846   :  { %v17273_v2 = vcombine.high %v8201_v45, %v8205_v53  ;;  %v17147_v11 = vcombine.high %v8074_v44, %v8078_v37  ;;  %v17272_v62 = vcombine.low %v8201_v45, %v8205_v53  ;;  %v17146_v16 = vcombine.low %v8074_v44, %v8078_v37 }
 0x847   :  { %14961 = vmatpush1.bf16.msra.mxu1 %v17192_v59  ;;  %v8193_v59 = vld [vmem:[#allocation8 + $0xf50] sm:$0xff] }
 0x848   :  { %15084 = vmatpush1.bf16.msra.mxu0 %v17066_v38  ;;  %14962 = vmatprep.subr.bf16.mxu1 %v17185_v26  ;;  %v8197_v38 = vld [vmem:[#allocation8 + $0xf70] sm:$0xff]  ;;  %v8066_v26 = vld [vmem:[#allocation8 + $0xb58] sm:$0xff] }
 0x849   :  { %15085 = vmatprep.subr.bf16.mxu0 %v17059_v32  ;;  %v8070_v32 = vld [vmem:[#allocation8 + $0xb78] sm:$0xff]  ;;  %v17265_v60 = vcombine.high %v8193_v59, %v8197_v38  ;;  %v17264_v12 = vcombine.low %v8193_v59, %v8197_v38 }
 0x84a   :  { %v17139_v24 = vcombine.high %v8066_v26, %v8070_v32  ;;  %v17138_v63 = vcombine.low %v8066_v26, %v8070_v32 }
 0x84b   :  { %14963 = vmatpush1.bf16.msra.mxu1 %v17184_v29  ;;  %v8185_v29 = vld [vmem:[#allocation8 + $0xf10] sm:$0xff] }
 0x84c   :  { %15086 = vmatpush1.bf16.msra.mxu0 %v17058_v55  ;;  %14964 = vmatprep.subr.bf16.mxu1 %v17177_v21  ;;  %v8189_v55 = vld [vmem:[#allocation8 + $0xf30] sm:$0xff]  ;;  %v8058_v21 = vld [vmem:[#allocation8 + $0xb18] sm:$0xff] }
 0x84d   :  { %15087 = vmatprep.subr.bf16.mxu0 %v17051_v54  ;;  %v8062_v54 = vld [vmem:[#allocation8 + $0xb38] sm:$0xff]  ;;  %v17257_v49 = vcombine.high %v8185_v29, %v8189_v55  ;;  %v17256_v7 = vcombine.low %v8185_v29, %v8189_v55 }
 0x84e   :  { %v17131_v35 = vcombine.high %v8058_v21, %v8062_v54  ;;  %v17130_v19 = vcombine.low %v8058_v21, %v8062_v54  ;;  %v7882_v55 = vld [vmem:[#allocation8 + $0x598] sm:$0xff] }
 0x84f   :  { %14965 = vmatpush1.bf16.msra.mxu1 %v17176_v33  ;;  %v8177_v33 = vld [vmem:[#allocation8 + $0xed0] sm:$0xff]  ;;  %v7886_v21 = vld [vmem:[#allocation8 + $0x5b8] sm:$0xff] }
 0x850   :  { %15088 = vmatpush1.bf16.msra.mxu0 %v17050_v31  ;;  %14966 = vmatprep.subr.bf16.mxu1 %v17169_v8  ;;  %v8181_v31 = vld [vmem:[#allocation8 + $0xef0] sm:$0xff]  ;;  %v8050_v8 = vld [vmem:[#allocation8 + $0xad8] sm:$0xff] }
 0x851   :  { %15089 = vmatprep.subr.bf16.mxu0 %v17043_v5  ;;  %v8054_v5 = vld [vmem:[#allocation8 + $0xaf8] sm:$0xff]  ;;  %v17249_v14 = vcombine.high %v8177_v33, %v8181_v31  ;;  %v17248_v34 = vcombine.low %v8177_v33, %v8181_v31 }
 0x852   :  { %v17123_v56 = vcombine.high %v8050_v8, %v8054_v5  ;;  %v17122_v9 = vcombine.low %v8050_v8, %v8054_v5  ;;  %v16954_v8 = vcombine.low %v7882_v55, %v7886_v21 }
 0x853   :  { %14967 = vmatpush1.bf16.msra.mxu1 %v17168_v46  ;;  %v8169_v46 = vld [vmem:[#allocation8 + $0xe90] sm:$0xff] }
 0x854   :  { %15090 = vmatpush1.bf16.msra.mxu0 %v17042_v4  ;;  %14968 = vmatprep.subr.bf16.mxu1 %v17161_v13  ;;  %v8173_v4 = vld [vmem:[#allocation8 + $0xeb0] sm:$0xff]  ;;  %v8042_v13 = vld [vmem:[#allocation8 + $0xa98] sm:$0xff] }
 0x855   :  { %15091 = vmatprep.subr.bf16.mxu0 %v17035_v1  ;;  %v8046_v1 = vld [vmem:[#allocation8 + $0xab8] sm:$0xff]  ;;  %v17241_v10 = vcombine.high %v8169_v46, %v8173_v4  ;;  %v17240_v45 = vcombine.low %v8169_v46, %v8173_v4 }
 0x856   :  { %v17115_v50 = vcombine.high %v8042_v13, %v8046_v1  ;;  %v17114_v53 = vcombine.low %v8042_v13, %v8046_v1  ;;  %v7866_v46 = vld [vmem:[#allocation8 + $0x518] sm:$0xff] }
 0x857   :  { %14969 = vmatpush1.bf16.msra.mxu1 %v17160_v22  ;;  %v8161_v22 = vld [vmem:[#allocation8 + $0xe50] sm:$0xff]  ;;  %v7870_v4 = vld [vmem:[#allocation8 + $0x538] sm:$0xff] }
 0x858   :  { %15092 = vmatpush1.bf16.msra.mxu0 %v17034_v58  ;;  %14970 = vmatprep.subr.bf16.mxu1 %v17281_v42  ;;  %v8165_v58 = vld [vmem:[#allocation8 + $0xe70] sm:$0xff]  ;;  %v8034_v42 = vld [vmem:[#allocation8 + $0xa58] sm:$0xff] }
 0x859   :  { %15093 = vmatprep.subr.bf16.mxu0 %v17155_v36  ;;  %v8038_v36 = vld [vmem:[#allocation8 + $0xa78] sm:$0xff]  ;;  %v17233_v44 = vcombine.high %v8161_v22, %v8165_v58  ;;  %v17232_v59 = vcombine.low %v8161_v22, %v8165_v58  ;;  %v16938_v22 = vcombine.low %v7866_v46, %v7870_v4 }
 0x85a   :  { %v17107_v37 = vcombine.high %v8034_v42, %v8038_v36  ;;  %v17106_v38 = vcombine.low %v8034_v42, %v8038_v36  ;;  %v7850_v58 = vld [vmem:[#allocation8 + $0x498] sm:$0xff] }
 0x85b   :  { %14971 = vmatpush2.bf16.msra.mxu1 %v17280_v23  ;;  %v8153_v23 = vld [vmem:[#allocation8 + $0xe10] sm:$0xff] }
 0x85c   :  { %15094 = vmatpush2.bf16.msra.mxu0 %v17154_v57  ;;  %14972 = vmatprep.subr.bf16.mxu1 %v17273_v2  ;;  %v8157_v57 = vld [vmem:[#allocation8 + $0xe30] sm:$0xff]  ;;  %v8026_v2 = vld [vmem:[#allocation8 + $0xa18] sm:$0xff] }
 0x85d   :  { %15095 = vmatprep.subr.bf16.mxu0 %v17147_v11  ;;  %v8030_v11 = vld [vmem:[#allocation8 + $0xa38] sm:$0xff]  ;;  %v17225_v26 = vcombine.high %v8153_v23, %v8157_v57 }
 0x85e   :  { %v17099_v32 = vcombine.high %v8026_v2, %v8030_v11 }
 0x85f   :  { %14973 = vmatpush2.bf16.msra.mxu1 %v17272_v62  ;;  %v7890_v62 = vld [vmem:[#allocation8 + $0x5d8] sm:$0xff] }
 0x860   :  { %15096 = vmatpush2.bf16.msra.mxu0 %v17146_v16  ;;  %14974 = vmatprep.subr.bf16.mxu1 %v17265_v60  ;;  %v7894_v16 = vld [vmem:[#allocation8 + $0x5f8] sm:$0xff]  ;;  %v17224_v60 = vcombine.low %v8153_v23, %v8157_v57 }
 0x861   :  { %15097 = vmatprep.subr.bf16.mxu0 %v17139_v24  ;;  %v17098_v24 = vcombine.low %v8026_v2, %v8030_v11  ;;  %v16963_v29 = vcombine.high %v7890_v62, %v7894_v16  ;;  %v16962_v54 = vcombine.low %v7890_v62, %v7894_v16  ;;  %v7838_v23 = vld [vmem:[#allocation8 + $0x438] sm:$0xff] }
 0x862   :  { %v7954_v11 = vld [vmem:[#allocation8 + $0x7d8] sm:$0xff] }
 0x863   :  { %14975 = vmatpush2.bf16.msra.mxu1 %v17264_v12  ;;  %v16955_v12 = vcombine.high %v7882_v55, %v7886_v21  ;;  %v7950_v62 = vld [vmem:[#allocation8 + $0x7b8] sm:$0xff] }
 0x864   :  { %15098 = vmatpush2.bf16.msra.mxu0 %v17138_v63  ;;  %14976 = vmatprep.subr.bf16.mxu1 %v17257_v49  ;;  %v7874_v63 = vld [vmem:[#allocation8 + $0x558] sm:$0xff] }
 0x865   :  { %15099 = vmatprep.subr.bf16.mxu0 %v17131_v35  ;;  %v7878_v49 = vld [vmem:[#allocation8 + $0x578] sm:$0xff] }
 0x867   :  { %14977 = vmatpush2.bf16.msra.mxu1 %v17256_v7 }
 0x868   :  { %15100 = vmatpush2.bf16.msra.mxu0 %v17130_v19  ;;  %14978 = vmatprep.subr.bf16.mxu1 %v17249_v14  ;;  %v16947_v19 = vcombine.high %v7874_v63, %v7878_v49 }
 0x869   :  { %15101 = vmatprep.subr.bf16.mxu0 %v17123_v56 }
 0x86b   :  { %14979 = vmatpush2.bf16.msra.mxu1 %v17248_v34 }
 0x86c   :  { %15102 = vmatpush2.bf16.msra.mxu0 %v17122_v9  ;;  %14980 = vmatprep.subr.bf16.mxu1 %v17241_v10  ;;  %v16939_v9 = vcombine.high %v7866_v46, %v7870_v4  ;;  %v7858_v10 = vld [vmem:[#allocation8 + $0x4d8] sm:$0xff] }
 0x86d   :  { %15103 = vmatprep.subr.bf16.mxu0 %v17115_v50  ;;  %v7862_v50 = vld [vmem:[#allocation8 + $0x4f8] sm:$0xff] }
 0x86e   :  { %v16930_v42 = vcombine.low %v7858_v10, %v7862_v50  ;;  %v7906_v46 = vld [vmem:[#allocation8 + $0x658] sm:$0xff] }
 0x86f   :  { %14981 = vmatpush2.bf16.msra.mxu1 %v17240_v45  ;;  %v7842_v45 = vld [vmem:[#allocation8 + $0x458] sm:$0xff] }
 0x870   :  { %15104 = vmatpush2.bf16.msra.mxu0 %v17114_v53  ;;  %14982 = vmatprep.subr.bf16.mxu1 %v17233_v44  ;;  %v7846_v53 = vld [vmem:[#allocation8 + $0x478] sm:$0xff] }
 0x871   :  { %15105 = vmatprep.subr.bf16.mxu0 %v17107_v37  ;;  %v16915_v44 = vcombine.high %v7842_v45, %v7846_v53  ;;  %v7834_v37 = vld [vmem:[#allocation8 + $0x418] sm:$0xff]  ;;  %v16914_v57 = vcombine.low %v7842_v45, %v7846_v53  ;;  %v15172_v45 = vrot.slane %v18063_v20, %v17646_v43 }
 0x872   :  { %v16907_v2 = vcombine.high %v7834_v37, %v7838_v23  ;;  %v7910_v4 = vld [vmem:[#allocation8 + $0x678] sm:$0xff] }
 0x873   :  { %14983 = vmatpush2.bf16.msra.mxu1 %v17232_v59  ;;  %v7958_v59 = vld [vmem:[#allocation8 + $0x7f8] sm:$0xff] }
 0x874   :  { %15106 = vmatpush2.bf16.msra.mxu0 %v17106_v38  ;;  %14984 = vmatprep.subr.bf16.mxu1 %v17225_v26  ;;  %v16906_v38 = vcombine.low %v7834_v37, %v7838_v23  ;;  %v17027_v26 = vcombine.high %v7954_v11, %v7958_v59  ;;  %v17026_v16 = vcombine.low %v7954_v11, %v7958_v59  ;;  %v8130_v53 = vld [vmem:[#allocation8 + $0xd58] sm:$0xff] }
 0x875   :  { %15107 = vmatprep.subr.bf16.mxu0 %v17099_v32  ;;  %v7946_v32 = vld [vmem:[#allocation8 + $0x798] sm:$0xff] }
 0x876   :  { %v17018_v55 = vcombine.low %v7946_v32, %v7950_v62 }
 0x877   :  { %14985 = vmatpush2.bf16.msra.mxu1 %v17224_v60  ;;  %v17019_v60 = vcombine.high %v7946_v32, %v7950_v62  ;;  %v8126_v32 = vld [vmem:[#allocation8 + $0xd38] sm:$0xff] }
 0x878   :  { %15108 = vmatpush2.bf16.msra.mxu0 %v17098_v24  ;;  %15036 = vmatprep.subr.bf16.mxu1 %v16963_v29  ;;  %v7938_v24 = vld [vmem:[#allocation8 + $0x758] sm:$0xff] }
 0x879   :  { %v7942_v29 = vld [vmem:[#allocation8 + $0x778] sm:$0xff] }
 0x87a   :  { %v14742_v35 = vpop.f32.mrf.mxu1  ;;  %14987 = vmatmul.mubr.bf16.vlgmr.msra.gmra.mxu1 %v17763_v0  ;;  %v17011_v21 = vcombine.high %v7938_v24, %v7942_v29 }
 0x87b   :  { %v14743_v33 = vadd.f32 %v14742_v35, %v18049_v39  ;;  %v14865_v31 = vpop.f32.mrf.mxu0  ;;  %15110 = vmatmul.mubr.bf16.vlgmr.msra.gmra.mxu0 %v17735_v6  ;;  %15037 = vmatpush1.bf16.msra.mxu1 %v16962_v54  ;;  %v7930_v54 = vld [vmem:[#allocation8 + $0x718] sm:$0xff] }
 0x87c   :  { %v18083_v5 = vadd.f32 %v14865_v31, %v18001_v28  ;;  %15068 = vmatprep.mubr.bf16.mxu1 %v17689_v47  ;;  %v14744_v7 = vpop.f32.mrf.mxu1  ;;  %15038 = vmatprep.subr.bf16.mxu1 %v16955_v12  ;;  %v16946_v28 = vcombine.low %v7874_v63, %v7878_v49  ;;  %v7934_v12 = vld [vmem:[#allocation8 + $0x738] sm:$0xff]  ;;  %v17010_v63 = vcombine.low %v7938_v24, %v7942_v29 }
 0x87d   :  { %v14745_v14 = vadd.f32 %v14744_v7, %v18058_v61  ;;  %v14867_v56 = vpop.f32.mrf.mxu0  ;;  %v18088_v39 = vadd.f32 %v18069_v18, %v14743_v33  ;;  %v16931_v18 = vcombine.high %v7858_v10, %v7862_v50  ;;  %v17003_v49 = vcombine.high %v7930_v54, %v7934_v12  ;;  %v7922_v35 = vld [vmem:[#allocation8 + $0x6d8] sm:$0xff] }
 0x87e   :  { %v18091_v6 = vadd.f32 %v14867_v56, %v18009_v3  ;;  %v14746_v13 = vpop.f32.mrf.mxu1  ;;  %v7854_v3 = vld [vmem:[#allocation8 + $0x4b8] sm:$0xff]  ;;  %v17002_v31 = vcombine.low %v7930_v54, %v7934_v12 }
 0x87f   :  { %v14869_v1 = vpop.f32.mrf.mxu0  ;;  %15039 = vmatpush1.bf16.msra.mxu1 %v16954_v8  ;;  %v18094_v47 = vadd.f32 %v18077_v52, %v14745_v14  ;;  %v16923_v36 = vcombine.high %v7850_v58, %v7854_v3  ;;  %v16922_v52 = vcombine.low %v7850_v58, %v7854_v3  ;;  %v7926_v33 = vld [vmem:[#allocation8 + $0x6f8] sm:$0xff] }
 0x880   :  { %v14747_v34 = vpop.f32.mrf.mxu1  ;;  %15040 = vmatprep.subr.bf16.mxu1 %v16947_v19  ;;  %v16995_v8 = vcombine.high %v7922_v35, %v7926_v33  ;;  %v7914_v7 = vld [vmem:[#allocation8 + $0x698] sm:$0xff]  ;;  %v16994_v14 = vcombine.low %v7922_v35, %v7926_v33  ;;  %v16979_v1 = vcombine.high %v7906_v46, %v7910_v4 }
 0x881   :  { %v14870_v61 = vpop.f32.mrf.mxu0  ;;  %v7918_v19 = vld [vmem:[#allocation8 + $0x6b8] sm:$0xff] }
 0x882   :  { %v16987_v56 = vcombine.high %v7914_v7, %v7918_v19  ;;  %v16986_v13 = vcombine.low %v7914_v7, %v7918_v19  ;;  %v7902_v34 = vld [vmem:[#allocation8 + $0x638] sm:$0xff] }
 0x883   :  { %15041 = vmatpush1.bf16.msra.mxu1 %v16946_v28  ;;  %v7898_v28 = vld [vmem:[#allocation8 + $0x618] sm:$0xff] }
 0x884   :  { %15042 = vmatprep.subr.bf16.mxu1 %v16939_v9  ;;  %v16978_v9 = vcombine.low %v7906_v46, %v7910_v4  ;;  %v16971_v61 = vcombine.high %v7898_v28, %v7902_v34  ;;  %v8146_v10 = vld [vmem:[#allocation8 + $0xdd8] sm:$0xff] }
 0x885   :  { %v8150_v50 = vld [vmem:[#allocation8 + $0xdf8] sm:$0xff] }
 0x886   :  { %v8138_v58 = vld [vmem:[#allocation8 + $0xd98] sm:$0xff] }
 0x887   :  { %15043 = vmatpush1.bf16.msra.mxu1 %v16938_v22  ;;  %v16970_v22 = vcombine.low %v7898_v28, %v7902_v34  ;;  %v8142_v3 = vld [vmem:[#allocation8 + $0xdb8] sm:$0xff] }
 0x888   :  { %15044 = vmatprep.subr.bf16.mxu1 %v16931_v18  ;;  %v17219_v18 = vcombine.high %v8146_v10, %v8150_v50  ;;  %v8114_v29 = vld [vmem:[#allocation8 + $0xcd8] sm:$0xff] }
 0x889   :  { %v8106_v54 = vld [vmem:[#allocation8 + $0xc98] sm:$0xff] }
 0x88a   :  { %v8110_v12 = vld [vmem:[#allocation8 + $0xcb8] sm:$0xff] }
 0x88b   :  { %15045 = vmatpush1.bf16.msra.mxu1 %v16930_v42  ;;  %v17218_v42 = vcombine.low %v8146_v10, %v8150_v50  ;;  %v8098_v35 = vld [vmem:[#allocation8 + $0xc58] sm:$0xff] }
 0x88c   :  { %15046 = vmatprep.subr.bf16.mxu1 %v16923_v36  ;;  %v17211_v36 = vcombine.high %v8138_v58, %v8142_v3  ;;  %v8102_v33 = vld [vmem:[#allocation8 + $0xc78] sm:$0xff] }
 0x88d   :  { %v8090_v7 = vld [vmem:[#allocation8 + $0xc18] sm:$0xff] }
 0x88e   :  { %v8094_v19 = vld [vmem:[#allocation8 + $0xc38] sm:$0xff] }
 0x88f   :  { %15047 = vmatpush1.bf16.msra.mxu1 %v16922_v52  ;;  %v8134_v52 = vld [vmem:[#allocation8 + $0xd78] sm:$0xff] }
 0x890   :  { %15048 = vmatprep.subr.bf16.mxu1 %v16915_v44  ;;  %v17203_v59 = vcombine.high %v8130_v53, %v8134_v52  ;;  %v8210_v46 = vld [vmem:[#allocation8 + $0xfd8] sm:$0xff] }
 0x891   :  { %v8214_v4 = vld [vmem:[#allocation8 + $0xff8] sm:$0xff] }
 0x892   :  { %v8202_v28 = vld [vmem:[#allocation8 + $0xf98] sm:$0xff] }
 0x893   :  { %15049 = vmatpush1.bf16.msra.mxu1 %v16914_v57  ;;  %v15176_v57 = vrot.slane %v18063_v20, %v17649_v48  ;;  %v8206_v34 = vld [vmem:[#allocation8 + $0xfb8] sm:$0xff] }
 0x894   :  { %15050 = vmatprep.subr.bf16.mxu1 %v16907_v2  ;;  %v17210_v2 = vcombine.low %v8138_v58, %v8142_v3  ;;  %v8194_v10 = vld [vmem:[#allocation8 + $0xf58] sm:$0xff] }
 0x895   :  { %v8198_v50 = vld [vmem:[#allocation8 + $0xf78] sm:$0xff] }
 0x896   :  { %v8186_v58 = vld [vmem:[#allocation8 + $0xf18] sm:$0xff] }
 0x897   :  { %15051 = vmatpush1.bf16.msra.mxu1 %v16906_v38  ;;  %v8190_v3 = vld [vmem:[#allocation8 + $0xf38] sm:$0xff] }
 0x898   :  { %15052 = vmatprep.subr.bf16.mxu1 %v17027_v26 }
 0x89b   :  { %15053 = vmatpush2.bf16.msra.mxu1 %v17026_v16 }
 0x89c   :  { %15054 = vmatprep.subr.bf16.mxu1 %v17019_v60 }
 0x89f   :  { %15055 = vmatpush2.bf16.msra.mxu1 %v17018_v55  ;;  %v8118_v55 = vld [vmem:[#allocation8 + $0xcf8] sm:$0xff] }
 0x8a0   :  { %15056 = vmatprep.subr.bf16.mxu1 %v17011_v21 }
 0x8a3   :  { %15057 = vmatpush2.bf16.msra.mxu1 %v17010_v63  ;;  %v17186_v63 = vcombine.low %v8114_v29, %v8118_v55 }
 0x8a4   :  { %15058 = vmatprep.subr.bf16.mxu1 %v17003_v49  ;;  %v17179_v49 = vcombine.high %v8106_v54, %v8110_v12 }
 0x8a7   :  { %15059 = vmatpush2.bf16.msra.mxu1 %v17002_v31  ;;  %v17178_v31 = vcombine.low %v8106_v54, %v8110_v12 }
 0x8a8   :  { %15060 = vmatprep.subr.bf16.mxu1 %v16995_v8  ;;  %v17171_v8 = vcombine.high %v8098_v35, %v8102_v33 }
 0x8ab   :  { %15061 = vmatpush2.bf16.msra.mxu1 %v16994_v14  ;;  %v17170_v14 = vcombine.low %v8098_v35, %v8102_v33 }
 0x8ac   :  { %15062 = vmatprep.subr.bf16.mxu1 %v16987_v56  ;;  %v17163_v56 = vcombine.high %v8090_v7, %v8094_v19 }
 0x8af   :  { %15063 = vmatpush2.bf16.msra.mxu1 %v16986_v13  ;;  %v17162_v13 = vcombine.low %v8090_v7, %v8094_v19 }
 0x8b0   :  { %15064 = vmatprep.subr.bf16.mxu1 %v16979_v1  ;;  %v17283_v1 = vcombine.high %v8210_v46, %v8214_v4 }
 0x8b3   :  { %15065 = vmatpush2.bf16.msra.mxu1 %v16978_v9  ;;  %v17282_v9 = vcombine.low %v8210_v46, %v8214_v4 }
 0x8b4   :  { %15066 = vmatprep.subr.bf16.mxu1 %v16971_v61  ;;  %v17275_v61 = vcombine.high %v8202_v28, %v8206_v34 }
 0x8b7   :  { %15067 = vmatpush2.bf16.msra.mxu1 %v16970_v22  ;;  %v17274_v22 = vcombine.low %v8202_v28, %v8206_v34 }
 0x8b8   :  { %15118 = vmatprep.subr.bf16.mxu1 %v17219_v18  ;;  %v17267_v18 = vcombine.high %v8194_v10, %v8198_v50 }
 0x8ba   :  { %v14824_v44 = vpop.f32.mrf.mxu1  ;;  %15069 = vmatmul.mubr.bf16.vlgmr.msra.gmra.mxu1 %v17712_v17  ;;  %v8122_v17 = vld [vmem:[#allocation8 + $0xd18] sm:$0xff] }
 0x8bb   :  { %v14825_v37 = vadd.f32 %v14824_v44, %v18088_v39  ;;  %v18100_v23 = vpop.f32.mrf.mxu0  ;;  %15119 = vmatpush1.bf16.msra.mxu1 %v17218_v42  ;;  %15150 = vmatprep.mubr.bf16.mxu1 %v17761_v41  ;;  %v17202_v41 = vcombine.low %v8130_v53, %v8134_v52  ;;  %v17195_v48 = vcombine.high %v8122_v17, %v8126_v32  ;;  %v8182_v53 = vld [vmem:[#allocation8 + $0xef8] sm:$0xff] }
 0x8bc   :  { %v14826_v11 = vpop.f32.mrf.mxu1  ;;  %15120 = vmatprep.subr.bf16.mxu1 %v17211_v36  ;;  %v17194_v21 = vcombine.low %v8122_v17, %v8126_v32  ;;  %v17266_v42 = vcombine.low %v8194_v10, %v8198_v50  ;;  %v17259_v36 = vcombine.high %v8186_v58, %v8190_v3  ;;  %v17258_v52 = vcombine.low %v8186_v58, %v8190_v3  ;;  %v8154_v32 = vld [vmem:[#allocation8 + $0xe18] sm:$0xff] }
 0x8bd   :  { %v15203_v43 = vadd.f32 %v15172_v45, %v14825_v37  ;;  %v14827_v38 = vadd.f32 %v14826_v11, %v18094_v47  ;;  %v18106_v26 = vpop.f32.mrf.mxu0  ;;  %v17187_v47 = vcombine.high %v8114_v29, %v8118_v55  ;;  %v8178_v45 = vld [vmem:[#allocation8 + $0xed8] sm:$0xff] }
 0x8be   :  { %v14828_v39 = vpop.f32.mrf.mxu1  ;;  %v17251_v44 = vcombine.high %v8178_v45, %v8182_v53  ;;  %v8170_v37 = vld [vmem:[#allocation8 + $0xe98] sm:$0xff] }
 0x8bf   :  { %15211 = vst [vmem:[#allocation16 + $0x10] sm:$0xff] %v15203_v43  ;;  %v15204_v62 = vadd.f32 %v15176_v57, %v14827_v38  ;;  %v14951_v16 = vpop.f32.mrf.mxu0  ;;  %15121 = vmatpush1.bf16.msra.mxu1 %v17210_v2  ;;  %v8174_v57 = vld [vmem:[#allocation8 + $0xeb8] sm:$0xff]  ;;  %v17250_v2 = vcombine.low %v8178_v45, %v8182_v53 }
 0x8c0   :  { %v14829_v60 = vpop.f32.mrf.mxu1  ;;  %15122 = vmatprep.subr.bf16.mxu1 %v17203_v59  ;;  %v17243_v11 = vcombine.high %v8170_v37, %v8174_v57  ;;  %v8162_v59 = vld [vmem:[#allocation8 + $0xe58] sm:$0xff]  ;;  %v17242_v38 = vcombine.low %v8170_v37, %v8174_v57 }
 0x8c1   :  { %15212 = vst [vmem:[#allocation16 + $0x18] sm:$0xff] %v15204_v62  ;;  %v14952_v24 = vpop.f32.mrf.mxu0  ;;  %v8166_v43 = vld [vmem:[#allocation8 + $0xe78] sm:$0xff] }
 0x8c2   :  { %v17235_v17 = vcombine.high %v8162_v59, %v8166_v43  ;;  %v8158_v39 = vld [vmem:[#allocation8 + $0xe38] sm:$0xff]  ;;  %v17234_v62 = vcombine.low %v8162_v59, %v8166_v43 }
 0x8c3   :  { %15123 = vmatpush1.bf16.msra.mxu1 %v17202_v41  ;;  %v17227_v16 = vcombine.high %v8154_v32, %v8158_v39  ;;  %v17226_v41 = vcombine.low %v8154_v32, %v8158_v39 }
 0x8c4   :  { %15124 = vmatprep.subr.bf16.mxu1 %v17195_v48 }
 0x8c7   :  { %15125 = vmatpush1.bf16.msra.mxu1 %v17194_v21 }
 0x8c8   :  { %15126 = vmatprep.subr.bf16.mxu1 %v17187_v47 }
 0x8cb   :  { %15127 = vmatpush1.bf16.msra.mxu1 %v17186_v63 }
 0x8cc   :  { %15128 = vmatprep.subr.bf16.mxu1 %v17179_v49 }
 0x8cf   :  { %15129 = vmatpush1.bf16.msra.mxu1 %v17178_v31 }
 0x8d0   :  { %15130 = vmatprep.subr.bf16.mxu1 %v17171_v8 }
 0x8d3   :  { %15131 = vmatpush1.bf16.msra.mxu1 %v17170_v14 }
 0x8d4   :  { %15132 = vmatprep.subr.bf16.mxu1 %v17163_v56 }
 0x8d7   :  { %15133 = vmatpush1.bf16.msra.mxu1 %v17162_v13 }
 0x8d8   :  { %15134 = vmatprep.subr.bf16.mxu1 %v17283_v1 }
 0x8db   :  { %15135 = vmatpush2.bf16.msra.mxu1 %v17282_v9 }
 0x8dc   :  { %15136 = vmatprep.subr.bf16.mxu1 %v17275_v61 }
 0x8df   :  { %15137 = vmatpush2.bf16.msra.mxu1 %v17274_v22 }
 0x8e0   :  { %15138 = vmatprep.subr.bf16.mxu1 %v17267_v18  ;;  %v15192_v18 = vrot.slane %v18063_v20, %v17751_v30 }
 0x8e3   :  { %15139 = vmatpush2.bf16.msra.mxu1 %v17266_v42 }
 0x8e4   :  { %15140 = vmatprep.subr.bf16.mxu1 %v17259_v36 }
 0x8e7   :  { %15141 = vmatpush2.bf16.msra.mxu1 %v17258_v52 }
 0x8e8   :  { %15142 = vmatprep.subr.bf16.mxu1 %v17251_v44 }
 0x8eb   :  { %15143 = vmatpush2.bf16.msra.mxu1 %v17250_v2 }
 0x8ec   :  { %15144 = vmatprep.subr.bf16.mxu1 %v17243_v11 }
 0x8ef   :  { %15145 = vmatpush2.bf16.msra.mxu1 %v17242_v38 }
 0x8f0   :  { %15146 = vmatprep.subr.bf16.mxu1 %v17235_v17 }
 0x8f3   :  { %15147 = vmatpush2.bf16.msra.mxu1 %v17234_v62 }
 0x8f4   :  { %15148 = vmatprep.subr.bf16.mxu1 %v17227_v16 }
 0x8f7   :  { %15149 = vmatpush2.bf16.msra.mxu1 %v17226_v41 }
 0x8fa   :  { %v14906_v60 = vpop.f32.mrf.mxu1  ;;  %15151 = vmatmul.mubr.bf16.vlgmr.msra.gmra.mxu1 %v17763_v0  ;;  %v15180_v0 = vrot.slane %v18063_v20, %v17677_v15 }
 0x8fb   :  { %v14907_v48 = vadd.f32 %v14906_v60, %v18083_v5  ;;  %v15029_v24 = vpop.f32.mrf.mxu0 }
 0x8fc   :  { %v15030_v29 = vadd.f32 %v15029_v24, %v18033_v25  ;;  %v14908_v55 = vpop.f32.mrf.mxu1 }
 0x8fd   :  { %v14909_v21 = vadd.f32 %v14908_v55, %v18091_v6  ;;  %v15031_v47 = vpop.f32.mrf.mxu0  ;;  %v14948_v54 = vadd.f32 %v18100_v23, %v14907_v48  ;;  %v15184_v6 = vrot.slane %v18063_v20, %v17701_v51  ;;  %v15188_v51 = vrot.slane %v18063_v20, %v17748_v27 }
 0x8fe   :  { %v15032_v12 = vadd.f32 %v15031_v47, %v18041_v40  ;;  %v14910_v63 = vpop.f32.mrf.mxu1 }
 0x8ff   :  { %v15033_v49 = vpop.f32.mrf.mxu0  ;;  %v14950_v35 = vadd.f32 %v18106_v26, %v14909_v21 }
 0x900   :  { %v14911_v33 = vpop.f32.mrf.mxu1 }
 0x901   :  { %v15034_v31 = vpop.f32.mrf.mxu0 }
 0x93a   :  { %v14988_v5 = vpop.f32.mrf.mxu1 }
 0x93b   :  { %v14989_v8 = vadd.f32 %v14988_v5, %v14948_v54  ;;  %v15111_v25 = vpop.f32.mrf.mxu0 }
 0x93c   :  { %v14990_v7 = vpop.f32.mrf.mxu1 }
 0x93d   :  { %v15205_v19 = vadd.f32 %v15180_v0, %v14989_v8  ;;  %v14991_v23 = vadd.f32 %v14990_v7, %v14950_v35  ;;  %v15113_v14 = vpop.f32.mrf.mxu0 }
 0x93e   :  { %v14992_v40 = vpop.f32.mrf.mxu1 }
 0x93f   :  { %15213 = vst [vmem:[#allocation16 + $0x20] sm:$0xff] %v15205_v19  ;;  %v15206_v56 = vadd.f32 %v15184_v6, %v14991_v23  ;;  %v15115_v46 = vpop.f32.mrf.mxu0 }
 0x940   :  { %v14993_v26 = vpop.f32.mrf.mxu1 }
 0x941   :  { %15214 = vst [vmem:[#allocation16 + $0x28] sm:$0xff] %v15206_v56  ;;  %v15116_v4 = vpop.f32.mrf.mxu0 }
 0x97a   :  { %v15070_v13 = vpop.f32.mrf.mxu1 }
 0x97b   :  { %v15071_v1 = vadd.f32 %v15070_v13, %v15030_v29 }
 0x97c   :  { %v15072_v15 = vpop.f32.mrf.mxu1 }
 0x97d   :  { %v15073_v28 = vadd.f32 %v15072_v15, %v15032_v12  ;;  %v15112_v34 = vadd.f32 %v15111_v25, %v15071_v1 }
 0x97e   :  { %v15074_v9 = vpop.f32.mrf.mxu1 }
 0x97f   :  { %v15114_v61 = vadd.f32 %v15113_v14, %v15073_v28 }
 0x980   :  { %v15075_v10 = vpop.f32.mrf.mxu1 }
 0x9ba   :  { %v15152_v50 = vpop.f32.mrf.mxu1 }
 0x9bb   :  { %v15153_v22 = vadd.f32 %v15152_v50, %v15112_v34 }
 0x9bc   :  { %v15154_v58 = vpop.f32.mrf.mxu1 }
 0x9bd   :  { %v15207_v3 = vadd.f32 %v15188_v51, %v15153_v22  ;;  %v15155_v42 = vadd.f32 %v15154_v58, %v15114_v61 }
 0x9be   :  { %v15156_v36 = vpop.f32.mrf.mxu1 }
 0x9bf   :  { %15215 = vst [vmem:[#allocation16 + $0x30] sm:$0xff] %v15207_v3  ;;  %v15208_v45 = vadd.f32 %v15192_v18, %v15155_v42 }
 0x9c0   :  { %v15157_v53 = vpop.f32.mrf.mxu1 }
 0x9c1   :  { %15216 = vst [vmem:[#allocation16 + $0x38] sm:$0xff] %v15208_v45 }
 0x9c2   :  { %17470 = shalt.err (!%p17467_p2)
}
 0x9c3   :  { %15226 = dma.vmem_to_hbm [thread:$0]  %s15224_s7, 1024, %s18134_s8, [#allocation4]  }
 0x9c4   :  { %17489 = dma.done.wait [#allocation4], 1024  }
 0x9c5   :  { %17490 = vsyncadd [#allocation4], 4294966272 }
 0x9c6   :  { %15230 = vsyncpa [#allocation3], 1 }
 0x9c7   :  { %15231 = vsyncpa [#allocation6], 1 }
 0x9c8   :  { %15232 = vsyncpa [#allocation9], 1 }
 0x9c9   :  { %15233 = vsyncpa [#allocation12], 1 }
 0x9ca   :  { %15234 = vsyncpa [#allocation15], 1 }
 0x9cb   :  { %15235 = vsyncpa [#allocation4], 1 }

</bundles_post_ra>
